<compile_context>
chip_gen: v7x
topology: tpu7x:2x2x1
jax: 0.10.0
libtpu: 0.0.40
codegen_flags: <defaults>
</compile_context>

<pallas_src>
import functools

import jax
import jax.numpy as jnp
from jax.experimental import pallas as pl
from jax.experimental.pallas import tpu as pltpu


# PyTorch LSTM gate order is [i, f, g, o]; the kernel uses [i, f, o, g] so one
# sigmoid covers a contiguous 3*HP lane slice and one tanh covers HP lanes.
_GATE_PERM = (0, 1, 3, 2)


# ----------------------------- Pallas kernel -------------------------------


def _lstm_fc_kernel(
    x_ref,            # (TT, B, V)    time-major input block
    h0_ref, c0_ref,   # (B, 2*HP)     initial [layer0 | layer1] state (zero-padded)
    w0x_ref,          # (V, 4*HP)     layer-0 input -> gates
    whh_ref,          # (2*HP, 8*HP)  block-diag hidden -> gates (both layers)
    b0_ref,           # (1, 4*HP)     layer-0 combined bias
    w1in_ref,         # (HP, 4*HP)    layer-1 input -> gates
    b1_ref,           # (1, 4*HP)     layer-1 combined bias
    wfc_ref,          # (HP, VP)      fc weight
    bfc_ref,          # (1, VP)       fc bias
    out_ref,          # (TT*B, VP)    logits rows ordered t*B + b (dense store)
    hT_ref, cT_ref,   # (B, 2*HP)     running / final state (VMEM-resident)
    *, B, TT, HP,
):
    tb = pl.program_id(0)

    # Initialize the resident state outputs from h0/c0 on the first block;
    # afterwards they carry the running state across grid steps.
    @pl.when(tb == 0)
    def _():
        hT_ref[...] = h0_ref[...]
        cT_ref[...] = c0_ref[...]

    mm_dtype = whh_ref.dtype          # f32, or bf16 on v6e/v7x
    whh = whh_ref[...]
    w1in = w1in_ref[...]
    wfc = wfc_ref[...]
    # Hoisted bias broadcast (JAX does not CSE broadcast_in_dim in the loop).
    b1 = jnp.broadcast_to(b1_ref[...], (B, 4 * HP))

    # Layer-0 input projection (+bias) for the whole block: one MXU pass,
    # reshaped time-major so per-step reads are leading-axis full-tile loads.
    V = x_ref.shape[-1]
    xg = jnp.dot(x_ref[...].reshape(TT * B, V).astype(mm_dtype), w0x_ref[...],
                 preferred_element_type=jnp.float32)
    xg = (xg + b0_ref[...]).reshape(TT, B, 4 * HP)

    # Running state for this block (read once, written back once).
    h_cat = hT_ref[...]               # (B, 2*HP) = [h_l0 | h_l1]
    c_cat = cT_ref[...]
    c_l0 = c_cat[:, :HP]
    c_l1 = c_cat[:, HP:]

    def lstm_cell(gates, c_prev):
        # Gate layout [i | f | o | g]; each gate is a full 128-lane block, so
        # these slices never cut inside a vreg.  One sigmoid + one tanh push.
        sig = jax.nn.sigmoid(gates[:, :3 * HP])
        g = jnp.tanh(gates[:, 3 * HP:])
        i, f, o = sig[:, :HP], sig[:, HP:2 * HP], sig[:, 2 * HP:3 * HP]
        c_new = f * c_prev + i * g
        h_new = o * jnp.tanh(c_new)
        return h_new, c_new

    # Fully unrolled time loop: the scheduler interleaves MXU / EUP / VPU work
    # across timesteps.
    h1_steps = []
    for tt in range(TT):
        # One block-diagonal matmul gives BOTH layers' hidden->gate terms from
        # step t-1 state; only the K=HP layer-1 input matmul below remains on
        # the serial dependency chain.
        hg = jnp.dot(h_cat.astype(mm_dtype), whh,
                     preferred_element_type=jnp.float32)

        g0 = xg[tt] + hg[:, :4 * HP]
        h_l0, c_l0 = lstm_cell(g0, c_l0)

        # inter-layer LSTM dropout: identity at inference
        g1 = jnp.dot(h_l0.astype(mm_dtype), w1in,
                     preferred_element_type=jnp.float32) + hg[:, 4 * HP:] + b1
        h_l1, c_l1 = lstm_cell(g1, c_l1)

        h1_steps.append(h_l1)
        # HP is a multiple of 128, so this concat is lane-tile aligned.
        h_cat = jnp.concatenate([h_l0, h_l1], axis=-1)

    # FC head hoisted out of the time loop (self.dropout is identity in eval):
    # one (TT*B, HP) @ (HP, VP) MXU pass + a single dense block store.
    h1_all = jnp.concatenate(h1_steps, axis=0).astype(mm_dtype)   # (TT*B, HP)
    out_ref[...] = (
        jnp.dot(h1_all, wfc, preferred_element_type=jnp.float32) + bfc_ref[...]
    )

    hT_ref[...] = h_cat
    cT_ref[...] = jnp.concatenate([c_l0, c_l1], axis=-1)


# ------------------------------- wrapper ------------------------------------


def _round_up(n, m):
    return ((n + m - 1) // m) * m


def _gate_pad_cols(w, H, HP):
    """w: (4H, K) PyTorch gate weight -> (K, 4*HP) transposed + gate-permuted to
    [i|f|o|g]; gate slot s occupies columns [s*HP, s*HP+H), zero elsewhere so
    every gate slice is lane-tile aligned."""
    K = w.shape[1]
    out = jnp.zeros((K, 4 * HP), w.dtype)
    for s, src in enumerate(_GATE_PERM):
        out = out.at[:, s * HP:s * HP + H].set(w[src * H:(src + 1) * H, :].T)
    return out


def _gate_pad_bias(b, H, HP):
    out = jnp.zeros((1, 4 * HP), b.dtype)
    for s, src in enumerate(_GATE_PERM):
        out = out.at[0, s * HP:s * HP + H].set(b[src * H:(src + 1) * H])
    return out


def _pad_rows(w, rows):
    return jnp.zeros((rows, w.shape[1]), w.dtype).at[: w.shape[0], :].set(w)


def char_rnn_forward(x, hidden, params, n_hidden, *, time_block=None,
                     matmul_dtype=jnp.float32):
    """x: (B, T, V) float32; hidden: ((2,B,H), (2,B,H)).
    Returns (out, (hT, cT)) with out of shape (B*T, V), matching PyTorch."""
    h0, c0 = hidden
    B, T, V = x.shape
    H = n_hidden
    HP = _round_up(H, 128)   # padded hidden: each gate a full lane tile
    VP = _round_up(V, 128)   # padded logits: lane-dense stores
    f32 = jnp.float32

    # time-block size: whole sequence per grid step for short sequences
    if time_block is None:
        time_block = T if T <= 32 else 32
    TT = time_block
    assert T % TT == 0, "T must be divisible by the time block"
    assert TT == T or (TT * B) % 8 == 0, "output blocks must be sublane-aligned"

    # --- weight prep: pre-transpose, gate-pad to HP, block-diag hidden path ---
    w0x = _gate_pad_cols(params["w_ih_l0"], H, HP)                    # (V, 4HP)
    w0h = _pad_rows(_gate_pad_cols(params["w_hh_l0"], H, HP), HP)     # (HP, 4HP)
    w1h = _pad_rows(_gate_pad_cols(params["w_hh_l1"], H, HP), HP)     # (HP, 4HP)
    whh = jnp.zeros((2 * HP, 8 * HP), f32)
    whh = whh.at[:HP, :4 * HP].set(w0h).at[HP:, 4 * HP:].set(w1h)     # block-diag
    w1in = _pad_rows(_gate_pad_cols(params["w_ih_l1"], H, HP), HP)    # (HP, 4HP)
    b0 = _gate_pad_bias(params["b_ih_l0"] + params["b_hh_l0"], H, HP)
    b1 = _gate_pad_bias(params["b_ih_l1"] + params["b_hh_l1"], H, HP)
    wfc = jnp.zeros((HP, VP), f32).at[:H, :V].set(params["fc_w"].T)
    bfc = jnp.zeros((1, VP), f32).at[0, :V].set(params["fc_b"])

    # matmul operands in matmul_dtype (bf16 on v6e/v7x: full-rate MXU + half
    # the weight traffic / VMEM residency); biases and cell math stay f32.
    w0x = w0x.astype(matmul_dtype)
    whh = whh.astype(matmul_dtype)
    w1in = w1in.astype(matmul_dtype)
    wfc = wfc.astype(matmul_dtype)

    # combined [layer0 | layer1] state, zero-padded to HP lanes per layer
    h0p = jnp.zeros((B, 2 * HP), f32)
    h0p = h0p.at[:, :H].set(h0[0]).at[:, HP:HP + H].set(h0[1])
    c0p = jnp.zeros((B, 2 * HP), f32)
    c0p = c0p.at[:, :H].set(c0[0]).at[:, HP:HP + H].set(c0[1])

    # time-major input so the kernel's per-step reads are leading-axis tiles
    x_tm = jnp.transpose(x, (1, 0, 2))                                # (T, B, V)

    def const_spec(arr):
        nd = arr.ndim
        # NOTE: at large H, pipeline_mode=pl.Buffered(1) on these constant-index
        # weights halves their VMEM footprint (matters on v7x's 64 MiB VMEM).
        return pl.BlockSpec(arr.shape, lambda tb, _nd=nd: (0,) * _nd)

    kernel = functools.partial(_lstm_fc_kernel, B=B, TT=TT, HP=HP)

    out_pad, hTp, cTp = pl.pallas_call(
        kernel,
        out_shape=(
            jax.ShapeDtypeStruct((T * B, VP), f32),
            jax.ShapeDtypeStruct((B, 2 * HP), f32),
            jax.ShapeDtypeStruct((B, 2 * HP), f32),
        ),
        grid_spec=pltpu.PrefetchScalarGridSpec(
            num_scalar_prefetch=0,
            grid=(T // TT,),
            in_specs=[
                pl.BlockSpec((TT, B, V), lambda tb: (tb, 0, 0)),  # x, time-major
                const_spec(h0p), const_spec(c0p),
                const_spec(w0x), const_spec(whh), const_spec(b0),
                const_spec(w1in), const_spec(b1),
                const_spec(wfc), const_spec(bfc),
            ],
            out_specs=[
                pl.BlockSpec((TT * B, VP), lambda tb: (tb, 0)),   # dense logits
                pl.BlockSpec((B, 2 * HP), lambda tb: (0, 0)),     # state, resident
                pl.BlockSpec((B, 2 * HP), lambda tb: (0, 0)),
            ],
        ),
        compiler_params=pltpu.CompilerParams(
            dimension_semantics=("arbitrary",),        # time blocks are sequential
            vmem_limit_bytes=32 * 1024 * 1024,         # safe on v5e/v6e/v7x
        ),
    )(x_tm, h0p, c0p, w0x, whh, b0, w1in, b1, wfc, bfc)

    # out_pad rows are ordered t*B + b; PyTorch view(-1, H) orders rows b*T + t.
    out = out_pad[:, :V].reshape(T, B, V).transpose(1, 0, 2).reshape(B * T, V)
    hT = jnp.stack([hTp[:, :H], hTp[:, HP:HP + H]], axis=0)
    cT = jnp.stack([cTp[:, :H], cTp[:, HP:HP + H]], axis=0)
    return out, (hT, cT)


# ---------------------------- pure-JAX reference ----------------------------


def ref_forward(x, hidden, params, n_hidden):
    h0, c0 = hidden
    B, T, V = x.shape
    H = n_hidden
    h = [h0[0], h0[1]]
    c = [c0[0], c0[1]]
    outs = []
    for t in range(T):
        inp = x[:, t, :]
        for layer in range(2):
            wih = params[f"w_ih_l{layer}"]
            whh = params[f"w_hh_l{layer}"]
            b = params[f"b_ih_l{layer}"] + params[f"b_hh_l{layer}"]
            gates = inp @ wih.T + h[layer] @ whh.T + b
            i, f, g, o = jnp.split(gates, 4, axis=-1)
            i = jax.nn.sigmoid(i)
            f = jax.nn.sigmoid(f)
            g = jnp.tanh(g)
            o = jax.nn.sigmoid(o)
            c[layer] = f * c[layer] + i * g
            h[layer] = o * jnp.tanh(c[layer])
            inp = h[layer]
        outs.append(inp)
    r = jnp.stack(outs, axis=1)                  # (B, T, H)
    out = r.reshape(-1, H) @ params["fc_w"].T + params["fc_b"]
    return out, (jnp.stack(h), jnp.stack(c))


# --------------------------------- main --------------------------------------


if __name__ == "__main__":
    # synthetic config (small shapes consistent with the module)
    V = 32          # len(tokens) — vocabulary size
    H = 32          # n_hidden
    B = 2           # batch
    T = 8           # sequence length
    N_LAYERS = 2    # n_layers (structure hard-wired into the kernel)

    key = jax.random.PRNGKey(0)
    k = 1.0 / jnp.sqrt(jnp.float32(H))

    names_shapes = [
        ("w_ih_l0", (4 * H, V)),
        ("w_hh_l0", (4 * H, H)),
        ("b_ih_l0", (4 * H,)),
        ("b_hh_l0", (4 * H,)),
        ("w_ih_l1", (4 * H, H)),
        ("w_hh_l1", (4 * H, H)),
        ("b_ih_l1", (4 * H,)),
        ("b_hh_l1", (4 * H,)),
        ("fc_w", (V, H)),
        ("fc_b", (V,)),
    ]
    keys = jax.random.split(key, len(names_shapes) + 1)
    params = {
        name: jax.random.uniform(keys[i], shape, jnp.float32, -k, k)
        for i, (name, shape) in enumerate(names_shapes)
    }

    # one-hot encoded character input, as CharRNN expects
    char_ids = jax.random.randint(keys[-1], (B, T), 0, V)
    x = jax.nn.one_hot(char_ids, V, dtype=jnp.float32)   # (B, T, V)

    # init_hidden(batch_size): zeros of shape (n_layers, B, H)
    hidden = (
        jnp.zeros((N_LAYERS, B, H), jnp.float32),
        jnp.zeros((N_LAYERS, B, H), jnp.float32),
    )

    out_ref_, (hT_ref_, cT_ref_) = ref_forward(x, hidden, params, H)

    # --- f32 path (exact match to the PyTorch module) ---
    out, (hT, cT) = char_rnn_forward(x, hidden, params, H)
    out = jax.block_until_ready(out)
    hT = jax.block_until_ready(hT)
    cT = jax.block_until_ready(cT)

    assert out.shape == (B * T, V)
    assert hT.shape == (N_LAYERS, B, H) and cT.shape == (N_LAYERS, B, H)
    assert jnp.allclose(out, out_ref_, atol=1e-5, rtol=1e-5)
    assert jnp.allclose(hT, hT_ref_, atol=1e-5, rtol=1e-5)
    assert jnp.allclose(cT, cT_ref_, atol=1e-5, rtol=1e-5)

    # --- bf16 matmul-operand path (full-rate MXU on v6e/v7x); cell math in f32 ---
    out_bf, (hT_bf, cT_bf) = char_rnn_forward(
        x, hidden, params, H, matmul_dtype=jnp.bfloat16)
    out_bf = jax.block_until_ready(out_bf)
    assert jnp.allclose(out_bf, out_ref_, atol=5e-2)
    assert jnp.allclose(jax.block_until_ready(hT_bf), hT_ref_, atol=5e-2)
    assert jnp.allclose(jax.block_until_ready(cT_bf), cT_ref_, atol=5e-2)

    print("KERNEL_OK")
</pallas_src>

<mosaic_0001>
module attributes {stable_mosaic.version = 11 : i64} {
  func.func @_lstm_fc_kernel(%arg0: i32, %arg1: memref<8x2x32xf32, #tpu.memory_space<vmem>>, %arg2: memref<2x256xf32, #tpu.memory_space<vmem>>, %arg3: memref<2x256xf32, #tpu.memory_space<vmem>>, %arg4: memref<32x512xf32, #tpu.memory_space<vmem>>, %arg5: memref<256x1024xf32, #tpu.memory_space<vmem>>, %arg6: memref<1x512xf32, #tpu.memory_space<vmem>>, %arg7: memref<128x512xf32, #tpu.memory_space<vmem>>, %arg8: memref<1x512xf32, #tpu.memory_space<vmem>>, %arg9: memref<128x128xf32, #tpu.memory_space<vmem>>, %arg10: memref<1x128xf32, #tpu.memory_space<vmem>>, %arg11: memref<16x128xf32, #tpu.memory_space<vmem>>, %arg12: memref<2x256xf32, #tpu.memory_space<vmem>>, %arg13: memref<2x256xf32, #tpu.memory_space<vmem>>) attributes {dimension_semantics = [#tpu.dimension_semantics<arbitrary>], iteration_bounds = array<i64: 1>, scalar_prefetch = 0 : i64, scratch_operands = 0 : i64, tpu.core_type = #tpu.core_type<tc>, window_params = [{transform_indices = @transform_0, window_bounds = array<i64: 8, 2, 32>}, {pipeline_mode = #tpu.pipeline_mode<synchronous>, transform_indices = @transform_1, window_bounds = array<i64: 2, 256>}, {pipeline_mode = #tpu.pipeline_mode<synchronous>, transform_indices = @transform_2, window_bounds = array<i64: 2, 256>}, {pipeline_mode = #tpu.pipeline_mode<synchronous>, transform_indices = @transform_3, window_bounds = array<i64: 32, 512>}, {pipeline_mode = #tpu.pipeline_mode<synchronous>, transform_indices = @transform_4, window_bounds = array<i64: 256, 1024>}, {pipeline_mode = #tpu.pipeline_mode<synchronous>, transform_indices = @transform_5, window_bounds = array<i64: 1, 512>}, {pipeline_mode = #tpu.pipeline_mode<synchronous>, transform_indices = @transform_6, window_bounds = array<i64: 128, 512>}, {pipeline_mode = #tpu.pipeline_mode<synchronous>, transform_indices = @transform_7, window_bounds = array<i64: 1, 512>}, {pipeline_mode = #tpu.pipeline_mode<synchronous>, transform_indices = @transform_8, window_bounds = array<i64: 128, 128>}, {pipeline_mode = #tpu.pipeline_mode<synchronous>, transform_indices = @transform_9, window_bounds = array<i64: 1, 128>}, {transform_indices = @transform_10, window_bounds = array<i64: 16, 128>}, {pipeline_mode = #tpu.pipeline_mode<synchronous>, transform_indices = @transform_11, window_bounds = array<i64: 2, 256>}, {pipeline_mode = #tpu.pipeline_mode<synchronous>, transform_indices = @transform_12, window_bounds = array<i64: 2, 256>}]} {
    %c0_i32 = arith.constant 0 : i32
    %0 = arith.cmpi eq, %arg0, %c0_i32 : i32
    %1 = arith.extui %0 : i1 to i32
    %c0_i32_0 = arith.constant 0 : i32
    %2 = arith.cmpi ne, %1, %c0_i32_0 : i32
    scf.if %2 {
      %c0_60 = arith.constant 0 : index
      %c0_61 = arith.constant 0 : index
      %366 = vector.load %arg2[%c0_60, %c0_61] : memref<2x256xf32, #tpu.memory_space<vmem>>, vector<2x256xf32>
      %c0_62 = arith.constant 0 : index
      %c0_63 = arith.constant 0 : index
      %367 = vector.load %arg12[%c0_62, %c0_63] : memref<2x256xf32, #tpu.memory_space<vmem>>, vector<2x256xf32>
      tpu.vector_store %arg12[%c0_62, %c0_63], %366 {strides = array<i32>} : memref<2x256xf32, #tpu.memory_space<vmem>>, vector<2x256xf32>,
      %c0_64 = arith.constant 0 : index
      %c0_65 = arith.constant 0 : index
      %368 = vector.load %arg3[%c0_64, %c0_65] : memref<2x256xf32, #tpu.memory_space<vmem>>, vector<2x256xf32>
      %c0_66 = arith.constant 0 : index
      %c0_67 = arith.constant 0 : index
      %369 = vector.load %arg13[%c0_66, %c0_67] : memref<2x256xf32, #tpu.memory_space<vmem>>, vector<2x256xf32>
      tpu.vector_store %arg13[%c0_66, %c0_67], %368 {strides = array<i32>} : memref<2x256xf32, #tpu.memory_space<vmem>>, vector<2x256xf32>,
    } else {
    }
    %c0 = arith.constant 0 : index
    %c0_1 = arith.constant 0 : index
    %3 = vector.load %arg5[%c0, %c0_1] : memref<256x1024xf32, #tpu.memory_space<vmem>>, vector<256x1024xf32>
    %c0_2 = arith.constant 0 : index
    %c0_3 = arith.constant 0 : index
    %4 = vector.load %arg7[%c0_2, %c0_3] : memref<128x512xf32, #tpu.memory_space<vmem>>, vector<128x512xf32>
    %c0_4 = arith.constant 0 : index
    %c0_5 = arith.constant 0 : index
    %5 = vector.load %arg9[%c0_4, %c0_5] : memref<128x128xf32, #tpu.memory_space<vmem>>, vector<128x128xf32>
    %c0_6 = arith.constant 0 : index
    %c0_7 = arith.constant 0 : index
    %6 = vector.load %arg8[%c0_6, %c0_7] : memref<1x512xf32, #tpu.memory_space<vmem>>, vector<1x512xf32>
    %7 = vector.shape_cast %6 : vector<1x512xf32> to vector<1x512xf32>
    %8 = vector.broadcast %7 : vector<1x512xf32> to vector<2x512xf32>
    %c0_8 = arith.constant 0 : index
    %c0_9 = arith.constant 0 : index
    %c0_10 = arith.constant 0 : index
    %9 = vector.load %arg1[%c0_8, %c0_9, %c0_10] : memref<8x2x32xf32, #tpu.memory_space<vmem>>, vector<8x2x32xf32>
    %10 = vector.shape_cast %9 : vector<8x2x32xf32> to vector<16x32xf32>
    %c0_11 = arith.constant 0 : index
    %c0_12 = arith.constant 0 : index
    %11 = vector.load %arg4[%c0_11, %c0_12] : memref<32x512xf32, #tpu.memory_space<vmem>>, vector<32x512xf32>
    %cst = arith.constant dense<0.000000e+00> : vector<16x512xf32>
    %12 = tpu.matmul %10, %11, %cst {dimension_numbers = #tpu.dot_dimension_numbers<[1], [0], [0], [1], [0, 0, 1, 1], [], []>} : vector<16x32xf32>, vector<32x512xf32>, vector<16x512xf32> -> vector<16x512xf32>
    %c0_13 = arith.constant 0 : index
    %c0_14 = arith.constant 0 : index
    %13 = vector.load %arg6[%c0_13, %c0_14] : memref<1x512xf32, #tpu.memory_space<vmem>>, vector<1x512xf32>
    %14 = vector.broadcast %13 : vector<1x512xf32> to vector<16x512xf32>
    %15 = arith.addf %12, %14 : vector<16x512xf32>
    %16 = vector.shape_cast %15 : vector<16x512xf32> to vector<8x2x512xf32>
    %c0_15 = arith.constant 0 : index
    %c0_16 = arith.constant 0 : index
    %17 = vector.load %arg12[%c0_15, %c0_16] : memref<2x256xf32, #tpu.memory_space<vmem>>, vector<2x256xf32>
    %c0_17 = arith.constant 0 : index
    %c0_18 = arith.constant 0 : index
    %18 = vector.load %arg13[%c0_17, %c0_18] : memref<2x256xf32, #tpu.memory_space<vmem>>, vector<2x256xf32>
    %19 = vector.extract_strided_slice %18 {offsets = [0, 0], sizes = [2, 128], strides = [1, 1]} : vector<2x256xf32> to vector<2x128xf32>
    %20 = vector.extract_strided_slice %18 {offsets = [0, 128], sizes = [2, 128], strides = [1, 1]} : vector<2x256xf32> to vector<2x128xf32>
    %cst_19 = arith.constant dense<0.000000e+00> : vector<2x1024xf32>
    %21 = tpu.matmul %17, %3, %cst_19 {dimension_numbers = #tpu.dot_dimension_numbers<[1], [0], [0], [1], [0, 0, 1, 1], [], []>} : vector<2x256xf32>, vector<256x1024xf32>, vector<2x1024xf32> -> vector<2x1024xf32>
    %22 = vector.extract_strided_slice %16 {offsets = [0, 0, 0], sizes = [1, 2, 512], strides = [1, 1, 1]} : vector<8x2x512xf32> to vector<1x2x512xf32>
    %23 = vector.shape_cast %22 : vector<1x2x512xf32> to vector<2x512xf32>
    %24 = vector.extract_strided_slice %21 {offsets = [0, 0], sizes = [2, 512], strides = [1, 1]} : vector<2x1024xf32> to vector<2x512xf32>
    %25 = arith.addf %23, %24 : vector<2x512xf32>
    %26 = vector.extract_strided_slice %25 {offsets = [0, 0], sizes = [2, 384], strides = [1, 1]} : vector<2x512xf32> to vector<2x384xf32>
    %27 = arith.negf %26 : vector<2x384xf32>
    %28 = math.exp %27 : vector<2x384xf32>
    %cst_20 = arith.constant 1.000000e+00 : f32
    %29 = vector.broadcast %cst_20 : f32 to vector<2x384xf32>
    %30 = arith.addf %29, %28 : vector<2x384xf32>
    %31 = arith.divf %29, %30 : vector<2x384xf32>
    %32 = vector.extract_strided_slice %25 {offsets = [0, 384], sizes = [2, 128], strides = [1, 1]} : vector<2x512xf32> to vector<2x128xf32>
    %33 = math.tanh %32 : vector<2x128xf32>
    %34 = vector.extract_strided_slice %31 {offsets = [0, 0], sizes = [2, 128], strides = [1, 1]} : vector<2x384xf32> to vector<2x128xf32>
    %35 = vector.extract_strided_slice %31 {offsets = [0, 128], sizes = [2, 128], strides = [1, 1]} : vector<2x384xf32> to vector<2x128xf32>
    %36 = vector.extract_strided_slice %31 {offsets = [0, 256], sizes = [2, 128], strides = [1, 1]} : vector<2x384xf32> to vector<2x128xf32>
    %37 = arith.mulf %35, %19 : vector<2x128xf32>
    %38 = arith.mulf %34, %33 : vector<2x128xf32>
    %39 = arith.addf %37, %38 : vector<2x128xf32>
    %40 = math.tanh %39 : vector<2x128xf32>
    %41 = arith.mulf %36, %40 : vector<2x128xf32>
    %cst_21 = arith.constant dense<0.000000e+00> : vector<2x512xf32>
    %42 = tpu.matmul %41, %4, %cst_21 {dimension_numbers = #tpu.dot_dimension_numbers<[1], [0], [0], [1], [0, 0, 1, 1], [], []>} : vector<2x128xf32>, vector<128x512xf32>, vector<2x512xf32> -> vector<2x512xf32>
    %43 = vector.extract_strided_slice %21 {offsets = [0, 512], sizes = [2, 512], strides = [1, 1]} : vector<2x1024xf32> to vector<2x512xf32>
    %44 = arith.addf %42, %43 : vector<2x512xf32>
    %45 = arith.addf %44, %8 : vector<2x512xf32>
    %46 = vector.extract_strided_slice %45 {offsets = [0, 0], sizes = [2, 384], strides = [1, 1]} : vector<2x512xf32> to vector<2x384xf32>
    %47 = arith.negf %46 : vector<2x384xf32>
    %48 = math.exp %47 : vector<2x384xf32>
    %cst_22 = arith.constant 1.000000e+00 : f32
    %49 = vector.broadcast %cst_22 : f32 to vector<2x384xf32>
    %50 = arith.addf %49, %48 : vector<2x384xf32>
    %51 = arith.divf %49, %50 : vector<2x384xf32>
    %52 = vector.extract_strided_slice %45 {offsets = [0, 384], sizes = [2, 128], strides = [1, 1]} : vector<2x512xf32> to vector<2x128xf32>
    %53 = math.tanh %52 : vector<2x128xf32>
    %54 = vector.extract_strided_slice %51 {offsets = [0, 0], sizes = [2, 128], strides = [1, 1]} : vector<2x384xf32> to vector<2x128xf32>
    %55 = vector.extract_strided_slice %51 {offsets = [0, 128], sizes = [2, 128], strides = [1, 1]} : vector<2x384xf32> to vector<2x128xf32>
    %56 = vector.extract_strided_slice %51 {offsets = [0, 256], sizes = [2, 128], strides = [1, 1]} : vector<2x384xf32> to vector<2x128xf32>
    %57 = arith.mulf %55, %20 : vector<2x128xf32>
    %58 = arith.mulf %54, %53 : vector<2x128xf32>
    %59 = arith.addf %57, %58 : vector<2x128xf32>
    %60 = math.tanh %59 : vector<2x128xf32>
    %61 = arith.mulf %56, %60 : vector<2x128xf32>
    %62 = tpu.concatenate %41, %61 in 1 : vector<2x128xf32>, vector<2x128xf32> -> vector<2x256xf32>
    %cst_23 = arith.constant dense<0.000000e+00> : vector<2x1024xf32>
    %63 = tpu.matmul %62, %3, %cst_23 {dimension_numbers = #tpu.dot_dimension_numbers<[1], [0], [0], [1], [0, 0, 1, 1], [], []>} : vector<2x256xf32>, vector<256x1024xf32>, vector<2x1024xf32> -> vector<2x1024xf32>
    %64 = vector.extract_strided_slice %16 {offsets = [1, 0, 0], sizes = [1, 2, 512], strides = [1, 1, 1]} : vector<8x2x512xf32> to vector<1x2x512xf32>
    %65 = vector.shape_cast %64 : vector<1x2x512xf32> to vector<2x512xf32>
    %66 = vector.extract_strided_slice %63 {offsets = [0, 0], sizes = [2, 512], strides = [1, 1]} : vector<2x1024xf32> to vector<2x512xf32>
    %67 = arith.addf %65, %66 : vector<2x512xf32>
    %68 = vector.extract_strided_slice %67 {offsets = [0, 0], sizes = [2, 384], strides = [1, 1]} : vector<2x512xf32> to vector<2x384xf32>
    %69 = arith.negf %68 : vector<2x384xf32>
    %70 = math.exp %69 : vector<2x384xf32>
    %cst_24 = arith.constant 1.000000e+00 : f32
    %71 = vector.broadcast %cst_24 : f32 to vector<2x384xf32>
    %72 = arith.addf %71, %70 : vector<2x384xf32>
    %73 = arith.divf %71, %72 : vector<2x384xf32>
    %74 = vector.extract_strided_slice %67 {offsets = [0, 384], sizes = [2, 128], strides = [1, 1]} : vector<2x512xf32> to vector<2x128xf32>
    %75 = math.tanh %74 : vector<2x128xf32>
    %76 = vector.extract_strided_slice %73 {offsets = [0, 0], sizes = [2, 128], strides = [1, 1]} : vector<2x384xf32> to vector<2x128xf32>
    %77 = vector.extract_strided_slice %73 {offsets = [0, 128], sizes = [2, 128], strides = [1, 1]} : vector<2x384xf32> to vector<2x128xf32>
    %78 = vector.extract_strided_slice %73 {offsets = [0, 256], sizes = [2, 128], strides = [1, 1]} : vector<2x384xf32> to vector<2x128xf32>
    %79 = arith.mulf %77, %39 : vector<2x128xf32>
    %80 = arith.mulf %76, %75 : vector<2x128xf32>
    %81 = arith.addf %79, %80 : vector<2x128xf32>
    %82 = math.tanh %81 : vector<2x128xf32>
    %83 = arith.mulf %78, %82 : vector<2x128xf32>
    %cst_25 = arith.constant dense<0.000000e+00> : vector<2x512xf32>
    %84 = tpu.matmul %83, %4, %cst_25 {dimension_numbers = #tpu.dot_dimension_numbers<[1], [0], [0], [1], [0, 0, 1, 1], [], []>} : vector<2x128xf32>, vector<128x512xf32>, vector<2x512xf32> -> vector<2x512xf32>
    %85 = vector.extract_strided_slice %63 {offsets = [0, 512], sizes = [2, 512], strides = [1, 1]} : vector<2x1024xf32> to vector<2x512xf32>
    %86 = arith.addf %84, %85 : vector<2x512xf32>
    %87 = arith.addf %86, %8 : vector<2x512xf32>
    %88 = vector.extract_strided_slice %87 {offsets = [0, 0], sizes = [2, 384], strides = [1, 1]} : vector<2x512xf32> to vector<2x384xf32>
    %89 = arith.negf %88 : vector<2x384xf32>
    %90 = math.exp %89 : vector<2x384xf32>
    %cst_26 = arith.constant 1.000000e+00 : f32
    %91 = vector.broadcast %cst_26 : f32 to vector<2x384xf32>
    %92 = arith.addf %91, %90 : vector<2x384xf32>
    %93 = arith.divf %91, %92 : vector<2x384xf32>
    %94 = vector.extract_strided_slice %87 {offsets = [0, 384], sizes = [2, 128], strides = [1, 1]} : vector<2x512xf32> to vector<2x128xf32>
    %95 = math.tanh %94 : vector<2x128xf32>
    %96 = vector.extract_strided_slice %93 {offsets = [0, 0], sizes = [2, 128], strides = [1, 1]} : vector<2x384xf32> to vector<2x128xf32>
    %97 = vector.extract_strided_slice %93 {offsets = [0, 128], sizes = [2, 128], strides = [1, 1]} : vector<2x384xf32> to vector<2x128xf32>
    %98 = vector.extract_strided_slice %93 {offsets = [0, 256], sizes = [2, 128], strides = [1, 1]} : vector<2x384xf32> to vector<2x128xf32>
    %99 = arith.mulf %97, %59 : vector<2x128xf32>
    %100 = arith.mulf %96, %95 : vector<2x128xf32>
    %101 = arith.addf %99, %100 : vector<2x128xf32>
    %102 = math.tanh %101 : vector<2x128xf32>
    %103 = arith.mulf %98, %102 : vector<2x128xf32>
    %104 = tpu.concatenate %83, %103 in 1 : vector<2x128xf32>, vector<2x128xf32> -> vector<2x256xf32>
    %cst_27 = arith.constant dense<0.000000e+00> : vector<2x1024xf32>
    %105 = tpu.matmul %104, %3, %cst_27 {dimension_numbers = #tpu.dot_dimension_numbers<[1], [0], [0], [1], [0, 0, 1, 1], [], []>} : vector<2x256xf32>, vector<256x1024xf32>, vector<2x1024xf32> -> vector<2x1024xf32>
    %106 = vector.extract_strided_slice %16 {offsets = [2, 0, 0], sizes = [1, 2, 512], strides = [1, 1, 1]} : vector<8x2x512xf32> to vector<1x2x512xf32>
    %107 = vector.shape_cast %106 : vector<1x2x512xf32> to vector<2x512xf32>
    %108 = vector.extract_strided_slice %105 {offsets = [0, 0], sizes = [2, 512], strides = [1, 1]} : vector<2x1024xf32> to vector<2x512xf32>
    %109 = arith.addf %107, %108 : vector<2x512xf32>
    %110 = vector.extract_strided_slice %109 {offsets = [0, 0], sizes = [2, 384], strides = [1, 1]} : vector<2x512xf32> to vector<2x384xf32>
    %111 = arith.negf %110 : vector<2x384xf32>
    %112 = math.exp %111 : vector<2x384xf32>
    %cst_28 = arith.constant 1.000000e+00 : f32
    %113 = vector.broadcast %cst_28 : f32 to vector<2x384xf32>
    %114 = arith.addf %113, %112 : vector<2x384xf32>
    %115 = arith.divf %113, %114 : vector<2x384xf32>
    %116 = vector.extract_strided_slice %109 {offsets = [0, 384], sizes = [2, 128], strides = [1, 1]} : vector<2x512xf32> to vector<2x128xf32>
    %117 = math.tanh %116 : vector<2x128xf32>
    %118 = vector.extract_strided_slice %115 {offsets = [0, 0], sizes = [2, 128], strides = [1, 1]} : vector<2x384xf32> to vector<2x128xf32>
    %119 = vector.extract_strided_slice %115 {offsets = [0, 128], sizes = [2, 128], strides = [1, 1]} : vector<2x384xf32> to vector<2x128xf32>
    %120 = vector.extract_strided_slice %115 {offsets = [0, 256], sizes = [2, 128], strides = [1, 1]} : vector<2x384xf32> to vector<2x128xf32>
    %121 = arith.mulf %119, %81 : vector<2x128xf32>
    %122 = arith.mulf %118, %117 : vector<2x128xf32>
    %123 = arith.addf %121, %122 : vector<2x128xf32>
    %124 = math.tanh %123 : vector<2x128xf32>
    %125 = arith.mulf %120, %124 : vector<2x128xf32>
    %cst_29 = arith.constant dense<0.000000e+00> : vector<2x512xf32>
    %126 = tpu.matmul %125, %4, %cst_29 {dimension_numbers = #tpu.dot_dimension_numbers<[1], [0], [0], [1], [0, 0, 1, 1], [], []>} : vector<2x128xf32>, vector<128x512xf32>, vector<2x512xf32> -> vector<2x512xf32>
    %127 = vector.extract_strided_slice %105 {offsets = [0, 512], sizes = [2, 512], strides = [1, 1]} : vector<2x1024xf32> to vector<2x512xf32>
    %128 = arith.addf %126, %127 : vector<2x512xf32>
    %129 = arith.addf %128, %8 : vector<2x512xf32>
    %130 = vector.extract_strided_slice %129 {offsets = [0, 0], sizes = [2, 384], strides = [1, 1]} : vector<2x512xf32> to vector<2x384xf32>
    %131 = arith.negf %130 : vector<2x384xf32>
    %132 = math.exp %131 : vector<2x384xf32>
    %cst_30 = arith.constant 1.000000e+00 : f32
    %133 = vector.broadcast %cst_30 : f32 to vector<2x384xf32>
    %134 = arith.addf %133, %132 : vector<2x384xf32>
    %135 = arith.divf %133, %134 : vector<2x384xf32>
    %136 = vector.extract_strided_slice %129 {offsets = [0, 384], sizes = [2, 128], strides = [1, 1]} : vector<2x512xf32> to vector<2x128xf32>
    %137 = math.tanh %136 : vector<2x128xf32>
    %138 = vector.extract_strided_slice %135 {offsets = [0, 0], sizes = [2, 128], strides = [1, 1]} : vector<2x384xf32> to vector<2x128xf32>
    %139 = vector.extract_strided_slice %135 {offsets = [0, 128], sizes = [2, 128], strides = [1, 1]} : vector<2x384xf32> to vector<2x128xf32>
    %140 = vector.extract_strided_slice %135 {offsets = [0, 256], sizes = [2, 128], strides = [1, 1]} : vector<2x384xf32> to vector<2x128xf32>
    %141 = arith.mulf %139, %101 : vector<2x128xf32>
    %142 = arith.mulf %138, %137 : vector<2x128xf32>
    %143 = arith.addf %141, %142 : vector<2x128xf32>
    %144 = math.tanh %143 : vector<2x128xf32>
    %145 = arith.mulf %140, %144 : vector<2x128xf32>
    %146 = tpu.concatenate %125, %145 in 1 : vector<2x128xf32>, vector<2x128xf32> -> vector<2x256xf32>
    %cst_31 = arith.constant dense<0.000000e+00> : vector<2x1024xf32>
    %147 = tpu.matmul %146, %3, %cst_31 {dimension_numbers = #tpu.dot_dimension_numbers<[1], [0], [0], [1], [0, 0, 1, 1], [], []>} : vector<2x256xf32>, vector<256x1024xf32>, vector<2x1024xf32> -> vector<2x1024xf32>
    %148 = vector.extract_strided_slice %16 {offsets = [3, 0, 0], sizes = [1, 2, 512], strides = [1, 1, 1]} : vector<8x2x512xf32> to vector<1x2x512xf32>
    %149 = vector.shape_cast %148 : vector<1x2x512xf32> to vector<2x512xf32>
    %150 = vector.extract_strided_slice %147 {offsets = [0, 0], sizes = [2, 512], strides = [1, 1]} : vector<2x1024xf32> to vector<2x512xf32>
    %151 = arith.addf %149, %150 : vector<2x512xf32>
    %152 = vector.extract_strided_slice %151 {offsets = [0, 0], sizes = [2, 384], strides = [1, 1]} : vector<2x512xf32> to vector<2x384xf32>
    %153 = arith.negf %152 : vector<2x384xf32>
    %154 = math.exp %153 : vector<2x384xf32>
    %cst_32 = arith.constant 1.000000e+00 : f32
    %155 = vector.broadcast %cst_32 : f32 to vector<2x384xf32>
    %156 = arith.addf %155, %154 : vector<2x384xf32>
    %157 = arith.divf %155, %156 : vector<2x384xf32>
    %158 = vector.extract_strided_slice %151 {offsets = [0, 384], sizes = [2, 128], strides = [1, 1]} : vector<2x512xf32> to vector<2x128xf32>
    %159 = math.tanh %158 : vector<2x128xf32>
    %160 = vector.extract_strided_slice %157 {offsets = [0, 0], sizes = [2, 128], strides = [1, 1]} : vector<2x384xf32> to vector<2x128xf32>
    %161 = vector.extract_strided_slice %157 {offsets = [0, 128], sizes = [2, 128], strides = [1, 1]} : vector<2x384xf32> to vector<2x128xf32>
    %162 = vector.extract_strided_slice %157 {offsets = [0, 256], sizes = [2, 128], strides = [1, 1]} : vector<2x384xf32> to vector<2x128xf32>
    %163 = arith.mulf %161, %123 : vector<2x128xf32>
    %164 = arith.mulf %160, %159 : vector<2x128xf32>
    %165 = arith.addf %163, %164 : vector<2x128xf32>
    %166 = math.tanh %165 : vector<2x128xf32>
    %167 = arith.mulf %162, %166 : vector<2x128xf32>
    %cst_33 = arith.constant dense<0.000000e+00> : vector<2x512xf32>
    %168 = tpu.matmul %167, %4, %cst_33 {dimension_numbers = #tpu.dot_dimension_numbers<[1], [0], [0], [1], [0, 0, 1, 1], [], []>} : vector<2x128xf32>, vector<128x512xf32>, vector<2x512xf32> -> vector<2x512xf32>
    %169 = vector.extract_strided_slice %147 {offsets = [0, 512], sizes = [2, 512], strides = [1, 1]} : vector<2x1024xf32> to vector<2x512xf32>
    %170 = arith.addf %168, %169 : vector<2x512xf32>
    %171 = arith.addf %170, %8 : vector<2x512xf32>
    %172 = vector.extract_strided_slice %171 {offsets = [0, 0], sizes = [2, 384], strides = [1, 1]} : vector<2x512xf32> to vector<2x384xf32>
    %173 = arith.negf %172 : vector<2x384xf32>
    %174 = math.exp %173 : vector<2x384xf32>
    %cst_34 = arith.constant 1.000000e+00 : f32
    %175 = vector.broadcast %cst_34 : f32 to vector<2x384xf32>
    %176 = arith.addf %175, %174 : vector<2x384xf32>
    %177 = arith.divf %175, %176 : vector<2x384xf32>
    %178 = vector.extract_strided_slice %171 {offsets = [0, 384], sizes = [2, 128], strides = [1, 1]} : vector<2x512xf32> to vector<2x128xf32>
    %179 = math.tanh %178 : vector<2x128xf32>
    %180 = vector.extract_strided_slice %177 {offsets = [0, 0], sizes = [2, 128], strides = [1, 1]} : vector<2x384xf32> to vector<2x128xf32>
    %181 = vector.extract_strided_slice %177 {offsets = [0, 128], sizes = [2, 128], strides = [1, 1]} : vector<2x384xf32> to vector<2x128xf32>
    %182 = vector.extract_strided_slice %177 {offsets = [0, 256], sizes = [2, 128], strides = [1, 1]} : vector<2x384xf32> to vector<2x128xf32>
    %183 = arith.mulf %181, %143 : vector<2x128xf32>
    %184 = arith.mulf %180, %179 : vector<2x128xf32>
    %185 = arith.addf %183, %184 : vector<2x128xf32>
    %186 = math.tanh %185 : vector<2x128xf32>
    %187 = arith.mulf %182, %186 : vector<2x128xf32>
    %188 = tpu.concatenate %167, %187 in 1 : vector<2x128xf32>, vector<2x128xf32> -> vector<2x256xf32>
    %cst_35 = arith.constant dense<0.000000e+00> : vector<2x1024xf32>
    %189 = tpu.matmul %188, %3, %cst_35 {dimension_numbers = #tpu.dot_dimension_numbers<[1], [0], [0], [1], [0, 0, 1, 1], [], []>} : vector<2x256xf32>, vector<256x1024xf32>, vector<2x1024xf32> -> vector<2x1024xf32>
    %190 = vector.extract_strided_slice %16 {offsets = [4, 0, 0], sizes = [1, 2, 512], strides = [1, 1, 1]} : vector<8x2x512xf32> to vector<1x2x512xf32>
    %191 = vector.shape_cast %190 : vector<1x2x512xf32> to vector<2x512xf32>
    %192 = vector.extract_strided_slice %189 {offsets = [0, 0], sizes = [2, 512], strides = [1, 1]} : vector<2x1024xf32> to vector<2x512xf32>
    %193 = arith.addf %191, %192 : vector<2x512xf32>
    %194 = vector.extract_strided_slice %193 {offsets = [0, 0], sizes = [2, 384], strides = [1, 1]} : vector<2x512xf32> to vector<2x384xf32>
    %195 = arith.negf %194 : vector<2x384xf32>
    %196 = math.exp %195 : vector<2x384xf32>
    %cst_36 = arith.constant 1.000000e+00 : f32
    %197 = vector.broadcast %cst_36 : f32 to vector<2x384xf32>
    %198 = arith.addf %197, %196 : vector<2x384xf32>
    %199 = arith.divf %197, %198 : vector<2x384xf32>
    %200 = vector.extract_strided_slice %193 {offsets = [0, 384], sizes = [2, 128], strides = [1, 1]} : vector<2x512xf32> to vector<2x128xf32>
    %201 = math.tanh %200 : vector<2x128xf32>
    %202 = vector.extract_strided_slice %199 {offsets = [0, 0], sizes = [2, 128], strides = [1, 1]} : vector<2x384xf32> to vector<2x128xf32>
    %203 = vector.extract_strided_slice %199 {offsets = [0, 128], sizes = [2, 128], strides = [1, 1]} : vector<2x384xf32> to vector<2x128xf32>
    %204 = vector.extract_strided_slice %199 {offsets = [0, 256], sizes = [2, 128], strides = [1, 1]} : vector<2x384xf32> to vector<2x128xf32>
    %205 = arith.mulf %203, %165 : vector<2x128xf32>
    %206 = arith.mulf %202, %201 : vector<2x128xf32>
    %207 = arith.addf %205, %206 : vector<2x128xf32>
    %208 = math.tanh %207 : vector<2x128xf32>
    %209 = arith.mulf %204, %208 : vector<2x128xf32>
    %cst_37 = arith.constant dense<0.000000e+00> : vector<2x512xf32>
    %210 = tpu.matmul %209, %4, %cst_37 {dimension_numbers = #tpu.dot_dimension_numbers<[1], [0], [0], [1], [0, 0, 1, 1], [], []>} : vector<2x128xf32>, vector<128x512xf32>, vector<2x512xf32> -> vector<2x512xf32>
    %211 = vector.extract_strided_slice %189 {offsets = [0, 512], sizes = [2, 512], strides = [1, 1]} : vector<2x1024xf32> to vector<2x512xf32>
    %212 = arith.addf %210, %211 : vector<2x512xf32>
    %213 = arith.addf %212, %8 : vector<2x512xf32>
    %214 = vector.extract_strided_slice %213 {offsets = [0, 0], sizes = [2, 384], strides = [1, 1]} : vector<2x512xf32> to vector<2x384xf32>
    %215 = arith.negf %214 : vector<2x384xf32>
    %216 = math.exp %215 : vector<2x384xf32>
    %cst_38 = arith.constant 1.000000e+00 : f32
    %217 = vector.broadcast %cst_38 : f32 to vector<2x384xf32>
    %218 = arith.addf %217, %216 : vector<2x384xf32>
    %219 = arith.divf %217, %218 : vector<2x384xf32>
    %220 = vector.extract_strided_slice %213 {offsets = [0, 384], sizes = [2, 128], strides = [1, 1]} : vector<2x512xf32> to vector<2x128xf32>
    %221 = math.tanh %220 : vector<2x128xf32>
    %222 = vector.extract_strided_slice %219 {offsets = [0, 0], sizes = [2, 128], strides = [1, 1]} : vector<2x384xf32> to vector<2x128xf32>
    %223 = vector.extract_strided_slice %219 {offsets = [0, 128], sizes = [2, 128], strides = [1, 1]} : vector<2x384xf32> to vector<2x128xf32>
    %224 = vector.extract_strided_slice %219 {offsets = [0, 256], sizes = [2, 128], strides = [1, 1]} : vector<2x384xf32> to vector<2x128xf32>
    %225 = arith.mulf %223, %185 : vector<2x128xf32>
    %226 = arith.mulf %222, %221 : vector<2x128xf32>
    %227 = arith.addf %225, %226 : vector<2x128xf32>
    %228 = math.tanh %227 : vector<2x128xf32>
    %229 = arith.mulf %224, %228 : vector<2x128xf32>
    %230 = tpu.concatenate %209, %229 in 1 : vector<2x128xf32>, vector<2x128xf32> -> vector<2x256xf32>
    %cst_39 = arith.constant dense<0.000000e+00> : vector<2x1024xf32>
    %231 = tpu.matmul %230, %3, %cst_39 {dimension_numbers = #tpu.dot_dimension_numbers<[1], [0], [0], [1], [0, 0, 1, 1], [], []>} : vector<2x256xf32>, vector<256x1024xf32>, vector<2x1024xf32> -> vector<2x1024xf32>
    %232 = vector.extract_strided_slice %16 {offsets = [5, 0, 0], sizes = [1, 2, 512], strides = [1, 1, 1]} : vector<8x2x512xf32> to vector<1x2x512xf32>
    %233 = vector.shape_cast %232 : vector<1x2x512xf32> to vector<2x512xf32>
    %234 = vector.extract_strided_slice %231 {offsets = [0, 0], sizes = [2, 512], strides = [1, 1]} : vector<2x1024xf32> to vector<2x512xf32>
    %235 = arith.addf %233, %234 : vector<2x512xf32>
    %236 = vector.extract_strided_slice %235 {offsets = [0, 0], sizes = [2, 384], strides = [1, 1]} : vector<2x512xf32> to vector<2x384xf32>
    %237 = arith.negf %236 : vector<2x384xf32>
    %238 = math.exp %237 : vector<2x384xf32>
    %cst_40 = arith.constant 1.000000e+00 : f32
    %239 = vector.broadcast %cst_40 : f32 to vector<2x384xf32>
    %240 = arith.addf %239, %238 : vector<2x384xf32>
    %241 = arith.divf %239, %240 : vector<2x384xf32>
    %242 = vector.extract_strided_slice %235 {offsets = [0, 384], sizes = [2, 128], strides = [1, 1]} : vector<2x512xf32> to vector<2x128xf32>
    %243 = math.tanh %242 : vector<2x128xf32>
    %244 = vector.extract_strided_slice %241 {offsets = [0, 0], sizes = [2, 128], strides = [1, 1]} : vector<2x384xf32> to vector<2x128xf32>
    %245 = vector.extract_strided_slice %241 {offsets = [0, 128], sizes = [2, 128], strides = [1, 1]} : vector<2x384xf32> to vector<2x128xf32>
    %246 = vector.extract_strided_slice %241 {offsets = [0, 256], sizes = [2, 128], strides = [1, 1]} : vector<2x384xf32> to vector<2x128xf32>
    %247 = arith.mulf %245, %207 : vector<2x128xf32>
    %248 = arith.mulf %244, %243 : vector<2x128xf32>
    %249 = arith.addf %247, %248 : vector<2x128xf32>
    %250 = math.tanh %249 : vector<2x128xf32>
    %251 = arith.mulf %246, %250 : vector<2x128xf32>
    %cst_41 = arith.constant dense<0.000000e+00> : vector<2x512xf32>
    %252 = tpu.matmul %251, %4, %cst_41 {dimension_numbers = #tpu.dot_dimension_numbers<[1], [0], [0], [1], [0, 0, 1, 1], [], []>} : vector<2x128xf32>, vector<128x512xf32>, vector<2x512xf32> -> vector<2x512xf32>
    %253 = vector.extract_strided_slice %231 {offsets = [0, 512], sizes = [2, 512], strides = [1, 1]} : vector<2x1024xf32> to vector<2x512xf32>
    %254 = arith.addf %252, %253 : vector<2x512xf32>
    %255 = arith.addf %254, %8 : vector<2x512xf32>
    %256 = vector.extract_strided_slice %255 {offsets = [0, 0], sizes = [2, 384], strides = [1, 1]} : vector<2x512xf32> to vector<2x384xf32>
    %257 = arith.negf %256 : vector<2x384xf32>
    %258 = math.exp %257 : vector<2x384xf32>
    %cst_42 = arith.constant 1.000000e+00 : f32
    %259 = vector.broadcast %cst_42 : f32 to vector<2x384xf32>
    %260 = arith.addf %259, %258 : vector<2x384xf32>
    %261 = arith.divf %259, %260 : vector<2x384xf32>
    %262 = vector.extract_strided_slice %255 {offsets = [0, 384], sizes = [2, 128], strides = [1, 1]} : vector<2x512xf32> to vector<2x128xf32>
    %263 = math.tanh %262 : vector<2x128xf32>
    %264 = vector.extract_strided_slice %261 {offsets = [0, 0], sizes = [2, 128], strides = [1, 1]} : vector<2x384xf32> to vector<2x128xf32>
    %265 = vector.extract_strided_slice %261 {offsets = [0, 128], sizes = [2, 128], strides = [1, 1]} : vector<2x384xf32> to vector<2x128xf32>
    %266 = vector.extract_strided_slice %261 {offsets = [0, 256], sizes = [2, 128], strides = [1, 1]} : vector<2x384xf32> to vector<2x128xf32>
    %267 = arith.mulf %265, %227 : vector<2x128xf32>
    %268 = arith.mulf %264, %263 : vector<2x128xf32>
    %269 = arith.addf %267, %268 : vector<2x128xf32>
    %270 = math.tanh %269 : vector<2x128xf32>
    %271 = arith.mulf %266, %270 : vector<2x128xf32>
    %272 = tpu.concatenate %251, %271 in 1 : vector<2x128xf32>, vector<2x128xf32> -> vector<2x256xf32>
    %cst_43 = arith.constant dense<0.000000e+00> : vector<2x1024xf32>
    %273 = tpu.matmul %272, %3, %cst_43 {dimension_numbers = #tpu.dot_dimension_numbers<[1], [0], [0], [1], [0, 0, 1, 1], [], []>} : vector<2x256xf32>, vector<256x1024xf32>, vector<2x1024xf32> -> vector<2x1024xf32>
    %274 = vector.extract_strided_slice %16 {offsets = [6, 0, 0], sizes = [1, 2, 512], strides = [1, 1, 1]} : vector<8x2x512xf32> to vector<1x2x512xf32>
    %275 = vector.shape_cast %274 : vector<1x2x512xf32> to vector<2x512xf32>
    %276 = vector.extract_strided_slice %273 {offsets = [0, 0], sizes = [2, 512], strides = [1, 1]} : vector<2x1024xf32> to vector<2x512xf32>
    %277 = arith.addf %275, %276 : vector<2x512xf32>
    %278 = vector.extract_strided_slice %277 {offsets = [0, 0], sizes = [2, 384], strides = [1, 1]} : vector<2x512xf32> to vector<2x384xf32>
    %279 = arith.negf %278 : vector<2x384xf32>
    %280 = math.exp %279 : vector<2x384xf32>
    %cst_44 = arith.constant 1.000000e+00 : f32
    %281 = vector.broadcast %cst_44 : f32 to vector<2x384xf32>
    %282 = arith.addf %281, %280 : vector<2x384xf32>
    %283 = arith.divf %281, %282 : vector<2x384xf32>
    %284 = vector.extract_strided_slice %277 {offsets = [0, 384], sizes = [2, 128], strides = [1, 1]} : vector<2x512xf32> to vector<2x128xf32>
    %285 = math.tanh %284 : vector<2x128xf32>
    %286 = vector.extract_strided_slice %283 {offsets = [0, 0], sizes = [2, 128], strides = [1, 1]} : vector<2x384xf32> to vector<2x128xf32>
    %287 = vector.extract_strided_slice %283 {offsets = [0, 128], sizes = [2, 128], strides = [1, 1]} : vector<2x384xf32> to vector<2x128xf32>
    %288 = vector.extract_strided_slice %283 {offsets = [0, 256], sizes = [2, 128], strides = [1, 1]} : vector<2x384xf32> to vector<2x128xf32>
    %289 = arith.mulf %287, %249 : vector<2x128xf32>
    %290 = arith.mulf %286, %285 : vector<2x128xf32>
    %291 = arith.addf %289, %290 : vector<2x128xf32>
    %292 = math.tanh %291 : vector<2x128xf32>
    %293 = arith.mulf %288, %292 : vector<2x128xf32>
    %cst_45 = arith.constant dense<0.000000e+00> : vector<2x512xf32>
    %294 = tpu.matmul %293, %4, %cst_45 {dimension_numbers = #tpu.dot_dimension_numbers<[1], [0], [0], [1], [0, 0, 1, 1], [], []>} : vector<2x128xf32>, vector<128x512xf32>, vector<2x512xf32> -> vector<2x512xf32>
    %295 = vector.extract_strided_slice %273 {offsets = [0, 512], sizes = [2, 512], strides = [1, 1]} : vector<2x1024xf32> to vector<2x512xf32>
    %296 = arith.addf %294, %295 : vector<2x512xf32>
    %297 = arith.addf %296, %8 : vector<2x512xf32>
    %298 = vector.extract_strided_slice %297 {offsets = [0, 0], sizes = [2, 384], strides = [1, 1]} : vector<2x512xf32> to vector<2x384xf32>
    %299 = arith.negf %298 : vector<2x384xf32>
    %300 = math.exp %299 : vector<2x384xf32>
    %cst_46 = arith.constant 1.000000e+00 : f32
    %301 = vector.broadcast %cst_46 : f32 to vector<2x384xf32>
    %302 = arith.addf %301, %300 : vector<2x384xf32>
    %303 = arith.divf %301, %302 : vector<2x384xf32>
    %304 = vector.extract_strided_slice %297 {offsets = [0, 384], sizes = [2, 128], strides = [1, 1]} : vector<2x512xf32> to vector<2x128xf32>
    %305 = math.tanh %304 : vector<2x128xf32>
    %306 = vector.extract_strided_slice %303 {offsets = [0, 0], sizes = [2, 128], strides = [1, 1]} : vector<2x384xf32> to vector<2x128xf32>
    %307 = vector.extract_strided_slice %303 {offsets = [0, 128], sizes = [2, 128], strides = [1, 1]} : vector<2x384xf32> to vector<2x128xf32>
    %308 = vector.extract_strided_slice %303 {offsets = [0, 256], sizes = [2, 128], strides = [1, 1]} : vector<2x384xf32> to vector<2x128xf32>
    %309 = arith.mulf %307, %269 : vector<2x128xf32>
    %310 = arith.mulf %306, %305 : vector<2x128xf32>
    %311 = arith.addf %309, %310 : vector<2x128xf32>
    %312 = math.tanh %311 : vector<2x128xf32>
    %313 = arith.mulf %308, %312 : vector<2x128xf32>
    %314 = tpu.concatenate %293, %313 in 1 : vector<2x128xf32>, vector<2x128xf32> -> vector<2x256xf32>
    %cst_47 = arith.constant dense<0.000000e+00> : vector<2x1024xf32>
    %315 = tpu.matmul %314, %3, %cst_47 {dimension_numbers = #tpu.dot_dimension_numbers<[1], [0], [0], [1], [0, 0, 1, 1], [], []>} : vector<2x256xf32>, vector<256x1024xf32>, vector<2x1024xf32> -> vector<2x1024xf32>
    %316 = vector.extract_strided_slice %16 {offsets = [7, 0, 0], sizes = [1, 2, 512], strides = [1, 1, 1]} : vector<8x2x512xf32> to vector<1x2x512xf32>
    %317 = vector.shape_cast %316 : vector<1x2x512xf32> to vector<2x512xf32>
    %318 = vector.extract_strided_slice %315 {offsets = [0, 0], sizes = [2, 512], strides = [1, 1]} : vector<2x1024xf32> to vector<2x512xf32>
    %319 = arith.addf %317, %318 : vector<2x512xf32>
    %320 = vector.extract_strided_slice %319 {offsets = [0, 0], sizes = [2, 384], strides = [1, 1]} : vector<2x512xf32> to vector<2x384xf32>
    %321 = arith.negf %320 : vector<2x384xf32>
    %322 = math.exp %321 : vector<2x384xf32>
    %cst_48 = arith.constant 1.000000e+00 : f32
    %323 = vector.broadcast %cst_48 : f32 to vector<2x384xf32>
    %324 = arith.addf %323, %322 : vector<2x384xf32>
    %325 = arith.divf %323, %324 : vector<2x384xf32>
    %326 = vector.extract_strided_slice %319 {offsets = [0, 384], sizes = [2, 128], strides = [1, 1]} : vector<2x512xf32> to vector<2x128xf32>
    %327 = math.tanh %326 : vector<2x128xf32>
    %328 = vector.extract_strided_slice %325 {offsets = [0, 0], sizes = [2, 128], strides = [1, 1]} : vector<2x384xf32> to vector<2x128xf32>
    %329 = vector.extract_strided_slice %325 {offsets = [0, 128], sizes = [2, 128], strides = [1, 1]} : vector<2x384xf32> to vector<2x128xf32>
    %330 = vector.extract_strided_slice %325 {offsets = [0, 256], sizes = [2, 128], strides = [1, 1]} : vector<2x384xf32> to vector<2x128xf32>
    %331 = arith.mulf %329, %291 : vector<2x128xf32>
    %332 = arith.mulf %328, %327 : vector<2x128xf32>
    %333 = arith.addf %331, %332 : vector<2x128xf32>
    %334 = math.tanh %333 : vector<2x128xf32>
    %335 = arith.mulf %330, %334 : vector<2x128xf32>
    %cst_49 = arith.constant dense<0.000000e+00> : vector<2x512xf32>
    %336 = tpu.matmul %335, %4, %cst_49 {dimension_numbers = #tpu.dot_dimension_numbers<[1], [0], [0], [1], [0, 0, 1, 1], [], []>} : vector<2x128xf32>, vector<128x512xf32>, vector<2x512xf32> -> vector<2x512xf32>
    %337 = vector.extract_strided_slice %315 {offsets = [0, 512], sizes = [2, 512], strides = [1, 1]} : vector<2x1024xf32> to vector<2x512xf32>
    %338 = arith.addf %336, %337 : vector<2x512xf32>
    %339 = arith.addf %338, %8 : vector<2x512xf32>
    %340 = vector.extract_strided_slice %339 {offsets = [0, 0], sizes = [2, 384], strides = [1, 1]} : vector<2x512xf32> to vector<2x384xf32>
    %341 = arith.negf %340 : vector<2x384xf32>
    %342 = math.exp %341 : vector<2x384xf32>
    %cst_50 = arith.constant 1.000000e+00 : f32
    %343 = vector.broadcast %cst_50 : f32 to vector<2x384xf32>
    %344 = arith.addf %343, %342 : vector<2x384xf32>
    %345 = arith.divf %343, %344 : vector<2x384xf32>
    %346 = vector.extract_strided_slice %339 {offsets = [0, 384], sizes = [2, 128], strides = [1, 1]} : vector<2x512xf32> to vector<2x128xf32>
    %347 = math.tanh %346 : vector<2x128xf32>
    %348 = vector.extract_strided_slice %345 {offsets = [0, 0], sizes = [2, 128], strides = [1, 1]} : vector<2x384xf32> to vector<2x128xf32>
    %349 = vector.extract_strided_slice %345 {offsets = [0, 128], sizes = [2, 128], strides = [1, 1]} : vector<2x384xf32> to vector<2x128xf32>
    %350 = vector.extract_strided_slice %345 {offsets = [0, 256], sizes = [2, 128], strides = [1, 1]} : vector<2x384xf32> to vector<2x128xf32>
    %351 = arith.mulf %349, %311 : vector<2x128xf32>
    %352 = arith.mulf %348, %347 : vector<2x128xf32>
    %353 = arith.addf %351, %352 : vector<2x128xf32>
    %354 = math.tanh %353 : vector<2x128xf32>
    %355 = arith.mulf %350, %354 : vector<2x128xf32>
    %356 = tpu.concatenate %335, %355 in 1 : vector<2x128xf32>, vector<2x128xf32> -> vector<2x256xf32>
    %357 = tpu.concatenate %61, %103, %145, %187, %229, %271, %313, %355 in 0 : vector<2x128xf32>, vector<2x128xf32>, vector<2x128xf32>, vector<2x128xf32>, vector<2x128xf32>, vector<2x128xf32>, vector<2x128xf32>, vector<2x128xf32> -> vector<16x128xf32>
    %cst_51 = arith.constant dense<0.000000e+00> : vector<16x128xf32>
    %358 = tpu.matmul %357, %5, %cst_51 {dimension_numbers = #tpu.dot_dimension_numbers<[1], [0], [0], [1], [0, 0, 1, 1], [], []>} : vector<16x128xf32>, vector<128x128xf32>, vector<16x128xf32> -> vector<16x128xf32>
    %c0_52 = arith.constant 0 : index
    %c0_53 = arith.constant 0 : index
    %359 = vector.load %arg10[%c0_52, %c0_53] : memref<1x128xf32, #tpu.memory_space<vmem>>, vector<1x128xf32>
    %360 = vector.broadcast %359 : vector<1x128xf32> to vector<16x128xf32>
    %361 = arith.addf %358, %360 : vector<16x128xf32>
    %c0_54 = arith.constant 0 : index
    %c0_55 = arith.constant 0 : index
    %362 = vector.load %arg11[%c0_54, %c0_55] : memref<16x128xf32, #tpu.memory_space<vmem>>, vector<16x128xf32>
    tpu.vector_store %arg11[%c0_54, %c0_55], %361 {strides = array<i32>} : memref<16x128xf32, #tpu.memory_space<vmem>>, vector<16x128xf32>,
    %c0_56 = arith.constant 0 : index
    %c0_57 = arith.constant 0 : index
    %363 = vector.load %arg12[%c0_56, %c0_57] : memref<2x256xf32, #tpu.memory_space<vmem>>, vector<2x256xf32>
    tpu.vector_store %arg12[%c0_56, %c0_57], %356 {strides = array<i32>} : memref<2x256xf32, #tpu.memory_space<vmem>>, vector<2x256xf32>,
    %364 = tpu.concatenate %333, %353 in 1 : vector<2x128xf32>, vector<2x128xf32> -> vector<2x256xf32>
    %c0_58 = arith.constant 0 : index
    %c0_59 = arith.constant 0 : index
    %365 = vector.load %arg13[%c0_58, %c0_59] : memref<2x256xf32, #tpu.memory_space<vmem>>, vector<2x256xf32>
    tpu.vector_store %arg13[%c0_58, %c0_59], %364 {strides = array<i32>} : memref<2x256xf32, #tpu.memory_space<vmem>>, vector<2x256xf32>,
    return
  }
  func.func @transform_0(%arg0: i32) -> (i32, i32, i32) {
    %c0_i32 = arith.constant 0 : i32
    %c0_i32_0 = arith.constant 0 : i32
    %c0_i32_1 = arith.constant 0 : i32
    return %arg0, %c0_i32, %c0_i32_0 : i32, i32, i32
  }
  func.func @transform_1(%arg0: i32) -> (i32, i32) {
    %c0_i32 = arith.constant 0 : i32
    %c0_i32_0 = arith.constant 0 : i32
    %c0_i32_1 = arith.constant 0 : i32
    return %c0_i32, %c0_i32_0 : i32, i32
  }
  func.func @transform_2(%arg0: i32) -> (i32, i32) {
    %c0_i32 = arith.constant 0 : i32
    %c0_i32_0 = arith.constant 0 : i32
    %c0_i32_1 = arith.constant 0 : i32
    return %c0_i32, %c0_i32_0 : i32, i32
  }
  func.func @transform_3(%arg0: i32) -> (i32, i32) {
    %c0_i32 = arith.constant 0 : i32
    %c0_i32_0 = arith.constant 0 : i32
    %c0_i32_1 = arith.constant 0 : i32
    return %c0_i32, %c0_i32_0 : i32, i32
  }
  func.func @transform_4(%arg0: i32) -> (i32, i32) {
    %c0_i32 = arith.constant 0 : i32
    %c0_i32_0 = arith.constant 0 : i32
    %c0_i32_1 = arith.constant 0 : i32
    return %c0_i32, %c0_i32_0 : i32, i32
  }
  func.func @transform_5(%arg0: i32) -> (i32, i32) {
    %c0_i32 = arith.constant 0 : i32
    %c0_i32_0 = arith.constant 0 : i32
    %c0_i32_1 = arith.constant 0 : i32
    return %c0_i32, %c0_i32_0 : i32, i32
  }
  func.func @transform_6(%arg0: i32) -> (i32, i32) {
    %c0_i32 = arith.constant 0 : i32
    %c0_i32_0 = arith.constant 0 : i32
    %c0_i32_1 = arith.constant 0 : i32
    return %c0_i32, %c0_i32_0 : i32, i32
  }
  func.func @transform_7(%arg0: i32) -> (i32, i32) {
    %c0_i32 = arith.constant 0 : i32
    %c0_i32_0 = arith.constant 0 : i32
    %c0_i32_1 = arith.constant 0 : i32
    return %c0_i32, %c0_i32_0 : i32, i32
  }
  func.func @transform_8(%arg0: i32) -> (i32, i32) {
    %c0_i32 = arith.constant 0 : i32
    %c0_i32_0 = arith.constant 0 : i32
    %c0_i32_1 = arith.constant 0 : i32
    return %c0_i32, %c0_i32_0 : i32, i32
  }
  func.func @transform_9(%arg0: i32) -> (i32, i32) {
    %c0_i32 = arith.constant 0 : i32
    %c0_i32_0 = arith.constant 0 : i32
    %c0_i32_1 = arith.constant 0 : i32
    return %c0_i32, %c0_i32_0 : i32, i32
  }
  func.func @transform_10(%arg0: i32) -> (i32, i32) {
    %c0_i32 = arith.constant 0 : i32
    %c0_i32_0 = arith.constant 0 : i32
    return %arg0, %c0_i32 : i32, i32
  }
  func.func @transform_11(%arg0: i32) -> (i32, i32) {
    %c0_i32 = arith.constant 0 : i32
    %c0_i32_0 = arith.constant 0 : i32
    %c0_i32_1 = arith.constant 0 : i32
    return %c0_i32, %c0_i32_0 : i32, i32
  }
  func.func @transform_12(%arg0: i32) -> (i32, i32) {
    %c0_i32 = arith.constant 0 : i32
    %c0_i32_0 = arith.constant 0 : i32
    %c0_i32_1 = arith.constant 0 : i32
    return %c0_i32, %c0_i32_0 : i32, i32
  }
}

</mosaic_0001>

<bundles_post_ra>
// kernel: tpu_custom_call.1
= control target key start
LH: loop header
LB: loop body
LE: loop exit
PB: predicated region body
PF: predicated region fallthrough
CT: control target
= control target key end

     0   :  { %18 = vsyncpa [#allocation3], 0  ;;  %s10321_s0 = inlined_call_operand.hbm [shape: f32[8,2,32], index: 0, kind: input, shape index: {}]   ;;  %s10322_s1 = inlined_call_operand.hbm [shape: f32[2,256], index: 1, kind: input, shape index: {}]   ;;  %s10323_s2 = inlined_call_operand.vmem [shape: f32[2,256], index: 2, kind: input, shape index: {}]   ;;  %s10324_s3 = inlined_call_operand.hbm [shape: f32[32,512], index: 3, kind: input, shape index: {}]   ;;  %s10325_s4 = inlined_call_operand.hbm [shape: f32[256,1024], index: 4, kind: input, shape index: {}]   ;;  %s10326_s5 = inlined_call_operand.vmem [shape: f32[1,512], index: 5, kind: input, shape index: {}]   ;;  %s10327_s6 = inlined_call_operand.hbm [shape: f32[128,512], index: 6, kind: input, shape index: {}]   ;;  %s10328_s7 = inlined_call_operand.vmem [shape: f32[1,512], index: 7, kind: input, shape index: {}]   ;;  %s10329_s8 = inlined_call_operand.hbm [shape: f32[128,128], index: 8, kind: input, shape index: {}]   ;;  %s10330_s9 = inlined_call_operand.vmem [shape: f32[1,128], index: 9, kind: input, shape index: {}]   ;;  %s10331_s10 = inlined_call_operand.hbm [shape: f32[16,128], index: 10, kind: output, shape index: {0}]   ;;  %s10332_s11 = inlined_call_operand.hbm [shape: f32[2,256], index: 11, kind: output, shape index: {1}]   ;;  %s10333_s12 = inlined_call_operand.hbm [shape: f32[2,256], index: 12, kind: output, shape index: {2}]  }
   0x1   :  { %19 = vsyncpa [#allocation6], 0 }
   0x2   :  { %20 = vsyncpa [#allocation9], 0 }
   0x3   :  { %21 = vsyncpa [#allocation12], 0 }
   0x4   :  { %22 = vsyncpa [#allocation4], 0 }
   0x5   :  { %23 = vsyncpa [#allocation15], 0  ;;  %s8154_s21 = smov [#allocation5]   ;;  %s8155_s23 = smov [#allocation8]  }
   0x6   :  { %s42_s22 = sshll.u32 %s8154_s21, 4  ;;  %s65_s24 = sshll.u32 %s8155_s23, 4  ;;  %s43_s22 = int_to_ptr.vmem [resolvable:$true] %s42_s22  ;;  %s8237_s24 = int_to_ptr.vmem [resolvable:$true] %s65_s24 }
   0x7   :  { %s7944_s27 = scalar_lea.hbm %s10322_s1, 64 }
   0x8   :  { %p7945_p0 = scmp.ne.s32.totalorder %s10322_s1, %s7944_s27  ;;  %p7948_p1 = scmp.lt.u32.totalorder %s7944_s27, %s10322_s1 }
   0xa   :  { %p7950_p2 = pnand %p7948_p1, %p7945_p0 }
   0xc   :  { %7953 = shalt.err (!%p7950_p2)
}
   0xd   :  { %s7954_s14 = scalar_lea.vmem %s43_s22, 64  ;;  %p7959_p4 = scmp.lt.s32.totalorder %s43_s22, %s43_s22 }
   0xe   :  { %p7955_p3 = scmp.ne.s32.totalorder %s43_s22, %s7954_s14  ;;  %p7960_p5 = scmp.lt.s32.totalorder %s7954_s14, %s7954_s14 }
  0x10   :  { %p7961_p6 = por %p7960_p5, %p7959_p4 }
  0x12   :  { %p7962_p7 = pnand %p7961_p6, %p7955_p3 }
  0x14   :  { %7965 = shalt.err (!%p7962_p7)
}
  0x15   :  { %45 = dma.hbm_to_vmem [thread:$0]  %s10322_s1, 64, %s43_s22, [#allocation6]  }
  0x16   :  { %s7966_s19 = scalar_lea.hbm %s10325_s4, 32768 }
  0x17   :  { %p7967_p8 = scmp.ne.s32.totalorder %s10325_s4, %s7966_s19  ;;  %p7970_p9 = scmp.lt.u32.totalorder %s7966_s19, %s10325_s4 }
  0x19   :  { %p7972_p10 = pnand %p7970_p9, %p7967_p8 }
  0x1b   :  { %7975 = shalt.err (!%p7972_p10)
}
  0x1c   :  { %s7976_s26 = scalar_lea.vmem %s8237_s24, 32768  ;;  %p7981_p12 = scmp.lt.s32.totalorder %s8237_s24, %s8237_s24 }
  0x1d   :  { %p7977_p11 = scmp.ne.s32.totalorder %s8237_s24, %s7976_s26  ;;  %p7982_p13 = scmp.lt.s32.totalorder %s7976_s26, %s7976_s26 }
  0x1f   :  { %p7983_p0 = por %p7982_p13, %p7981_p12 }
  0x21   :  { %p7984_p1 = pnand %p7983_p0, %p7977_p11 }
  0x23   :  { %7987 = shalt.err (!%p7984_p1)
}
  0x24   :  { %s8156_s1 = smov 1024   ;;  %s8157_s22 = smov 64  }
  0x25   :  { %71 = dma.hbm_to_vmem [thread:$0]  %s10325_s4, 32768, %s8237_s24, [#allocation9], %s8156_s1, %s8156_s1, %s8157_s22  }
  0x26   :  { %s8158_s29 = smov [#allocation2]   ;;  %s7988_s15 = scalar_lea.hbm %s10321_s0, 256 }
  0x27   :  { %s29_s30 = sshll.u32 %s8158_s29, 4  ;;  %p7989_p2 = scmp.ne.s32.totalorder %s10321_s0, %s7988_s15  ;;  %s30_s30 = int_to_ptr.vmem [resolvable:$true] %s29_s30 }
  0x28   :  { %p7992_p3 = scmp.lt.u32.totalorder %s7988_s15, %s10321_s0 }
  0x2a   :  { %p7994_p4 = pnand %p7992_p3, %p7989_p2 }
  0x2c   :  { %7997 = shalt.err (!%p7994_p4)
}
  0x2d   :  { %s7998_s20 = scalar_lea.vmem %s30_s30, 256  ;;  %p8003_p6 = scmp.lt.s32.totalorder %s30_s30, %s30_s30 }
  0x2e   :  { %p7999_p5 = scmp.ne.s32.totalorder %s30_s30, %s7998_s20  ;;  %p8004_p7 = scmp.lt.s32.totalorder %s7998_s20, %s7998_s20 }
  0x30   :  { %p8005_p8 = por %p8004_p7, %p8003_p6 }
  0x32   :  { %p8006_p9 = pnand %p8005_p8, %p7999_p5 }
  0x34   :  { %8009 = shalt.err (!%p8006_p9)
}
  0x35   :  { %s8159_s4 = smov 32   ;;  %s8160_s24 = smov 2  }
  0x36   :  { %35 = dma.hbm_to_vmem [thread:$0]  %s10321_s0, 256, %s30_s30, [#allocation3], %s8159_s4, %s8159_s4, %s8160_s24  }
  0x37   :  { %s8161_s25 = smov [#allocation7]   ;;  %s8010_s27 = scalar_lea.hbm %s10324_s3, 2048 }
  0x38   :  { %s53_s26 = sshll.u32 %s8161_s25, 4  ;;  %p8011_p10 = scmp.ne.s32.totalorder %s10324_s3, %s8010_s27  ;;  %s54_s26 = int_to_ptr.vmem [resolvable:$true] %s53_s26 }
  0x39   :  { %p8014_p11 = scmp.lt.u32.totalorder %s8010_s27, %s10324_s3 }
  0x3b   :  { %p8016_p12 = pnand %p8014_p11, %p8011_p10 }
  0x3d   :  { %8019 = shalt.err (!%p8016_p12)
}
  0x3e   :  { %s8020_s15 = scalar_lea.vmem %s54_s26, 2048  ;;  %p8025_p0 = scmp.lt.s32.totalorder %s54_s26, %s54_s26 }
  0x3f   :  { %p8021_p13 = scmp.ne.s32.totalorder %s54_s26, %s8020_s15  ;;  %p8026_p1 = scmp.lt.s32.totalorder %s8020_s15, %s8020_s15 }
  0x41   :  { %p8027_p2 = por %p8026_p1, %p8025_p0 }
  0x43   :  { %p8028_p3 = pnand %p8027_p2, %p8021_p13 }
  0x45   :  { %8031 = shalt.err (!%p8028_p3)
}
  0x46   :  { %s8162_s0 = smov 512   ;;  %s8163_s17 = smov [#allocation10]  }
  0x47   :  { %59 = dma.hbm_to_vmem [thread:$0]  %s10324_s3, 2048, %s54_s26, [#allocation6], %s8162_s0, %s8162_s0, %s8159_s4  }
  0x48   :  { %s79_s18 = sshll.u32 %s8163_s17, 4  ;;  %s8164_s19 = smov [#allocation11]   ;;  %s80_s18 = int_to_ptr.vmem [resolvable:$true] %s79_s18 }
  0x49   :  { %s93_s20 = sshll.u32 %s8164_s19, 4  ;;  %s8032_s23 = scalar_lea.hbm %s10327_s6, 8192  ;;  %s94_s20 = int_to_ptr.vmem [resolvable:$true] %s93_s20 }
  0x4a   :  { %p8033_p4 = scmp.ne.s32.totalorder %s10327_s6, %s8032_s23  ;;  %p8036_p5 = scmp.lt.u32.totalorder %s8032_s23, %s10327_s6 }
  0x4c   :  { %p8038_p6 = pnand %p8036_p5, %p8033_p4 }
  0x4e   :  { %8041 = shalt.err (!%p8038_p6)
}
  0x4f   :  { %s8042_s3 = scalar_lea.vmem %s80_s18, 8192  ;;  %p8047_p8 = scmp.lt.s32.totalorder %s80_s18, %s80_s18 }
  0x50   :  { %p8043_p7 = scmp.ne.s32.totalorder %s80_s18, %s8042_s3  ;;  %p8048_p9 = scmp.lt.s32.totalorder %s8042_s3, %s8042_s3 }
  0x52   :  { %p8049_p10 = por %p8048_p9, %p8047_p8 }
  0x54   :  { %p8050_p11 = pnand %p8049_p10, %p8043_p7 }
  0x56   :  { %8053 = shalt.err (!%p8050_p11)
}
  0x57   :  { %85 = dma.hbm_to_vmem [thread:$0]  %s10327_s6, 8192, %s80_s18, [#allocation9], %s8162_s0, %s8162_s0, %s8159_s4  }
  0x58   :  { %s8054_s14 = scalar_lea.hbm %s10329_s8, 2048 }
  0x59   :  { %p8055_p12 = scmp.ne.s32.totalorder %s10329_s8, %s8054_s14  ;;  %p8058_p13 = scmp.lt.u32.totalorder %s8054_s14, %s10329_s8 }
  0x5b   :  { %p8060_p0 = pnand %p8058_p13, %p8055_p12 }
  0x5d   :  { %8063 = shalt.err (!%p8060_p0)
}
  0x5e   :  { %s8064_s19 = scalar_lea.vmem %s94_s20, 2048  ;;  %p8069_p2 = scmp.lt.s32.totalorder %s94_s20, %s94_s20 }
  0x5f   :  { %p8065_p1 = scmp.ne.s32.totalorder %s94_s20, %s8064_s19  ;;  %p8070_p3 = scmp.lt.s32.totalorder %s8064_s19, %s8064_s19 }
  0x61   :  { %p8071_p4 = por %p8070_p3, %p8069_p2 }
  0x63   :  { %p8072_p5 = pnand %p8071_p4, %p8065_p1 }
  0x65   :  { %8075 = shalt.err (!%p8072_p5)
}
  0x66   :  { %s8165_s6 = smov 128   ;;  %s8166_s4 = smov 8  }
  0x67   :  { %99 = dma.hbm_to_vmem [thread:$0]  %s10329_s8, 2048, %s94_s20, [#allocation12], %s8165_s6, %s8165_s6, %s8166_s4  }
  0x68   :  { %8142 = dma.done.wait [#allocation3], 256  }
  0x69   :  { %8143 = vsyncadd [#allocation3], 4294967040 }
  0x6a   :  { %8144 = dma.done.wait [#allocation6], 2112  }
  0x6b   :  { %8145 = vsyncadd [#allocation6], 4294965184 }
  0x6c   :  { %8146 = dma.done.wait [#allocation9], 40960  }
  0x6d   :  { %8147 = vsyncadd [#allocation9], 4294926336 }
  0x6e   :  { %8148 = dma.done.wait [#allocation12], 2048  }
  0x6f   :  { %8149 = vsyncadd [#allocation12], 4294965248  ;;  %v10334_v0 = vmov 0.0   ;;  %v466_v1 = vlaneseq  ;;  %v8168_v2 = vmov 1983009808   ;;  %v495_v6 = vld [vmem:[#allocation7 + $0x8] sm:$0xff] }
  0x70   :  { %643 = vmatprep.mubr.f32.mxu1 %v10334_v0  ;;  %v543_v3 = vunpack.c.l.s4 %v8168_v2  ;;  %v499_v7 = vld [vmem:[#allocation7 + $0x28] sm:$0xff]  ;;  %v494_v8 = vld [vmem:[#allocation7] sm:$0xff]  ;;  %v488_v20 = vld [vmem:[#allocation2 + $0x4] sm:$0x3]  ;;  %vm574_vm0 = vcmask 261120   ;;  %vm4838_vm1 = vcmask 1041408  }
  0x71   :  { %v8324_v4 = vshrl.u32 %v466_v1, 7  ;;  %v5094_v9 = vpack.c.bf16 %v499_v7, %v495_v6  ;;  %v498_v10 = vld [vmem:[#allocation7 + $0x20] sm:$0xff]  ;;  %v503_v11 = vld [vmem:[#allocation7 + $0x48] sm:$0xff]  ;;  %v489_v21 = vld [vmem:[#allocation2 + $0x6] sm:$0x3]  ;;  %vm4840_vm2 = vcmask 1043456  }
  0x72   :  { %v544_v5 = vunpack.c.0.s8 %v543_v3  ;;  %v507_v12 = vld [vmem:[#allocation7 + $0x68] sm:$0xff]  ;;  %v5096_v13 = vpack.c.bf16 %v498_v10, %v494_v8  ;;  %v502_v15 = vld [vmem:[#allocation7 + $0x40] sm:$0xff]  ;;  %v541_v24 = vcombine.low %v488_v20, %v489_v21  ;;  %v497_v25 = vld [vmem:[#allocation7 + $0x18] sm:$0xff]  ;;  %vm4842_vm3 = vcmask 1045504  }
  0x73   :  { %v5098_v14 = vpack.c.bf16 %v507_v12, %v503_v11  ;;  %v506_v16 = vld [vmem:[#allocation7 + $0x60] sm:$0xff]  ;;  %v486_v17 = vld [vmem:[#allocation2] sm:$0x3]  ;;  %5095 = vmatprep.subr.bf16.mxu1 %v5094_v9  ;;  %v487_v19 = vld [vmem:[#allocation2 + $0x2] sm:$0x3] }
  0x74   :  { %v8327_v18 = vsub.s32 %v544_v5, %v8324_v4  ;;  %5097 = vmatpush1.bf16.msra.mxu1 %v5096_v13  ;;  %v5100_v22 = vpack.c.bf16 %v506_v16, %v502_v15  ;;  %v540_v23 = vcombine.low %v486_v17, %v487_v19  ;;  %v501_v26 = vld [vmem:[#allocation7 + $0x38] sm:$0xff]  ;;  %v496_v27 = vld [vmem:[#allocation7 + $0x10] sm:$0xff]  ;;  %v129_v43 = vld [vmem:[#allocation8 + $0x8] sm:$0xff] }
  0x75   :  { %5099 = vmatprep.subr.bf16.mxu1 %v5098_v14  ;;  %v5102_v28 = vpack.c.bf16 %v501_v26, %v497_v25  ;;  %v500_v29 = vld [vmem:[#allocation7 + $0x30] sm:$0xff]  ;;  %v492_v34 = vld [vmem:[#allocation2 + $0xc] sm:$0x3]  ;;  %v493_v35 = vld [vmem:[#allocation2 + $0xe] sm:$0x3] }
  0x76   :  { %v490_v30 = vld [vmem:[#allocation2 + $0x8] sm:$0x3]  ;;  %v491_v31 = vld [vmem:[#allocation2 + $0xa] sm:$0x3]  ;;  %v548_v32 = vrot.slane %v540_v23, %v8327_v18  ;;  %v555_v33 = vrot.slane %v541_v24, %v8327_v18  ;;  %v505_v37 = vld [vmem:[#allocation7 + $0x58] sm:$0xff]  ;;  %v558_v38 = vcombine.low %v492_v34, %v493_v35  ;;  %v5104_v41 = vpack.c.bf16 %v500_v29, %v496_v27 }
  0x77   :  { %v557_v36 = vcombine.low %v490_v30, %v491_v31  ;;  %v509_v39 = vld [vmem:[#allocation7 + $0x78] sm:$0xff]  ;;  %v137_v44 = vld [vmem:[#allocation8 + $0x48] sm:$0xff]  ;;  %v128_v45 = vld [vmem:[#allocation8] sm:$0xff] }
  0x78   :  { %5101 = vmatpush1.bf16.msra.mxu1 %v5100_v22  ;;  %v556_v40 = vcombine.low %v548_v32, %v555_v33  ;;  %v572_v46 = vrot.slane %v558_v38, %v8327_v18  ;;  %v5106_v47 = vpack.c.bf16 %v509_v39, %v505_v37  ;;  %v504_v48 = vld [vmem:[#allocation7 + $0x50] sm:$0xff]  ;;  %v8333_v50 = vpack.c.bf16 %v137_v44, %v129_v43  ;;  %v136_v51 = vld [vmem:[#allocation8 + $0x40] sm:$0xff]  ;;  %v131_v53 = vld [vmem:[#allocation8 + $0x18] sm:$0xff] }
  0x79   :  { %v565_v42 = vrot.slane %v557_v36, %v8327_v18  ;;  %5103 = vmatprep.subr.bf16.mxu1 %v5102_v28  ;;  %v508_v49 = vld [vmem:[#allocation7 + $0x70] sm:$0xff]  ;;  %v8335_v52 = vpack.c.bf16 %v136_v51, %v128_v45  ;;  %v139_v54 = vld [vmem:[#allocation8 + $0x58] sm:$0xff]  ;;  %v145_v55 = vld [vmem:[#allocation8 + $0x88] sm:$0xff] }
  0x7a   :  { %10623 = vst [vmem:[#allocation23_spill] sm:$0xff] %v8333_v50  ;;  %5111 = vmatprep.subr.bf16.mxu0 %v8333_v50  ;;  %v153_v57 = vld [vmem:[#allocation8 + $0xc8] sm:$0xff]  ;;  %v144_v58 = vld [vmem:[#allocation8 + $0x80] sm:$0xff]  ;;  %v5108_v60 = vpack.c.bf16 %v508_v49, %v504_v48  ;;  %v130_v61 = vld [vmem:[#allocation8 + $0x10] sm:$0xff]  ;;  %v8343_v1 = vpack.c.bf16 %v139_v54, %v131_v53 }
  0x7b   :  { %5001 = vmatmul.mubr.msk.f32.vlgmr.msra.gmra.mrb[0].mxu1 %vm574_vm0, %v556_v40  ;;  %v573_v56 = vcombine.low %v565_v42, %v572_v46  ;;  %v152_v59 = vld [vmem:[#allocation8 + $0xc0] sm:$0xff]  ;;  %v138_v62 = vld [vmem:[#allocation8 + $0x50] sm:$0xff]  ;;  %v8340_v63 = vpack.c.bf16 %v153_v57, %v145_v55  ;;  %5113 = vmatpush1.bf16.msra.mxu0 %v8335_v52  ;;  %v147_v3 = vld [vmem:[#allocation8 + $0x98] sm:$0xff] }
  0x7c   :  { %5105 = vmatpush1.bf16.msra.mxu1 %v5104_v41  ;;  %649 = vmatprep.mubr.f32.mxu1 %v10334_v0  ;;  %10624 = vst [vmem:[#allocation24_spill] sm:$0xff] %v8343_v1  ;;  %v8345_v2 = vpack.c.bf16 %v152_v59, %v144_v58  ;;  %v161_v5 = vld [vmem:[#allocation8 + $0x108] sm:$0xff]  ;;  %v155_v7 = vld [vmem:[#allocation8 + $0xd8] sm:$0xff]  ;;  %v160_v9 = vld [vmem:[#allocation8 + $0x100] sm:$0xff]  ;;  %v8352_v11 = vpack.c.bf16 %v138_v62, %v130_v61 }
  0x7d   :  { %5107 = vmatprep.subr.bf16.mxu1 %v5106_v47  ;;  %v169_v6 = vld [vmem:[#allocation8 + $0x148] sm:$0xff]  ;;  %5115 = vmatprep.subr.bf16.mxu0 %v8340_v63  ;;  %v168_v10 = vld [vmem:[#allocation8 + $0x140] sm:$0xff]  ;;  %v8356_v14 = vpack.c.bf16 %v155_v7, %v147_v3  ;;  %v146_v15 = vld [vmem:[#allocation8 + $0x90] sm:$0xff] }
  0x7e   :  { %v8348_v8 = vpack.c.bf16 %v169_v6, %v161_v5  ;;  %v177_v12 = vld [vmem:[#allocation8 + $0x188] sm:$0xff]  ;;  %v154_v16 = vld [vmem:[#allocation8 + $0xd0] sm:$0xff]  ;;  %v8358_v17 = vpack.c.bf16 %v168_v10, %v160_v9  ;;  %v163_v19 = vld [vmem:[#allocation8 + $0x118] sm:$0xff] }
  0x7f   :  { %5002 = vmatmul.mubr.msk.f32.gmra.mrb[2].mxu1 %vm574_vm0, %v573_v56  ;;  %v185_v13 = vld [vmem:[#allocation8 + $0x1c8] sm:$0xff]  ;;  %5117 = vmatpush1.bf16.msra.mxu0 %v8345_v2  ;;  %v171_v20 = vld [vmem:[#allocation8 + $0x158] sm:$0xff]  ;;  %v176_v22 = vld [vmem:[#allocation8 + $0x180] sm:$0xff]  ;;  %v8366_v26 = vpack.c.bf16 %v154_v16, %v146_v15 }
  0x80   :  { %5109 = vmatpush1.bf16.msra.mxu1 %v5108_v60  ;;  %720 = vmatprep.mubr.f32.mxu1 %v10334_v0  ;;  %v8361_v21 = vpack.c.bf16 %v185_v13, %v177_v12  ;;  %v184_v23 = vld [vmem:[#allocation8 + $0x1c0] sm:$0xff]  ;;  %v193_v24 = vld [vmem:[#allocation8 + $0x208] sm:$0xff]  ;;  %v8370_v27 = vpack.c.bf16 %v171_v20, %v163_v19  ;;  %v162_v28 = vld [vmem:[#allocation8 + $0x110] sm:$0xff] }
  0x81   :  { %5175 = vmatprep.subr.bf16.mxu1 %v8343_v1  ;;  %5119 = vmatprep.subr.bf16.mxu0 %v8348_v8  ;;  %v201_v25 = vld [vmem:[#allocation8 + $0x248] sm:$0xff]  ;;  %v170_v29 = vld [vmem:[#allocation8 + $0x150] sm:$0xff]  ;;  %v8372_v30 = vpack.c.bf16 %v184_v23, %v176_v22  ;;  %v179_v31 = vld [vmem:[#allocation8 + $0x198] sm:$0xff] }
  0x82   :  { %v187_v32 = vld [vmem:[#allocation8 + $0x1d8] sm:$0xff]  ;;  %v8375_v33 = vpack.c.bf16 %v201_v25, %v193_v24  ;;  %v192_v34 = vld [vmem:[#allocation8 + $0x200] sm:$0xff]  ;;  %v209_v36 = vld [vmem:[#allocation8 + $0x288] sm:$0xff]  ;;  %v8379_v38 = vpack.c.bf16 %v170_v29, %v162_v28 }
  0x83   :  { %5003 = vmatmul.mubr.msk.f32.vlgmr.msra.gmra.mrb[4].mxu1 %vm574_vm0, %v556_v40  ;;  %5121 = vmatpush1.bf16.msra.mxu0 %v8358_v17  ;;  %v200_v35 = vld [vmem:[#allocation8 + $0x240] sm:$0xff]  ;;  %v217_v37 = vld [vmem:[#allocation8 + $0x2c8] sm:$0xff]  ;;  %v8383_v39 = vpack.c.bf16 %v187_v32, %v179_v31  ;;  %v178_v40 = vld [vmem:[#allocation8 + $0x190] sm:$0xff] }
  0x84   :  { %5177 = vmatpush1.bf16.msra.mxu1 %v8352_v11  ;;  %726 = vmatprep.mubr.f32.mxu1 %v10334_v0  ;;  %v186_v41 = vld [vmem:[#allocation8 + $0x1d0] sm:$0xff]  ;;  %v8385_v42 = vpack.c.bf16 %v200_v35, %v192_v34  ;;  %v195_v43 = vld [vmem:[#allocation8 + $0x218] sm:$0xff]  ;;  %v8388_v45 = vpack.c.bf16 %v217_v37, %v209_v36  ;;  %v208_v46 = vld [vmem:[#allocation8 + $0x280] sm:$0xff] }
  0x85   :  { %5179 = vmatprep.subr.bf16.mxu1 %v8356_v14  ;;  %5123 = vmatprep.subr.bf16.mxu0 %v8361_v21  ;;  %v203_v44 = vld [vmem:[#allocation8 + $0x258] sm:$0xff]  ;;  %v216_v47 = vld [vmem:[#allocation8 + $0x2c0] sm:$0xff]  ;;  %v225_v48 = vld [vmem:[#allocation8 + $0x308] sm:$0xff]  ;;  %v8391_v51 = vpack.c.bf16 %v186_v41, %v178_v40 }
  0x86   :  { %v233_v49 = vld [vmem:[#allocation8 + $0x348] sm:$0xff]  ;;  %v8395_v53 = vpack.c.bf16 %v203_v44, %v195_v43  ;;  %v194_v54 = vld [vmem:[#allocation8 + $0x210] sm:$0xff]  ;;  %v211_v57 = vld [vmem:[#allocation8 + $0x298] sm:$0xff] }
  0x87   :  { %5004 = vmatmul.mubr.msk.f32.gmra.mrb[6].mxu1 %vm574_vm0, %v573_v56  ;;  %5125 = vmatpush1.bf16.msra.mxu0 %v8372_v30  ;;  %v202_v55 = vld [vmem:[#allocation8 + $0x250] sm:$0xff]  ;;  %v8397_v56 = vpack.c.bf16 %v216_v47, %v208_v46  ;;  %v219_v58 = vld [vmem:[#allocation8 + $0x2d8] sm:$0xff]  ;;  %v8400_v59 = vpack.c.bf16 %v233_v49, %v225_v48  ;;  %v224_v60 = vld [vmem:[#allocation8 + $0x300] sm:$0xff] }
  0x88   :  { %5181 = vmatpush1.bf16.msra.mxu1 %v8366_v26  ;;  %5127 = vmatprep.subr.bf16.mxu0 %v8375_v33  ;;  %v232_v61 = vld [vmem:[#allocation8 + $0x340] sm:$0xff]  ;;  %v241_v62 = vld [vmem:[#allocation8 + $0x388] sm:$0xff]  ;;  %v8403_v5 = vpack.c.bf16 %v202_v55, %v194_v54  ;;  %v8407_v6 = vpack.c.bf16 %v219_v58, %v211_v57  ;;  %v210_v7 = vld [vmem:[#allocation8 + $0x290] sm:$0xff] }
  0x89   :  { %5183 = vmatprep.subr.bf16.mxu1 %v8370_v27  ;;  %v249_v3 = vld [vmem:[#allocation8 + $0x3c8] sm:$0xff]  ;;  %v218_v9 = vld [vmem:[#allocation8 + $0x2d0] sm:$0xff]  ;;  %v8409_v10 = vpack.c.bf16 %v232_v61, %v224_v60  ;;  %v227_v12 = vld [vmem:[#allocation8 + $0x318] sm:$0xff] }
  0x8a   :  { %v235_v13 = vld [vmem:[#allocation8 + $0x358] sm:$0xff]  ;;  %v8412_v15 = vpack.c.bf16 %v249_v3, %v241_v62  ;;  %v240_v16 = vld [vmem:[#allocation8 + $0x380] sm:$0xff]  ;;  %v257_v20 = vld [vmem:[#allocation8 + $0x408] sm:$0xff]  ;;  %v8415_v23 = vpack.c.bf16 %v218_v9, %v210_v7 }
  0x8b   :  { %5129 = vmatpush1.bf16.msra.mxu0 %v8385_v42  ;;  %v248_v19 = vld [vmem:[#allocation8 + $0x3c0] sm:$0xff]  ;;  %v265_v22 = vld [vmem:[#allocation8 + $0x448] sm:$0xff]  ;;  %v8419_v24 = vpack.c.bf16 %v235_v13, %v227_v12  ;;  %v226_v25 = vld [vmem:[#allocation8 + $0x310] sm:$0xff] }
  0x8c   :  { %5185 = vmatpush1.bf16.msra.mxu1 %v8379_v38  ;;  %5131 = vmatprep.subr.bf16.mxu0 %v8388_v45  ;;  %v234_v28 = vld [vmem:[#allocation8 + $0x350] sm:$0xff]  ;;  %v8421_v29 = vpack.c.bf16 %v248_v19, %v240_v16  ;;  %v243_v31 = vld [vmem:[#allocation8 + $0x398] sm:$0xff]  ;;  %v8424_v34 = vpack.c.bf16 %v265_v22, %v257_v20  ;;  %v256_v35 = vld [vmem:[#allocation8 + $0x400] sm:$0xff] }
  0x8d   :  { %5187 = vmatprep.subr.bf16.mxu1 %v8383_v39  ;;  %v251_v32 = vld [vmem:[#allocation8 + $0x3d8] sm:$0xff]  ;;  %v264_v36 = vld [vmem:[#allocation8 + $0x440] sm:$0xff]  ;;  %v273_v37 = vld [vmem:[#allocation8 + $0x488] sm:$0xff]  ;;  %v8427_v41 = vpack.c.bf16 %v234_v28, %v226_v25 }
  0x8e   :  { %v281_v40 = vld [vmem:[#allocation8 + $0x4c8] sm:$0xff]  ;;  %v8431_v43 = vpack.c.bf16 %v251_v32, %v243_v31  ;;  %v242_v44 = vld [vmem:[#allocation8 + $0x390] sm:$0xff]  ;;  %v8433_v47 = vpack.c.bf16 %v264_v36, %v256_v35  ;;  %v259_v48 = vld [vmem:[#allocation8 + $0x418] sm:$0xff] }
  0x8f   :  { %5133 = vmatpush1.bf16.msra.mxu0 %v8397_v56  ;;  %v250_v46 = vld [vmem:[#allocation8 + $0x3d0] sm:$0xff]  ;;  %v267_v49 = vld [vmem:[#allocation8 + $0x458] sm:$0xff]  ;;  %v8436_v54 = vpack.c.bf16 %v281_v40, %v273_v37  ;;  %v272_v55 = vld [vmem:[#allocation8 + $0x480] sm:$0xff] }
  0x90   :  { %5189 = vmatpush1.bf16.msra.mxu1 %v8391_v51  ;;  %5135 = vmatprep.subr.bf16.mxu0 %v8400_v59  ;;  %v280_v57 = vld [vmem:[#allocation8 + $0x4c0] sm:$0xff]  ;;  %v289_v58 = vld [vmem:[#allocation8 + $0x508] sm:$0xff]  ;;  %v8439_v61 = vpack.c.bf16 %v250_v46, %v242_v44  ;;  %v8443_v62 = vpack.c.bf16 %v267_v49, %v259_v48  ;;  %v258_v3 = vld [vmem:[#allocation8 + $0x410] sm:$0xff] }
  0x91   :  { %5191 = vmatprep.subr.bf16.mxu1 %v8395_v53  ;;  %v297_v60 = vld [vmem:[#allocation8 + $0x548] sm:$0xff]  ;;  %v266_v7 = vld [vmem:[#allocation8 + $0x450] sm:$0xff]  ;;  %v8445_v9 = vpack.c.bf16 %v280_v57, %v272_v55  ;;  %v275_v12 = vld [vmem:[#allocation8 + $0x498] sm:$0xff] }
  0x92   :  { %v283_v13 = vld [vmem:[#allocation8 + $0x4d8] sm:$0xff]  ;;  %v8448_v16 = vpack.c.bf16 %v297_v60, %v289_v58  ;;  %v288_v19 = vld [vmem:[#allocation8 + $0x500] sm:$0xff]  ;;  %v305_v22 = vld [vmem:[#allocation8 + $0x588] sm:$0xff]  ;;  %v8451_v28 = vpack.c.bf16 %v266_v7, %v258_v3 }
  0x93   :  { %5137 = vmatpush1.bf16.msra.mxu0 %v8409_v10  ;;  %v296_v20 = vld [vmem:[#allocation8 + $0x540] sm:$0xff]  ;;  %v313_v25 = vld [vmem:[#allocation8 + $0x5c8] sm:$0xff]  ;;  %v274_v31 = vld [vmem:[#allocation8 + $0x490] sm:$0xff]  ;;  %v8455_v32 = vpack.c.bf16 %v283_v13, %v275_v12 }
  0x94   :  { %5193 = vmatpush1.bf16.msra.mxu1 %v8403_v5  ;;  %5139 = vmatprep.subr.bf16.mxu0 %v8412_v15  ;;  %10625 = vst [vmem:[#allocation25_spill] sm:$0xff] %v8448_v16  ;;  %v282_v35 = vld [vmem:[#allocation8 + $0x4d0] sm:$0xff]  ;;  %v8457_v36 = vpack.c.bf16 %v296_v20, %v288_v19  ;;  %v291_v37 = vld [vmem:[#allocation8 + $0x518] sm:$0xff]  ;;  %v8460_v44 = vpack.c.bf16 %v313_v25, %v305_v22  ;;  %v304_v46 = vld [vmem:[#allocation8 + $0x580] sm:$0xff] }
  0x95   :  { %5195 = vmatprep.subr.bf16.mxu1 %v8407_v6  ;;  %v299_v40 = vld [vmem:[#allocation8 + $0x558] sm:$0xff]  ;;  %v312_v48 = vld [vmem:[#allocation8 + $0x5c0] sm:$0xff]  ;;  %v321_v55 = vld [vmem:[#allocation8 + $0x608] sm:$0xff]  ;;  %v8463_v58 = vpack.c.bf16 %v282_v35, %v274_v31 }
  0x96   :  { %10626 = vst [vmem:[#allocation26_spill] sm:$0xff] %v8457_v36  ;;  %10627 = vst [vmem:[#allocation27_spill] sm:$0xff] %v8460_v44  ;;  %v124_v49 = vld [vmem:[#allocation5] sm:$0xf]  ;;  %v329_v57 = vld [vmem:[#allocation8 + $0x648] sm:$0xff]  ;;  %v8467_v60 = vpack.c.bf16 %v299_v40, %v291_v37  ;;  %v8469_v12 = vpack.c.bf16 %v312_v48, %v304_v46 }
  0x97   :  { %5141 = vmatpush1.bf16.msra.mxu0 %v8421_v29  ;;  %125 = vst [vmem:[#allocation14] sm:$0xf] %v124_v49  ;;  %10628 = vst [vmem:[#allocation28_spill] sm:$0xff] %v8463_v58  ;;  %v290_v3 = vld [vmem:[#allocation8 + $0x510] sm:$0xff]  ;;  %v307_v13 = vld [vmem:[#allocation8 + $0x598] sm:$0xff]  ;;  %v8472_v20 = vpack.c.bf16 %v329_v57, %v321_v55 }
  0x98   :  { %5197 = vmatpush1.bf16.msra.mxu1 %v8415_v23  ;;  %5143 = vmatprep.subr.bf16.mxu0 %v8424_v34  ;;  %10629 = vst [vmem:[#allocation29_spill] sm:$0xff] %v8467_v60  ;;  %v298_v7 = vld [vmem:[#allocation8 + $0x550] sm:$0xff]  ;;  %10630 = vst [vmem:[#allocation30_spill] sm:$0xff] %v8469_v12  ;;  %v315_v19 = vld [vmem:[#allocation8 + $0x5d8] sm:$0xff] }
  0x99   :  { %5199 = vmatprep.subr.bf16.mxu1 %v8419_v24  ;;  %10631 = vst [vmem:[#allocation31_spill] sm:$0xff] %v8472_v20  ;;  %v320_v22 = vld [vmem:[#allocation8 + $0x600] sm:$0xff]  ;;  %v337_v31 = vld [vmem:[#allocation8 + $0x688] sm:$0xff]  ;;  %v8475_v49 = vpack.c.bf16 %v298_v7, %v290_v3  ;;  %v306_v37 = vld [vmem:[#allocation8 + $0x590] sm:$0xff]  ;;  %v8479_v40 = vpack.c.bf16 %v315_v19, %v307_v13 }
  0x9a   :  { %v328_v25 = vld [vmem:[#allocation8 + $0x640] sm:$0xff]  ;;  %v345_v35 = vld [vmem:[#allocation8 + $0x6c8] sm:$0xff]  ;;  %v314_v46 = vld [vmem:[#allocation8 + $0x5d0] sm:$0xff] }
  0x9b   :  { %5145 = vmatpush1.bf16.msra.mxu0 %v8433_v47  ;;  %10632 = vst [vmem:[#allocation32_spill] sm:$0xff] %v8475_v49  ;;  %10633 = vst [vmem:[#allocation33_spill] sm:$0xff] %v8479_v40  ;;  %v8481_v48 = vpack.c.bf16 %v328_v25, %v320_v22  ;;  %v323_v55 = vld [vmem:[#allocation8 + $0x618] sm:$0xff]  ;;  %v8484_v0 = vpack.c.bf16 %v345_v35, %v337_v31  ;;  %v353_v7 = vld [vmem:[#allocation8 + $0x708] sm:$0xff]  ;;  %v8491_v13 = vpack.c.bf16 %v314_v46, %v306_v37 }
  0x9c   :  { %5201 = vmatpush1.bf16.msra.mxu1 %v8427_v41  ;;  %5147 = vmatprep.subr.bf16.mxu0 %v8436_v54  ;;  %v331_v57 = vld [vmem:[#allocation8 + $0x658] sm:$0xff]  ;;  %v322_v22 = vld [vmem:[#allocation8 + $0x610] sm:$0xff]  ;;  %v369_v37 = vld [vmem:[#allocation8 + $0x788] sm:$0xff] }
  0x9d   :  { %5203 = vmatprep.subr.bf16.mxu1 %v8431_v43  ;;  %10634 = vst [vmem:[#allocation34_spill] sm:$0xff] %v8481_v48  ;;  %10635 = vst [vmem:[#allocation35_spill] sm:$0xff] %v8484_v0  ;;  %v8495_v19 = vpack.c.bf16 %v331_v57, %v323_v55  ;;  %v330_v25 = vld [vmem:[#allocation8 + $0x650] sm:$0xff]  ;;  %v339_v35 = vld [vmem:[#allocation8 + $0x698] sm:$0xff] }
  0x9e   :  { %v8486_v3 = vld.sshfl [vmem:[#allocation14] sm:$0x33 pattern:$0x76325410]  ;;  %10636 = vst [vmem:[#allocation36_spill] sm:$0xff] %v8491_v13  ;;  %v377_v46 = vld [vmem:[#allocation8 + $0x7c8] sm:$0xff]  ;;  %v8503_v55 = vpack.c.bf16 %v330_v25, %v322_v22 }
  0x9f   :  { %5149 = vmatpush1.bf16.msra.mxu0 %v8445_v9  ;;  %10637 = vst [vmem:[#allocation37_spill] sm:$0xff] %v8495_v19  ;;  %v346_v57 = vld [vmem:[#allocation8 + $0x6d0] sm:$0xff] }
  0xa0   :  { %5205 = vmatpush1.bf16.msra.mxu1 %v8439_v61  ;;  %5151 = vmatprep.subr.bf16.mxu0 %v8448_v16  ;;  %v361_v16 = vld [vmem:[#allocation8 + $0x748] sm:$0xff]  ;;  %10640 = vst [vmem:[#allocation40_spill] sm:$0xff] %v8503_v55 }
  0xa1   :  { %5207 = vmatprep.subr.bf16.mxu1 %v8443_v62 }
  0xa3   :  { %5153 = vmatpush1.bf16.msra.mxu0 %v8457_v36  ;;  %v344_v36 = vld [vmem:[#allocation8 + $0x6c0] sm:$0xff] }
  0xa4   :  { %5209 = vmatpush1.bf16.msra.mxu1 %v8451_v28  ;;  %5155 = vmatprep.subr.bf16.mxu0 %v8460_v44  ;;  %v336_v44 = vld [vmem:[#allocation8 + $0x680] sm:$0xff] }
  0xa5   :  { %5211 = vmatprep.subr.bf16.mxu1 %v8455_v32  ;;  %v8497_v31 = vpack.c.bf16 %v344_v36, %v336_v44  ;;  %v338_v44 = vld [vmem:[#allocation8 + $0x690] sm:$0xff] }
  0xa6   :  { %v8515_v22 = vpack.c.bf16 %v346_v57, %v338_v44  ;;  %v378_v57 = vld [vmem:[#allocation8 + $0x7d0] sm:$0xff] }
  0xa7   :  { %5157 = vmatpush1.bf16.msra.mxu0 %v8469_v12  ;;  %v831_v12 = vcombine.high %v8486_v3, %v8486_v3  ;;  %10638 = vst [vmem:[#allocation38_spill] sm:$0xff] %v8497_v31 }
  0xa8   :  { %5213 = vmatpush1.bf16.msra.mxu1 %v8463_v58  ;;  %5159 = vmatprep.subr.bf16.mxu0 %v8472_v20  ;;  %v347_v20 = vld [vmem:[#allocation8 + $0x6d8] sm:$0xff]  ;;  %v352_v58 = vld [vmem:[#allocation8 + $0x700] sm:$0xff]  ;;  %10644 = vst [vmem:[#allocation44_spill] sm:$0xff] %v8515_v22 }
  0xa9   :  { %5215 = vmatprep.subr.bf16.mxu1 %v8467_v60  ;;  %v8500_v60 = vpack.c.bf16 %v361_v16, %v353_v7  ;;  %898 = vmatprep.mubr.f32.mxu0 %v831_v12  ;;  %v8507_v36 = vpack.c.bf16 %v347_v20, %v339_v35  ;;  %v355_v7 = vld [vmem:[#allocation8 + $0x718] sm:$0xff] }
  0xaa   :  { %969 = vmatprep.mubr.f32.mxu1 %v831_v12  ;;  %v371_v35 = vld [vmem:[#allocation8 + $0x798] sm:$0xff] }
  0xab   :  { %5161 = vmatpush1.bf16.msra.mxu0 %v8481_v48  ;;  %10639 = vst [vmem:[#allocation39_spill] sm:$0xff] %v8500_v60  ;;  %10641 = vst [vmem:[#allocation41_spill] sm:$0xff] %v8507_v36  ;;  %v8512_v48 = vpack.c.bf16 %v377_v46, %v369_v37  ;;  %v379_v37 = vld [vmem:[#allocation8 + $0x7d8] sm:$0xff] }
  0xac   :  { %5217 = vmatpush1.bf16.msra.mxu1 %v8475_v49  ;;  %5163 = vmatprep.subr.bf16.mxu0 %v8484_v0  ;;  %v360_v49 = vld [vmem:[#allocation8 + $0x740] sm:$0xff]  ;;  %v363_v0 = vld [vmem:[#allocation8 + $0x758] sm:$0xff]  ;;  %v8529_v44 = vpack.c.bf16 %v379_v37, %v371_v35 }
  0xad   :  { %5219 = vmatprep.subr.bf16.mxu1 %v8479_v40  ;;  %v8509_v16 = vpack.c.bf16 %v360_v49, %v352_v58  ;;  %10643 = vst [vmem:[#allocation43_spill] sm:$0xff] %v8512_v48  ;;  %v368_v40 = vld [vmem:[#allocation8 + $0x780] sm:$0xff]  ;;  %v8519_v20 = vpack.c.bf16 %v363_v0, %v355_v7  ;;  %v354_v58 = vld [vmem:[#allocation8 + $0x710] sm:$0xff]  ;;  %v141_v7 = vld [vmem:[#allocation8 + $0x68] sm:$0xff] }
  0xae   :  { %v362_v49 = vld [vmem:[#allocation8 + $0x750] sm:$0xff]  ;;  %10648 = vst [vmem:[#allocation48_spill] sm:$0xff] %v8529_v44  ;;  %v143_v35 = vld [vmem:[#allocation8 + $0x78] sm:$0xff]  ;;  %v132_v37 = vld [vmem:[#allocation8 + $0x20] sm:$0xff] }
  0xaf   :  { %5165 = vmatpush1.bf16.msra.mxu0 %v8497_v31  ;;  %10642 = vst [vmem:[#allocation42_spill] sm:$0xff] %v8509_v16  ;;  %10645 = vst [vmem:[#allocation45_spill] sm:$0xff] %v8519_v20  ;;  %v8525_v46 = vpack.c.bf16 %v362_v49, %v354_v58  ;;  %v370_v0 = vld [vmem:[#allocation8 + $0x790] sm:$0xff]  ;;  %v135_v58 = vld [vmem:[#allocation8 + $0x38] sm:$0xff] }
  0xb0   :  { %5221 = vmatpush1.bf16.msra.mxu1 %v8491_v13  ;;  %5167 = vmatprep.subr.bf16.mxu0 %v8500_v60  ;;  %v376_v13 = vld [vmem:[#allocation8 + $0x7c0] sm:$0xff]  ;;  %v183_v31 = vld [vmem:[#allocation8 + $0x1b8] sm:$0xff] }
  0xb1   :  { %5223 = vmatprep.subr.bf16.mxu1 %v8495_v19  ;;  %v8521_v25 = vpack.c.bf16 %v376_v13, %v368_v40  ;;  %10647 = vst [vmem:[#allocation47_spill] sm:$0xff] %v8525_v46  ;;  %v8532_v40 = vpack.c.bf16 %v378_v57, %v370_v0  ;;  %v133_v13 = vld [vmem:[#allocation8 + $0x28] sm:$0xff]  ;;  %v8540_v0 = vpack.c.bf16 %v143_v35, %v135_v58  ;;  %v156_v58 = vld [vmem:[#allocation8 + $0xe0] sm:$0xff]  ;;  %v150_v35 = vld [vmem:[#allocation8 + $0xb0] sm:$0xff] }
  0xb2   :  { %v8538_v49 = vpack.c.bf16 %v141_v7, %v133_v13  ;;  %v172_v60 = vld [vmem:[#allocation8 + $0x160] sm:$0xff] }
  0xb3   :  { %5169 = vmatpush1.bf16.msra.mxu0 %v8509_v16  ;;  %10646 = vst [vmem:[#allocation46_spill] sm:$0xff] %v8521_v25  ;;  %10649 = vst [vmem:[#allocation49_spill] sm:$0xff] %v8532_v40  ;;  %v151_v16 = vld [vmem:[#allocation8 + $0xb8] sm:$0xff] }
  0xb4   :  { %5225 = vmatpush1.bf16.msra.mxu1 %v8503_v55  ;;  %5171 = vmatprep.subr.bf16.mxu0 %v8512_v48  ;;  %10650 = vst [vmem:[#allocation50_spill] sm:$0xff] %v8538_v49  ;;  %10651 = vst [vmem:[#allocation51_spill] sm:$0xff] %v8540_v0  ;;  %v134_v48 = vld [vmem:[#allocation8 + $0x30] sm:$0xff]  ;;  %v207_v55 = vld [vmem:[#allocation8 + $0x278] sm:$0xff] }
  0xb5   :  { %5227 = vmatprep.subr.bf16.mxu1 %v8507_v36  ;;  %v199_v36 = vld [vmem:[#allocation8 + $0x238] sm:$0xff] }
  0xb7   :  { %5173 = vmatpush1.bf16.msra.mxu0 %v8521_v25  ;;  %v140_v25 = vld [vmem:[#allocation8 + $0x60] sm:$0xff] }
  0xb8   :  { %5229 = vmatpush1.bf16.msra.mxu1 %v8515_v22  ;;  %v8542_v57 = vpack.c.bf16 %v140_v25, %v132_v37  ;;  %5239 = vmatprep.subr.bf16.mxu0 %v8538_v49  ;;  %v148_v25 = vld [vmem:[#allocation8 + $0xa0] sm:$0xff]  ;;  %v173_v49 = vld [vmem:[#allocation8 + $0x168] sm:$0xff] }
  0xb9   :  { %5231 = vmatprep.subr.bf16.mxu1 %v8519_v20  ;;  %v159_v20 = vld [vmem:[#allocation8 + $0xf8] sm:$0xff]  ;;  %v8554_v37 = vpack.c.bf16 %v156_v58, %v148_v25  ;;  %v174_v25 = vld [vmem:[#allocation8 + $0x170] sm:$0xff]  ;;  %v181_v22 = vld [vmem:[#allocation8 + $0x1a8] sm:$0xff] }
  0xba   :  { %899 = vmatmul.mubr.f32.vlgmr.msra.gmra.mrb[0].mxu0 %v8486_v3  ;;  %10652 = vst [vmem:[#allocation52_spill] sm:$0xff] %v8542_v57  ;;  %v8551_v7 = vpack.c.bf16 %v159_v20, %v151_v16  ;;  %v167_v16 = vld [vmem:[#allocation8 + $0x138] sm:$0xff] }
  0xbb   :  { %1040 = vmatprep.mubr.f32.mxu0 %v831_v12  ;;  %5241 = vmatpush1.bf16.msra.mxu0 %v8542_v57  ;;  %10656 = vst [vmem:[#allocation56_spill] sm:$0xff] %v8554_v37  ;;  %v175_v20 = vld [vmem:[#allocation8 + $0x178] sm:$0xff] }
  0xbc   :  { %5233 = vmatpush1.bf16.msra.mxu1 %v8525_v46  ;;  %v149_v46 = vld [vmem:[#allocation8 + $0xa8] sm:$0xff]  ;;  %10655 = vst [vmem:[#allocation55_spill] sm:$0xff] %v8551_v7  ;;  %v8562_v57 = vpack.c.bf16 %v175_v20, %v167_v16  ;;  %v188_v16 = vld [vmem:[#allocation8 + $0x1e0] sm:$0xff] }
  0xbd   :  { %5235 = vmatprep.subr.bf16.mxu1 %v8529_v44  ;;  %v142_v44 = vld [vmem:[#allocation8 + $0x70] sm:$0xff] }
  0xbe   :  { %10659 = vst [vmem:[#allocation59_spill] sm:$0xff] %v8562_v57 }
  0xc0   :  { %5237 = vmatpush1.bf16.msra.mxu1 %v8532_v40  ;;  %v8545_v40 = vpack.c.bf16 %v142_v44, %v134_v48  ;;  %v158_v48 = vld [vmem:[#allocation8 + $0xf0] sm:$0xff]  ;;  %v165_v44 = vld [vmem:[#allocation8 + $0x128] sm:$0xff] }
  0xc1   :  { %5303 = vmatprep.subr.bf16.mxu1 %v8540_v0  ;;  %v8558_v0 = vpack.c.bf16 %v158_v48, %v150_v35  ;;  %v191_v48 = vld [vmem:[#allocation8 + $0x1f8] sm:$0xff] }
  0xc2   :  { %10653 = vst [vmem:[#allocation53_spill] sm:$0xff] %v8545_v40  ;;  %v8574_v20 = vpack.c.bf16 %v191_v48, %v183_v31  ;;  %v196_v31 = vld [vmem:[#allocation8 + $0x220] sm:$0xff]  ;;  %v8586_v48 = vpack.c.bf16 %v207_v55, %v199_v36  ;;  %v214_v36 = vld [vmem:[#allocation8 + $0x2b0] sm:$0xff] }
  0xc3   :  { %970 = vmatmul.mubr.f32.vlgmr.msra.gmra.mrb[8].mxu1 %v8486_v3  ;;  %10657 = vst [vmem:[#allocation57_spill] sm:$0xff] %v8558_v0  ;;  %v220_v55 = vld [vmem:[#allocation8 + $0x2e0] sm:$0xff] }
  0xc4   :  { %1111 = vmatprep.mubr.f32.mxu1 %v831_v12  ;;  %v157_v12 = vld [vmem:[#allocation8 + $0xe8] sm:$0xff]  ;;  %5305 = vmatpush1.bf16.msra.mxu1 %v8545_v40  ;;  %v166_v40 = vld [vmem:[#allocation8 + $0x130] sm:$0xff]  ;;  %10663 = vst [vmem:[#allocation63_spill] sm:$0xff] %v8574_v20  ;;  %10667 = vst [vmem:[#allocation67_spill] sm:$0xff] %v8586_v48 }
  0xc5   :  { %v8549_v13 = vpack.c.bf16 %v157_v12, %v149_v46  ;;  %5307 = vmatprep.subr.bf16.mxu1 %v8551_v7  ;;  %v8560_v46 = vpack.c.bf16 %v173_v49, %v165_v44  ;;  %v164_v12 = vld [vmem:[#allocation8 + $0x120] sm:$0xff]  ;;  %v8569_v49 = vpack.c.bf16 %v174_v25, %v166_v40  ;;  %v205_v7 = vld [vmem:[#allocation8 + $0x268] sm:$0xff]  ;;  %v198_v25 = vld [vmem:[#allocation8 + $0x230] sm:$0xff] }
  0xc6   :  { %v8565_v58 = vpack.c.bf16 %v172_v60, %v164_v12  ;;  %v180_v44 = vld [vmem:[#allocation8 + $0x1a0] sm:$0xff]  ;;  %v182_v60 = vld [vmem:[#allocation8 + $0x1b0] sm:$0xff] }
  0xc7   :  { %10654 = vst [vmem:[#allocation54_spill] sm:$0xff] %v8549_v13  ;;  %5243 = vmatprep.subr.bf16.mxu0 %v8549_v13  ;;  %10658 = vst [vmem:[#allocation58_spill] sm:$0xff] %v8560_v46  ;;  %v189_v13 = vld [vmem:[#allocation8 + $0x1e8] sm:$0xff]  ;;  %v190_v12 = vld [vmem:[#allocation8 + $0x1f0] sm:$0xff] }
  0xc8   :  { %5245 = vmatpush1.bf16.msra.mxu0 %v8554_v37  ;;  %10660 = vst [vmem:[#allocation60_spill] sm:$0xff] %v8565_v58  ;;  %5309 = vmatpush1.bf16.msra.mxu1 %v8558_v0  ;;  %10661 = vst [vmem:[#allocation61_spill] sm:$0xff] %v8569_v49  ;;  %v8571_v35 = vpack.c.bf16 %v189_v13, %v181_v22  ;;  %v197_v37 = vld [vmem:[#allocation8 + $0x228] sm:$0xff]  ;;  %v8581_v22 = vpack.c.bf16 %v190_v12, %v182_v60  ;;  %v204_v13 = vld [vmem:[#allocation8 + $0x260] sm:$0xff] }
  0xc9   :  { %5247 = vmatprep.subr.bf16.mxu0 %v8560_v46  ;;  %5311 = vmatprep.subr.bf16.mxu1 %v8562_v57  ;;  %v8577_v46 = vpack.c.bf16 %v188_v16, %v180_v44  ;;  %v8583_v40 = vpack.c.bf16 %v205_v7, %v197_v37  ;;  %v206_v57 = vld [vmem:[#allocation8 + $0x270] sm:$0xff]  ;;  %v213_v0 = vld [vmem:[#allocation8 + $0x2a8] sm:$0xff]  ;;  %v215_v44 = vld [vmem:[#allocation8 + $0x2b8] sm:$0xff] }
  0xca   :  { %10662 = vst [vmem:[#allocation62_spill] sm:$0xff] %v8571_v35  ;;  %10665 = vst [vmem:[#allocation65_spill] sm:$0xff] %v8581_v22  ;;  %v223_v16 = vld [vmem:[#allocation8 + $0x2f8] sm:$0xff]  ;;  %v8593_v7 = vpack.c.bf16 %v206_v57, %v198_v25  ;;  %v212_v60 = vld [vmem:[#allocation8 + $0x2a0] sm:$0xff] }
  0xcb   :  { %10664 = vst [vmem:[#allocation64_spill] sm:$0xff] %v8577_v46  ;;  %10666 = vst [vmem:[#allocation66_spill] sm:$0xff] %v8583_v40  ;;  %v8598_v12 = vpack.c.bf16 %v223_v16, %v215_v44  ;;  %v236_v25 = vld [vmem:[#allocation8 + $0x360] sm:$0xff]  ;;  %v230_v44 = vld [vmem:[#allocation8 + $0x330] sm:$0xff] }
  0xcc   :  { %5249 = vmatpush1.bf16.msra.mxu0 %v8565_v58  ;;  %5313 = vmatpush1.bf16.msra.mxu1 %v8569_v49  ;;  %v221_v58 = vld [vmem:[#allocation8 + $0x2e8] sm:$0xff]  ;;  %v8589_v49 = vpack.c.bf16 %v204_v13, %v196_v31  ;;  %10669 = vst [vmem:[#allocation69_spill] sm:$0xff] %v8593_v7  ;;  %v231_v31 = vld [vmem:[#allocation8 + $0x338] sm:$0xff] }
  0xcd   :  { %5251 = vmatprep.subr.bf16.mxu0 %v8571_v35  ;;  %5315 = vmatprep.subr.bf16.mxu1 %v8574_v20  ;;  %v8595_v37 = vpack.c.bf16 %v221_v58, %v213_v0  ;;  %10671 = vst [vmem:[#allocation71_spill] sm:$0xff] %v8598_v12  ;;  %v222_v20 = vld [vmem:[#allocation8 + $0x2f0] sm:$0xff]  ;;  %v229_v35 = vld [vmem:[#allocation8 + $0x328] sm:$0xff]  ;;  %v239_v13 = vld [vmem:[#allocation8 + $0x378] sm:$0xff] }
  0xce   :  { %10668 = vst [vmem:[#allocation68_spill] sm:$0xff] %v8589_v49  ;;  %v8605_v0 = vpack.c.bf16 %v222_v20, %v214_v36  ;;  %v228_v58 = vld [vmem:[#allocation8 + $0x320] sm:$0xff]  ;;  %v8610_v16 = vpack.c.bf16 %v239_v13, %v231_v31  ;;  %v246_v31 = vld [vmem:[#allocation8 + $0x3b0] sm:$0xff] }
  0xcf   :  { %10670 = vst [vmem:[#allocation70_spill] sm:$0xff] %v8595_v37  ;;  %v244_v20 = vld [vmem:[#allocation8 + $0x3a0] sm:$0xff] }
  0xd0   :  { %5253 = vmatpush1.bf16.msra.mxu0 %v8577_v46  ;;  %5317 = vmatpush1.bf16.msra.mxu1 %v8581_v22  ;;  %v237_v46 = vld [vmem:[#allocation8 + $0x368] sm:$0xff]  ;;  %v8601_v22 = vpack.c.bf16 %v220_v55, %v212_v60  ;;  %10673 = vst [vmem:[#allocation73_spill] sm:$0xff] %v8605_v0  ;;  %10675 = vst [vmem:[#allocation75_spill] sm:$0xff] %v8610_v16  ;;  %v247_v60 = vld [vmem:[#allocation8 + $0x3b8] sm:$0xff] }
  0xd1   :  { %5255 = vmatprep.subr.bf16.mxu0 %v8583_v40  ;;  %5319 = vmatprep.subr.bf16.mxu1 %v8586_v48  ;;  %v8607_v57 = vpack.c.bf16 %v237_v46, %v229_v35  ;;  %v238_v48 = vld [vmem:[#allocation8 + $0x370] sm:$0xff]  ;;  %v245_v40 = vld [vmem:[#allocation8 + $0x3a8] sm:$0xff]  ;;  %v255_v55 = vld [vmem:[#allocation8 + $0x3f8] sm:$0xff] }
  0xd2   :  { %10672 = vst [vmem:[#allocation72_spill] sm:$0xff] %v8601_v22  ;;  %v8617_v46 = vpack.c.bf16 %v238_v48, %v230_v44  ;;  %v252_v36 = vld [vmem:[#allocation8 + $0x3e0] sm:$0xff]  ;;  %v8622_v13 = vpack.c.bf16 %v255_v55, %v247_v60  ;;  %v262_v60 = vld [vmem:[#allocation8 + $0x430] sm:$0xff] }
  0xd3   :  { %10674 = vst [vmem:[#allocation74_spill] sm:$0xff] %v8607_v57  ;;  %v260_v48 = vld [vmem:[#allocation8 + $0x420] sm:$0xff] }
  0xd4   :  { %5257 = vmatpush1.bf16.msra.mxu0 %v8589_v49  ;;  %5321 = vmatpush1.bf16.msra.mxu1 %v8593_v7  ;;  %v253_v49 = vld [vmem:[#allocation8 + $0x3e8] sm:$0xff]  ;;  %v8613_v7 = vpack.c.bf16 %v236_v25, %v228_v58  ;;  %10677 = vst [vmem:[#allocation77_spill] sm:$0xff] %v8617_v46  ;;  %10679 = vst [vmem:[#allocation79_spill] sm:$0xff] %v8622_v13  ;;  %v263_v58 = vld [vmem:[#allocation8 + $0x438] sm:$0xff] }
  0xd5   :  { %5259 = vmatprep.subr.bf16.mxu0 %v8595_v37  ;;  %5323 = vmatprep.subr.bf16.mxu1 %v8598_v12  ;;  %v8619_v35 = vpack.c.bf16 %v253_v49, %v245_v40  ;;  %v254_v12 = vld [vmem:[#allocation8 + $0x3f0] sm:$0xff]  ;;  %v261_v37 = vld [vmem:[#allocation8 + $0x428] sm:$0xff]  ;;  %v271_v25 = vld [vmem:[#allocation8 + $0x478] sm:$0xff] }
  0xd6   :  { %10676 = vst [vmem:[#allocation76_spill] sm:$0xff] %v8613_v7  ;;  %v8629_v49 = vpack.c.bf16 %v254_v12, %v246_v31  ;;  %v268_v44 = vld [vmem:[#allocation8 + $0x460] sm:$0xff]  ;;  %v8634_v55 = vpack.c.bf16 %v271_v25, %v263_v58  ;;  %v278_v25 = vld [vmem:[#allocation8 + $0x4b0] sm:$0xff] }
  0xd7   :  { %10678 = vst [vmem:[#allocation78_spill] sm:$0xff] %v8619_v35  ;;  %v276_v12 = vld [vmem:[#allocation8 + $0x4a0] sm:$0xff] }
  0xd8   :  { %5261 = vmatpush1.bf16.msra.mxu0 %v8601_v22  ;;  %5325 = vmatpush1.bf16.msra.mxu1 %v8605_v0  ;;  %v269_v22 = vld [vmem:[#allocation8 + $0x468] sm:$0xff]  ;;  %v8625_v0 = vpack.c.bf16 %v252_v36, %v244_v20  ;;  %10681 = vst [vmem:[#allocation81_spill] sm:$0xff] %v8629_v49  ;;  %10683 = vst [vmem:[#allocation83_spill] sm:$0xff] %v8634_v55  ;;  %v279_v20 = vld [vmem:[#allocation8 + $0x4b8] sm:$0xff] }
  0xd9   :  { %5263 = vmatprep.subr.bf16.mxu0 %v8607_v57  ;;  %5327 = vmatprep.subr.bf16.mxu1 %v8610_v16  ;;  %v8631_v40 = vpack.c.bf16 %v269_v22, %v261_v37  ;;  %v270_v16 = vld [vmem:[#allocation8 + $0x470] sm:$0xff]  ;;  %v277_v57 = vld [vmem:[#allocation8 + $0x4a8] sm:$0xff]  ;;  %v287_v36 = vld [vmem:[#allocation8 + $0x4f8] sm:$0xff] }
  0xda   :  { %10680 = vst [vmem:[#allocation80_spill] sm:$0xff] %v8625_v0  ;;  %v8641_v22 = vpack.c.bf16 %v270_v16, %v262_v60  ;;  %v284_v31 = vld [vmem:[#allocation8 + $0x4e0] sm:$0xff]  ;;  %v8646_v58 = vpack.c.bf16 %v287_v36, %v279_v20  ;;  %v303_v20 = vld [vmem:[#allocation8 + $0x578] sm:$0xff] }
  0xdb   :  { %10682 = vst [vmem:[#allocation82_spill] sm:$0xff] %v8631_v40 }
  0xdc   :  { %5265 = vmatpush1.bf16.msra.mxu0 %v8613_v7  ;;  %5329 = vmatpush1.bf16.msra.mxu1 %v8617_v46  ;;  %v285_v7 = vld [vmem:[#allocation8 + $0x4e8] sm:$0xff]  ;;  %v8637_v46 = vpack.c.bf16 %v268_v44, %v260_v48  ;;  %10685 = vst [vmem:[#allocation85_spill] sm:$0xff] %v8641_v22  ;;  %10687 = vst [vmem:[#allocation87_spill] sm:$0xff] %v8646_v58  ;;  %v8649_v48 = vpack.c.bf16 %v284_v31, %v276_v12  ;;  %v295_v44 = vld [vmem:[#allocation8 + $0x538] sm:$0xff] }
  0xdd   :  { %5267 = vmatprep.subr.bf16.mxu0 %v8619_v35  ;;  %5331 = vmatprep.subr.bf16.mxu1 %v8622_v13  ;;  %v8643_v37 = vpack.c.bf16 %v285_v7, %v277_v57  ;;  %v286_v13 = vld [vmem:[#allocation8 + $0x4f0] sm:$0xff]  ;;  %v293_v7 = vld [vmem:[#allocation8 + $0x528] sm:$0xff]  ;;  %v8660_v36 = vpack.c.bf16 %v303_v20, %v295_v44  ;;  %v300_v12 = vld [vmem:[#allocation8 + $0x560] sm:$0xff] }
  0xde   :  { %10684 = vst [vmem:[#allocation84_spill] sm:$0xff] %v8637_v46  ;;  %10688 = vst [vmem:[#allocation88_spill] sm:$0xff] %v8649_v48  ;;  %v8653_v16 = vpack.c.bf16 %v286_v13, %v278_v25  ;;  %v301_v57 = vld [vmem:[#allocation8 + $0x568] sm:$0xff]  ;;  %v292_v13 = vld [vmem:[#allocation8 + $0x520] sm:$0xff] }
  0xdf   :  { %10686 = vst [vmem:[#allocation86_spill] sm:$0xff] %v8643_v37  ;;  %v8658_v60 = vpack.c.bf16 %v301_v57, %v293_v7  ;;  %10691 = vst [vmem:[#allocation91_spill] sm:$0xff] %v8660_v36  ;;  %v294_v31 = vld [vmem:[#allocation8 + $0x530] sm:$0xff]  ;;  %v8664_v25 = vpack.c.bf16 %v300_v12, %v292_v13  ;;  %v126_v7 = vld [vmem:[%s10323_s2] sm:$0xf] }
  0xe0   :  { %5269 = vmatpush1.bf16.msra.mxu0 %v8625_v0  ;;  %5333 = vmatpush1.bf16.msra.mxu1 %v8629_v49  ;;  %10689 = vst [vmem:[#allocation89_spill] sm:$0xff] %v8653_v16  ;;  %127 = vst [vmem:[#allocation16] sm:$0xf] %v126_v7  ;;  %v309_v57 = vld [vmem:[#allocation8 + $0x5a8] sm:$0xff]  ;;  %v311_v20 = vld [vmem:[#allocation8 + $0x5b8] sm:$0xff] }
  0xe1   :  { %5271 = vmatprep.subr.bf16.mxu0 %v8631_v40  ;;  %5335 = vmatprep.subr.bf16.mxu1 %v8634_v55  ;;  %10690 = vst [vmem:[#allocation90_spill] sm:$0xff] %v8658_v60  ;;  %10692 = vst [vmem:[#allocation92_spill] sm:$0xff] %v8664_v25  ;;  %v317_v44 = vld [vmem:[#allocation8 + $0x5e8] sm:$0xff]  ;;  %v308_v13 = vld [vmem:[#allocation8 + $0x5a0] sm:$0xff] }
  0xe2   :  { %v316_v12 = vld [vmem:[#allocation8 + $0x5e0] sm:$0xff]  ;;  %v325_v7 = vld [vmem:[#allocation8 + $0x628] sm:$0xff] }
  0xe4   :  { %5273 = vmatpush1.bf16.msra.mxu0 %v8637_v46  ;;  %5337 = vmatpush1.bf16.msra.mxu1 %v8641_v22  ;;  %v439_v46 = vld [vmem:[#allocation10 + $0x1b8] sm:$0xff] }
  0xe5   :  { %5275 = vmatprep.subr.bf16.mxu0 %v8643_v37  ;;  %5339 = vmatprep.subr.bf16.mxu1 %v8646_v58  ;;  %v318_v37 = vld [vmem:[#allocation8 + $0x5f0] sm:$0xff] }
  0xe8   :  { %5277 = vmatpush1.bf16.msra.mxu0 %v8649_v48  ;;  %5341 = vmatpush1.bf16.msra.mxu1 %v8653_v16  ;;  %v302_v48 = vld [vmem:[#allocation8 + $0x570] sm:$0xff] }
  0xe9   :  { %5279 = vmatprep.subr.bf16.mxu0 %v8658_v60  ;;  %5343 = vmatprep.subr.bf16.mxu1 %v8660_v36  ;;  %v8666_v58 = vpack.c.bf16 %v302_v48, %v294_v31  ;;  %v8673_v36 = vpack.c.bf16 %v317_v44, %v309_v57  ;;  %v319_v60 = vld [vmem:[#allocation8 + $0x5f8] sm:$0xff]  ;;  %v8677_v48 = vpack.c.bf16 %v316_v12, %v308_v13  ;;  %v310_v31 = vld [vmem:[#allocation8 + $0x5b0] sm:$0xff]  ;;  %v333_v57 = vld [vmem:[#allocation8 + $0x668] sm:$0xff] }
  0xea   :  { %v8675_v16 = vpack.c.bf16 %v319_v60, %v311_v20  ;;  %v327_v44 = vld [vmem:[#allocation8 + $0x638] sm:$0xff]  ;;  %v324_v20 = vld [vmem:[#allocation8 + $0x620] sm:$0xff] }
  0xeb   :  { %10693 = vst [vmem:[#allocation93_spill] sm:$0xff] %v8666_v58  ;;  %10694 = vst [vmem:[#allocation94_spill] sm:$0xff] %v8673_v36  ;;  %v335_v60 = vld [vmem:[#allocation8 + $0x678] sm:$0xff]  ;;  %v332_v13 = vld [vmem:[#allocation8 + $0x660] sm:$0xff] }
  0xec   :  { %5281 = vmatpush1.bf16.msra.mxu0 %v8664_v25  ;;  %5345 = vmatpush1.bf16.msra.mxu1 %v8666_v58  ;;  %10695 = vst [vmem:[#allocation95_spill] sm:$0xff] %v8675_v16  ;;  %10696 = vst [vmem:[#allocation96_spill] sm:$0xff] %v8677_v48  ;;  %v8680_v25 = vpack.c.bf16 %v318_v37, %v310_v31  ;;  %v8685_v58 = vpack.c.bf16 %v333_v57, %v325_v7  ;;  %v326_v37 = vld [vmem:[#allocation8 + $0x630] sm:$0xff]  ;;  %v349_v7 = vld [vmem:[#allocation8 + $0x6e8] sm:$0xff] }
  0xed   :  { %5283 = vmatprep.subr.bf16.mxu0 %v8673_v36  ;;  %5347 = vmatprep.subr.bf16.mxu1 %v8675_v16  ;;  %v8687_v12 = vpack.c.bf16 %v335_v60, %v327_v44  ;;  %v8689_v22 = vpack.c.bf16 %v332_v13, %v324_v20  ;;  %v334_v31 = vld [vmem:[#allocation8 + $0x670] sm:$0xff]  ;;  %v343_v57 = vld [vmem:[#allocation8 + $0x6b8] sm:$0xff]  ;;  %v340_v60 = vld [vmem:[#allocation8 + $0x6a0] sm:$0xff] }
  0xee   :  { %10697 = vst [vmem:[#allocation97_spill] sm:$0xff] %v8680_v25  ;;  %10698 = vst [vmem:[#allocation98_spill] sm:$0xff] %v8685_v58  ;;  %v8692_v16 = vpack.c.bf16 %v334_v31, %v326_v37  ;;  %v351_v44 = vld [vmem:[#allocation8 + $0x6f8] sm:$0xff]  ;;  %v348_v20 = vld [vmem:[#allocation8 + $0x6e0] sm:$0xff] }
  0xef   :  { %10699 = vst [vmem:[#allocation99_spill] sm:$0xff] %v8687_v12  ;;  %10700 = vst [vmem:[#allocation100_spill] sm:$0xff] %v8689_v22  ;;  %v8699_v13 = vpack.c.bf16 %v351_v44, %v343_v57  ;;  %v8701_v36 = vpack.c.bf16 %v348_v20, %v340_v60  ;;  %v342_v37 = vld [vmem:[#allocation8 + $0x6b0] sm:$0xff]  ;;  %v367_v57 = vld [vmem:[#allocation8 + $0x778] sm:$0xff] }
  0xf0   :  { %5285 = vmatpush1.bf16.msra.mxu0 %v8677_v48  ;;  %5349 = vmatpush1.bf16.msra.mxu1 %v8680_v25  ;;  %10701 = vst [vmem:[#allocation101_spill] sm:$0xff] %v8692_v16  ;;  %v341_v25 = vld [vmem:[#allocation8 + $0x6a8] sm:$0xff]  ;;  %v350_v31 = vld [vmem:[#allocation8 + $0x6f0] sm:$0xff]  ;;  %v356_v44 = vld [vmem:[#allocation8 + $0x720] sm:$0xff] }
  0xf1   :  { %5287 = vmatprep.subr.bf16.mxu0 %v8685_v58  ;;  %5351 = vmatprep.subr.bf16.mxu1 %v8687_v12  ;;  %v8697_v48 = vpack.c.bf16 %v349_v7, %v341_v25  ;;  %10703 = vst [vmem:[#allocation103_spill] sm:$0xff] %v8699_v13  ;;  %10704 = vst [vmem:[#allocation104_spill] sm:$0xff] %v8701_v36  ;;  %v8704_v12 = vpack.c.bf16 %v350_v31, %v342_v37  ;;  %v365_v25 = vld [vmem:[#allocation8 + $0x768] sm:$0xff]  ;;  %v359_v7 = vld [vmem:[#allocation8 + $0x738] sm:$0xff] }
  0xf2   :  { %v364_v60 = vld [vmem:[#allocation8 + $0x760] sm:$0xff]  ;;  %v8711_v20 = vpack.c.bf16 %v367_v57, %v359_v7  ;;  %v358_v37 = vld [vmem:[#allocation8 + $0x730] sm:$0xff]  ;;  %v383_v7 = vld [vmem:[#allocation8 + $0x7f8] sm:$0xff] }
  0xf3   :  { %10702 = vst [vmem:[#allocation102_spill] sm:$0xff] %v8697_v48  ;;  %10705 = vst [vmem:[#allocation105_spill] sm:$0xff] %v8704_v12  ;;  %v8713_v58 = vpack.c.bf16 %v364_v60, %v356_v44  ;;  %v366_v31 = vld [vmem:[#allocation8 + $0x770] sm:$0xff]  ;;  %v372_v57 = vld [vmem:[#allocation8 + $0x7a0] sm:$0xff] }
  0xf4   :  { %5289 = vmatpush1.bf16.msra.mxu0 %v8689_v22  ;;  %5353 = vmatpush1.bf16.msra.mxu1 %v8692_v16  ;;  %v357_v16 = vld [vmem:[#allocation8 + $0x728] sm:$0xff]  ;;  %10707 = vst [vmem:[#allocation107_spill] sm:$0xff] %v8711_v20  ;;  %v380_v44 = vld [vmem:[#allocation8 + $0x7e0] sm:$0xff] }
  0xf5   :  { %5291 = vmatprep.subr.bf16.mxu0 %v8697_v48  ;;  %5355 = vmatprep.subr.bf16.mxu1 %v8699_v13  ;;  %v8709_v22 = vpack.c.bf16 %v365_v25, %v357_v16  ;;  %10708 = vst [vmem:[#allocation108_spill] sm:$0xff] %v8713_v58  ;;  %v8716_v13 = vpack.c.bf16 %v366_v31, %v358_v37  ;;  %v381_v16 = vld [vmem:[#allocation8 + $0x7e8] sm:$0xff]  ;;  %v375_v25 = vld [vmem:[#allocation8 + $0x7b8] sm:$0xff]  ;;  %v374_v37 = vld [vmem:[#allocation8 + $0x7b0] sm:$0xff] }
  0xf6   :  { %v8723_v60 = vpack.c.bf16 %v383_v7, %v375_v25  ;;  %v8725_v48 = vpack.c.bf16 %v380_v44, %v372_v57  ;;  %v382_v31 = vld [vmem:[#allocation8 + $0x7f0] sm:$0xff]  ;;  %v391_v25 = vld [vmem:[#allocation10 + $0x38] sm:$0xff]  ;;  %v384_v7 = vld [vmem:[#allocation10] sm:$0xff] }
  0xf7   :  { %10706 = vst [vmem:[#allocation106_spill] sm:$0xff] %v8709_v22  ;;  %10709 = vst [vmem:[#allocation109_spill] sm:$0xff] %v8716_v13  ;;  %v388_v57 = vld [vmem:[#allocation10 + $0x20] sm:$0xff] }
  0xf8   :  { %5293 = vmatpush1.bf16.msra.mxu0 %v8701_v36  ;;  %5357 = vmatpush1.bf16.msra.mxu1 %v8704_v12  ;;  %v373_v12 = vld [vmem:[#allocation8 + $0x7a8] sm:$0xff]  ;;  %10711 = vst [vmem:[#allocation111_spill] sm:$0xff] %v8723_v60  ;;  %10712 = vst [vmem:[#allocation112_spill] sm:$0xff] %v8725_v48 }
  0xf9   :  { %5295 = vmatprep.subr.bf16.mxu0 %v8709_v22  ;;  %5359 = vmatprep.subr.bf16.mxu1 %v8711_v20  ;;  %v8721_v36 = vpack.c.bf16 %v381_v16, %v373_v12  ;;  %v8728_v20 = vpack.c.bf16 %v382_v31, %v374_v37  ;;  %v389_v12 = vld [vmem:[#allocation10 + $0x28] sm:$0xff]  ;;  %v387_v16 = vld [vmem:[#allocation10 + $0x18] sm:$0xff]  ;;  %v8737_v22 = vpack.c.bf16 %v388_v57, %v384_v7  ;;  %v386_v37 = vld [vmem:[#allocation10 + $0x10] sm:$0xff] }
  0xfa   :  { %v8735_v44 = vpack.c.bf16 %v391_v25, %v387_v16  ;;  %v390_v31 = vld [vmem:[#allocation10 + $0x30] sm:$0xff]  ;;  %v399_v25 = vld [vmem:[#allocation10 + $0x78] sm:$0xff]  ;;  %v392_v7 = vld [vmem:[#allocation10 + $0x40] sm:$0xff] }
  0xfb   :  { %10710 = vst [vmem:[#allocation110_spill] sm:$0xff] %v8721_v36  ;;  %10713 = vst [vmem:[#allocation113_spill] sm:$0xff] %v8728_v20  ;;  %v396_v57 = vld [vmem:[#allocation10 + $0x60] sm:$0xff] }
  0xfc   :  { %5297 = vmatpush1.bf16.msra.mxu0 %v8713_v58  ;;  %5361 = vmatpush1.bf16.msra.mxu1 %v8716_v13  ;;  %v385_v13 = vld [vmem:[#allocation10 + $0x8] sm:$0xff]  ;;  %10715 = vst [vmem:[#allocation115_spill] sm:$0xff] %v8735_v44  ;;  %10716 = vst [vmem:[#allocation116_spill] sm:$0xff] %v8737_v22 }
  0xfd   :  { %5299 = vmatprep.subr.bf16.mxu0 %v8721_v36  ;;  %5363 = vmatprep.subr.bf16.mxu1 %v8723_v60  ;;  %v8733_v58 = vpack.c.bf16 %v389_v12, %v385_v13  ;;  %v393_v13 = vld [vmem:[#allocation10 + $0x48] sm:$0xff]  ;;  %v10721_v60 = vmov 0.0  }
  0xfe   :  { %v397_v12 = vld [vmem:[#allocation10 + $0x68] sm:$0xff] }
  0xff   :  { %10714 = vst [vmem:[#allocation114_spill] sm:$0xff] %v8733_v58  ;;  %v8747_v16 = vpack.c.bf16 %v397_v12, %v393_v13  ;;  %v401_v13 = vld [vmem:[#allocation10 + $0x88] sm:$0xff] }
 0x100   :  { %5301 = vmatpush1.bf16.msra.mxu0 %v8725_v48  ;;  %5365 = vmatpush1.bf16.msra.mxu1 %v8728_v20  ;;  %v8741_v48 = vpack.c.bf16 %v390_v31, %v386_v37  ;;  %v395_v20 = vld [vmem:[#allocation10 + $0x58] sm:$0xff]  ;;  %v8751_v37 = vpack.c.bf16 %v396_v57, %v392_v7  ;;  %v394_v31 = vld [vmem:[#allocation10 + $0x50] sm:$0xff]  ;;  %v405_v12 = vld [vmem:[#allocation10 + $0xa8] sm:$0xff] }
 0x101   :  { %5367 = vmatprep.subr.bf16.mxu0 %v8733_v58  ;;  %5399 = vmatprep.subr.bf16.mxu1 %v8735_v44  ;;  %10718 = vst [vmem:[#allocation118_spill] sm:$0xff] %v8747_v16  ;;  %v8749_v58 = vpack.c.bf16 %v399_v25, %v395_v20  ;;  %v398_v44 = vld [vmem:[#allocation10 + $0x70] sm:$0xff]  ;;  %v8761_v20 = vpack.c.bf16 %v405_v12, %v401_v13  ;;  %v407_v25 = vld [vmem:[#allocation10 + $0xb8] sm:$0xff]  ;;  %v400_v7 = vld [vmem:[#allocation10 + $0x80] sm:$0xff] }
 0x102   :  { %10717 = vst [vmem:[#allocation117_spill] sm:$0xff] %v8741_v48  ;;  %10720 = vst [vmem:[#allocation120_spill] sm:$0xff] %v8751_v37  ;;  %v404_v57 = vld [vmem:[#allocation10 + $0xa0] sm:$0xff]  ;;  %v437_v36 = vld [vmem:[#allocation10 + $0x1a8] sm:$0xff] }
 0x103   :  { %1041 = vmatmul.mubr.f32.vlgmr.msra.gmra.mrb[2].mxu0 %v8486_v3  ;;  %1112 = vmatmul.mubr.f32.vlgmr.msra.gmra.mrb[10].mxu1 %v8486_v3  ;;  %10719 = vst [vmem:[#allocation119_spill] sm:$0xff] %v8749_v58  ;;  %v8756_v3 = vpack.c.bf16 %v398_v44, %v394_v31  ;;  %10723 = vst [vmem:[#allocation122_spill] sm:$0xff] %v8761_v20  ;;  %v402_v44 = vld [vmem:[#allocation10 + $0x90] sm:$0xff]  ;;  %v408_v12 = vld [vmem:[#allocation10 + $0xc0] sm:$0xff] }
 0x104   :  { %5369 = vmatpush1.bf16.msra.mxu0 %v8737_v22  ;;  %5401 = vmatpush1.bf16.msra.mxu1 %v8741_v48  ;;  %v403_v48 = vld [vmem:[#allocation10 + $0x98] sm:$0xff]  ;;  %v406_v31 = vld [vmem:[#allocation10 + $0xb0] sm:$0xff] }
 0x105   :  { %1225 = vmatprep.mubr.f32.mxu0 %v10721_v60  ;;  %1296 = vmatprep.mubr.f32.mxu1 %v10721_v60  ;;  %10722 = vst [vmem:[#allocation121_spill] sm:$0xff] %v8756_v3  ;;  %v8763_v22 = vpack.c.bf16 %v407_v25, %v403_v48  ;;  %v8765_v60 = vpack.c.bf16 %v404_v57, %v400_v7  ;;  %v415_v48 = vld [vmem:[#allocation10 + $0xf8] sm:$0xff]  ;;  %v412_v25 = vld [vmem:[#allocation10 + $0xe0] sm:$0xff] }
 0x106   :  { %5371 = vmatprep.subr.bf16.mxu0 %v8747_v16  ;;  %5403 = vmatprep.subr.bf16.mxu1 %v8749_v58  ;;  %v8768_v58 = vpack.c.bf16 %v406_v31, %v402_v44  ;;  %v413_v16 = vld [vmem:[#allocation10 + $0xe8] sm:$0xff]  ;;  %v8777_v57 = vpack.c.bf16 %v412_v25, %v408_v12  ;;  %v410_v44 = vld [vmem:[#allocation10 + $0xd0] sm:$0xff] }
 0x107   :  { %10724 = vst [vmem:[#allocation123_spill] sm:$0xff] %v8763_v22  ;;  %10725 = vst [vmem:[#allocation124_spill] sm:$0xff] %v8765_v60  ;;  %v414_v31 = vld [vmem:[#allocation10 + $0xf0] sm:$0xff] }
 0x108   :  { %5373 = vmatpush1.bf16.msra.mxu0 %v8751_v37  ;;  %5405 = vmatpush1.bf16.msra.mxu1 %v8756_v3  ;;  %10726 = vst [vmem:[#allocation125_spill] sm:$0xff] %v8768_v58  ;;  %v409_v37 = vld [vmem:[#allocation10 + $0xc8] sm:$0xff]  ;;  %v411_v3 = vld [vmem:[#allocation10 + $0xd8] sm:$0xff]  ;;  %10729 = vst [vmem:[#allocation128_spill] sm:$0xff] %v8777_v57 }
 0x109   :  { %5375 = vmatprep.subr.bf16.mxu0 %v8761_v20  ;;  %5407 = vmatprep.subr.bf16.mxu1 %v8763_v22  ;;  %v8773_v13 = vpack.c.bf16 %v413_v16, %v409_v37  ;;  %v8775_v7 = vpack.c.bf16 %v415_v48, %v411_v3  ;;  %v8780_v22 = vpack.c.bf16 %v414_v31, %v410_v44  ;;  %v421_v20 = vld [vmem:[#allocation10 + $0x128] sm:$0xff]  ;;  %v423_v37 = vld [vmem:[#allocation10 + $0x138] sm:$0xff]  ;;  %v416_v3 = vld [vmem:[#allocation10 + $0x100] sm:$0xff] }
 0x10a   :  { %v420_v48 = vld [vmem:[#allocation10 + $0x120] sm:$0xff]  ;;  %v418_v44 = vld [vmem:[#allocation10 + $0x110] sm:$0xff] }
 0x10b   :  { %10727 = vst [vmem:[#allocation126_spill] sm:$0xff] %v8773_v13  ;;  %10728 = vst [vmem:[#allocation127_spill] sm:$0xff] %v8775_v7  ;;  %v8789_v25 = vpack.c.bf16 %v420_v48, %v416_v3  ;;  %v422_v31 = vld [vmem:[#allocation10 + $0x130] sm:$0xff] }
 0x10c   :  { %5377 = vmatpush1.bf16.msra.mxu0 %v8765_v60  ;;  %5409 = vmatpush1.bf16.msra.mxu1 %v8768_v58  ;;  %10730 = vst [vmem:[#allocation129_spill] sm:$0xff] %v8780_v22  ;;  %v417_v60 = vld [vmem:[#allocation10 + $0x108] sm:$0xff]  ;;  %v419_v58 = vld [vmem:[#allocation10 + $0x118] sm:$0xff] }
 0x10d   :  { %5379 = vmatprep.subr.bf16.mxu0 %v8773_v13  ;;  %5411 = vmatprep.subr.bf16.mxu1 %v8775_v7  ;;  %v8785_v16 = vpack.c.bf16 %v421_v20, %v417_v60  ;;  %v8787_v12 = vpack.c.bf16 %v423_v37, %v419_v58  ;;  %10733 = vst [vmem:[#allocation132_spill] sm:$0xff] %v8789_v25  ;;  %v429_v13 = vld [vmem:[#allocation10 + $0x168] sm:$0xff]  ;;  %v431_v58 = vld [vmem:[#allocation10 + $0x178] sm:$0xff]  ;;  %v424_v20 = vld [vmem:[#allocation10 + $0x140] sm:$0xff] }
 0x10e   :  { %v8792_v7 = vpack.c.bf16 %v422_v31, %v418_v44  ;;  %v428_v37 = vld [vmem:[#allocation10 + $0x160] sm:$0xff]  ;;  %v426_v44 = vld [vmem:[#allocation10 + $0x150] sm:$0xff] }
 0x10f   :  { %10731 = vst [vmem:[#allocation130_spill] sm:$0xff] %v8785_v16  ;;  %10732 = vst [vmem:[#allocation131_spill] sm:$0xff] %v8787_v12  ;;  %v8801_v48 = vpack.c.bf16 %v428_v37, %v424_v20  ;;  %v430_v31 = vld [vmem:[#allocation10 + $0x170] sm:$0xff] }
 0x110   :  { %5381 = vmatpush1.bf16.msra.mxu0 %v8777_v57  ;;  %5413 = vmatpush1.bf16.msra.mxu1 %v8780_v22  ;;  %10734 = vst [vmem:[#allocation133_spill] sm:$0xff] %v8792_v7  ;;  %v425_v57 = vld [vmem:[#allocation10 + $0x148] sm:$0xff]  ;;  %v427_v22 = vld [vmem:[#allocation10 + $0x158] sm:$0xff]  ;;  %v434_v20 = vld [vmem:[#allocation10 + $0x190] sm:$0xff] }
 0x111   :  { %5383 = vmatprep.subr.bf16.mxu0 %v8785_v16  ;;  %5415 = vmatprep.subr.bf16.mxu1 %v8787_v12  ;;  %v8797_v60 = vpack.c.bf16 %v429_v13, %v425_v57  ;;  %v8799_v3 = vpack.c.bf16 %v431_v58, %v427_v22  ;;  %10737 = vst [vmem:[#allocation136_spill] sm:$0xff] %v8801_v48  ;;  %v433_v16 = vld [vmem:[#allocation10 + $0x188] sm:$0xff]  ;;  %v432_v22 = vld [vmem:[#allocation10 + $0x180] sm:$0xff] }
 0x112   :  { %v8804_v12 = vpack.c.bf16 %v430_v31, %v426_v44  ;;  %v8807_v13 = vpack.c.bf16 %v437_v36, %v433_v16  ;;  %v436_v58 = vld [vmem:[#allocation10 + $0x1a0] sm:$0xff]  ;;  %v438_v44 = vld [vmem:[#allocation10 + $0x1b0] sm:$0xff]  ;;  %v441_v31 = vld [vmem:[#allocation10 + $0x1c8] sm:$0xff] }
 0x113   :  { %10735 = vst [vmem:[#allocation134_spill] sm:$0xff] %v8797_v60  ;;  %10736 = vst [vmem:[#allocation135_spill] sm:$0xff] %v8799_v3  ;;  %v8813_v37 = vpack.c.bf16 %v436_v58, %v432_v22  ;;  %v8817_v36 = vpack.c.bf16 %v438_v44, %v434_v20  ;;  %v443_v16 = vld [vmem:[#allocation10 + $0x1d8] sm:$0xff]  ;;  %v446_v22 = vld [vmem:[#allocation10 + $0x1f0] sm:$0xff]  ;;  %v10555_v58 = vsub.s32 0, %v8324_v4 }
 0x114   :  { %5385 = vmatpush1.bf16.msra.mxu0 %v8789_v25  ;;  %5417 = vmatpush1.bf16.msra.mxu1 %v8792_v7  ;;  %10738 = vst [vmem:[#allocation137_spill] sm:$0xff] %v8804_v12  ;;  %v435_v25 = vld [vmem:[#allocation10 + $0x198] sm:$0xff]  ;;  %10739 = vst [vmem:[#allocation138_spill] sm:$0xff] %v8807_v13 }
 0x115   :  { %5387 = vmatprep.subr.bf16.mxu0 %v8797_v60  ;;  %5419 = vmatprep.subr.bf16.mxu1 %v8799_v3  ;;  %v8809_v57 = vpack.c.bf16 %v439_v46, %v435_v25  ;;  %10741 = vst [vmem:[#allocation140_spill] sm:$0xff] %v8813_v37  ;;  %v445_v60 = vld [vmem:[#allocation10 + $0x1e8] sm:$0xff]  ;;  %10742 = vst [vmem:[#allocation141_spill] sm:$0xff] %v8817_v36  ;;  %v447_v25 = vld [vmem:[#allocation10 + $0x1f8] sm:$0xff] }
 0x116   :  { %v8819_v46 = vpack.c.bf16 %v445_v60, %v441_v31  ;;  %v440_v3 = vld [vmem:[#allocation10 + $0x1c0] sm:$0xff]  ;;  %v8821_v7 = vpack.c.bf16 %v447_v25, %v443_v16  ;;  %v10584_v16 = vsub.s32 2, %v8324_v4 }
 0x117   :  { %10740 = vst [vmem:[#allocation139_spill] sm:$0xff] %v8809_v57 }
 0x118   :  { %5389 = vmatpush1.bf16.msra.mxu0 %v8801_v48  ;;  %5421 = vmatpush1.bf16.msra.mxu1 %v8804_v12  ;;  %10743 = vst [vmem:[#allocation142_spill] sm:$0xff] %v8819_v46  ;;  %10744 = vst [vmem:[#allocation143_spill] sm:$0xff] %v8821_v7  ;;  %v444_v48 = vld [vmem:[#allocation10 + $0x1e0] sm:$0xff]  ;;  %v442_v12 = vld [vmem:[#allocation10 + $0x1d0] sm:$0xff] }
 0x119   :  { %5391 = vmatprep.subr.bf16.mxu0 %v8807_v13  ;;  %5423 = vmatprep.subr.bf16.mxu1 %v8809_v57  ;;  %v510_v13 = vld [vmem:[%s10326_s5] sm:$0xf]  ;;  %v10560_v57 = vsub.s32 1, %v8324_v4  ;;  %v8830_v60 = vpack.c.bf16 %v444_v48, %v440_v3  ;;  %v8832_v20 = vpack.c.bf16 %v446_v22, %v442_v12  ;;  %v10583_v22 = vsub.s32 3, %v8324_v4 }
 0x11a   :  { %v515_v44 = vrot.slane %v510_v13, %v10555_v58 }
 0x11b   :  { %10745 = vst [vmem:[#allocation144_spill] sm:$0xff] %v8830_v60  ;;  %10746 = vst [vmem:[#allocation145_spill] sm:$0xff] %v8832_v20  ;;  %v519_v31 = vrot.slane %v510_v13, %v10560_v57 }
 0x11c   :  { %5393 = vmatpush1.bf16.msra.mxu0 %v8813_v37  ;;  %5425 = vmatpush1.bf16.msra.mxu1 %v8817_v36 }
 0x11d   :  { %5395 = vmatprep.subr.bf16.mxu0 %v8819_v46  ;;  %5427 = vmatprep.subr.bf16.mxu1 %v8821_v7 }
 0x120   :  { %5397 = vmatpush1.bf16.msra.mxu0 %v8830_v60  ;;  %5429 = vmatpush1.bf16.msra.mxu1 %v8832_v20  ;;  %v523_v20 = vrot.slane %v510_v13, %v10584_v16 }
 0x121   :  { %5431 = vmatprep.subr.bf16.mxu0 %v8333_v50  ;;  %5495 = vmatprep.subr.bf16.mxu1 %v8343_v1  ;;  %v527_v1 = vrot.slane %v510_v13, %v10583_v22 }
 0x14e   :  { %v645_v12 = vpop.f32.mrb[0].mxu1 }
 0x14f   :  { %v646_v3 = vadd.f32 %v645_v12, %v515_v44  ;;  %v647_v48 = vpop.f32.mrb[1].mxu1 }
 0x150   :  { %v648_v25 = vadd.f32 %v647_v48, %v519_v31 }
 0x152   :  { %v741_v58 = vcombine.low %v646_v3, %v648_v25  ;;  %v742_v7 = vcombine.high %v646_v3, %v648_v25  ;;  %v651_v46 = vpop.f32.mrb[2].mxu1 }
 0x153   :  { %v652_v57 = vadd.f32 %v651_v46, %v515_v44  ;;  %v653_v36 = vpop.f32.mrb[3].mxu1 }
 0x154   :  { %v654_v60 = vadd.f32 %v653_v36, %v519_v31  ;;  %v8851_v3 = vrot.slane %v741_v58, %v8327_v18  ;;  %v8854_v25 = vrot.slane %v742_v7, %v8327_v18 }
 0x156   :  { %v777_v50 = vcombine.low %v652_v57, %v654_v60  ;;  %v778_v12 = vcombine.high %v652_v57, %v654_v60  ;;  %v722_v37 = vpop.f32.mrb[4].mxu1  ;;  %10747 = vst [vmem:[#allocation146_spill] sm:$0xff] %v8854_v25  ;;  %v10771_v25 = vld [vmem:[#allocation42_spill] sm:$0xff] }
 0x157   :  { %v723_v55 = vadd.f32 %v722_v37, %v523_v20  ;;  %v724_v40 = vpop.f32.mrb[5].mxu1 }
 0x158   :  { %v725_v48 = vadd.f32 %v724_v40, %v527_v1 }
 0x15a   :  { %v743_v49 = vcombine.low %v723_v55, %v725_v48  ;;  %v744_v0 = vcombine.high %v723_v55, %v725_v48  ;;  %v728_v35 = vpop.f32.mrb[6].mxu1 }
 0x15b   :  { %v729_v46 = vadd.f32 %v728_v35, %v523_v20  ;;  %v730_v44 = vpop.f32.mrb[7].mxu1 }
 0x15c   :  { %v8857_v36 = vrot.slane %v743_v49, %v8327_v18  ;;  %v8860_v13 = vrot.slane %v744_v0, %v8327_v18  ;;  %v731_v57 = vadd.f32 %v730_v44, %v527_v1  ;;  %v8871_v49 = vrot.slane %v777_v50, %v8327_v18 }
 0x15d   :  { %v8874_v0 = vrot.slane %v778_v12, %v8327_v18 }
 0x15e   :  { %10748 = vst [vmem:[#allocation147_spill] sm:$0xff] %v8860_v13  ;;  %v773_v40 = vcombine.low %v8851_v3, %v8857_v36  ;;  %v779_v37 = vcombine.low %v729_v46, %v731_v57  ;;  %v780_v58 = vcombine.high %v729_v46, %v731_v57  ;;  %10749 = vst [vmem:[#allocation148_spill] sm:$0xff] %v8871_v49  ;;  %v10769_v49 = vld [vmem:[#allocation39_spill] sm:$0xff]  ;;  %v10770_v13 = vld [vmem:[#allocation45_spill] sm:$0xff] }
 0x15f   :  { %10750 = vst [vmem:[#allocation149_spill] sm:$0xff] %v8874_v0 }
 0x160   :  { %v8877_v1 = vrot.slane %v779_v37, %v8327_v18  ;;  %v8880_v60 = vrot.slane %v780_v58, %v8327_v18 }
 0x162   :  { %10751 = vst [vmem:[#allocation150_spill] sm:$0xff] %v8877_v1  ;;  %10752 = vst [vmem:[#allocation151_spill] sm:$0xff] %v8880_v60  ;;  %v8892_v60 = vld [vmem:[#allocation16] sm:$0xf]  ;;  %v10768_v1 = vld [vmem:[#allocation44_spill] sm:$0xff] }
 0x18d   :  { %v900_v12 = vpop.f32.mrb[0].mxu0 }
 0x18e   :  { %v902_v46 = vpop.f32.mrb[1].mxu0 }
 0x18f   :  { %v1122_v44 = vcombine.low %v900_v12, %v902_v46 }
 0x191   :  { %v1130_v58 = vrot.slane %v1122_v44, %v8327_v18 }
 0x196   :  { %v971_v57 = vpop.f32.mrb[8].mxu1 }
 0x197   :  { %v973_v37 = vpop.f32.mrb[9].mxu1 }
 0x198   :  { %v1123_v7 = vcombine.low %v971_v57, %v973_v37  ;;  %v10761_v37 = vld [vmem:[#allocation36_spill] sm:$0xff] }
 0x19a   :  { %v1137_v35 = vrot.slane %v1123_v7, %v8327_v18  ;;  %v10755_v7 = vld [vmem:[#allocation29_spill] sm:$0xff] }
 0x19c   :  { %v1138_v20 = vcombine.low %v1130_v58, %v1137_v35  ;;  %v10762_v58 = vld [vmem:[#allocation31_spill] sm:$0xff] }
 0x19e   :  { %v1140_v55 = vadd.f32 %v1138_v20, %v773_v40  ;;  %v10757_v20 = vld [vmem:[#allocation32_spill] sm:$0xff] }
 0x1a0   :  { %v5006_v22 = vmul.f32 -1.442695, %v1140_v55  ;;  %v1148_v48 = vrot.slane %v1140_v55, 6  ;;  %v10754_v55 = vld [vmem:[#allocation25_spill] sm:$0xff] }
 0x1a2   :  { %7752 = vpow2.f32 %v5006_v22 }
 0x1ac   :  { %v7753_v31 = vpop.eup %7752 }
 0x1ad   :  { %v1144_v16 = vadd.f32 1.0, %v7753_v31  ;;  %v10758_v31 = vld [vmem:[#allocation27_spill] sm:$0xff] }
 0x1af   :  { %7754 = vrcp.f32 %v1144_v16  ;;  %v10753_v16 = vld [vmem:[#allocation28_spill] sm:$0xff] }
 0x1b0   :  { %7756 = vtanh.f32 %v1148_v48  ;;  %v10759_v48 = vld [vmem:[#allocation33_spill] sm:$0xff] }
 0x1b9   :  { %v7755_v50 = vpop.eup %7754 }
 0x1ba   :  { %v1152_v12 = vrot.slane %v7755_v50, 2  ;;  %v7757_v46 = vpop.eup %7756  ;;  %v1158_v40 = vrot.slane %v7755_v50, 4 }
 0x1bb   :  { %v1155_v44 = vmul.f32 %v7757_v46, %v7755_v50  ;;  %v10760_v50 = vld [vmem:[#allocation30_spill] sm:$0xff]  ;;  %v10764_v46 = vld [vmem:[#allocation40_spill] sm:$0xff] }
 0x1bc   :  { %v1154_v0 = vmul.f32 %v1152_v12, %v8892_v60  ;;  %v10763_v12 = vld [vmem:[#allocation34_spill] sm:$0xff] }
 0x1be   :  { %v8895_v57 = vadd.f32 %v1155_v44, %v1154_v0  ;;  %v10756_v0 = vld [vmem:[#allocation26_spill] sm:$0xff]  ;;  %v10765_v44 = vld [vmem:[#allocation35_spill] sm:$0xff] }
 0x1c0   :  { %7758 = vtanh.f32 %v8895_v57 }
 0x1ca   :  { %v7759_v35 = vpop.eup %7758 }
 0x1cb   :  { %v8898_v22 = vmul.f32 %v7759_v35, %v1158_v40  ;;  %v10766_v40 = vld [vmem:[#allocation41_spill] sm:$0xff]  ;;  %v10767_v35 = vld [vmem:[#allocation38_spill] sm:$0xff] }
 0x1cd   :  { %1226 = vmatmul.mubr.f32.vlgmr.msra.gmra.mrb[2].mxu0 %v8898_v22  ;;  %1297 = vmatmul.mubr.f32.vlgmr.msra.gmra.mrb[10].mxu1 %v8898_v22 }
 0x1ce   :  { %5433 = vmatpush1.bf16.msra.mxu0 %v8335_v52  ;;  %5497 = vmatpush1.bf16.msra.mxu1 %v8352_v11 }
 0x1cf   :  { %5435 = vmatprep.subr.bf16.mxu0 %v8340_v63  ;;  %5499 = vmatprep.subr.bf16.mxu1 %v8356_v14 }
 0x1d2   :  { %5437 = vmatpush1.bf16.msra.mxu0 %v8345_v2  ;;  %5501 = vmatpush1.bf16.msra.mxu1 %v8366_v26 }
 0x1d3   :  { %5439 = vmatprep.subr.bf16.mxu0 %v8348_v8  ;;  %5503 = vmatprep.subr.bf16.mxu1 %v8370_v27 }
 0x1d6   :  { %5441 = vmatpush1.bf16.msra.mxu0 %v8358_v17  ;;  %5505 = vmatpush1.bf16.msra.mxu1 %v8379_v38 }
 0x1d7   :  { %5443 = vmatprep.subr.bf16.mxu0 %v8361_v21  ;;  %5507 = vmatprep.subr.bf16.mxu1 %v8383_v39 }
 0x1da   :  { %5445 = vmatpush1.bf16.msra.mxu0 %v8372_v30  ;;  %5509 = vmatpush1.bf16.msra.mxu1 %v8391_v51 }
 0x1db   :  { %5447 = vmatprep.subr.bf16.mxu0 %v8375_v33  ;;  %5511 = vmatprep.subr.bf16.mxu1 %v8395_v53 }
 0x1de   :  { %5449 = vmatpush1.bf16.msra.mxu0 %v8385_v42  ;;  %5513 = vmatpush1.bf16.msra.mxu1 %v8403_v5 }
 0x1df   :  { %5451 = vmatprep.subr.bf16.mxu0 %v8388_v45  ;;  %5515 = vmatprep.subr.bf16.mxu1 %v8407_v6 }
 0x1e2   :  { %5453 = vmatpush1.bf16.msra.mxu0 %v8397_v56  ;;  %5517 = vmatpush1.bf16.msra.mxu1 %v8415_v23 }
 0x1e3   :  { %5455 = vmatprep.subr.bf16.mxu0 %v8400_v59  ;;  %5519 = vmatprep.subr.bf16.mxu1 %v8419_v24 }
 0x1e6   :  { %5457 = vmatpush1.bf16.msra.mxu0 %v8409_v10  ;;  %5521 = vmatpush1.bf16.msra.mxu1 %v8427_v41 }
 0x1e7   :  { %5459 = vmatprep.subr.bf16.mxu0 %v8412_v15  ;;  %5523 = vmatprep.subr.bf16.mxu1 %v8431_v43 }
 0x1ea   :  { %5461 = vmatpush1.bf16.msra.mxu0 %v8421_v29  ;;  %5525 = vmatpush1.bf16.msra.mxu1 %v8439_v61 }
 0x1eb   :  { %5463 = vmatprep.subr.bf16.mxu0 %v8424_v34  ;;  %5527 = vmatprep.subr.bf16.mxu1 %v8443_v62 }
 0x1ee   :  { %5465 = vmatpush1.bf16.msra.mxu0 %v8433_v47  ;;  %5529 = vmatpush1.bf16.msra.mxu1 %v8451_v28 }
 0x1ef   :  { %5467 = vmatprep.subr.bf16.mxu0 %v8436_v54  ;;  %5531 = vmatprep.subr.bf16.mxu1 %v8455_v32 }
 0x1f2   :  { %5469 = vmatpush1.bf16.msra.mxu0 %v8445_v9  ;;  %5533 = vmatpush1.bf16.msra.mxu1 %v10753_v16 }
 0x1f3   :  { %5471 = vmatprep.subr.bf16.mxu0 %v10754_v55  ;;  %5535 = vmatprep.subr.bf16.mxu1 %v10755_v7 }
 0x1f6   :  { %5473 = vmatpush1.bf16.msra.mxu0 %v10756_v0  ;;  %5537 = vmatpush1.bf16.msra.mxu1 %v10757_v20 }
 0x1f7   :  { %5475 = vmatprep.subr.bf16.mxu0 %v10758_v31  ;;  %5539 = vmatprep.subr.bf16.mxu1 %v10759_v48  ;;  %v10783_v48 = vsub.s32 2, %v8324_v4 }
 0x1fa   :  { %5477 = vmatpush1.bf16.msra.mxu0 %v10760_v50  ;;  %5541 = vmatpush1.bf16.msra.mxu1 %v10761_v37 }
 0x1fb   :  { %5479 = vmatprep.subr.bf16.mxu0 %v10762_v58  ;;  %5543 = vmatprep.subr.bf16.mxu1 %v8495_v19  ;;  %v10772_v58 = vld [vmem:[#allocation47_spill] sm:$0xff] }
 0x1fc   :  { %v10773_v19 = vld [vmem:[#allocation43_spill] sm:$0xff] }
 0x1fe   :  { %5481 = vmatpush1.bf16.msra.mxu0 %v10763_v12  ;;  %5545 = vmatpush1.bf16.msra.mxu1 %v10764_v46  ;;  %v10774_v12 = vld [vmem:[#allocation48_spill] sm:$0xff]  ;;  %v10775_v46 = vld [vmem:[#allocation46_spill] sm:$0xff] }
 0x1ff   :  { %5483 = vmatprep.subr.bf16.mxu0 %v10765_v44  ;;  %5547 = vmatprep.subr.bf16.mxu1 %v10766_v40  ;;  %v10776_v44 = vld [vmem:[#allocation49_spill] sm:$0xff]  ;;  %v10777_v40 = vld [vmem:[#allocation50_spill] sm:$0xff] }
 0x202   :  { %5485 = vmatpush1.bf16.msra.mxu0 %v10767_v35  ;;  %5549 = vmatpush1.bf16.msra.mxu1 %v10768_v1  ;;  %v10778_v35 = vld [vmem:[#allocation51_spill] sm:$0xff] }
 0x203   :  { %5487 = vmatprep.subr.bf16.mxu0 %v10769_v49  ;;  %5551 = vmatprep.subr.bf16.mxu1 %v10770_v13  ;;  %v464_v13 = vld [vmem:[%s10328_s7] sm:$0xf]  ;;  %s8169_s7 = smov [#allocation14]  }
 0x204   :  { %v8981_v31 = vrot.slane %v464_v13, %v10783_v48  ;;  %v1333_v48 = vrot.slane %v8892_v60, %v8327_v18  ;;  %v10787_v60 = vld [vmem:[#allocation52_spill] sm:$0xff]  ;;  %s4972_s23 = sshll.u32 %s8169_s7, 4  ;;  %s4973_s23 = int_to_ptr.vmem [resolvable:$true] %s4972_s23 }
 0x205   :  { %s8076_s25 = scalar_lea.vmem %s4973_s23, 64  ;;  %p8081_p7 = scmp.lt.s32.totalorder %s4973_s23, %s4973_s23 }
 0x206   :  { %5489 = vmatpush1.bf16.msra.mxu0 %v10771_v25  ;;  %5553 = vmatpush1.bf16.msra.mxu1 %v10772_v58  ;;  %v10779_v25 = vsub.s32 0, %v8324_v4  ;;  %p8077_p6 = scmp.ne.s32.totalorder %s4973_s23, %s8076_s25  ;;  %p8082_p8 = scmp.lt.s32.totalorder %s8076_s25, %s8076_s25 }
 0x207   :  { %5491 = vmatprep.subr.bf16.mxu0 %v10773_v19  ;;  %5555 = vmatprep.subr.bf16.mxu1 %v10774_v12  ;;  %v10781_v19 = vsub.s32 1, %v8324_v4 }
 0x208   :  { %v8971_v49 = vrot.slane %v464_v13, %v10779_v25  ;;  %v10784_v25 = vsub.s32 3, %v8324_v4  ;;  %p8083_p9 = por %p8082_p8, %p8081_p7 }
 0x209   :  { %v8975_v58 = vrot.slane %v464_v13, %v10781_v19 }
 0x20a   :  { %5493 = vmatpush1.bf16.msra.mxu0 %v10775_v46  ;;  %5557 = vmatpush1.bf16.msra.mxu1 %v10776_v44  ;;  %10780 = vst [vmem:[#allocation28_spill] sm:$0xff] %v8971_v49  ;;  %v8985_v19 = vrot.slane %v464_v13, %v10784_v25  ;;  %v1334_v13 = vcombine.high %v1333_v48, %v1333_v48  ;;  %v10791_v48 = vld [vmem:[#allocation56_spill] sm:$0xff]  ;;  %p8084_p10 = pnand %p8083_p9, %p8077_p6 }
 0x20b   :  { %5559 = vmatprep.subr.bf16.mxu0 %v10777_v40  ;;  %5623 = vmatprep.subr.bf16.mxu1 %v10778_v35  ;;  %10782 = vst [vmem:[#allocation25_spill] sm:$0xff] %v8975_v58 }
 0x20c   :  { %10785 = vst [vmem:[#allocation152_spill] sm:$0xff] %v8985_v19 }
 0x2a0   :  { %v1227_v12 = vpop.f32.mrb[2].mxu0  ;;  %v1298_v46 = vpop.f32.mrb[10].mxu1 }
 0x2a1   :  { %v1303_v44 = vadd.f32 %v1227_v12, %v8971_v49  ;;  %v1229_v1 = vpop.f32.mrb[3].mxu0  ;;  %v1300_v40 = vpop.f32.mrb[11].mxu1  ;;  %v1305_v20 = vadd.f32 %v1298_v46, %v8981_v31 }
 0x2a2   :  { %v1304_v35 = vadd.f32 %v1229_v1, %v8975_v58  ;;  %v1306_v12 = vadd.f32 %v1300_v40, %v8985_v19 }
 0x2a3   :  { %v5007_v37 = vmul.f32 -1.442695, %v1303_v44  ;;  %v5009_v49 = vmul.f32 -1.442695, %v1305_v20 }
 0x2a4   :  { %v5008_v50 = vmul.f32 -1.442695, %v1304_v35 }
 0x2a5   :  { %7760 = vpow2.f32 %v5007_v37 }
 0x2a6   :  { %7762 = vpow2.f32 %v5008_v50 }
 0x2a7   :  { %7764 = vtanh.f32 %v1306_v12  ;;  %v10788_v12 = vld [vmem:[#allocation53_spill] sm:$0xff] }
 0x2a8   :  { %7766 = vpow2.f32 %v5009_v49 }
 0x2af   :  { %v7761_v0 = vpop.eup %7760 }
 0x2b0   :  { %v1316_v7 = vadd.f32 1.0, %v7761_v0  ;;  %v7763_v1 = vpop.eup %7762 }
 0x2b1   :  { %v1317_v44 = vadd.f32 1.0, %v7763_v1  ;;  %v7765_v50 = vpop.eup %7764  ;;  %v10789_v1 = vld [vmem:[#allocation54_spill] sm:$0xff] }
 0x2b2   :  { %7768 = vrcp.f32 %v1316_v7  ;;  %v7767_v4 = vpop.eup %7766 }
 0x2b3   :  { %7770 = vrcp.f32 %v1317_v44  ;;  %v1318_v25 = vadd.f32 1.0, %v7767_v4  ;;  %v10790_v44 = vld [vmem:[#allocation55_spill] sm:$0xff]  ;;  %v10793_v4 = vld [vmem:[#allocation58_spill] sm:$0xff] }
 0x2b5   :  { %7772 = vrcp.f32 %v1318_v25  ;;  %v10798_v25 = vld [vmem:[#allocation63_spill] sm:$0xff] }
 0x2bc   :  { %v7769_v37 = vpop.eup %7768 }
 0x2bd   :  { %v1337_v35 = vmul.f32 %v7769_v37, %v7765_v50  ;;  %v7771_v46 = vpop.eup %7770  ;;  %v10792_v50 = vld [vmem:[#allocation57_spill] sm:$0xff]  ;;  %v10795_v37 = vld [vmem:[#allocation60_spill] sm:$0xff] }
 0x2be   :  { %v1336_v40 = vmul.f32 %v7771_v46, %v1334_v13  ;;  %v10794_v13 = vld [vmem:[#allocation59_spill] sm:$0xff]  ;;  %v10797_v46 = vld [vmem:[#allocation62_spill] sm:$0xff] }
 0x2bf   :  { %v7773_v49 = vpop.eup %7772 }
 0x2c0   :  { %v8991_v20 = vadd.f32 %v1337_v35, %v1336_v40  ;;  %v10796_v35 = vld [vmem:[#allocation61_spill] sm:$0xff]  ;;  %v10799_v40 = vld [vmem:[#allocation64_spill] sm:$0xff] }
 0x2c2   :  { %7774 = vtanh.f32 %v8991_v20 }
 0x2cc   :  { %v7775_v7 = vpop.eup %7774 }
 0x2cd   :  { %v8994_v0 = vmul.f32 %v7775_v7, %v7773_v49  ;;  %v10800_v49 = vld [vmem:[#allocation65_spill] sm:$0xff]  ;;  %v10801_v7 = vld [vmem:[#allocation66_spill] sm:$0xff] }
 0x2cf   :  { %10786 = vst [vmem:[#allocation153_spill] sm:$0xff] %v8994_v0  ;;  %1405 = vmatprep.mubr.f32.mxu0 %v8994_v0  ;;  %1476 = vmatprep.mubr.f32.mxu1 %v8994_v0 }
 0x2d0   :  { %1406 = vmatmul.mubr.f32.vlgmr.msra.gmra.mrb[4].mxu0 %v8898_v22  ;;  %1477 = vmatmul.mubr.f32.vlgmr.msra.gmra.mrb[12].mxu1 %v8898_v22 }
 0x2d1   :  { %5561 = vmatpush1.bf16.msra.mxu0 %v10787_v60  ;;  %5625 = vmatpush1.bf16.msra.mxu1 %v10788_v12 }
 0x2d2   :  { %1547 = vmatprep.mubr.f32.mxu0 %v8994_v0  ;;  %1618 = vmatprep.mubr.f32.mxu1 %v8994_v0  ;;  %v10802_v0 = vld [vmem:[#allocation67_spill] sm:$0xff] }
 0x2d3   :  { %5563 = vmatprep.subr.bf16.mxu0 %v10789_v1  ;;  %5627 = vmatprep.subr.bf16.mxu1 %v10790_v44 }
 0x2d5   :  { %5565 = vmatpush1.bf16.msra.mxu0 %v10791_v48  ;;  %5629 = vmatpush1.bf16.msra.mxu1 %v10792_v50  ;;  %v10803_v50 = vld [vmem:[#allocation68_spill] sm:$0xff] }
 0x2d6   :  { %5567 = vmatprep.subr.bf16.mxu0 %v10793_v4  ;;  %5631 = vmatprep.subr.bf16.mxu1 %v10794_v13  ;;  %v10804_v4 = vld [vmem:[#allocation69_spill] sm:$0xff]  ;;  %v10805_v13 = vld [vmem:[#allocation70_spill] sm:$0xff] }
 0x2d9   :  { %5569 = vmatpush1.bf16.msra.mxu0 %v10795_v37  ;;  %5633 = vmatpush1.bf16.msra.mxu1 %v10796_v35  ;;  %v10806_v37 = vld [vmem:[#allocation71_spill] sm:$0xff]  ;;  %v10807_v35 = vld [vmem:[#allocation72_spill] sm:$0xff] }
 0x2da   :  { %5571 = vmatprep.subr.bf16.mxu0 %v10797_v46  ;;  %5635 = vmatprep.subr.bf16.mxu1 %v10798_v25  ;;  %v10808_v46 = vld [vmem:[#allocation73_spill] sm:$0xff]  ;;  %v10809_v25 = vld [vmem:[#allocation74_spill] sm:$0xff] }
 0x2dd   :  { %5573 = vmatpush1.bf16.msra.mxu0 %v10799_v40  ;;  %5637 = vmatpush1.bf16.msra.mxu1 %v10800_v49  ;;  %v10810_v40 = vld [vmem:[#allocation75_spill] sm:$0xff]  ;;  %v10811_v49 = vld [vmem:[#allocation76_spill] sm:$0xff] }
 0x2de   :  { %5575 = vmatprep.subr.bf16.mxu0 %v10801_v7  ;;  %5639 = vmatprep.subr.bf16.mxu1 %v10802_v0  ;;  %v10812_v7 = vld [vmem:[#allocation77_spill] sm:$0xff]  ;;  %v10813_v0 = vld [vmem:[#allocation78_spill] sm:$0xff] }
 0x2e1   :  { %5577 = vmatpush1.bf16.msra.mxu0 %v10803_v50  ;;  %5641 = vmatpush1.bf16.msra.mxu1 %v10804_v4  ;;  %v10814_v50 = vld [vmem:[#allocation79_spill] sm:$0xff]  ;;  %v10815_v4 = vld [vmem:[#allocation80_spill] sm:$0xff] }
 0x2e2   :  { %5579 = vmatprep.subr.bf16.mxu0 %v10805_v13  ;;  %5643 = vmatprep.subr.bf16.mxu1 %v10806_v37  ;;  %v10816_v13 = vld [vmem:[#allocation81_spill] sm:$0xff]  ;;  %v10817_v37 = vld [vmem:[#allocation82_spill] sm:$0xff] }
 0x2e5   :  { %5581 = vmatpush1.bf16.msra.mxu0 %v10807_v35  ;;  %5645 = vmatpush1.bf16.msra.mxu1 %v10808_v46  ;;  %v10818_v35 = vld [vmem:[#allocation83_spill] sm:$0xff]  ;;  %v10819_v46 = vld [vmem:[#allocation84_spill] sm:$0xff] }
 0x2e6   :  { %5583 = vmatprep.subr.bf16.mxu0 %v10809_v25  ;;  %5647 = vmatprep.subr.bf16.mxu1 %v10810_v40  ;;  %v10820_v25 = vld [vmem:[#allocation85_spill] sm:$0xff]  ;;  %v10821_v40 = vld [vmem:[#allocation86_spill] sm:$0xff] }
 0x2e9   :  { %5585 = vmatpush1.bf16.msra.mxu0 %v10811_v49  ;;  %5649 = vmatpush1.bf16.msra.mxu1 %v10812_v7  ;;  %v10822_v49 = vld [vmem:[#allocation87_spill] sm:$0xff]  ;;  %v10823_v7 = vld [vmem:[#allocation88_spill] sm:$0xff] }
 0x2ea   :  { %5587 = vmatprep.subr.bf16.mxu0 %v10813_v0  ;;  %5651 = vmatprep.subr.bf16.mxu1 %v10814_v50  ;;  %v10824_v0 = vld [vmem:[#allocation89_spill] sm:$0xff]  ;;  %v10825_v50 = vld [vmem:[#allocation90_spill] sm:$0xff] }
 0x2ed   :  { %5589 = vmatpush1.bf16.msra.mxu0 %v10815_v4  ;;  %5653 = vmatpush1.bf16.msra.mxu1 %v10816_v13  ;;  %v10826_v4 = vld [vmem:[#allocation91_spill] sm:$0xff]  ;;  %v10827_v13 = vld [vmem:[#allocation92_spill] sm:$0xff] }
 0x2ee   :  { %5591 = vmatprep.subr.bf16.mxu0 %v10817_v37  ;;  %5655 = vmatprep.subr.bf16.mxu1 %v10818_v35  ;;  %v10828_v37 = vld [vmem:[#allocation93_spill] sm:$0xff]  ;;  %v10829_v35 = vld [vmem:[#allocation94_spill] sm:$0xff] }
 0x2f1   :  { %5593 = vmatpush1.bf16.msra.mxu0 %v10819_v46  ;;  %5657 = vmatpush1.bf16.msra.mxu1 %v10820_v25  ;;  %v10830_v46 = vld [vmem:[#allocation95_spill] sm:$0xff]  ;;  %v10831_v25 = vld [vmem:[#allocation96_spill] sm:$0xff] }
 0x2f2   :  { %5595 = vmatprep.subr.bf16.mxu0 %v10821_v40  ;;  %5659 = vmatprep.subr.bf16.mxu1 %v10822_v49  ;;  %v10832_v40 = vld [vmem:[#allocation97_spill] sm:$0xff]  ;;  %v10833_v49 = vld [vmem:[#allocation98_spill] sm:$0xff] }
 0x2f5   :  { %5597 = vmatpush1.bf16.msra.mxu0 %v10823_v7  ;;  %5661 = vmatpush1.bf16.msra.mxu1 %v10824_v0  ;;  %v10834_v7 = vld [vmem:[#allocation99_spill] sm:$0xff]  ;;  %v10835_v0 = vld [vmem:[#allocation100_spill] sm:$0xff] }
 0x2f6   :  { %5599 = vmatprep.subr.bf16.mxu0 %v10825_v50  ;;  %5663 = vmatprep.subr.bf16.mxu1 %v10826_v4  ;;  %v10836_v50 = vld [vmem:[#allocation101_spill] sm:$0xff]  ;;  %v10837_v4 = vld [vmem:[#allocation102_spill] sm:$0xff] }
 0x2f9   :  { %5601 = vmatpush1.bf16.msra.mxu0 %v10827_v13  ;;  %5665 = vmatpush1.bf16.msra.mxu1 %v10828_v37  ;;  %v10838_v13 = vld [vmem:[#allocation103_spill] sm:$0xff]  ;;  %v10839_v37 = vld [vmem:[#allocation104_spill] sm:$0xff] }
 0x2fa   :  { %5603 = vmatprep.subr.bf16.mxu0 %v10829_v35  ;;  %5667 = vmatprep.subr.bf16.mxu1 %v10830_v46  ;;  %v10840_v35 = vld [vmem:[#allocation105_spill] sm:$0xff]  ;;  %v10841_v46 = vld [vmem:[#allocation106_spill] sm:$0xff] }
 0x2fd   :  { %5605 = vmatpush1.bf16.msra.mxu0 %v10831_v25  ;;  %5669 = vmatpush1.bf16.msra.mxu1 %v10832_v40  ;;  %v10842_v25 = vld [vmem:[#allocation107_spill] sm:$0xff]  ;;  %v10843_v40 = vld [vmem:[#allocation108_spill] sm:$0xff] }
 0x2fe   :  { %5607 = vmatprep.subr.bf16.mxu0 %v10833_v49  ;;  %5671 = vmatprep.subr.bf16.mxu1 %v10834_v7  ;;  %v10844_v49 = vld [vmem:[#allocation109_spill] sm:$0xff]  ;;  %v10845_v7 = vld [vmem:[#allocation110_spill] sm:$0xff] }
 0x301   :  { %5609 = vmatpush1.bf16.msra.mxu0 %v10835_v0  ;;  %5673 = vmatpush1.bf16.msra.mxu1 %v10836_v50  ;;  %v10846_v0 = vld [vmem:[#allocation111_spill] sm:$0xff]  ;;  %v10847_v50 = vld [vmem:[#allocation112_spill] sm:$0xff] }
 0x302   :  { %5611 = vmatprep.subr.bf16.mxu0 %v10837_v4  ;;  %5675 = vmatprep.subr.bf16.mxu1 %v10838_v13  ;;  %v10848_v4 = vld [vmem:[#allocation113_spill] sm:$0xff]  ;;  %v10849_v13 = vld [vmem:[#allocation114_spill] sm:$0xff] }
 0x305   :  { %5613 = vmatpush1.bf16.msra.mxu0 %v10839_v37  ;;  %5677 = vmatpush1.bf16.msra.mxu1 %v10840_v35  ;;  %v10850_v37 = vld [vmem:[#allocation115_spill] sm:$0xff] }
 0x306   :  { %5615 = vmatprep.subr.bf16.mxu0 %v10841_v46  ;;  %5679 = vmatprep.subr.bf16.mxu1 %v10842_v25  ;;  %v10851_v25 = vld [vmem:[#allocation116_spill] sm:$0xff]  ;;  %v10865_v46 = vld [vmem:[#allocation129_spill] sm:$0xff] }
 0x309   :  { %5617 = vmatpush1.bf16.msra.mxu0 %v10843_v40  ;;  %5681 = vmatpush1.bf16.msra.mxu1 %v10844_v49  ;;  %v10852_v40 = vld [vmem:[#allocation117_spill] sm:$0xff]  ;;  %v10853_v49 = vld [vmem:[#allocation118_spill] sm:$0xff] }
 0x30a   :  { %5619 = vmatprep.subr.bf16.mxu0 %v10845_v7  ;;  %5683 = vmatprep.subr.bf16.mxu1 %v10846_v0  ;;  %v10854_v7 = vld [vmem:[#allocation119_spill] sm:$0xff]  ;;  %v10855_v0 = vmov 0.0  }
 0x30d   :  { %5621 = vmatpush1.bf16.msra.mxu0 %v10847_v50  ;;  %5685 = vmatpush1.bf16.msra.mxu1 %v10848_v4  ;;  %v10856_v4 = vld [vmem:[#allocation120_spill] sm:$0xff]  ;;  %v10859_v50 = vld [vmem:[#allocation123_spill] sm:$0xff] }
 0x30e   :  { %5687 = vmatprep.subr.bf16.mxu0 %v10849_v13  ;;  %5719 = vmatprep.subr.bf16.mxu1 %v10850_v37  ;;  %v10857_v13 = vld [vmem:[#allocation121_spill] sm:$0xff]  ;;  %v10858_v37 = vld [vmem:[#allocation122_spill] sm:$0xff] }
 0x310   :  { %1548 = vmatmul.mubr.f32.vlgmr.msra.gmra.mrb[6].mxu0 %v8898_v22  ;;  %1619 = vmatmul.mubr.f32.vlgmr.msra.gmra.mrb[14].mxu1 %v8898_v22  ;;  %v10860_v22 = vld [vmem:[#allocation124_spill] sm:$0xff] }
 0x311   :  { %5689 = vmatpush1.bf16.msra.mxu0 %v10851_v25  ;;  %5721 = vmatpush1.bf16.msra.mxu1 %v10852_v40  ;;  %v10861_v25 = vld [vmem:[#allocation125_spill] sm:$0xff]  ;;  %v10862_v40 = vld [vmem:[#allocation126_spill] sm:$0xff] }
 0x312   :  { %5691 = vmatprep.subr.bf16.mxu0 %v10853_v49  ;;  %5723 = vmatprep.subr.bf16.mxu1 %v10854_v7  ;;  %v10863_v49 = vld [vmem:[#allocation127_spill] sm:$0xff]  ;;  %v10864_v7 = vld [vmem:[#allocation128_spill] sm:$0xff] }
 0x313   :  { %1732 = vmatprep.mubr.f32.mxu0 %v10855_v0  ;;  %1803 = vmatprep.mubr.f32.mxu1 %v10855_v0  ;;  %v10866_v0 = vld [vmem:[#allocation130_spill] sm:$0xff] }
 0x315   :  { %5693 = vmatpush1.bf16.msra.mxu0 %v10856_v4  ;;  %5725 = vmatpush1.bf16.msra.mxu1 %v10857_v13  ;;  %v10867_v4 = vld [vmem:[#allocation131_spill] sm:$0xff]  ;;  %v10868_v13 = vld [vmem:[#allocation132_spill] sm:$0xff] }
 0x316   :  { %5695 = vmatprep.subr.bf16.mxu0 %v10858_v37  ;;  %5727 = vmatprep.subr.bf16.mxu1 %v10859_v50  ;;  %v10869_v37 = vld [vmem:[#allocation133_spill] sm:$0xff]  ;;  %v10870_v50 = vld [vmem:[#allocation134_spill] sm:$0xff] }
 0x319   :  { %5697 = vmatpush1.bf16.msra.mxu0 %v10860_v22  ;;  %5729 = vmatpush1.bf16.msra.mxu1 %v10861_v25  ;;  %v10871_v22 = vld [vmem:[#allocation135_spill] sm:$0xff]  ;;  %v10872_v25 = vld [vmem:[#allocation136_spill] sm:$0xff] }
 0x31a   :  { %5699 = vmatprep.subr.bf16.mxu0 %v10862_v40  ;;  %5731 = vmatprep.subr.bf16.mxu1 %v10863_v49  ;;  %v10873_v40 = vld [vmem:[#allocation137_spill] sm:$0xff]  ;;  %v10874_v49 = vld [vmem:[#allocation138_spill] sm:$0xff] }
 0x31d   :  { %5701 = vmatpush1.bf16.msra.mxu0 %v10864_v7  ;;  %5733 = vmatpush1.bf16.msra.mxu1 %v10865_v46  ;;  %v10875_v7 = vld [vmem:[#allocation139_spill] sm:$0xff]  ;;  %v10876_v46 = vld [vmem:[#allocation140_spill] sm:$0xff] }
 0x31e   :  { %5703 = vmatprep.subr.bf16.mxu0 %v10866_v0  ;;  %5735 = vmatprep.subr.bf16.mxu1 %v10867_v4  ;;  %v10877_v0 = vld [vmem:[#allocation141_spill] sm:$0xff]  ;;  %v10878_v4 = vld [vmem:[#allocation142_spill] sm:$0xff] }
 0x321   :  { %5705 = vmatpush1.bf16.msra.mxu0 %v10868_v13  ;;  %5737 = vmatpush1.bf16.msra.mxu1 %v10869_v37  ;;  %v10879_v13 = vld [vmem:[#allocation143_spill] sm:$0xff]  ;;  %v10880_v37 = vld [vmem:[#allocation144_spill] sm:$0xff] }
 0x322   :  { %5707 = vmatprep.subr.bf16.mxu0 %v10870_v50  ;;  %5739 = vmatprep.subr.bf16.mxu1 %v10871_v22  ;;  %v10881_v50 = vld [vmem:[#allocation145_spill] sm:$0xff]  ;;  %v10882_v22 = vld [vmem:[#allocation23_spill] sm:$0xff] }
 0x325   :  { %5709 = vmatpush1.bf16.msra.mxu0 %v10872_v25  ;;  %5741 = vmatpush1.bf16.msra.mxu1 %v10873_v40  ;;  %v10883_v25 = vld [vmem:[#allocation24_spill] sm:$0xff] }
 0x326   :  { %5711 = vmatprep.subr.bf16.mxu0 %v10874_v49  ;;  %5743 = vmatprep.subr.bf16.mxu1 %v10875_v7 }
 0x329   :  { %5713 = vmatpush1.bf16.msra.mxu0 %v10876_v46  ;;  %5745 = vmatpush1.bf16.msra.mxu1 %v10877_v0 }
 0x32a   :  { %5715 = vmatprep.subr.bf16.mxu0 %v10878_v4  ;;  %5747 = vmatprep.subr.bf16.mxu1 %v10879_v13 }
 0x32d   :  { %5717 = vmatpush1.bf16.msra.mxu0 %v10880_v37  ;;  %5749 = vmatpush1.bf16.msra.mxu1 %v10881_v50  ;;  %v10884_v37 = vcombine.high %v8851_v3, %v8857_v36 }
 0x32e   :  { %5751 = vmatprep.subr.bf16.mxu0 %v10882_v22  ;;  %5815 = vmatprep.subr.bf16.mxu1 %v10883_v25 }
 0x3a3   :  { %v1407_v40 = vpop.f32.mrb[4].mxu0  ;;  %v1478_v49 = vpop.f32.mrb[12].mxu1 }
 0x3a4   :  { %v1409_v35 = vpop.f32.mrb[5].mxu0  ;;  %v1480_v7 = vpop.f32.mrb[13].mxu1 }
 0x3a5   :  { %v1629_v48 = vcombine.low %v1407_v40, %v1409_v35  ;;  %v1630_v46 = vcombine.low %v1478_v49, %v1480_v7  ;;  %v10896_v7 = vld [vmem:[#allocation35_spill] sm:$0xff] }
 0x3a7   :  { %v1637_v0 = vrot.slane %v1629_v48, %v8327_v18  ;;  %v1644_v4 = vrot.slane %v1630_v46, %v8327_v18  ;;  %v10894_v46 = vld [vmem:[#allocation34_spill] sm:$0xff] }
 0x3a9   :  { %v1645_v44 = vcombine.low %v1637_v0, %v1644_v4  ;;  %v10891_v4 = vld [vmem:[#allocation36_spill] sm:$0xff] }
 0x3ab   :  { %v1647_v13 = vadd.f32 %v1645_v44, %v10884_v37  ;;  %v10889_v44 = vld [vmem:[#allocation33_spill] sm:$0xff] }
 0x3ac   :  { %v10893_v37 = vld [vmem:[#allocation37_spill] sm:$0xff] }
 0x3ad   :  { %v5010_v50 = vmul.f32 -1.442695, %v1647_v13  ;;  %v1655_v25 = vrot.slane %v1647_v13, 6  ;;  %v10892_v13 = vld [vmem:[#allocation31_spill] sm:$0xff] }
 0x3af   :  { %7776 = vpow2.f32 %v5010_v50  ;;  %v10890_v50 = vld [vmem:[#allocation30_spill] sm:$0xff] }
 0x3b9   :  { %v7777_v22 = vpop.eup %7776 }
 0x3ba   :  { %v1651_v1 = vadd.f32 1.0, %v7777_v22  ;;  %v10897_v22 = vld [vmem:[#allocation41_spill] sm:$0xff] }
 0x3bc   :  { %7778 = vrcp.f32 %v1651_v1  ;;  %v10888_v1 = vld [vmem:[#allocation27_spill] sm:$0xff] }
 0x3bd   :  { %7780 = vtanh.f32 %v1655_v25  ;;  %v10895_v25 = vld [vmem:[#allocation40_spill] sm:$0xff] }
 0x3c6   :  { %v7779_v12 = vpop.eup %7778 }
 0x3c7   :  { %v1659_v60 = vrot.slane %v7779_v12, 2  ;;  %v7781_v35 = vpop.eup %7780  ;;  %v1665_v0 = vrot.slane %v7779_v12, 4 }
 0x3c8   :  { %v1662_v48 = vmul.f32 %v7781_v35, %v7779_v12  ;;  %v10887_v12 = vld [vmem:[#allocation32_spill] sm:$0xff]  ;;  %v10898_v35 = vld [vmem:[#allocation38_spill] sm:$0xff] }
 0x3c9   :  { %v1661_v40 = vmul.f32 %v1659_v60, %v8895_v57  ;;  %v10885_v57 = vld [vmem:[#allocation29_spill] sm:$0xff]  ;;  %v10886_v60 = vld [vmem:[#allocation26_spill] sm:$0xff] }
 0x3cb   :  { %v9108_v49 = vadd.f32 %v1662_v48, %v1661_v40  ;;  %v10899_v40 = vld [vmem:[#allocation44_spill] sm:$0xff]  ;;  %v10900_v48 = vld [vmem:[#allocation39_spill] sm:$0xff] }
 0x3cd   :  { %7782 = vtanh.f32 %v9108_v49 }
 0x3d7   :  { %v7783_v3 = vpop.eup %7782 }
 0x3d8   :  { %v9111_v36 = vmul.f32 %v7783_v3, %v1665_v0  ;;  %v10901_v0 = vld [vmem:[#allocation45_spill] sm:$0xff]  ;;  %v10902_v3 = vld [vmem:[#allocation42_spill] sm:$0xff] }
 0x3da   :  { %1733 = vmatmul.mubr.f32.vlgmr.msra.gmra.mrb[6].mxu0 %v9111_v36  ;;  %1804 = vmatmul.mubr.f32.vlgmr.msra.gmra.mrb[14].mxu1 %v9111_v36 }
 0x3db   :  { %5753 = vmatpush1.bf16.msra.mxu0 %v8335_v52  ;;  %5817 = vmatpush1.bf16.msra.mxu1 %v8352_v11 }
 0x3dc   :  { %5755 = vmatprep.subr.bf16.mxu0 %v8340_v63  ;;  %5819 = vmatprep.subr.bf16.mxu1 %v8356_v14 }
 0x3df   :  { %5757 = vmatpush1.bf16.msra.mxu0 %v8345_v2  ;;  %5821 = vmatpush1.bf16.msra.mxu1 %v8366_v26 }
 0x3e0   :  { %5759 = vmatprep.subr.bf16.mxu0 %v8348_v8  ;;  %5823 = vmatprep.subr.bf16.mxu1 %v8370_v27 }
 0x3e3   :  { %5761 = vmatpush1.bf16.msra.mxu0 %v8358_v17  ;;  %5825 = vmatpush1.bf16.msra.mxu1 %v8379_v38 }
 0x3e4   :  { %5763 = vmatprep.subr.bf16.mxu0 %v8361_v21  ;;  %5827 = vmatprep.subr.bf16.mxu1 %v8383_v39 }
 0x3e7   :  { %5765 = vmatpush1.bf16.msra.mxu0 %v8372_v30  ;;  %5829 = vmatpush1.bf16.msra.mxu1 %v8391_v51 }
 0x3e8   :  { %5767 = vmatprep.subr.bf16.mxu0 %v8375_v33  ;;  %5831 = vmatprep.subr.bf16.mxu1 %v8395_v53 }
 0x3eb   :  { %5769 = vmatpush1.bf16.msra.mxu0 %v8385_v42  ;;  %5833 = vmatpush1.bf16.msra.mxu1 %v8403_v5 }
 0x3ec   :  { %5771 = vmatprep.subr.bf16.mxu0 %v8388_v45  ;;  %5835 = vmatprep.subr.bf16.mxu1 %v8407_v6 }
 0x3ef   :  { %5773 = vmatpush1.bf16.msra.mxu0 %v8397_v56  ;;  %5837 = vmatpush1.bf16.msra.mxu1 %v8415_v23 }
 0x3f0   :  { %5775 = vmatprep.subr.bf16.mxu0 %v8400_v59  ;;  %5839 = vmatprep.subr.bf16.mxu1 %v8419_v24 }
 0x3f3   :  { %5777 = vmatpush1.bf16.msra.mxu0 %v8409_v10  ;;  %5841 = vmatpush1.bf16.msra.mxu1 %v8427_v41 }
 0x3f4   :  { %5779 = vmatprep.subr.bf16.mxu0 %v8412_v15  ;;  %5843 = vmatprep.subr.bf16.mxu1 %v8431_v43 }
 0x3f7   :  { %5781 = vmatpush1.bf16.msra.mxu0 %v8421_v29  ;;  %5845 = vmatpush1.bf16.msra.mxu1 %v8439_v61 }
 0x3f8   :  { %5783 = vmatprep.subr.bf16.mxu0 %v8424_v34  ;;  %5847 = vmatprep.subr.bf16.mxu1 %v8443_v62 }
 0x3fb   :  { %5785 = vmatpush1.bf16.msra.mxu0 %v8433_v47  ;;  %5849 = vmatpush1.bf16.msra.mxu1 %v8451_v28 }
 0x3fc   :  { %5787 = vmatprep.subr.bf16.mxu0 %v8436_v54  ;;  %5851 = vmatprep.subr.bf16.mxu1 %v8455_v32 }
 0x3ff   :  { %5789 = vmatpush1.bf16.msra.mxu0 %v8445_v9  ;;  %5853 = vmatpush1.bf16.msra.mxu1 %v10753_v16 }
 0x400   :  { %5791 = vmatprep.subr.bf16.mxu0 %v10754_v55  ;;  %5855 = vmatprep.subr.bf16.mxu1 %v10885_v57 }
 0x403   :  { %5793 = vmatpush1.bf16.msra.mxu0 %v10886_v60  ;;  %5857 = vmatpush1.bf16.msra.mxu1 %v10887_v12 }
 0x404   :  { %5795 = vmatprep.subr.bf16.mxu0 %v10888_v1  ;;  %5859 = vmatprep.subr.bf16.mxu1 %v10889_v44 }
 0x407   :  { %5797 = vmatpush1.bf16.msra.mxu0 %v10890_v50  ;;  %5861 = vmatpush1.bf16.msra.mxu1 %v10891_v4  ;;  %v10910_v4 = vld [vmem:[#allocation28_spill] sm:$0xff] }
 0x408   :  { %5799 = vmatprep.subr.bf16.mxu0 %v10892_v13  ;;  %5863 = vmatprep.subr.bf16.mxu1 %v10893_v37  ;;  %v10903_v13 = vld [vmem:[#allocation47_spill] sm:$0xff] }
 0x409   :  { %v10904_v37 = vld [vmem:[#allocation43_spill] sm:$0xff] }
 0x40b   :  { %5801 = vmatpush1.bf16.msra.mxu0 %v10894_v46  ;;  %5865 = vmatpush1.bf16.msra.mxu1 %v10895_v25  ;;  %v10905_v46 = vld [vmem:[#allocation48_spill] sm:$0xff]  ;;  %v10906_v25 = vld [vmem:[#allocation46_spill] sm:$0xff] }
 0x40c   :  { %5803 = vmatprep.subr.bf16.mxu0 %v10896_v7  ;;  %5867 = vmatprep.subr.bf16.mxu1 %v10897_v22  ;;  %v10907_v7 = vld [vmem:[#allocation49_spill] sm:$0xff]  ;;  %v10908_v22 = vld [vmem:[#allocation50_spill] sm:$0xff] }
 0x40f   :  { %5805 = vmatpush1.bf16.msra.mxu0 %v10898_v35  ;;  %5869 = vmatpush1.bf16.msra.mxu1 %v10899_v40  ;;  %v10909_v35 = vld [vmem:[#allocation51_spill] sm:$0xff] }
 0x410   :  { %5807 = vmatprep.subr.bf16.mxu0 %v10900_v48  ;;  %5871 = vmatprep.subr.bf16.mxu1 %v10901_v0 }
 0x413   :  { %5809 = vmatpush1.bf16.msra.mxu0 %v10902_v3  ;;  %5873 = vmatpush1.bf16.msra.mxu1 %v10903_v13 }
 0x414   :  { %5811 = vmatprep.subr.bf16.mxu0 %v10904_v37  ;;  %5875 = vmatprep.subr.bf16.mxu1 %v10905_v46 }
 0x417   :  { %5813 = vmatpush1.bf16.msra.mxu0 %v10906_v25  ;;  %5877 = vmatpush1.bf16.msra.mxu1 %v10907_v7 }
 0x418   :  { %5879 = vmatprep.subr.bf16.mxu0 %v10908_v22  ;;  %5943 = vmatprep.subr.bf16.mxu1 %v10909_v35 }
 0x4ad   :  { %v1734_v40 = vpop.f32.mrb[6].mxu0  ;;  %v1805_v48 = vpop.f32.mrb[14].mxu1 }
 0x4ae   :  { %v1810_v0 = vadd.f32 %v1734_v40, %v10910_v4  ;;  %v1736_v50 = vpop.f32.mrb[7].mxu0  ;;  %v1807_v3 = vpop.f32.mrb[15].mxu1  ;;  %v1812_v25 = vadd.f32 %v1805_v48, %v8981_v31 }
 0x4af   :  { %v1811_v13 = vadd.f32 %v1736_v50, %v8975_v58  ;;  %v1813_v7 = vadd.f32 %v1807_v3, %v8985_v19  ;;  %v10919_v3 = vld [vmem:[#allocation58_spill] sm:$0xff] }
 0x4b0   :  { %v5011_v44 = vmul.f32 -1.442695, %v1810_v0  ;;  %v5013_v46 = vmul.f32 -1.442695, %v1812_v25 }
 0x4b1   :  { %v5012_v37 = vmul.f32 -1.442695, %v1811_v13 }
 0x4b2   :  { %7784 = vpow2.f32 %v5011_v44 }
 0x4b3   :  { %7786 = vpow2.f32 %v5012_v37 }
 0x4b4   :  { %7788 = vtanh.f32 %v1813_v7 }
 0x4b5   :  { %7790 = vpow2.f32 %v5013_v46  ;;  %v10917_v46 = vld [vmem:[#allocation56_spill] sm:$0xff] }
 0x4bc   :  { %v7785_v22 = vpop.eup %7784 }
 0x4bd   :  { %v1823_v1 = vadd.f32 1.0, %v7785_v22  ;;  %v7787_v35 = vpop.eup %7786 }
 0x4be   :  { %v1824_v40 = vadd.f32 1.0, %v7787_v35  ;;  %v7789_v4 = vpop.eup %7788  ;;  %v10918_v35 = vld [vmem:[#allocation57_spill] sm:$0xff] }
 0x4bf   :  { %7792 = vrcp.f32 %v1823_v1  ;;  %v7791_v12 = vpop.eup %7790  ;;  %v10915_v1 = vld [vmem:[#allocation54_spill] sm:$0xff] }
 0x4c0   :  { %7794 = vrcp.f32 %v1824_v40  ;;  %v1825_v44 = vadd.f32 1.0, %v7791_v12  ;;  %v10913_v12 = vld [vmem:[#allocation52_spill] sm:$0xff]  ;;  %v10920_v40 = vld [vmem:[#allocation59_spill] sm:$0xff] }
 0x4c2   :  { %7796 = vrcp.f32 %v1825_v44  ;;  %v10924_v44 = vld [vmem:[#allocation63_spill] sm:$0xff] }
 0x4c9   :  { %v7793_v50 = vpop.eup %7792 }
 0x4ca   :  { %v1834_v0 = vmul.f32 %v7793_v50, %v7789_v4  ;;  %v7795_v13 = vpop.eup %7794  ;;  %v10916_v4 = vld [vmem:[#allocation55_spill] sm:$0xff]  ;;  %v10921_v50 = vld [vmem:[#allocation60_spill] sm:$0xff] }
 0x4cb   :  { %v1833_v37 = vmul.f32 %v7795_v13, %v8991_v20  ;;  %v10914_v20 = vld [vmem:[#allocation53_spill] sm:$0xff]  ;;  %v10923_v13 = vld [vmem:[#allocation62_spill] sm:$0xff] }
 0x4cc   :  { %v7797_v25 = vpop.eup %7796 }
 0x4cd   :  { %v9184_v48 = vadd.f32 %v1834_v0, %v1833_v37  ;;  %v10922_v0 = vld [vmem:[#allocation61_spill] sm:$0xff]  ;;  %v10925_v37 = vld [vmem:[#allocation64_spill] sm:$0xff] }
 0x4cf   :  { %10911 = vst [vmem:[#allocation29_spill] sm:$0xff] %v9184_v48  ;;  %7798 = vtanh.f32 %v9184_v48 }
 0x4d9   :  { %v7799_v7 = vpop.eup %7798 }
 0x4da   :  { %v9187_v22 = vmul.f32 %v7799_v7, %v7797_v25  ;;  %v10926_v25 = vld [vmem:[#allocation65_spill] sm:$0xff]  ;;  %v10927_v7 = vld [vmem:[#allocation66_spill] sm:$0xff] }
 0x4dc   :  { %10912 = vst [vmem:[#allocation154_spill] sm:$0xff] %v9187_v22  ;;  %1902 = vmatprep.mubr.f32.mxu0 %v9187_v22  ;;  %1973 = vmatprep.mubr.f32.mxu1 %v9187_v22 }
 0x4dd   :  { %1903 = vmatmul.mubr.f32.vlgmr.msra.gmra.mrb[8].mxu0 %v9111_v36  ;;  %1974 = vmatmul.mubr.f32.vlgmr.msra.gmra.mrb[16].mxu1 %v9111_v36 }
 0x4de   :  { %5881 = vmatpush1.bf16.msra.mxu0 %v10913_v12  ;;  %5945 = vmatpush1.bf16.msra.mxu1 %v10914_v20  ;;  %v11011_v20 = vld [vmem:[#allocation147_spill] sm:$0xff] }
 0x4df   :  { %2044 = vmatprep.mubr.f32.mxu0 %v9187_v22  ;;  %2115 = vmatprep.mubr.f32.mxu1 %v9187_v22 }
 0x4e0   :  { %5883 = vmatprep.subr.bf16.mxu0 %v10915_v1  ;;  %5947 = vmatprep.subr.bf16.mxu1 %v10916_v4 }
 0x4e2   :  { %5885 = vmatpush1.bf16.msra.mxu0 %v10917_v46  ;;  %5949 = vmatpush1.bf16.msra.mxu1 %v10918_v35  ;;  %v10928_v46 = vld [vmem:[#allocation67_spill] sm:$0xff]  ;;  %v10929_v35 = vld [vmem:[#allocation68_spill] sm:$0xff] }
 0x4e3   :  { %5887 = vmatprep.subr.bf16.mxu0 %v10919_v3  ;;  %5951 = vmatprep.subr.bf16.mxu1 %v10920_v40  ;;  %v10930_v3 = vld [vmem:[#allocation69_spill] sm:$0xff]  ;;  %v10931_v40 = vld [vmem:[#allocation70_spill] sm:$0xff] }
 0x4e6   :  { %5889 = vmatpush1.bf16.msra.mxu0 %v10921_v50  ;;  %5953 = vmatpush1.bf16.msra.mxu1 %v10922_v0  ;;  %v10932_v50 = vld [vmem:[#allocation71_spill] sm:$0xff]  ;;  %v10933_v0 = vld [vmem:[#allocation72_spill] sm:$0xff] }
 0x4e7   :  { %5891 = vmatprep.subr.bf16.mxu0 %v10923_v13  ;;  %5955 = vmatprep.subr.bf16.mxu1 %v10924_v44  ;;  %v10934_v13 = vld [vmem:[#allocation73_spill] sm:$0xff]  ;;  %v10935_v44 = vld [vmem:[#allocation74_spill] sm:$0xff] }
 0x4ea   :  { %5893 = vmatpush1.bf16.msra.mxu0 %v10925_v37  ;;  %5957 = vmatpush1.bf16.msra.mxu1 %v10926_v25  ;;  %v10936_v37 = vld [vmem:[#allocation75_spill] sm:$0xff]  ;;  %v10937_v25 = vld [vmem:[#allocation76_spill] sm:$0xff] }
 0x4eb   :  { %5895 = vmatprep.subr.bf16.mxu0 %v10927_v7  ;;  %5959 = vmatprep.subr.bf16.mxu1 %v10928_v46  ;;  %v10938_v7 = vld [vmem:[#allocation77_spill] sm:$0xff]  ;;  %v10939_v46 = vld [vmem:[#allocation78_spill] sm:$0xff] }
 0x4ee   :  { %5897 = vmatpush1.bf16.msra.mxu0 %v10929_v35  ;;  %5961 = vmatpush1.bf16.msra.mxu1 %v10930_v3  ;;  %v10940_v35 = vld [vmem:[#allocation79_spill] sm:$0xff]  ;;  %v10941_v3 = vld [vmem:[#allocation80_spill] sm:$0xff] }
 0x4ef   :  { %5899 = vmatprep.subr.bf16.mxu0 %v10931_v40  ;;  %5963 = vmatprep.subr.bf16.mxu1 %v10932_v50  ;;  %v10942_v40 = vld [vmem:[#allocation81_spill] sm:$0xff]  ;;  %v10943_v50 = vld [vmem:[#allocation82_spill] sm:$0xff] }
 0x4f2   :  { %5901 = vmatpush1.bf16.msra.mxu0 %v10933_v0  ;;  %5965 = vmatpush1.bf16.msra.mxu1 %v10934_v13  ;;  %v10944_v0 = vld [vmem:[#allocation83_spill] sm:$0xff]  ;;  %v10945_v13 = vld [vmem:[#allocation84_spill] sm:$0xff] }
 0x4f3   :  { %5903 = vmatprep.subr.bf16.mxu0 %v10935_v44  ;;  %5967 = vmatprep.subr.bf16.mxu1 %v10936_v37  ;;  %v10946_v44 = vld [vmem:[#allocation85_spill] sm:$0xff]  ;;  %v10947_v37 = vld [vmem:[#allocation86_spill] sm:$0xff] }
 0x4f6   :  { %5905 = vmatpush1.bf16.msra.mxu0 %v10937_v25  ;;  %5969 = vmatpush1.bf16.msra.mxu1 %v10938_v7  ;;  %v10948_v25 = vld [vmem:[#allocation87_spill] sm:$0xff]  ;;  %v10949_v7 = vld [vmem:[#allocation88_spill] sm:$0xff] }
 0x4f7   :  { %5907 = vmatprep.subr.bf16.mxu0 %v10939_v46  ;;  %5971 = vmatprep.subr.bf16.mxu1 %v10940_v35  ;;  %v10950_v46 = vld [vmem:[#allocation89_spill] sm:$0xff]  ;;  %v10951_v35 = vld [vmem:[#allocation90_spill] sm:$0xff] }
 0x4fa   :  { %5909 = vmatpush1.bf16.msra.mxu0 %v10941_v3  ;;  %5973 = vmatpush1.bf16.msra.mxu1 %v10942_v40  ;;  %v10952_v3 = vld [vmem:[#allocation91_spill] sm:$0xff]  ;;  %v10953_v40 = vld [vmem:[#allocation92_spill] sm:$0xff] }
 0x4fb   :  { %5911 = vmatprep.subr.bf16.mxu0 %v10943_v50  ;;  %5975 = vmatprep.subr.bf16.mxu1 %v10944_v0  ;;  %v10954_v50 = vld [vmem:[#allocation93_spill] sm:$0xff]  ;;  %v10955_v0 = vld [vmem:[#allocation94_spill] sm:$0xff] }
 0x4fe   :  { %5913 = vmatpush1.bf16.msra.mxu0 %v10945_v13  ;;  %5977 = vmatpush1.bf16.msra.mxu1 %v10946_v44  ;;  %v10956_v13 = vld [vmem:[#allocation95_spill] sm:$0xff]  ;;  %v10957_v44 = vld [vmem:[#allocation96_spill] sm:$0xff] }
 0x4ff   :  { %5915 = vmatprep.subr.bf16.mxu0 %v10947_v37  ;;  %5979 = vmatprep.subr.bf16.mxu1 %v10948_v25  ;;  %v10958_v37 = vld [vmem:[#allocation97_spill] sm:$0xff]  ;;  %v10959_v25 = vld [vmem:[#allocation98_spill] sm:$0xff] }
 0x502   :  { %5917 = vmatpush1.bf16.msra.mxu0 %v10949_v7  ;;  %5981 = vmatpush1.bf16.msra.mxu1 %v10950_v46  ;;  %v10960_v7 = vld [vmem:[#allocation99_spill] sm:$0xff]  ;;  %v10961_v46 = vld [vmem:[#allocation100_spill] sm:$0xff] }
 0x503   :  { %5919 = vmatprep.subr.bf16.mxu0 %v10951_v35  ;;  %5983 = vmatprep.subr.bf16.mxu1 %v10952_v3  ;;  %v10962_v35 = vld [vmem:[#allocation101_spill] sm:$0xff]  ;;  %v10963_v3 = vld [vmem:[#allocation102_spill] sm:$0xff] }
 0x506   :  { %5921 = vmatpush1.bf16.msra.mxu0 %v10953_v40  ;;  %5985 = vmatpush1.bf16.msra.mxu1 %v10954_v50  ;;  %v10964_v40 = vld [vmem:[#allocation103_spill] sm:$0xff]  ;;  %v10965_v50 = vld [vmem:[#allocation104_spill] sm:$0xff] }
 0x507   :  { %5923 = vmatprep.subr.bf16.mxu0 %v10955_v0  ;;  %5987 = vmatprep.subr.bf16.mxu1 %v10956_v13  ;;  %v10966_v0 = vld [vmem:[#allocation105_spill] sm:$0xff]  ;;  %v10967_v13 = vld [vmem:[#allocation106_spill] sm:$0xff] }
 0x50a   :  { %5925 = vmatpush1.bf16.msra.mxu0 %v10957_v44  ;;  %5989 = vmatpush1.bf16.msra.mxu1 %v10958_v37  ;;  %v10968_v44 = vld [vmem:[#allocation107_spill] sm:$0xff]  ;;  %v10969_v37 = vld [vmem:[#allocation108_spill] sm:$0xff] }
 0x50b   :  { %5927 = vmatprep.subr.bf16.mxu0 %v10959_v25  ;;  %5991 = vmatprep.subr.bf16.mxu1 %v10960_v7  ;;  %v10970_v25 = vld [vmem:[#allocation109_spill] sm:$0xff]  ;;  %v10971_v7 = vld [vmem:[#allocation110_spill] sm:$0xff] }
 0x50e   :  { %5929 = vmatpush1.bf16.msra.mxu0 %v10961_v46  ;;  %5993 = vmatpush1.bf16.msra.mxu1 %v10962_v35  ;;  %v10972_v46 = vld [vmem:[#allocation111_spill] sm:$0xff]  ;;  %v10973_v35 = vld [vmem:[#allocation112_spill] sm:$0xff] }
 0x50f   :  { %5931 = vmatprep.subr.bf16.mxu0 %v10963_v3  ;;  %5995 = vmatprep.subr.bf16.mxu1 %v10964_v40  ;;  %v10974_v3 = vld [vmem:[#allocation113_spill] sm:$0xff]  ;;  %v10975_v40 = vld [vmem:[#allocation114_spill] sm:$0xff] }
 0x512   :  { %5933 = vmatpush1.bf16.msra.mxu0 %v10965_v50  ;;  %5997 = vmatpush1.bf16.msra.mxu1 %v10966_v0  ;;  %v10976_v50 = vld [vmem:[#allocation115_spill] sm:$0xff] }
 0x513   :  { %5935 = vmatprep.subr.bf16.mxu0 %v10967_v13  ;;  %5999 = vmatprep.subr.bf16.mxu1 %v10968_v44  ;;  %v10977_v44 = vld [vmem:[#allocation116_spill] sm:$0xff]  ;;  %v10991_v13 = vld [vmem:[#allocation129_spill] sm:$0xff] }
 0x516   :  { %5937 = vmatpush1.bf16.msra.mxu0 %v10969_v37  ;;  %6001 = vmatpush1.bf16.msra.mxu1 %v10970_v25  ;;  %v10978_v37 = vld [vmem:[#allocation117_spill] sm:$0xff]  ;;  %v10979_v25 = vld [vmem:[#allocation118_spill] sm:$0xff] }
 0x517   :  { %5939 = vmatprep.subr.bf16.mxu0 %v10971_v7  ;;  %6003 = vmatprep.subr.bf16.mxu1 %v10972_v46  ;;  %v10980_v7 = vld [vmem:[#allocation119_spill] sm:$0xff]  ;;  %v10981_v46 = vmov 0.0  }
 0x51a   :  { %5941 = vmatpush1.bf16.msra.mxu0 %v10973_v35  ;;  %6005 = vmatpush1.bf16.msra.mxu1 %v10974_v3  ;;  %v10982_v3 = vld [vmem:[#allocation120_spill] sm:$0xff]  ;;  %v10985_v35 = vld [vmem:[#allocation123_spill] sm:$0xff] }
 0x51b   :  { %6007 = vmatprep.subr.bf16.mxu0 %v10975_v40  ;;  %6039 = vmatprep.subr.bf16.mxu1 %v10976_v50  ;;  %v10983_v40 = vld [vmem:[#allocation121_spill] sm:$0xff]  ;;  %v10984_v50 = vld [vmem:[#allocation122_spill] sm:$0xff] }
 0x51d   :  { %2045 = vmatmul.mubr.f32.vlgmr.msra.gmra.mrb[10].mxu0 %v9111_v36  ;;  %2116 = vmatmul.mubr.f32.vlgmr.msra.gmra.mrb[18].mxu1 %v9111_v36  ;;  %v10986_v36 = vld [vmem:[#allocation124_spill] sm:$0xff] }
 0x51e   :  { %6009 = vmatpush1.bf16.msra.mxu0 %v10977_v44  ;;  %6041 = vmatpush1.bf16.msra.mxu1 %v10978_v37  ;;  %v10987_v44 = vld [vmem:[#allocation125_spill] sm:$0xff]  ;;  %v10988_v37 = vld [vmem:[#allocation126_spill] sm:$0xff] }
 0x51f   :  { %6011 = vmatprep.subr.bf16.mxu0 %v10979_v25  ;;  %6043 = vmatprep.subr.bf16.mxu1 %v10980_v7  ;;  %v10989_v25 = vld [vmem:[#allocation127_spill] sm:$0xff]  ;;  %v10990_v7 = vld [vmem:[#allocation128_spill] sm:$0xff] }
 0x520   :  { %2229 = vmatprep.mubr.f32.mxu0 %v10981_v46  ;;  %2300 = vmatprep.mubr.f32.mxu1 %v10981_v46  ;;  %v10992_v46 = vld [vmem:[#allocation130_spill] sm:$0xff] }
 0x522   :  { %6013 = vmatpush1.bf16.msra.mxu0 %v10982_v3  ;;  %6045 = vmatpush1.bf16.msra.mxu1 %v10983_v40  ;;  %v10993_v3 = vld [vmem:[#allocation131_spill] sm:$0xff]  ;;  %v10994_v40 = vld [vmem:[#allocation132_spill] sm:$0xff] }
 0x523   :  { %6015 = vmatprep.subr.bf16.mxu0 %v10984_v50  ;;  %6047 = vmatprep.subr.bf16.mxu1 %v10985_v35  ;;  %v10995_v50 = vld [vmem:[#allocation133_spill] sm:$0xff]  ;;  %v10996_v35 = vld [vmem:[#allocation134_spill] sm:$0xff] }
 0x526   :  { %6017 = vmatpush1.bf16.msra.mxu0 %v10986_v36  ;;  %6049 = vmatpush1.bf16.msra.mxu1 %v10987_v44  ;;  %v10997_v36 = vld [vmem:[#allocation135_spill] sm:$0xff]  ;;  %v10998_v44 = vld [vmem:[#allocation136_spill] sm:$0xff] }
 0x527   :  { %6019 = vmatprep.subr.bf16.mxu0 %v10988_v37  ;;  %6051 = vmatprep.subr.bf16.mxu1 %v10989_v25  ;;  %v10999_v37 = vld [vmem:[#allocation137_spill] sm:$0xff]  ;;  %v11000_v25 = vld [vmem:[#allocation138_spill] sm:$0xff] }
 0x52a   :  { %6021 = vmatpush1.bf16.msra.mxu0 %v10990_v7  ;;  %6053 = vmatpush1.bf16.msra.mxu1 %v10991_v13  ;;  %v11001_v7 = vld [vmem:[#allocation139_spill] sm:$0xff]  ;;  %v11002_v13 = vld [vmem:[#allocation140_spill] sm:$0xff] }
 0x52b   :  { %6023 = vmatprep.subr.bf16.mxu0 %v10992_v46  ;;  %6055 = vmatprep.subr.bf16.mxu1 %v10993_v3  ;;  %v11003_v46 = vld [vmem:[#allocation141_spill] sm:$0xff]  ;;  %v11004_v3 = vld [vmem:[#allocation142_spill] sm:$0xff] }
 0x52e   :  { %6025 = vmatpush1.bf16.msra.mxu0 %v10994_v40  ;;  %6057 = vmatpush1.bf16.msra.mxu1 %v10995_v50  ;;  %v11005_v40 = vld [vmem:[#allocation143_spill] sm:$0xff]  ;;  %v11006_v50 = vld [vmem:[#allocation144_spill] sm:$0xff] }
 0x52f   :  { %6027 = vmatprep.subr.bf16.mxu0 %v10996_v35  ;;  %6059 = vmatprep.subr.bf16.mxu1 %v10997_v36  ;;  %v11007_v35 = vld [vmem:[#allocation145_spill] sm:$0xff]  ;;  %v11008_v36 = vld [vmem:[#allocation23_spill] sm:$0xff] }
 0x532   :  { %6029 = vmatpush1.bf16.msra.mxu0 %v10998_v44  ;;  %6061 = vmatpush1.bf16.msra.mxu1 %v10999_v37  ;;  %v11009_v44 = vld [vmem:[#allocation24_spill] sm:$0xff] }
 0x533   :  { %6031 = vmatprep.subr.bf16.mxu0 %v11000_v25  ;;  %6063 = vmatprep.subr.bf16.mxu1 %v11001_v7 }
 0x536   :  { %6033 = vmatpush1.bf16.msra.mxu0 %v11002_v13  ;;  %6065 = vmatpush1.bf16.msra.mxu1 %v11003_v46 }
 0x537   :  { %6035 = vmatprep.subr.bf16.mxu0 %v11004_v3  ;;  %6067 = vmatprep.subr.bf16.mxu1 %v11005_v40  ;;  %v11010_v40 = vld [vmem:[#allocation146_spill] sm:$0xff] }
 0x53a   :  { %6037 = vmatpush1.bf16.msra.mxu0 %v11006_v50  ;;  %6069 = vmatpush1.bf16.msra.mxu1 %v11007_v35  ;;  %v11012_v50 = vcombine.low %v11010_v40, %v11011_v20 }
 0x53b   :  { %6071 = vmatprep.subr.bf16.mxu0 %v11008_v36  ;;  %6135 = vmatprep.subr.bf16.mxu1 %v11009_v44 }
 0x5b0   :  { %v1904_v37 = vpop.f32.mrb[8].mxu0  ;;  %v1975_v25 = vpop.f32.mrb[16].mxu1 }
 0x5b1   :  { %v1906_v0 = vpop.f32.mrb[9].mxu0  ;;  %v1977_v7 = vpop.f32.mrb[17].mxu1 }
 0x5b2   :  { %v2126_v4 = vcombine.low %v1904_v37, %v1906_v0  ;;  %v2127_v13 = vcombine.low %v1975_v25, %v1977_v7  ;;  %v11022_v7 = vld [vmem:[#allocation35_spill] sm:$0xff] }
 0x5b4   :  { %v2134_v46 = vrot.slane %v2126_v4, %v8327_v18  ;;  %v2141_v3 = vrot.slane %v2127_v13, %v8327_v18  ;;  %v11020_v13 = vld [vmem:[#allocation34_spill] sm:$0xff] }
 0x5b6   :  { %v2142_v1 = vcombine.low %v2134_v46, %v2141_v3 }
 0x5b8   :  { %v2144_v12 = vadd.f32 %v2142_v1, %v11012_v50  ;;  %v11019_v50 = vld [vmem:[#allocation37_spill] sm:$0xff] }
 0x5ba   :  { %v5014_v35 = vmul.f32 -1.442695, %v2144_v12  ;;  %v2152_v44 = vrot.slane %v2144_v12, 6  ;;  %v11017_v12 = vld [vmem:[#allocation36_spill] sm:$0xff] }
 0x5bc   :  { %7800 = vpow2.f32 %v5014_v35  ;;  %v11018_v35 = vld [vmem:[#allocation31_spill] sm:$0xff] }
 0x5c6   :  { %v7801_v36 = vpop.eup %7800 }
 0x5c7   :  { %v2148_v22 = vadd.f32 1.0, %v7801_v36  ;;  %v11023_v36 = vld [vmem:[#allocation41_spill] sm:$0xff] }
 0x5c9   :  { %7802 = vrcp.f32 %v2148_v22  ;;  %v11016_v22 = vld [vmem:[#allocation30_spill] sm:$0xff] }
 0x5ca   :  { %7804 = vtanh.f32 %v2152_v44  ;;  %v11021_v44 = vld [vmem:[#allocation40_spill] sm:$0xff] }
 0x5d3   :  { %v7803_v48 = vpop.eup %7802 }
 0x5d4   :  { %v2156_v19 = vrot.slane %v7803_v48, 2  ;;  %v7805_v0 = vpop.eup %7804  ;;  %v2162_v46 = vrot.slane %v7803_v48, 4 }
 0x5d5   :  { %v2159_v4 = vmul.f32 %v7805_v0, %v7803_v48  ;;  %v11015_v48 = vld [vmem:[#allocation33_spill] sm:$0xff]  ;;  %v11024_v0 = vld [vmem:[#allocation38_spill] sm:$0xff] }
 0x5d6   :  { %v2158_v37 = vmul.f32 %v2156_v19, %v9108_v49  ;;  %v11013_v19 = vld [vmem:[#allocation32_spill] sm:$0xff]  ;;  %v11014_v49 = vld [vmem:[#allocation27_spill] sm:$0xff] }
 0x5d8   :  { %v9301_v25 = vadd.f32 %v2159_v4, %v2158_v37  ;;  %v11025_v37 = vld [vmem:[#allocation44_spill] sm:$0xff]  ;;  %v11026_v4 = vld [vmem:[#allocation39_spill] sm:$0xff] }
 0x5da   :  { %7806 = vtanh.f32 %v9301_v25 }
 0x5e4   :  { %v7807_v3 = vpop.eup %7806 }
 0x5e5   :  { %v9304_v1 = vmul.f32 %v7807_v3, %v2162_v46  ;;  %v11027_v46 = vld [vmem:[#allocation45_spill] sm:$0xff]  ;;  %v11028_v3 = vld [vmem:[#allocation42_spill] sm:$0xff] }
 0x5e7   :  { %2230 = vmatmul.mubr.f32.vlgmr.msra.gmra.mrb[10].mxu0 %v9304_v1  ;;  %2301 = vmatmul.mubr.f32.vlgmr.msra.gmra.mrb[18].mxu1 %v9304_v1 }
 0x5e8   :  { %6073 = vmatpush1.bf16.msra.mxu0 %v8335_v52  ;;  %6137 = vmatpush1.bf16.msra.mxu1 %v8352_v11 }
 0x5e9   :  { %6075 = vmatprep.subr.bf16.mxu0 %v8340_v63  ;;  %6139 = vmatprep.subr.bf16.mxu1 %v8356_v14 }
 0x5ec   :  { %6077 = vmatpush1.bf16.msra.mxu0 %v8345_v2  ;;  %6141 = vmatpush1.bf16.msra.mxu1 %v8366_v26 }
 0x5ed   :  { %6079 = vmatprep.subr.bf16.mxu0 %v8348_v8  ;;  %6143 = vmatprep.subr.bf16.mxu1 %v8370_v27 }
 0x5f0   :  { %6081 = vmatpush1.bf16.msra.mxu0 %v8358_v17  ;;  %6145 = vmatpush1.bf16.msra.mxu1 %v8379_v38 }
 0x5f1   :  { %6083 = vmatprep.subr.bf16.mxu0 %v8361_v21  ;;  %6147 = vmatprep.subr.bf16.mxu1 %v8383_v39 }
 0x5f4   :  { %6085 = vmatpush1.bf16.msra.mxu0 %v8372_v30  ;;  %6149 = vmatpush1.bf16.msra.mxu1 %v8391_v51 }
 0x5f5   :  { %6087 = vmatprep.subr.bf16.mxu0 %v8375_v33  ;;  %6151 = vmatprep.subr.bf16.mxu1 %v8395_v53 }
 0x5f8   :  { %6089 = vmatpush1.bf16.msra.mxu0 %v8385_v42  ;;  %6153 = vmatpush1.bf16.msra.mxu1 %v8403_v5 }
 0x5f9   :  { %6091 = vmatprep.subr.bf16.mxu0 %v8388_v45  ;;  %6155 = vmatprep.subr.bf16.mxu1 %v8407_v6 }
 0x5fc   :  { %6093 = vmatpush1.bf16.msra.mxu0 %v8397_v56  ;;  %6157 = vmatpush1.bf16.msra.mxu1 %v8415_v23 }
 0x5fd   :  { %6095 = vmatprep.subr.bf16.mxu0 %v8400_v59  ;;  %6159 = vmatprep.subr.bf16.mxu1 %v8419_v24 }
 0x600   :  { %6097 = vmatpush1.bf16.msra.mxu0 %v8409_v10  ;;  %6161 = vmatpush1.bf16.msra.mxu1 %v8427_v41 }
 0x601   :  { %6099 = vmatprep.subr.bf16.mxu0 %v8412_v15  ;;  %6163 = vmatprep.subr.bf16.mxu1 %v8431_v43 }
 0x604   :  { %6101 = vmatpush1.bf16.msra.mxu0 %v8421_v29  ;;  %6165 = vmatpush1.bf16.msra.mxu1 %v8439_v61 }
 0x605   :  { %6103 = vmatprep.subr.bf16.mxu0 %v8424_v34  ;;  %6167 = vmatprep.subr.bf16.mxu1 %v8443_v62 }
 0x608   :  { %6105 = vmatpush1.bf16.msra.mxu0 %v8433_v47  ;;  %6169 = vmatpush1.bf16.msra.mxu1 %v8451_v28 }
 0x609   :  { %6107 = vmatprep.subr.bf16.mxu0 %v8436_v54  ;;  %6171 = vmatprep.subr.bf16.mxu1 %v8455_v32 }
 0x60c   :  { %6109 = vmatpush1.bf16.msra.mxu0 %v8445_v9  ;;  %6173 = vmatpush1.bf16.msra.mxu1 %v10753_v16 }
 0x60d   :  { %6111 = vmatprep.subr.bf16.mxu0 %v10754_v55  ;;  %6175 = vmatprep.subr.bf16.mxu1 %v10885_v57 }
 0x610   :  { %6113 = vmatpush1.bf16.msra.mxu0 %v10886_v60  ;;  %6177 = vmatpush1.bf16.msra.mxu1 %v11013_v19 }
 0x611   :  { %6115 = vmatprep.subr.bf16.mxu0 %v11014_v49  ;;  %6179 = vmatprep.subr.bf16.mxu1 %v11015_v48 }
 0x614   :  { %6117 = vmatpush1.bf16.msra.mxu0 %v11016_v22  ;;  %6181 = vmatpush1.bf16.msra.mxu1 %v11017_v12  ;;  %v11036_v12 = vld [vmem:[#allocation28_spill] sm:$0xff] }
 0x615   :  { %6119 = vmatprep.subr.bf16.mxu0 %v11018_v35  ;;  %6183 = vmatprep.subr.bf16.mxu1 %v11019_v50  ;;  %v11029_v35 = vld [vmem:[#allocation47_spill] sm:$0xff] }
 0x616   :  { %v11030_v50 = vld [vmem:[#allocation43_spill] sm:$0xff] }
 0x618   :  { %6121 = vmatpush1.bf16.msra.mxu0 %v11020_v13  ;;  %6185 = vmatpush1.bf16.msra.mxu1 %v11021_v44  ;;  %v11031_v13 = vld [vmem:[#allocation48_spill] sm:$0xff]  ;;  %v11032_v44 = vld [vmem:[#allocation46_spill] sm:$0xff] }
 0x619   :  { %6123 = vmatprep.subr.bf16.mxu0 %v11022_v7  ;;  %6187 = vmatprep.subr.bf16.mxu1 %v11023_v36  ;;  %v11033_v7 = vld [vmem:[#allocation49_spill] sm:$0xff]  ;;  %v11034_v36 = vld [vmem:[#allocation50_spill] sm:$0xff] }
 0x61c   :  { %6125 = vmatpush1.bf16.msra.mxu0 %v11024_v0  ;;  %6189 = vmatpush1.bf16.msra.mxu1 %v11025_v37  ;;  %v11035_v0 = vld [vmem:[#allocation51_spill] sm:$0xff] }
 0x61d   :  { %6127 = vmatprep.subr.bf16.mxu0 %v11026_v4  ;;  %6191 = vmatprep.subr.bf16.mxu1 %v11027_v46 }
 0x620   :  { %6129 = vmatpush1.bf16.msra.mxu0 %v11028_v3  ;;  %6193 = vmatpush1.bf16.msra.mxu1 %v11029_v35 }
 0x621   :  { %6131 = vmatprep.subr.bf16.mxu0 %v11030_v50  ;;  %6195 = vmatprep.subr.bf16.mxu1 %v11031_v13  ;;  %v11037_v13 = vld [vmem:[#allocation152_spill] sm:$0xff] }
 0x624   :  { %6133 = vmatpush1.bf16.msra.mxu0 %v11032_v44  ;;  %6197 = vmatpush1.bf16.msra.mxu1 %v11033_v7 }
 0x625   :  { %6199 = vmatprep.subr.bf16.mxu0 %v11034_v36  ;;  %6263 = vmatprep.subr.bf16.mxu1 %v11035_v0 }
 0x6ba   :  { %v2231_v37 = vpop.f32.mrb[10].mxu0  ;;  %v2302_v4 = vpop.f32.mrb[18].mxu1 }
 0x6bb   :  { %v2307_v46 = vadd.f32 %v2231_v37, %v11036_v12  ;;  %v2233_v22 = vpop.f32.mrb[11].mxu0  ;;  %v2304_v3 = vpop.f32.mrb[19].mxu1  ;;  %v2309_v44 = vadd.f32 %v2302_v4, %v8981_v31 }
 0x6bc   :  { %v2308_v35 = vadd.f32 %v2233_v22, %v8975_v58  ;;  %v2310_v7 = vadd.f32 %v2304_v3, %v11037_v13  ;;  %v11042_v3 = vld [vmem:[#allocation53_spill] sm:$0xff] }
 0x6bd   :  { %v5015_v48 = vmul.f32 -1.442695, %v2307_v46  ;;  %v5017_v49 = vmul.f32 -1.442695, %v2309_v44 }
 0x6be   :  { %v5016_v50 = vmul.f32 -1.442695, %v2308_v35 }
 0x6bf   :  { %7808 = vpow2.f32 %v5015_v48 }
 0x6c0   :  { %7810 = vpow2.f32 %v5016_v50  ;;  %v11038_v50 = vld [vmem:[#allocation29_spill] sm:$0xff] }
 0x6c1   :  { %7812 = vtanh.f32 %v2310_v7 }
 0x6c2   :  { %7814 = vpow2.f32 %v5017_v49 }
 0x6c9   :  { %v7809_v36 = vpop.eup %7808 }
 0x6ca   :  { %v2320_v19 = vadd.f32 1.0, %v7809_v36  ;;  %v7811_v0 = vpop.eup %7810  ;;  %v11039_v36 = vld [vmem:[#allocation154_spill] sm:$0xff] }
 0x6cb   :  { %v2321_v37 = vadd.f32 1.0, %v7811_v0  ;;  %v7813_v12 = vpop.eup %7812  ;;  %v4821_v49 = vrot.slane %v11039_v36, 6  ;;  %v11051_v36 = vld [vmem:[#allocation61_spill] sm:$0xff] }
 0x6cc   :  { %7816 = vrcp.f32 %v2320_v19  ;;  %v7815_v60 = vpop.eup %7814 }
 0x6cd   :  { %7818 = vrcp.f32 %v2321_v37  ;;  %v2322_v48 = vadd.f32 1.0, %v7815_v60  ;;  %v11040_v60 = vld [vmem:[#allocation153_spill] sm:$0xff] }
 0x6cf   :  { %7820 = vrcp.f32 %v2322_v48  ;;  %v11047_v48 = vld [vmem:[#allocation57_spill] sm:$0xff] }
 0x6d6   :  { %v7817_v22 = vpop.eup %7816 }
 0x6d7   :  { %v2331_v46 = vmul.f32 %v7817_v22, %v7813_v12  ;;  %v7819_v35 = vpop.eup %7818  ;;  %v11041_v12 = vld [vmem:[#allocation52_spill] sm:$0xff]  ;;  %v11044_v22 = vld [vmem:[#allocation54_spill] sm:$0xff] }
 0x6d8   :  { %v2330_v58 = vmul.f32 %v7819_v35, %v11038_v50  ;;  %v11046_v35 = vld [vmem:[#allocation56_spill] sm:$0xff]  ;;  %v11048_v50 = vld [vmem:[#allocation58_spill] sm:$0xff] }
 0x6d9   :  { %v7821_v44 = vpop.eup %7820 }
 0x6da   :  { %v9377_v4 = vadd.f32 %v2331_v46, %v2330_v58  ;;  %v4839_v58 = vsel %vm4838_vm1, %v11040_v60, %v4821_v49  ;;  %v11045_v46 = vld [vmem:[#allocation55_spill] sm:$0xff]  ;;  %v11052_v49 = vld [vmem:[#allocation62_spill] sm:$0xff]  ;;  %v11055_v60 = vld [vmem:[#allocation65_spill] sm:$0xff] }
 0x6dc   :  { %7822 = vtanh.f32 %v9377_v4 }
 0x6e6   :  { %v7823_v7 = vpop.eup %7822 }
 0x6e7   :  { %v2334_v19 = vmul.f32 %v7823_v7, %v7821_v44  ;;  %v11049_v44 = vld [vmem:[#allocation59_spill] sm:$0xff]  ;;  %v11050_v7 = vld [vmem:[#allocation60_spill] sm:$0xff] }
 0x6e9   :  { %2399 = vmatprep.mubr.f32.mxu0 %v2334_v19  ;;  %2470 = vmatprep.mubr.f32.mxu1 %v2334_v19  ;;  %v4824_v0 = vrot.slane %v2334_v19, 4 }
 0x6ea   :  { %2400 = vmatmul.mubr.f32.vlgmr.msra.gmra.mrb[12].mxu0 %v9304_v1  ;;  %2471 = vmatmul.mubr.f32.vlgmr.msra.gmra.mrb[20].mxu1 %v9304_v1 }
 0x6eb   :  { %6201 = vmatpush1.bf16.msra.mxu0 %v11041_v12  ;;  %6265 = vmatpush1.bf16.msra.mxu1 %v11042_v3  ;;  %v9388_v37 = vsel %vm4840_vm2, %v4839_v58, %v4824_v0  ;;  %v11053_v0 = vld [vmem:[#allocation63_spill] sm:$0xff]  ;;  %v11056_v58 = vld [vmem:[#allocation66_spill] sm:$0xff] }
 0x6ec   :  { %11043 = vst [vmem:[#allocation146_spill] sm:$0xff] %v9388_v37  ;;  %2541 = vmatprep.mubr.f32.mxu0 %v2334_v19  ;;  %2612 = vmatprep.mubr.f32.mxu1 %v2334_v19  ;;  %v11054_v19 = vld [vmem:[#allocation64_spill] sm:$0xff] }
 0x6ed   :  { %6203 = vmatprep.subr.bf16.mxu0 %v11044_v22  ;;  %6267 = vmatprep.subr.bf16.mxu1 %v11045_v46 }
 0x6ef   :  { %6205 = vmatpush1.bf16.msra.mxu0 %v11046_v35  ;;  %6269 = vmatpush1.bf16.msra.mxu1 %v11047_v48  ;;  %v11057_v35 = vld [vmem:[#allocation67_spill] sm:$0xff]  ;;  %v11058_v48 = vld [vmem:[#allocation68_spill] sm:$0xff] }
 0x6f0   :  { %6207 = vmatprep.subr.bf16.mxu0 %v11048_v50  ;;  %6271 = vmatprep.subr.bf16.mxu1 %v11049_v44  ;;  %v11059_v50 = vld [vmem:[#allocation69_spill] sm:$0xff]  ;;  %v11060_v44 = vld [vmem:[#allocation70_spill] sm:$0xff] }
 0x6f3   :  { %6209 = vmatpush1.bf16.msra.mxu0 %v11050_v7  ;;  %6273 = vmatpush1.bf16.msra.mxu1 %v11051_v36  ;;  %v11061_v7 = vld [vmem:[#allocation71_spill] sm:$0xff]  ;;  %v11062_v36 = vld [vmem:[#allocation72_spill] sm:$0xff] }
 0x6f4   :  { %6211 = vmatprep.subr.bf16.mxu0 %v11052_v49  ;;  %6275 = vmatprep.subr.bf16.mxu1 %v11053_v0  ;;  %v11063_v49 = vld [vmem:[#allocation73_spill] sm:$0xff]  ;;  %v11064_v0 = vld [vmem:[#allocation74_spill] sm:$0xff] }
 0x6f7   :  { %6213 = vmatpush1.bf16.msra.mxu0 %v11054_v19  ;;  %6277 = vmatpush1.bf16.msra.mxu1 %v11055_v60  ;;  %v11065_v19 = vld [vmem:[#allocation75_spill] sm:$0xff]  ;;  %v11066_v60 = vld [vmem:[#allocation76_spill] sm:$0xff] }
 0x6f8   :  { %6215 = vmatprep.subr.bf16.mxu0 %v11056_v58  ;;  %6279 = vmatprep.subr.bf16.mxu1 %v11057_v35  ;;  %v11067_v58 = vld [vmem:[#allocation77_spill] sm:$0xff]  ;;  %v11068_v35 = vld [vmem:[#allocation78_spill] sm:$0xff] }
 0x6fb   :  { %6217 = vmatpush1.bf16.msra.mxu0 %v11058_v48  ;;  %6281 = vmatpush1.bf16.msra.mxu1 %v11059_v50  ;;  %v11069_v48 = vld [vmem:[#allocation79_spill] sm:$0xff]  ;;  %v11070_v50 = vld [vmem:[#allocation80_spill] sm:$0xff] }
 0x6fc   :  { %6219 = vmatprep.subr.bf16.mxu0 %v11060_v44  ;;  %6283 = vmatprep.subr.bf16.mxu1 %v11061_v7  ;;  %v11071_v44 = vld [vmem:[#allocation81_spill] sm:$0xff]  ;;  %v11072_v7 = vld [vmem:[#allocation82_spill] sm:$0xff] }
 0x6ff   :  { %6221 = vmatpush1.bf16.msra.mxu0 %v11062_v36  ;;  %6285 = vmatpush1.bf16.msra.mxu1 %v11063_v49  ;;  %v11073_v36 = vld [vmem:[#allocation83_spill] sm:$0xff]  ;;  %v11074_v49 = vld [vmem:[#allocation84_spill] sm:$0xff] }
 0x700   :  { %6223 = vmatprep.subr.bf16.mxu0 %v11064_v0  ;;  %6287 = vmatprep.subr.bf16.mxu1 %v11065_v19  ;;  %v11075_v0 = vld [vmem:[#allocation85_spill] sm:$0xff]  ;;  %v11076_v19 = vld [vmem:[#allocation86_spill] sm:$0xff] }
 0x703   :  { %6225 = vmatpush1.bf16.msra.mxu0 %v11066_v60  ;;  %6289 = vmatpush1.bf16.msra.mxu1 %v11067_v58  ;;  %v11077_v60 = vld [vmem:[#allocation87_spill] sm:$0xff]  ;;  %v11078_v58 = vld [vmem:[#allocation88_spill] sm:$0xff] }
 0x704   :  { %6227 = vmatprep.subr.bf16.mxu0 %v11068_v35  ;;  %6291 = vmatprep.subr.bf16.mxu1 %v11069_v48  ;;  %v11079_v35 = vld [vmem:[#allocation89_spill] sm:$0xff]  ;;  %v11080_v48 = vld [vmem:[#allocation90_spill] sm:$0xff] }
 0x707   :  { %6229 = vmatpush1.bf16.msra.mxu0 %v11070_v50  ;;  %6293 = vmatpush1.bf16.msra.mxu1 %v11071_v44  ;;  %v11081_v50 = vld [vmem:[#allocation91_spill] sm:$0xff]  ;;  %v11082_v44 = vld [vmem:[#allocation92_spill] sm:$0xff] }
 0x708   :  { %6231 = vmatprep.subr.bf16.mxu0 %v11072_v7  ;;  %6295 = vmatprep.subr.bf16.mxu1 %v11073_v36  ;;  %v11083_v7 = vld [vmem:[#allocation93_spill] sm:$0xff]  ;;  %v11084_v36 = vld [vmem:[#allocation94_spill] sm:$0xff] }
 0x70b   :  { %6233 = vmatpush1.bf16.msra.mxu0 %v11074_v49  ;;  %6297 = vmatpush1.bf16.msra.mxu1 %v11075_v0  ;;  %v11085_v49 = vld [vmem:[#allocation95_spill] sm:$0xff]  ;;  %v11086_v0 = vld [vmem:[#allocation96_spill] sm:$0xff] }
 0x70c   :  { %6235 = vmatprep.subr.bf16.mxu0 %v11076_v19  ;;  %6299 = vmatprep.subr.bf16.mxu1 %v11077_v60  ;;  %v11087_v19 = vld [vmem:[#allocation97_spill] sm:$0xff]  ;;  %v11088_v60 = vld [vmem:[#allocation98_spill] sm:$0xff] }
 0x70f   :  { %6237 = vmatpush1.bf16.msra.mxu0 %v11078_v58  ;;  %6301 = vmatpush1.bf16.msra.mxu1 %v11079_v35  ;;  %v11089_v58 = vld [vmem:[#allocation99_spill] sm:$0xff]  ;;  %v11090_v35 = vld [vmem:[#allocation100_spill] sm:$0xff] }
 0x710   :  { %6239 = vmatprep.subr.bf16.mxu0 %v11080_v48  ;;  %6303 = vmatprep.subr.bf16.mxu1 %v11081_v50  ;;  %v11091_v48 = vld [vmem:[#allocation101_spill] sm:$0xff]  ;;  %v11092_v50 = vld [vmem:[#allocation102_spill] sm:$0xff] }
 0x713   :  { %6241 = vmatpush1.bf16.msra.mxu0 %v11082_v44  ;;  %6305 = vmatpush1.bf16.msra.mxu1 %v11083_v7  ;;  %v11093_v44 = vld [vmem:[#allocation103_spill] sm:$0xff]  ;;  %v11094_v7 = vld [vmem:[#allocation104_spill] sm:$0xff] }
 0x714   :  { %6243 = vmatprep.subr.bf16.mxu0 %v11084_v36  ;;  %6307 = vmatprep.subr.bf16.mxu1 %v11085_v49  ;;  %v11095_v36 = vld [vmem:[#allocation105_spill] sm:$0xff]  ;;  %v11096_v49 = vld [vmem:[#allocation106_spill] sm:$0xff] }
 0x717   :  { %6245 = vmatpush1.bf16.msra.mxu0 %v11086_v0  ;;  %6309 = vmatpush1.bf16.msra.mxu1 %v11087_v19  ;;  %v11097_v0 = vld [vmem:[#allocation107_spill] sm:$0xff]  ;;  %v11098_v19 = vld [vmem:[#allocation108_spill] sm:$0xff] }
 0x718   :  { %6247 = vmatprep.subr.bf16.mxu0 %v11088_v60  ;;  %6311 = vmatprep.subr.bf16.mxu1 %v11089_v58  ;;  %v11099_v60 = vld [vmem:[#allocation109_spill] sm:$0xff]  ;;  %v11100_v58 = vld [vmem:[#allocation110_spill] sm:$0xff] }
 0x71b   :  { %6249 = vmatpush1.bf16.msra.mxu0 %v11090_v35  ;;  %6313 = vmatpush1.bf16.msra.mxu1 %v11091_v48  ;;  %v11101_v35 = vld [vmem:[#allocation111_spill] sm:$0xff]  ;;  %v11102_v48 = vld [vmem:[#allocation112_spill] sm:$0xff] }
 0x71c   :  { %6251 = vmatprep.subr.bf16.mxu0 %v11092_v50  ;;  %6315 = vmatprep.subr.bf16.mxu1 %v11093_v44  ;;  %v11103_v50 = vld [vmem:[#allocation113_spill] sm:$0xff]  ;;  %v11104_v44 = vld [vmem:[#allocation114_spill] sm:$0xff] }
 0x71f   :  { %6253 = vmatpush1.bf16.msra.mxu0 %v11094_v7  ;;  %6317 = vmatpush1.bf16.msra.mxu1 %v11095_v36  ;;  %v11105_v7 = vld [vmem:[#allocation115_spill] sm:$0xff] }
 0x720   :  { %6255 = vmatprep.subr.bf16.mxu0 %v11096_v49  ;;  %6319 = vmatprep.subr.bf16.mxu1 %v11097_v0  ;;  %v11106_v0 = vld [vmem:[#allocation116_spill] sm:$0xff]  ;;  %v11120_v49 = vld [vmem:[#allocation129_spill] sm:$0xff] }
 0x723   :  { %6257 = vmatpush1.bf16.msra.mxu0 %v11098_v19  ;;  %6321 = vmatpush1.bf16.msra.mxu1 %v11099_v60  ;;  %v11107_v19 = vld [vmem:[#allocation117_spill] sm:$0xff]  ;;  %v11108_v60 = vld [vmem:[#allocation118_spill] sm:$0xff] }
 0x724   :  { %6259 = vmatprep.subr.bf16.mxu0 %v11100_v58  ;;  %6323 = vmatprep.subr.bf16.mxu1 %v11101_v35  ;;  %v11109_v58 = vld [vmem:[#allocation119_spill] sm:$0xff]  ;;  %v11110_v35 = vmov 0.0  }
 0x727   :  { %6261 = vmatpush1.bf16.msra.mxu0 %v11102_v48  ;;  %6325 = vmatpush1.bf16.msra.mxu1 %v11103_v50  ;;  %v11111_v50 = vld [vmem:[#allocation120_spill] sm:$0xff]  ;;  %v11114_v48 = vld [vmem:[#allocation123_spill] sm:$0xff] }
 0x728   :  { %6327 = vmatprep.subr.bf16.mxu0 %v11104_v44  ;;  %6359 = vmatprep.subr.bf16.mxu1 %v11105_v7  ;;  %v11112_v44 = vld [vmem:[#allocation121_spill] sm:$0xff]  ;;  %v11113_v7 = vld [vmem:[#allocation122_spill] sm:$0xff] }
 0x72a   :  { %2542 = vmatmul.mubr.f32.vlgmr.msra.gmra.mrb[14].mxu0 %v9304_v1  ;;  %2613 = vmatmul.mubr.f32.vlgmr.msra.gmra.mrb[22].mxu1 %v9304_v1  ;;  %v11115_v1 = vld [vmem:[#allocation124_spill] sm:$0xff] }
 0x72b   :  { %6329 = vmatpush1.bf16.msra.mxu0 %v11106_v0  ;;  %6361 = vmatpush1.bf16.msra.mxu1 %v11107_v19  ;;  %v11116_v0 = vld [vmem:[#allocation125_spill] sm:$0xff]  ;;  %v11117_v19 = vld [vmem:[#allocation126_spill] sm:$0xff] }
 0x72c   :  { %6331 = vmatprep.subr.bf16.mxu0 %v11108_v60  ;;  %6363 = vmatprep.subr.bf16.mxu1 %v11109_v58  ;;  %v11118_v60 = vld [vmem:[#allocation127_spill] sm:$0xff]  ;;  %v11119_v58 = vld [vmem:[#allocation128_spill] sm:$0xff] }
 0x72d   :  { %2726 = vmatprep.mubr.f32.mxu0 %v11110_v35  ;;  %2797 = vmatprep.mubr.f32.mxu1 %v11110_v35  ;;  %v11121_v35 = vld [vmem:[#allocation130_spill] sm:$0xff] }
 0x72f   :  { %6333 = vmatpush1.bf16.msra.mxu0 %v11111_v50  ;;  %6365 = vmatpush1.bf16.msra.mxu1 %v11112_v44  ;;  %v11122_v50 = vld [vmem:[#allocation131_spill] sm:$0xff]  ;;  %v11123_v44 = vld [vmem:[#allocation132_spill] sm:$0xff] }
 0x730   :  { %6335 = vmatprep.subr.bf16.mxu0 %v11113_v7  ;;  %6367 = vmatprep.subr.bf16.mxu1 %v11114_v48  ;;  %v11124_v7 = vld [vmem:[#allocation133_spill] sm:$0xff]  ;;  %v11125_v48 = vld [vmem:[#allocation134_spill] sm:$0xff] }
 0x733   :  { %6337 = vmatpush1.bf16.msra.mxu0 %v11115_v1  ;;  %6369 = vmatpush1.bf16.msra.mxu1 %v11116_v0  ;;  %v11126_v1 = vld [vmem:[#allocation135_spill] sm:$0xff]  ;;  %v11127_v0 = vld [vmem:[#allocation136_spill] sm:$0xff] }
 0x734   :  { %6339 = vmatprep.subr.bf16.mxu0 %v11117_v19  ;;  %6371 = vmatprep.subr.bf16.mxu1 %v11118_v60  ;;  %v11128_v19 = vld [vmem:[#allocation137_spill] sm:$0xff]  ;;  %v11129_v60 = vld [vmem:[#allocation138_spill] sm:$0xff] }
 0x737   :  { %6341 = vmatpush1.bf16.msra.mxu0 %v11119_v58  ;;  %6373 = vmatpush1.bf16.msra.mxu1 %v11120_v49  ;;  %v11130_v58 = vld [vmem:[#allocation139_spill] sm:$0xff]  ;;  %v11131_v49 = vld [vmem:[#allocation140_spill] sm:$0xff] }
 0x738   :  { %6343 = vmatprep.subr.bf16.mxu0 %v11121_v35  ;;  %6375 = vmatprep.subr.bf16.mxu1 %v11122_v50  ;;  %v11132_v35 = vld [vmem:[#allocation141_spill] sm:$0xff]  ;;  %v11133_v50 = vld [vmem:[#allocation142_spill] sm:$0xff] }
 0x73b   :  { %6345 = vmatpush1.bf16.msra.mxu0 %v11123_v44  ;;  %6377 = vmatpush1.bf16.msra.mxu1 %v11124_v7  ;;  %v11134_v44 = vld [vmem:[#allocation143_spill] sm:$0xff]  ;;  %v11135_v7 = vld [vmem:[#allocation144_spill] sm:$0xff] }
 0x73c   :  { %6347 = vmatprep.subr.bf16.mxu0 %v11125_v48  ;;  %6379 = vmatprep.subr.bf16.mxu1 %v11126_v1  ;;  %v11136_v48 = vld [vmem:[#allocation145_spill] sm:$0xff]  ;;  %v11137_v1 = vld [vmem:[#allocation23_spill] sm:$0xff] }
 0x73f   :  { %6349 = vmatpush1.bf16.msra.mxu0 %v11127_v0  ;;  %6381 = vmatpush1.bf16.msra.mxu1 %v11128_v19  ;;  %v11138_v0 = vld [vmem:[#allocation24_spill] sm:$0xff] }
 0x740   :  { %6351 = vmatprep.subr.bf16.mxu0 %v11129_v60  ;;  %6383 = vmatprep.subr.bf16.mxu1 %v11130_v58 }
 0x743   :  { %6353 = vmatpush1.bf16.msra.mxu0 %v11131_v49  ;;  %6385 = vmatpush1.bf16.msra.mxu1 %v11132_v35 }
 0x744   :  { %6355 = vmatprep.subr.bf16.mxu0 %v11133_v50  ;;  %6387 = vmatprep.subr.bf16.mxu1 %v11134_v44 }
 0x747   :  { %6357 = vmatpush1.bf16.msra.mxu0 %v11135_v7  ;;  %6389 = vmatpush1.bf16.msra.mxu1 %v11136_v48  ;;  %v11139_v7 = vcombine.high %v11010_v40, %v11011_v20 }
 0x748   :  { %6391 = vmatprep.subr.bf16.mxu0 %v11137_v1  ;;  %6455 = vmatprep.subr.bf16.mxu1 %v11138_v0 }
 0x7bd   :  { %v2401_v19 = vpop.f32.mrb[12].mxu0  ;;  %v2472_v60 = vpop.f32.mrb[20].mxu1 }
 0x7be   :  { %v2403_v36 = vpop.f32.mrb[13].mxu0  ;;  %v2474_v58 = vpop.f32.mrb[21].mxu1 }
 0x7bf   :  { %v2623_v46 = vcombine.low %v2401_v19, %v2403_v36  ;;  %v2624_v49 = vcombine.low %v2472_v60, %v2474_v58  ;;  %v11151_v58 = vld [vmem:[#allocation41_spill] sm:$0xff] }
 0x7c1   :  { %v2631_v35 = vrot.slane %v2623_v46, %v8327_v18  ;;  %v2638_v50 = vrot.slane %v2624_v49, %v8327_v18  ;;  %v11149_v49 = vld [vmem:[#allocation40_spill] sm:$0xff] }
 0x7c3   :  { %v2639_v22 = vcombine.low %v2631_v35, %v2638_v50  ;;  %v11146_v50 = vld [vmem:[#allocation31_spill] sm:$0xff] }
 0x7c5   :  { %v2641_v44 = vadd.f32 %v2639_v22, %v11139_v7  ;;  %v11144_v22 = vld [vmem:[#allocation30_spill] sm:$0xff] }
 0x7c6   :  { %v11148_v7 = vld [vmem:[#allocation34_spill] sm:$0xff] }
 0x7c7   :  { %v5018_v48 = vmul.f32 -1.442695, %v2641_v44  ;;  %v2649_v0 = vrot.slane %v2641_v44, 6  ;;  %v11147_v44 = vld [vmem:[#allocation37_spill] sm:$0xff] }
 0x7c9   :  { %7824 = vpow2.f32 %v5018_v48  ;;  %v11145_v48 = vld [vmem:[#allocation36_spill] sm:$0xff] }
 0x7d3   :  { %v7825_v1 = vpop.eup %7824 }
 0x7d4   :  { %v2645_v37 = vadd.f32 1.0, %v7825_v1  ;;  %v11152_v1 = vld [vmem:[#allocation38_spill] sm:$0xff] }
 0x7d6   :  { %7826 = vrcp.f32 %v2645_v37  ;;  %v11143_v37 = vld [vmem:[#allocation33_spill] sm:$0xff] }
 0x7d7   :  { %7828 = vtanh.f32 %v2649_v0  ;;  %v11150_v0 = vld [vmem:[#allocation35_spill] sm:$0xff] }
 0x7e0   :  { %v7827_v3 = vpop.eup %7826 }
 0x7e1   :  { %v2653_v12 = vrot.slane %v7827_v3, 2  ;;  %v7829_v36 = vpop.eup %7828  ;;  %v2659_v35 = vrot.slane %v7827_v3, 4 }
 0x7e2   :  { %v2656_v46 = vmul.f32 %v7829_v36, %v7827_v3  ;;  %v11142_v3 = vld [vmem:[#allocation27_spill] sm:$0xff]  ;;  %v11153_v36 = vld [vmem:[#allocation44_spill] sm:$0xff] }
 0x7e3   :  { %v2655_v19 = vmul.f32 %v2653_v12, %v9301_v25  ;;  %v11140_v25 = vld [vmem:[#allocation26_spill] sm:$0xff]  ;;  %v11141_v12 = vld [vmem:[#allocation32_spill] sm:$0xff] }
 0x7e5   :  { %v9494_v60 = vadd.f32 %v2656_v46, %v2655_v19  ;;  %v11154_v19 = vld [vmem:[#allocation39_spill] sm:$0xff]  ;;  %v11155_v46 = vld [vmem:[#allocation45_spill] sm:$0xff] }
 0x7e7   :  { %7830 = vtanh.f32 %v9494_v60 }
 0x7f1   :  { %v7831_v20 = vpop.eup %7830 }
 0x7f2   :  { %v9497_v40 = vmul.f32 %v7831_v20, %v2659_v35  ;;  %v11156_v35 = vld [vmem:[#allocation42_spill] sm:$0xff]  ;;  %v11157_v20 = vld [vmem:[#allocation47_spill] sm:$0xff] }
 0x7f4   :  { %2727 = vmatmul.mubr.f32.vlgmr.msra.gmra.mrb[14].mxu0 %v9497_v40  ;;  %2798 = vmatmul.mubr.f32.vlgmr.msra.gmra.mrb[22].mxu1 %v9497_v40 }
 0x7f5   :  { %6393 = vmatpush1.bf16.msra.mxu0 %v8335_v52  ;;  %6457 = vmatpush1.bf16.msra.mxu1 %v8352_v11 }
 0x7f6   :  { %6395 = vmatprep.subr.bf16.mxu0 %v8340_v63  ;;  %6459 = vmatprep.subr.bf16.mxu1 %v8356_v14 }
 0x7f9   :  { %6397 = vmatpush1.bf16.msra.mxu0 %v8345_v2  ;;  %6461 = vmatpush1.bf16.msra.mxu1 %v8366_v26 }
 0x7fa   :  { %6399 = vmatprep.subr.bf16.mxu0 %v8348_v8  ;;  %6463 = vmatprep.subr.bf16.mxu1 %v8370_v27 }
 0x7fd   :  { %6401 = vmatpush1.bf16.msra.mxu0 %v8358_v17  ;;  %6465 = vmatpush1.bf16.msra.mxu1 %v8379_v38 }
 0x7fe   :  { %6403 = vmatprep.subr.bf16.mxu0 %v8361_v21  ;;  %6467 = vmatprep.subr.bf16.mxu1 %v8383_v39 }
 0x801   :  { %6405 = vmatpush1.bf16.msra.mxu0 %v8372_v30  ;;  %6469 = vmatpush1.bf16.msra.mxu1 %v8391_v51 }
 0x802   :  { %6407 = vmatprep.subr.bf16.mxu0 %v8375_v33  ;;  %6471 = vmatprep.subr.bf16.mxu1 %v8395_v53 }
 0x805   :  { %6409 = vmatpush1.bf16.msra.mxu0 %v8385_v42  ;;  %6473 = vmatpush1.bf16.msra.mxu1 %v8403_v5 }
 0x806   :  { %6411 = vmatprep.subr.bf16.mxu0 %v8388_v45  ;;  %6475 = vmatprep.subr.bf16.mxu1 %v8407_v6 }
 0x809   :  { %6413 = vmatpush1.bf16.msra.mxu0 %v8397_v56  ;;  %6477 = vmatpush1.bf16.msra.mxu1 %v8415_v23 }
 0x80a   :  { %6415 = vmatprep.subr.bf16.mxu0 %v8400_v59  ;;  %6479 = vmatprep.subr.bf16.mxu1 %v8419_v24 }
 0x80d   :  { %6417 = vmatpush1.bf16.msra.mxu0 %v8409_v10  ;;  %6481 = vmatpush1.bf16.msra.mxu1 %v8427_v41 }
 0x80e   :  { %6419 = vmatprep.subr.bf16.mxu0 %v8412_v15  ;;  %6483 = vmatprep.subr.bf16.mxu1 %v8431_v43 }
 0x811   :  { %6421 = vmatpush1.bf16.msra.mxu0 %v8421_v29  ;;  %6485 = vmatpush1.bf16.msra.mxu1 %v8439_v61 }
 0x812   :  { %6423 = vmatprep.subr.bf16.mxu0 %v8424_v34  ;;  %6487 = vmatprep.subr.bf16.mxu1 %v8443_v62 }
 0x815   :  { %6425 = vmatpush1.bf16.msra.mxu0 %v8433_v47  ;;  %6489 = vmatpush1.bf16.msra.mxu1 %v8451_v28 }
 0x816   :  { %6427 = vmatprep.subr.bf16.mxu0 %v8436_v54  ;;  %6491 = vmatprep.subr.bf16.mxu1 %v8455_v32 }
 0x819   :  { %6429 = vmatpush1.bf16.msra.mxu0 %v8445_v9  ;;  %6493 = vmatpush1.bf16.msra.mxu1 %v10753_v16 }
 0x81a   :  { %6431 = vmatprep.subr.bf16.mxu0 %v10754_v55  ;;  %6495 = vmatprep.subr.bf16.mxu1 %v10885_v57 }
 0x81d   :  { %6433 = vmatpush1.bf16.msra.mxu0 %v11140_v25  ;;  %6497 = vmatpush1.bf16.msra.mxu1 %v11141_v12 }
 0x81e   :  { %6435 = vmatprep.subr.bf16.mxu0 %v11142_v3  ;;  %6499 = vmatprep.subr.bf16.mxu1 %v11143_v37 }
 0x821   :  { %6437 = vmatpush1.bf16.msra.mxu0 %v11144_v22  ;;  %6501 = vmatpush1.bf16.msra.mxu1 %v11145_v48  ;;  %v11165_v22 = vld [vmem:[#allocation25_spill] sm:$0xff] }
 0x822   :  { %6439 = vmatprep.subr.bf16.mxu0 %v11146_v50  ;;  %6503 = vmatprep.subr.bf16.mxu1 %v11147_v44  ;;  %v11158_v44 = vld [vmem:[#allocation43_spill] sm:$0xff]  ;;  %v11164_v50 = vld [vmem:[#allocation28_spill] sm:$0xff] }
 0x825   :  { %6441 = vmatpush1.bf16.msra.mxu0 %v11148_v7  ;;  %6505 = vmatpush1.bf16.msra.mxu1 %v11149_v49  ;;  %v11159_v7 = vld [vmem:[#allocation48_spill] sm:$0xff]  ;;  %v11160_v49 = vld [vmem:[#allocation46_spill] sm:$0xff] }
 0x826   :  { %6443 = vmatprep.subr.bf16.mxu0 %v11150_v0  ;;  %6507 = vmatprep.subr.bf16.mxu1 %v11151_v58  ;;  %v11161_v0 = vld [vmem:[#allocation49_spill] sm:$0xff]  ;;  %v11162_v58 = vld [vmem:[#allocation50_spill] sm:$0xff] }
 0x829   :  { %6445 = vmatpush1.bf16.msra.mxu0 %v11152_v1  ;;  %6509 = vmatpush1.bf16.msra.mxu1 %v11153_v36  ;;  %v11163_v1 = vld [vmem:[#allocation51_spill] sm:$0xff] }
 0x82a   :  { %6447 = vmatprep.subr.bf16.mxu0 %v11154_v19  ;;  %6511 = vmatprep.subr.bf16.mxu1 %v11155_v46 }
 0x82d   :  { %6449 = vmatpush1.bf16.msra.mxu0 %v11156_v35  ;;  %6513 = vmatpush1.bf16.msra.mxu1 %v11157_v20 }
 0x82e   :  { %6451 = vmatprep.subr.bf16.mxu0 %v11158_v44  ;;  %6515 = vmatprep.subr.bf16.mxu1 %v11159_v7 }
 0x831   :  { %6453 = vmatpush1.bf16.msra.mxu0 %v11160_v49  ;;  %6517 = vmatpush1.bf16.msra.mxu1 %v11161_v0 }
 0x832   :  { %6519 = vmatprep.subr.bf16.mxu0 %v11162_v58  ;;  %6583 = vmatprep.subr.bf16.mxu1 %v11163_v1 }
 0x8c7   :  { %v2728_v36 = vpop.f32.mrb[14].mxu0  ;;  %v2799_v19 = vpop.f32.mrb[22].mxu1 }
 0x8c8   :  { %v2804_v46 = vadd.f32 %v2728_v36, %v11164_v50  ;;  %v2730_v48 = vpop.f32.mrb[15].mxu0  ;;  %v2801_v35 = vpop.f32.mrb[23].mxu1  ;;  %v2806_v49 = vadd.f32 %v2799_v19, %v8981_v31 }
 0x8c9   :  { %v2805_v20 = vadd.f32 %v2730_v48, %v11165_v22  ;;  %v2807_v0 = vadd.f32 %v2801_v35, %v11037_v13  ;;  %v11172_v35 = vld [vmem:[#allocation55_spill] sm:$0xff] }
 0x8ca   :  { %v5019_v37 = vmul.f32 -1.442695, %v2804_v46  ;;  %v5021_v7 = vmul.f32 -1.442695, %v2806_v49 }
 0x8cb   :  { %v5020_v44 = vmul.f32 -1.442695, %v2805_v20 }
 0x8cc   :  { %7832 = vpow2.f32 %v5019_v37 }
 0x8cd   :  { %7834 = vpow2.f32 %v5020_v44 }
 0x8ce   :  { %7836 = vtanh.f32 %v2807_v0 }
 0x8cf   :  { %7838 = vpow2.f32 %v5021_v7 }
 0x8d6   :  { %v7833_v58 = vpop.eup %7832 }
 0x8d7   :  { %v2817_v3 = vadd.f32 1.0, %v7833_v58  ;;  %v7835_v1 = vpop.eup %7834 }
 0x8d8   :  { %v2818_v36 = vadd.f32 1.0, %v7835_v1  ;;  %v7837_v50 = vpop.eup %7836  ;;  %v11171_v1 = vld [vmem:[#allocation54_spill] sm:$0xff] }
 0x8d9   :  { %7840 = vrcp.f32 %v2817_v3  ;;  %v7839_v12 = vpop.eup %7838 }
 0x8da   :  { %7842 = vrcp.f32 %v2818_v36  ;;  %v2819_v37 = vadd.f32 1.0, %v7839_v12  ;;  %v11168_v12 = vld [vmem:[#allocation53_spill] sm:$0xff]  ;;  %v11173_v36 = vld [vmem:[#allocation56_spill] sm:$0xff] }
 0x8dc   :  { %7844 = vrcp.f32 %v2819_v37  ;;  %v11177_v37 = vld [vmem:[#allocation60_spill] sm:$0xff] }
 0x8e3   :  { %v7841_v48 = vpop.eup %7840 }
 0x8e4   :  { %v2828_v46 = vmul.f32 %v7841_v48, %v7837_v50  ;;  %v7843_v20 = vpop.eup %7842  ;;  %v11167_v50 = vld [vmem:[#allocation52_spill] sm:$0xff]  ;;  %v11174_v48 = vld [vmem:[#allocation57_spill] sm:$0xff] }
 0x8e5   :  { %v2827_v44 = vmul.f32 %v7843_v20, %v9377_v4  ;;  %v11169_v4 = vld [vmem:[#allocation146_spill] sm:$0xff]  ;;  %v11176_v20 = vld [vmem:[#allocation59_spill] sm:$0xff] }
 0x8e6   :  { %v7845_v49 = vpop.eup %7844 }
 0x8e7   :  { %v9570_v19 = vadd.f32 %v2828_v46, %v2827_v44  ;;  %v11175_v46 = vld [vmem:[#allocation58_spill] sm:$0xff]  ;;  %v11178_v44 = vld [vmem:[#allocation61_spill] sm:$0xff] }
 0x8e9   :  { %11166 = vst [vmem:[#allocation147_spill] sm:$0xff] %v9570_v19  ;;  %7846 = vtanh.f32 %v9570_v19 }
 0x8f3   :  { %v7847_v0 = vpop.eup %7846 }
 0x8f4   :  { %v2831_v58 = vmul.f32 %v7847_v0, %v7845_v49  ;;  %v11179_v49 = vld [vmem:[#allocation62_spill] sm:$0xff]  ;;  %v11180_v0 = vld [vmem:[#allocation63_spill] sm:$0xff] }
 0x8f6   :  { %2896 = vmatprep.mubr.f32.mxu0 %v2831_v58  ;;  %2967 = vmatprep.mubr.f32.mxu1 %v2831_v58  ;;  %v4827_v3 = vrot.slane %v2831_v58, 2 }
 0x8f7   :  { %2897 = vmatmul.mubr.f32.vlgmr.msra.gmra.mrb[16].mxu0 %v9497_v40  ;;  %2968 = vmatmul.mubr.f32.vlgmr.msra.gmra.mrb[24].mxu1 %v9497_v40 }
 0x8f8   :  { %6521 = vmatpush1.bf16.msra.mxu0 %v11167_v50  ;;  %6585 = vmatpush1.bf16.msra.mxu1 %v11168_v12  ;;  %v9579_v7 = vsel %vm4842_vm3, %v11169_v4, %v4827_v3  ;;  %v11182_v3 = vld [vmem:[#allocation65_spill] sm:$0xff]  ;;  %v11183_v4 = vld [vmem:[#allocation66_spill] sm:$0xff] }
 0x8f9   :  { %11170 = vst [vmem:[#allocation29_spill] sm:$0xff] %v9579_v7  ;;  %3038 = vmatprep.mubr.f32.mxu0 %v2831_v58  ;;  %3109 = vmatprep.mubr.f32.mxu1 %v2831_v58  ;;  %v11181_v58 = vld [vmem:[#allocation64_spill] sm:$0xff]  ;;  %v11184_v7 = vld [vmem:[#allocation67_spill] sm:$0xff] }
 0x8fa   :  { %6523 = vmatprep.subr.bf16.mxu0 %v11171_v1  ;;  %6587 = vmatprep.subr.bf16.mxu1 %v11172_v35  ;;  %v11267_v1 = vld [vmem:[#allocation150_spill] sm:$0xff] }
 0x8fc   :  { %6525 = vmatpush1.bf16.msra.mxu0 %v11173_v36  ;;  %6589 = vmatpush1.bf16.msra.mxu1 %v11174_v48  ;;  %v11185_v48 = vld [vmem:[#allocation68_spill] sm:$0xff] }
 0x8fd   :  { %6527 = vmatprep.subr.bf16.mxu0 %v11175_v46  ;;  %6591 = vmatprep.subr.bf16.mxu1 %v11176_v20  ;;  %v11186_v46 = vld [vmem:[#allocation69_spill] sm:$0xff]  ;;  %v11187_v20 = vld [vmem:[#allocation70_spill] sm:$0xff] }
 0x900   :  { %6529 = vmatpush1.bf16.msra.mxu0 %v11177_v37  ;;  %6593 = vmatpush1.bf16.msra.mxu1 %v11178_v44  ;;  %v11188_v37 = vld [vmem:[#allocation71_spill] sm:$0xff]  ;;  %v11189_v44 = vld [vmem:[#allocation72_spill] sm:$0xff] }
 0x901   :  { %6531 = vmatprep.subr.bf16.mxu0 %v11179_v49  ;;  %6595 = vmatprep.subr.bf16.mxu1 %v11180_v0  ;;  %v11190_v49 = vld [vmem:[#allocation73_spill] sm:$0xff]  ;;  %v11191_v0 = vld [vmem:[#allocation74_spill] sm:$0xff] }
 0x904   :  { %6533 = vmatpush1.bf16.msra.mxu0 %v11181_v58  ;;  %6597 = vmatpush1.bf16.msra.mxu1 %v11182_v3  ;;  %v11192_v58 = vld [vmem:[#allocation75_spill] sm:$0xff]  ;;  %v11193_v3 = vld [vmem:[#allocation76_spill] sm:$0xff] }
 0x905   :  { %6535 = vmatprep.subr.bf16.mxu0 %v11183_v4  ;;  %6599 = vmatprep.subr.bf16.mxu1 %v11184_v7  ;;  %v11194_v4 = vld [vmem:[#allocation77_spill] sm:$0xff]  ;;  %v11195_v7 = vld [vmem:[#allocation78_spill] sm:$0xff] }
 0x908   :  { %6537 = vmatpush1.bf16.msra.mxu0 %v11185_v48  ;;  %6601 = vmatpush1.bf16.msra.mxu1 %v11186_v46  ;;  %v11196_v48 = vld [vmem:[#allocation79_spill] sm:$0xff]  ;;  %v11197_v46 = vld [vmem:[#allocation80_spill] sm:$0xff] }
 0x909   :  { %6539 = vmatprep.subr.bf16.mxu0 %v11187_v20  ;;  %6603 = vmatprep.subr.bf16.mxu1 %v11188_v37  ;;  %v11198_v20 = vld [vmem:[#allocation81_spill] sm:$0xff]  ;;  %v11199_v37 = vld [vmem:[#allocation82_spill] sm:$0xff] }
 0x90c   :  { %6541 = vmatpush1.bf16.msra.mxu0 %v11189_v44  ;;  %6605 = vmatpush1.bf16.msra.mxu1 %v11190_v49  ;;  %v11200_v44 = vld [vmem:[#allocation83_spill] sm:$0xff]  ;;  %v11201_v49 = vld [vmem:[#allocation84_spill] sm:$0xff] }
 0x90d   :  { %6543 = vmatprep.subr.bf16.mxu0 %v11191_v0  ;;  %6607 = vmatprep.subr.bf16.mxu1 %v11192_v58  ;;  %v11202_v0 = vld [vmem:[#allocation85_spill] sm:$0xff]  ;;  %v11203_v58 = vld [vmem:[#allocation86_spill] sm:$0xff] }
 0x910   :  { %6545 = vmatpush1.bf16.msra.mxu0 %v11193_v3  ;;  %6609 = vmatpush1.bf16.msra.mxu1 %v11194_v4  ;;  %v11204_v3 = vld [vmem:[#allocation87_spill] sm:$0xff]  ;;  %v11205_v4 = vld [vmem:[#allocation88_spill] sm:$0xff] }
 0x911   :  { %6547 = vmatprep.subr.bf16.mxu0 %v11195_v7  ;;  %6611 = vmatprep.subr.bf16.mxu1 %v11196_v48  ;;  %v11206_v7 = vld [vmem:[#allocation89_spill] sm:$0xff]  ;;  %v11207_v48 = vld [vmem:[#allocation90_spill] sm:$0xff] }
 0x914   :  { %6549 = vmatpush1.bf16.msra.mxu0 %v11197_v46  ;;  %6613 = vmatpush1.bf16.msra.mxu1 %v11198_v20  ;;  %v11208_v46 = vld [vmem:[#allocation91_spill] sm:$0xff]  ;;  %v11209_v20 = vld [vmem:[#allocation92_spill] sm:$0xff] }
 0x915   :  { %6551 = vmatprep.subr.bf16.mxu0 %v11199_v37  ;;  %6615 = vmatprep.subr.bf16.mxu1 %v11200_v44  ;;  %v11210_v37 = vld [vmem:[#allocation93_spill] sm:$0xff]  ;;  %v11211_v44 = vld [vmem:[#allocation94_spill] sm:$0xff] }
 0x918   :  { %6553 = vmatpush1.bf16.msra.mxu0 %v11201_v49  ;;  %6617 = vmatpush1.bf16.msra.mxu1 %v11202_v0  ;;  %v11212_v49 = vld [vmem:[#allocation95_spill] sm:$0xff]  ;;  %v11213_v0 = vld [vmem:[#allocation96_spill] sm:$0xff] }
 0x919   :  { %6555 = vmatprep.subr.bf16.mxu0 %v11203_v58  ;;  %6619 = vmatprep.subr.bf16.mxu1 %v11204_v3  ;;  %v11214_v58 = vld [vmem:[#allocation97_spill] sm:$0xff]  ;;  %v11215_v3 = vld [vmem:[#allocation98_spill] sm:$0xff] }
 0x91c   :  { %6557 = vmatpush1.bf16.msra.mxu0 %v11205_v4  ;;  %6621 = vmatpush1.bf16.msra.mxu1 %v11206_v7  ;;  %v11216_v4 = vld [vmem:[#allocation99_spill] sm:$0xff]  ;;  %v11217_v7 = vld [vmem:[#allocation100_spill] sm:$0xff] }
 0x91d   :  { %6559 = vmatprep.subr.bf16.mxu0 %v11207_v48  ;;  %6623 = vmatprep.subr.bf16.mxu1 %v11208_v46  ;;  %v11218_v48 = vld [vmem:[#allocation101_spill] sm:$0xff]  ;;  %v11219_v46 = vld [vmem:[#allocation102_spill] sm:$0xff] }
 0x920   :  { %6561 = vmatpush1.bf16.msra.mxu0 %v11209_v20  ;;  %6625 = vmatpush1.bf16.msra.mxu1 %v11210_v37  ;;  %v11220_v20 = vld [vmem:[#allocation103_spill] sm:$0xff]  ;;  %v11221_v37 = vld [vmem:[#allocation104_spill] sm:$0xff] }
 0x921   :  { %6563 = vmatprep.subr.bf16.mxu0 %v11211_v44  ;;  %6627 = vmatprep.subr.bf16.mxu1 %v11212_v49  ;;  %v11222_v44 = vld [vmem:[#allocation105_spill] sm:$0xff]  ;;  %v11223_v49 = vld [vmem:[#allocation106_spill] sm:$0xff] }
 0x924   :  { %6565 = vmatpush1.bf16.msra.mxu0 %v11213_v0  ;;  %6629 = vmatpush1.bf16.msra.mxu1 %v11214_v58  ;;  %v11224_v0 = vld [vmem:[#allocation107_spill] sm:$0xff]  ;;  %v11225_v58 = vld [vmem:[#allocation108_spill] sm:$0xff] }
 0x925   :  { %6567 = vmatprep.subr.bf16.mxu0 %v11215_v3  ;;  %6631 = vmatprep.subr.bf16.mxu1 %v11216_v4  ;;  %v11226_v3 = vld [vmem:[#allocation109_spill] sm:$0xff]  ;;  %v11227_v4 = vld [vmem:[#allocation110_spill] sm:$0xff] }
 0x928   :  { %6569 = vmatpush1.bf16.msra.mxu0 %v11217_v7  ;;  %6633 = vmatpush1.bf16.msra.mxu1 %v11218_v48  ;;  %v11228_v7 = vld [vmem:[#allocation111_spill] sm:$0xff]  ;;  %v11229_v48 = vld [vmem:[#allocation112_spill] sm:$0xff] }
 0x929   :  { %6571 = vmatprep.subr.bf16.mxu0 %v11219_v46  ;;  %6635 = vmatprep.subr.bf16.mxu1 %v11220_v20  ;;  %v11230_v46 = vld [vmem:[#allocation113_spill] sm:$0xff]  ;;  %v11231_v20 = vld [vmem:[#allocation114_spill] sm:$0xff] }
 0x92c   :  { %6573 = vmatpush1.bf16.msra.mxu0 %v11221_v37  ;;  %6637 = vmatpush1.bf16.msra.mxu1 %v11222_v44  ;;  %v11232_v37 = vld [vmem:[#allocation115_spill] sm:$0xff] }
 0x92d   :  { %6575 = vmatprep.subr.bf16.mxu0 %v11223_v49  ;;  %6639 = vmatprep.subr.bf16.mxu1 %v11224_v0  ;;  %v11233_v0 = vld [vmem:[#allocation116_spill] sm:$0xff]  ;;  %v11247_v49 = vld [vmem:[#allocation129_spill] sm:$0xff] }
 0x930   :  { %6577 = vmatpush1.bf16.msra.mxu0 %v11225_v58  ;;  %6641 = vmatpush1.bf16.msra.mxu1 %v11226_v3  ;;  %v11234_v58 = vld [vmem:[#allocation117_spill] sm:$0xff]  ;;  %v11235_v3 = vld [vmem:[#allocation118_spill] sm:$0xff] }
 0x931   :  { %6579 = vmatprep.subr.bf16.mxu0 %v11227_v4  ;;  %6643 = vmatprep.subr.bf16.mxu1 %v11228_v7  ;;  %v11236_v4 = vld [vmem:[#allocation119_spill] sm:$0xff]  ;;  %v11237_v7 = vmov 0.0  }
 0x934   :  { %6581 = vmatpush1.bf16.msra.mxu0 %v11229_v48  ;;  %6645 = vmatpush1.bf16.msra.mxu1 %v11230_v46  ;;  %v11238_v46 = vld [vmem:[#allocation120_spill] sm:$0xff]  ;;  %v11241_v48 = vld [vmem:[#allocation123_spill] sm:$0xff] }
 0x935   :  { %6647 = vmatprep.subr.bf16.mxu0 %v11231_v20  ;;  %6679 = vmatprep.subr.bf16.mxu1 %v11232_v37  ;;  %v11239_v20 = vld [vmem:[#allocation121_spill] sm:$0xff]  ;;  %v11240_v37 = vld [vmem:[#allocation122_spill] sm:$0xff] }
 0x937   :  { %3039 = vmatmul.mubr.f32.vlgmr.msra.gmra.mrb[18].mxu0 %v9497_v40  ;;  %3110 = vmatmul.mubr.f32.vlgmr.msra.gmra.mrb[26].mxu1 %v9497_v40  ;;  %v11242_v40 = vld [vmem:[#allocation124_spill] sm:$0xff] }
 0x938   :  { %6649 = vmatpush1.bf16.msra.mxu0 %v11233_v0  ;;  %6681 = vmatpush1.bf16.msra.mxu1 %v11234_v58  ;;  %v11243_v0 = vld [vmem:[#allocation125_spill] sm:$0xff]  ;;  %v11244_v58 = vld [vmem:[#allocation126_spill] sm:$0xff] }
 0x939   :  { %6651 = vmatprep.subr.bf16.mxu0 %v11235_v3  ;;  %6683 = vmatprep.subr.bf16.mxu1 %v11236_v4  ;;  %v11245_v3 = vld [vmem:[#allocation127_spill] sm:$0xff]  ;;  %v11246_v4 = vld [vmem:[#allocation128_spill] sm:$0xff] }
 0x93a   :  { %3223 = vmatprep.mubr.f32.mxu0 %v11237_v7  ;;  %3294 = vmatprep.mubr.f32.mxu1 %v11237_v7  ;;  %v11248_v7 = vld [vmem:[#allocation130_spill] sm:$0xff] }
 0x93c   :  { %6653 = vmatpush1.bf16.msra.mxu0 %v11238_v46  ;;  %6685 = vmatpush1.bf16.msra.mxu1 %v11239_v20  ;;  %v11249_v46 = vld [vmem:[#allocation131_spill] sm:$0xff]  ;;  %v11250_v20 = vld [vmem:[#allocation132_spill] sm:$0xff] }
 0x93d   :  { %6655 = vmatprep.subr.bf16.mxu0 %v11240_v37  ;;  %6687 = vmatprep.subr.bf16.mxu1 %v11241_v48  ;;  %v11251_v37 = vld [vmem:[#allocation133_spill] sm:$0xff]  ;;  %v11252_v48 = vld [vmem:[#allocation134_spill] sm:$0xff] }
 0x940   :  { %6657 = vmatpush1.bf16.msra.mxu0 %v11242_v40  ;;  %6689 = vmatpush1.bf16.msra.mxu1 %v11243_v0  ;;  %v11253_v40 = vld [vmem:[#allocation135_spill] sm:$0xff]  ;;  %v11254_v0 = vld [vmem:[#allocation136_spill] sm:$0xff] }
 0x941   :  { %6659 = vmatprep.subr.bf16.mxu0 %v11244_v58  ;;  %6691 = vmatprep.subr.bf16.mxu1 %v11245_v3  ;;  %v11255_v58 = vld [vmem:[#allocation137_spill] sm:$0xff]  ;;  %v11256_v3 = vld [vmem:[#allocation138_spill] sm:$0xff] }
 0x944   :  { %6661 = vmatpush1.bf16.msra.mxu0 %v11246_v4  ;;  %6693 = vmatpush1.bf16.msra.mxu1 %v11247_v49  ;;  %v11257_v4 = vld [vmem:[#allocation139_spill] sm:$0xff]  ;;  %v11258_v49 = vld [vmem:[#allocation140_spill] sm:$0xff] }
 0x945   :  { %6663 = vmatprep.subr.bf16.mxu0 %v11248_v7  ;;  %6695 = vmatprep.subr.bf16.mxu1 %v11249_v46  ;;  %v11259_v7 = vld [vmem:[#allocation141_spill] sm:$0xff]  ;;  %v11260_v46 = vld [vmem:[#allocation142_spill] sm:$0xff] }
 0x948   :  { %6665 = vmatpush1.bf16.msra.mxu0 %v11250_v20  ;;  %6697 = vmatpush1.bf16.msra.mxu1 %v11251_v37  ;;  %v11261_v20 = vld [vmem:[#allocation143_spill] sm:$0xff]  ;;  %v11262_v37 = vld [vmem:[#allocation144_spill] sm:$0xff] }
 0x949   :  { %6667 = vmatprep.subr.bf16.mxu0 %v11252_v48  ;;  %6699 = vmatprep.subr.bf16.mxu1 %v11253_v40  ;;  %v11263_v48 = vld [vmem:[#allocation145_spill] sm:$0xff]  ;;  %v11264_v40 = vld [vmem:[#allocation23_spill] sm:$0xff] }
 0x94c   :  { %6669 = vmatpush1.bf16.msra.mxu0 %v11254_v0  ;;  %6701 = vmatpush1.bf16.msra.mxu1 %v11255_v58  ;;  %v11265_v0 = vld [vmem:[#allocation24_spill] sm:$0xff] }
 0x94d   :  { %6671 = vmatprep.subr.bf16.mxu0 %v11256_v3  ;;  %6703 = vmatprep.subr.bf16.mxu1 %v11257_v4 }
 0x950   :  { %6673 = vmatpush1.bf16.msra.mxu0 %v11258_v49  ;;  %6705 = vmatpush1.bf16.msra.mxu1 %v11259_v7 }
 0x951   :  { %6675 = vmatprep.subr.bf16.mxu0 %v11260_v46  ;;  %6707 = vmatprep.subr.bf16.mxu1 %v11261_v20  ;;  %v11266_v20 = vld [vmem:[#allocation148_spill] sm:$0xff] }
 0x954   :  { %6677 = vmatpush1.bf16.msra.mxu0 %v11262_v37  ;;  %6709 = vmatpush1.bf16.msra.mxu1 %v11263_v48  ;;  %v11268_v37 = vcombine.low %v11266_v20, %v11267_v1 }
 0x955   :  { %6711 = vmatprep.subr.bf16.mxu0 %v11264_v40  ;;  %6775 = vmatprep.subr.bf16.mxu1 %v11265_v0 }
 0x9ca   :  { %v2898_v58 = vpop.f32.mrb[16].mxu0  ;;  %v2969_v3 = vpop.f32.mrb[24].mxu1 }
 0x9cb   :  { %v2900_v44 = vpop.f32.mrb[17].mxu0  ;;  %v2971_v4 = vpop.f32.mrb[25].mxu1 }
 0x9cc   :  { %v3120_v36 = vcombine.low %v2898_v58, %v2900_v44  ;;  %v3121_v49 = vcombine.low %v2969_v3, %v2971_v4  ;;  %v11278_v4 = vld [vmem:[#allocation35_spill] sm:$0xff] }
 0x9ce   :  { %v3128_v7 = vrot.slane %v3120_v36, %v8327_v18  ;;  %v3135_v46 = vrot.slane %v3121_v49, %v8327_v18  ;;  %v11276_v49 = vld [vmem:[#allocation34_spill] sm:$0xff] }
 0x9d0   :  { %v3136_v35 = vcombine.low %v3128_v7, %v3135_v46 }
 0x9d2   :  { %v3138_v12 = vadd.f32 %v3136_v35, %v11268_v37  ;;  %v11275_v37 = vld [vmem:[#allocation37_spill] sm:$0xff] }
 0x9d4   :  { %v5022_v48 = vmul.f32 -1.442695, %v3138_v12  ;;  %v3146_v0 = vrot.slane %v3138_v12, 6  ;;  %v11273_v12 = vld [vmem:[#allocation36_spill] sm:$0xff] }
 0x9d6   :  { %7848 = vpow2.f32 %v5022_v48  ;;  %v11274_v48 = vld [vmem:[#allocation31_spill] sm:$0xff] }
 0x9e0   :  { %v7849_v40 = vpop.eup %7848 }
 0x9e1   :  { %v3142_v50 = vadd.f32 1.0, %v7849_v40  ;;  %v11279_v40 = vld [vmem:[#allocation41_spill] sm:$0xff] }
 0x9e3   :  { %7850 = vrcp.f32 %v3142_v50  ;;  %v11272_v50 = vld [vmem:[#allocation30_spill] sm:$0xff] }
 0x9e4   :  { %7852 = vtanh.f32 %v3146_v0  ;;  %v11277_v0 = vld [vmem:[#allocation40_spill] sm:$0xff] }
 0x9ed   :  { %v7851_v19 = vpop.eup %7850 }
 0x9ee   :  { %v3150_v13 = vrot.slane %v7851_v19, 2  ;;  %v7853_v44 = vpop.eup %7852  ;;  %v3156_v7 = vrot.slane %v7851_v19, 4 }
 0x9ef   :  { %v3153_v36 = vmul.f32 %v7853_v44, %v7851_v19  ;;  %v11271_v19 = vld [vmem:[#allocation33_spill] sm:$0xff]  ;;  %v11280_v44 = vld [vmem:[#allocation38_spill] sm:$0xff] }
 0x9f0   :  { %v3152_v58 = vmul.f32 %v3150_v13, %v9494_v60  ;;  %v11269_v13 = vld [vmem:[#allocation32_spill] sm:$0xff]  ;;  %v11270_v60 = vld [vmem:[#allocation27_spill] sm:$0xff] }
 0x9f2   :  { %v9685_v3 = vadd.f32 %v3153_v36, %v3152_v58  ;;  %v11281_v58 = vld [vmem:[#allocation44_spill] sm:$0xff]  ;;  %v11282_v36 = vld [vmem:[#allocation39_spill] sm:$0xff] }
 0x9f4   :  { %7854 = vtanh.f32 %v9685_v3 }
 0x9fe   :  { %v7855_v46 = vpop.eup %7854 }
 0x9ff   :  { %v9688_v35 = vmul.f32 %v7855_v46, %v3156_v7  ;;  %v11283_v7 = vld [vmem:[#allocation45_spill] sm:$0xff]  ;;  %v11284_v46 = vld [vmem:[#allocation42_spill] sm:$0xff] }
 0xa01   :  { %3224 = vmatmul.mubr.f32.vlgmr.msra.gmra.mrb[18].mxu0 %v9688_v35  ;;  %3295 = vmatmul.mubr.f32.vlgmr.msra.gmra.mrb[26].mxu1 %v9688_v35 }
 0xa02   :  { %6713 = vmatpush1.bf16.msra.mxu0 %v8335_v52  ;;  %6777 = vmatpush1.bf16.msra.mxu1 %v8352_v11 }
 0xa03   :  { %6715 = vmatprep.subr.bf16.mxu0 %v8340_v63  ;;  %6779 = vmatprep.subr.bf16.mxu1 %v8356_v14 }
 0xa06   :  { %6717 = vmatpush1.bf16.msra.mxu0 %v8345_v2  ;;  %6781 = vmatpush1.bf16.msra.mxu1 %v8366_v26 }
 0xa07   :  { %6719 = vmatprep.subr.bf16.mxu0 %v8348_v8  ;;  %6783 = vmatprep.subr.bf16.mxu1 %v8370_v27 }
 0xa0a   :  { %6721 = vmatpush1.bf16.msra.mxu0 %v8358_v17  ;;  %6785 = vmatpush1.bf16.msra.mxu1 %v8379_v38 }
 0xa0b   :  { %6723 = vmatprep.subr.bf16.mxu0 %v8361_v21  ;;  %6787 = vmatprep.subr.bf16.mxu1 %v8383_v39 }
 0xa0e   :  { %6725 = vmatpush1.bf16.msra.mxu0 %v8372_v30  ;;  %6789 = vmatpush1.bf16.msra.mxu1 %v8391_v51 }
 0xa0f   :  { %6727 = vmatprep.subr.bf16.mxu0 %v8375_v33  ;;  %6791 = vmatprep.subr.bf16.mxu1 %v8395_v53 }
 0xa12   :  { %6729 = vmatpush1.bf16.msra.mxu0 %v8385_v42  ;;  %6793 = vmatpush1.bf16.msra.mxu1 %v8403_v5 }
 0xa13   :  { %6731 = vmatprep.subr.bf16.mxu0 %v8388_v45  ;;  %6795 = vmatprep.subr.bf16.mxu1 %v8407_v6 }
 0xa16   :  { %6733 = vmatpush1.bf16.msra.mxu0 %v8397_v56  ;;  %6797 = vmatpush1.bf16.msra.mxu1 %v8415_v23 }
 0xa17   :  { %6735 = vmatprep.subr.bf16.mxu0 %v8400_v59  ;;  %6799 = vmatprep.subr.bf16.mxu1 %v8419_v24 }
 0xa1a   :  { %6737 = vmatpush1.bf16.msra.mxu0 %v8409_v10  ;;  %6801 = vmatpush1.bf16.msra.mxu1 %v8427_v41 }
 0xa1b   :  { %6739 = vmatprep.subr.bf16.mxu0 %v8412_v15  ;;  %6803 = vmatprep.subr.bf16.mxu1 %v8431_v43 }
 0xa1e   :  { %6741 = vmatpush1.bf16.msra.mxu0 %v8421_v29  ;;  %6805 = vmatpush1.bf16.msra.mxu1 %v8439_v61 }
 0xa1f   :  { %6743 = vmatprep.subr.bf16.mxu0 %v8424_v34  ;;  %6807 = vmatprep.subr.bf16.mxu1 %v8443_v62 }
 0xa22   :  { %6745 = vmatpush1.bf16.msra.mxu0 %v8433_v47  ;;  %6809 = vmatpush1.bf16.msra.mxu1 %v8451_v28 }
 0xa23   :  { %6747 = vmatprep.subr.bf16.mxu0 %v8436_v54  ;;  %6811 = vmatprep.subr.bf16.mxu1 %v8455_v32 }
 0xa26   :  { %6749 = vmatpush1.bf16.msra.mxu0 %v8445_v9  ;;  %6813 = vmatpush1.bf16.msra.mxu1 %v10753_v16 }
 0xa27   :  { %6751 = vmatprep.subr.bf16.mxu0 %v10754_v55  ;;  %6815 = vmatprep.subr.bf16.mxu1 %v10885_v57 }
 0xa2a   :  { %6753 = vmatpush1.bf16.msra.mxu0 %v11140_v25  ;;  %6817 = vmatpush1.bf16.msra.mxu1 %v11269_v13 }
 0xa2b   :  { %6755 = vmatprep.subr.bf16.mxu0 %v11270_v60  ;;  %6819 = vmatprep.subr.bf16.mxu1 %v11271_v19 }
 0xa2e   :  { %6757 = vmatpush1.bf16.msra.mxu0 %v11272_v50  ;;  %6821 = vmatpush1.bf16.msra.mxu1 %v11273_v12  ;;  %v11292_v12 = vld [vmem:[#allocation28_spill] sm:$0xff] }
 0xa2f   :  { %6759 = vmatprep.subr.bf16.mxu0 %v11274_v48  ;;  %6823 = vmatprep.subr.bf16.mxu1 %v11275_v37  ;;  %v11285_v48 = vld [vmem:[#allocation47_spill] sm:$0xff] }
 0xa30   :  { %v11286_v37 = vld [vmem:[#allocation43_spill] sm:$0xff] }
 0xa32   :  { %6761 = vmatpush1.bf16.msra.mxu0 %v11276_v49  ;;  %6825 = vmatpush1.bf16.msra.mxu1 %v11277_v0  ;;  %v11287_v49 = vld [vmem:[#allocation48_spill] sm:$0xff]  ;;  %v11288_v0 = vld [vmem:[#allocation46_spill] sm:$0xff] }
 0xa33   :  { %6763 = vmatprep.subr.bf16.mxu0 %v11278_v4  ;;  %6827 = vmatprep.subr.bf16.mxu1 %v11279_v40  ;;  %v11289_v4 = vld [vmem:[#allocation49_spill] sm:$0xff]  ;;  %v11290_v40 = vld [vmem:[#allocation50_spill] sm:$0xff] }
 0xa36   :  { %6765 = vmatpush1.bf16.msra.mxu0 %v11280_v44  ;;  %6829 = vmatpush1.bf16.msra.mxu1 %v11281_v58  ;;  %v11291_v44 = vld [vmem:[#allocation51_spill] sm:$0xff] }
 0xa37   :  { %6767 = vmatprep.subr.bf16.mxu0 %v11282_v36  ;;  %6831 = vmatprep.subr.bf16.mxu1 %v11283_v7 }
 0xa3a   :  { %6769 = vmatpush1.bf16.msra.mxu0 %v11284_v46  ;;  %6833 = vmatpush1.bf16.msra.mxu1 %v11285_v48 }
 0xa3b   :  { %6771 = vmatprep.subr.bf16.mxu0 %v11286_v37  ;;  %6835 = vmatprep.subr.bf16.mxu1 %v11287_v49  ;;  %v11293_v49 = vld [vmem:[#allocation152_spill] sm:$0xff] }
 0xa3e   :  { %6773 = vmatpush1.bf16.msra.mxu0 %v11288_v0  ;;  %6837 = vmatpush1.bf16.msra.mxu1 %v11289_v4 }
 0xa3f   :  { %6839 = vmatprep.subr.bf16.mxu0 %v11290_v40  ;;  %6903 = vmatprep.subr.bf16.mxu1 %v11291_v44 }
 0xad4   :  { %v3225_v58 = vpop.f32.mrb[18].mxu0  ;;  %v3296_v36 = vpop.f32.mrb[26].mxu1 }
 0xad5   :  { %v3301_v7 = vadd.f32 %v3225_v58, %v11292_v12  ;;  %v3227_v50 = vpop.f32.mrb[19].mxu0  ;;  %v3298_v46 = vpop.f32.mrb[27].mxu1  ;;  %v3303_v0 = vadd.f32 %v3296_v36, %v8981_v31 }
 0xad6   :  { %v3302_v48 = vadd.f32 %v3227_v50, %v11165_v22  ;;  %v3304_v4 = vadd.f32 %v3298_v46, %v11293_v49  ;;  %v11302_v46 = vld [vmem:[#allocation58_spill] sm:$0xff] }
 0xad7   :  { %v5023_v19 = vmul.f32 -1.442695, %v3301_v7  ;;  %v5025_v60 = vmul.f32 -1.442695, %v3303_v0 }
 0xad8   :  { %v5024_v37 = vmul.f32 -1.442695, %v3302_v48 }
 0xad9   :  { %7856 = vpow2.f32 %v5023_v19 }
 0xada   :  { %7858 = vpow2.f32 %v5024_v37  ;;  %v11294_v37 = vld [vmem:[#allocation147_spill] sm:$0xff] }
 0xadb   :  { %7860 = vtanh.f32 %v3304_v4 }
 0xadc   :  { %7862 = vpow2.f32 %v5025_v60  ;;  %v11299_v60 = vld [vmem:[#allocation55_spill] sm:$0xff] }
 0xae3   :  { %v7857_v40 = vpop.eup %7856 }
 0xae4   :  { %v3314_v13 = vadd.f32 1.0, %v7857_v40  ;;  %v7859_v44 = vpop.eup %7858 }
 0xae5   :  { %v3315_v58 = vadd.f32 1.0, %v7859_v44  ;;  %v7861_v12 = vpop.eup %7860  ;;  %v11301_v44 = vld [vmem:[#allocation57_spill] sm:$0xff] }
 0xae6   :  { %7864 = vrcp.f32 %v3314_v13  ;;  %v7863_v25 = vpop.eup %7862  ;;  %v11297_v13 = vld [vmem:[#allocation53_spill] sm:$0xff] }
 0xae7   :  { %7866 = vrcp.f32 %v3315_v58  ;;  %v3316_v19 = vadd.f32 1.0, %v7863_v25  ;;  %v11296_v25 = vld [vmem:[#allocation52_spill] sm:$0xff]  ;;  %v11303_v58 = vld [vmem:[#allocation59_spill] sm:$0xff] }
 0xae9   :  { %7868 = vrcp.f32 %v3316_v19  ;;  %v11307_v19 = vld [vmem:[#allocation63_spill] sm:$0xff] }
 0xaf0   :  { %v7865_v50 = vpop.eup %7864 }
 0xaf1   :  { %v3325_v7 = vmul.f32 %v7865_v50, %v7861_v12  ;;  %v7867_v48 = vpop.eup %7866  ;;  %v11300_v12 = vld [vmem:[#allocation56_spill] sm:$0xff] }
 0xaf2   :  { %v3324_v22 = vmul.f32 %v7867_v48, %v11294_v37  ;;  %v11304_v50 = vld [vmem:[#allocation60_spill] sm:$0xff]  ;;  %v11306_v48 = vld [vmem:[#allocation62_spill] sm:$0xff] }
 0xaf3   :  { %v7869_v0 = vpop.eup %7868  ;;  %v11308_v37 = vld [vmem:[#allocation64_spill] sm:$0xff] }
 0xaf4   :  { %v9761_v36 = vadd.f32 %v3325_v7, %v3324_v22  ;;  %v11298_v22 = vld [vmem:[#allocation54_spill] sm:$0xff]  ;;  %v11305_v7 = vld [vmem:[#allocation61_spill] sm:$0xff] }
 0xaf6   :  { %7870 = vtanh.f32 %v9761_v36 }
 0xb00   :  { %v7871_v4 = vpop.eup %7870 }
 0xb01   :  { %v9764_v40 = vmul.f32 %v7871_v4, %v7869_v0  ;;  %v11309_v0 = vld [vmem:[#allocation65_spill] sm:$0xff]  ;;  %v11310_v4 = vld [vmem:[#allocation66_spill] sm:$0xff] }
 0xb03   :  { %11295 = vst [vmem:[#allocation154_spill] sm:$0xff] %v9764_v40  ;;  %3393 = vmatprep.mubr.f32.mxu0 %v9764_v40  ;;  %3464 = vmatprep.mubr.f32.mxu1 %v9764_v40 }
 0xb04   :  { %3394 = vmatmul.mubr.f32.vlgmr.msra.gmra.mrb[20].mxu0 %v9688_v35  ;;  %3465 = vmatmul.mubr.f32.vlgmr.msra.gmra.mrb[28].mxu1 %v9688_v35 }
 0xb05   :  { %6841 = vmatpush1.bf16.msra.mxu0 %v11296_v25  ;;  %6905 = vmatpush1.bf16.msra.mxu1 %v11297_v13 }
 0xb06   :  { %3535 = vmatprep.mubr.f32.mxu0 %v9764_v40  ;;  %3606 = vmatprep.mubr.f32.mxu1 %v9764_v40  ;;  %v11311_v40 = vld [vmem:[#allocation67_spill] sm:$0xff] }
 0xb07   :  { %6843 = vmatprep.subr.bf16.mxu0 %v11298_v22  ;;  %6907 = vmatprep.subr.bf16.mxu1 %v11299_v60 }
 0xb09   :  { %6845 = vmatpush1.bf16.msra.mxu0 %v11300_v12  ;;  %6909 = vmatpush1.bf16.msra.mxu1 %v11301_v44  ;;  %v11312_v44 = vld [vmem:[#allocation68_spill] sm:$0xff] }
 0xb0a   :  { %6847 = vmatprep.subr.bf16.mxu0 %v11302_v46  ;;  %6911 = vmatprep.subr.bf16.mxu1 %v11303_v58  ;;  %v11313_v46 = vld [vmem:[#allocation69_spill] sm:$0xff]  ;;  %v11314_v58 = vld [vmem:[#allocation70_spill] sm:$0xff] }
 0xb0d   :  { %6849 = vmatpush1.bf16.msra.mxu0 %v11304_v50  ;;  %6913 = vmatpush1.bf16.msra.mxu1 %v11305_v7  ;;  %v11315_v50 = vld [vmem:[#allocation71_spill] sm:$0xff]  ;;  %v11316_v7 = vld [vmem:[#allocation72_spill] sm:$0xff] }
 0xb0e   :  { %6851 = vmatprep.subr.bf16.mxu0 %v11306_v48  ;;  %6915 = vmatprep.subr.bf16.mxu1 %v11307_v19  ;;  %v11317_v48 = vld [vmem:[#allocation73_spill] sm:$0xff]  ;;  %v11318_v19 = vld [vmem:[#allocation74_spill] sm:$0xff] }
 0xb11   :  { %6853 = vmatpush1.bf16.msra.mxu0 %v11308_v37  ;;  %6917 = vmatpush1.bf16.msra.mxu1 %v11309_v0  ;;  %v11319_v37 = vld [vmem:[#allocation75_spill] sm:$0xff]  ;;  %v11320_v0 = vld [vmem:[#allocation76_spill] sm:$0xff] }
 0xb12   :  { %6855 = vmatprep.subr.bf16.mxu0 %v11310_v4  ;;  %6919 = vmatprep.subr.bf16.mxu1 %v11311_v40  ;;  %v11321_v4 = vld [vmem:[#allocation77_spill] sm:$0xff]  ;;  %v11322_v40 = vld [vmem:[#allocation78_spill] sm:$0xff] }
 0xb15   :  { %6857 = vmatpush1.bf16.msra.mxu0 %v11312_v44  ;;  %6921 = vmatpush1.bf16.msra.mxu1 %v11313_v46  ;;  %v11323_v44 = vld [vmem:[#allocation79_spill] sm:$0xff]  ;;  %v11324_v46 = vld [vmem:[#allocation80_spill] sm:$0xff] }
 0xb16   :  { %6859 = vmatprep.subr.bf16.mxu0 %v11314_v58  ;;  %6923 = vmatprep.subr.bf16.mxu1 %v11315_v50  ;;  %v11325_v58 = vld [vmem:[#allocation81_spill] sm:$0xff]  ;;  %v11326_v50 = vld [vmem:[#allocation82_spill] sm:$0xff] }
 0xb19   :  { %6861 = vmatpush1.bf16.msra.mxu0 %v11316_v7  ;;  %6925 = vmatpush1.bf16.msra.mxu1 %v11317_v48  ;;  %v11327_v7 = vld [vmem:[#allocation83_spill] sm:$0xff]  ;;  %v11328_v48 = vld [vmem:[#allocation84_spill] sm:$0xff] }
 0xb1a   :  { %6863 = vmatprep.subr.bf16.mxu0 %v11318_v19  ;;  %6927 = vmatprep.subr.bf16.mxu1 %v11319_v37  ;;  %v11329_v19 = vld [vmem:[#allocation85_spill] sm:$0xff]  ;;  %v11330_v37 = vld [vmem:[#allocation86_spill] sm:$0xff] }
 0xb1d   :  { %6865 = vmatpush1.bf16.msra.mxu0 %v11320_v0  ;;  %6929 = vmatpush1.bf16.msra.mxu1 %v11321_v4  ;;  %v11331_v0 = vld [vmem:[#allocation87_spill] sm:$0xff]  ;;  %v11332_v4 = vld [vmem:[#allocation88_spill] sm:$0xff] }
 0xb1e   :  { %6867 = vmatprep.subr.bf16.mxu0 %v11322_v40  ;;  %6931 = vmatprep.subr.bf16.mxu1 %v11323_v44  ;;  %v11333_v40 = vld [vmem:[#allocation89_spill] sm:$0xff]  ;;  %v11334_v44 = vld [vmem:[#allocation90_spill] sm:$0xff] }
 0xb21   :  { %6869 = vmatpush1.bf16.msra.mxu0 %v11324_v46  ;;  %6933 = vmatpush1.bf16.msra.mxu1 %v11325_v58  ;;  %v11335_v46 = vld [vmem:[#allocation91_spill] sm:$0xff]  ;;  %v11336_v58 = vld [vmem:[#allocation92_spill] sm:$0xff] }
 0xb22   :  { %6871 = vmatprep.subr.bf16.mxu0 %v11326_v50  ;;  %6935 = vmatprep.subr.bf16.mxu1 %v11327_v7  ;;  %v11337_v50 = vld [vmem:[#allocation93_spill] sm:$0xff]  ;;  %v11338_v7 = vld [vmem:[#allocation94_spill] sm:$0xff] }
 0xb25   :  { %6873 = vmatpush1.bf16.msra.mxu0 %v11328_v48  ;;  %6937 = vmatpush1.bf16.msra.mxu1 %v11329_v19  ;;  %v11339_v48 = vld [vmem:[#allocation95_spill] sm:$0xff]  ;;  %v11340_v19 = vld [vmem:[#allocation96_spill] sm:$0xff] }
 0xb26   :  { %6875 = vmatprep.subr.bf16.mxu0 %v11330_v37  ;;  %6939 = vmatprep.subr.bf16.mxu1 %v11331_v0  ;;  %v11341_v37 = vld [vmem:[#allocation97_spill] sm:$0xff]  ;;  %v11342_v0 = vld [vmem:[#allocation98_spill] sm:$0xff] }
 0xb29   :  { %6877 = vmatpush1.bf16.msra.mxu0 %v11332_v4  ;;  %6941 = vmatpush1.bf16.msra.mxu1 %v11333_v40  ;;  %v11343_v4 = vld [vmem:[#allocation99_spill] sm:$0xff]  ;;  %v11344_v40 = vld [vmem:[#allocation100_spill] sm:$0xff] }
 0xb2a   :  { %6879 = vmatprep.subr.bf16.mxu0 %v11334_v44  ;;  %6943 = vmatprep.subr.bf16.mxu1 %v11335_v46  ;;  %v11345_v44 = vld [vmem:[#allocation101_spill] sm:$0xff]  ;;  %v11346_v46 = vld [vmem:[#allocation102_spill] sm:$0xff] }
 0xb2d   :  { %6881 = vmatpush1.bf16.msra.mxu0 %v11336_v58  ;;  %6945 = vmatpush1.bf16.msra.mxu1 %v11337_v50  ;;  %v11347_v58 = vld [vmem:[#allocation103_spill] sm:$0xff]  ;;  %v11348_v50 = vld [vmem:[#allocation104_spill] sm:$0xff] }
 0xb2e   :  { %6883 = vmatprep.subr.bf16.mxu0 %v11338_v7  ;;  %6947 = vmatprep.subr.bf16.mxu1 %v11339_v48  ;;  %v11349_v7 = vld [vmem:[#allocation105_spill] sm:$0xff]  ;;  %v11350_v48 = vld [vmem:[#allocation106_spill] sm:$0xff] }
 0xb31   :  { %6885 = vmatpush1.bf16.msra.mxu0 %v11340_v19  ;;  %6949 = vmatpush1.bf16.msra.mxu1 %v11341_v37  ;;  %v11351_v19 = vld [vmem:[#allocation107_spill] sm:$0xff]  ;;  %v11352_v37 = vld [vmem:[#allocation108_spill] sm:$0xff] }
 0xb32   :  { %6887 = vmatprep.subr.bf16.mxu0 %v11342_v0  ;;  %6951 = vmatprep.subr.bf16.mxu1 %v11343_v4  ;;  %v11353_v0 = vld [vmem:[#allocation109_spill] sm:$0xff]  ;;  %v11354_v4 = vld [vmem:[#allocation110_spill] sm:$0xff] }
 0xb35   :  { %6889 = vmatpush1.bf16.msra.mxu0 %v11344_v40  ;;  %6953 = vmatpush1.bf16.msra.mxu1 %v11345_v44  ;;  %v11355_v40 = vld [vmem:[#allocation111_spill] sm:$0xff]  ;;  %v11356_v44 = vld [vmem:[#allocation112_spill] sm:$0xff] }
 0xb36   :  { %6891 = vmatprep.subr.bf16.mxu0 %v11346_v46  ;;  %6955 = vmatprep.subr.bf16.mxu1 %v11347_v58  ;;  %v11357_v46 = vld [vmem:[#allocation113_spill] sm:$0xff]  ;;  %v11358_v58 = vld [vmem:[#allocation114_spill] sm:$0xff] }
 0xb39   :  { %6893 = vmatpush1.bf16.msra.mxu0 %v11348_v50  ;;  %6957 = vmatpush1.bf16.msra.mxu1 %v11349_v7  ;;  %v11359_v50 = vld [vmem:[#allocation115_spill] sm:$0xff] }
 0xb3a   :  { %6895 = vmatprep.subr.bf16.mxu0 %v11350_v48  ;;  %6959 = vmatprep.subr.bf16.mxu1 %v11351_v19  ;;  %v11360_v19 = vld [vmem:[#allocation116_spill] sm:$0xff]  ;;  %v11374_v48 = vld [vmem:[#allocation129_spill] sm:$0xff] }
 0xb3d   :  { %6897 = vmatpush1.bf16.msra.mxu0 %v11352_v37  ;;  %6961 = vmatpush1.bf16.msra.mxu1 %v11353_v0  ;;  %v11361_v37 = vld [vmem:[#allocation117_spill] sm:$0xff]  ;;  %v11362_v0 = vld [vmem:[#allocation118_spill] sm:$0xff] }
 0xb3e   :  { %6899 = vmatprep.subr.bf16.mxu0 %v11354_v4  ;;  %6963 = vmatprep.subr.bf16.mxu1 %v11355_v40  ;;  %v11363_v4 = vld [vmem:[#allocation119_spill] sm:$0xff]  ;;  %v11364_v40 = vmov 0.0  }
 0xb41   :  { %6901 = vmatpush1.bf16.msra.mxu0 %v11356_v44  ;;  %6965 = vmatpush1.bf16.msra.mxu1 %v11357_v46  ;;  %v11365_v46 = vld [vmem:[#allocation120_spill] sm:$0xff]  ;;  %v11368_v44 = vld [vmem:[#allocation123_spill] sm:$0xff] }
 0xb42   :  { %6967 = vmatprep.subr.bf16.mxu0 %v11358_v58  ;;  %6999 = vmatprep.subr.bf16.mxu1 %v11359_v50  ;;  %v11366_v58 = vld [vmem:[#allocation121_spill] sm:$0xff]  ;;  %v11367_v50 = vld [vmem:[#allocation122_spill] sm:$0xff] }
 0xb44   :  { %3536 = vmatmul.mubr.f32.vlgmr.msra.gmra.mrb[22].mxu0 %v9688_v35  ;;  %3607 = vmatmul.mubr.f32.vlgmr.msra.gmra.mrb[30].mxu1 %v9688_v35  ;;  %v11369_v35 = vld [vmem:[#allocation124_spill] sm:$0xff] }
 0xb45   :  { %6969 = vmatpush1.bf16.msra.mxu0 %v11360_v19  ;;  %7001 = vmatpush1.bf16.msra.mxu1 %v11361_v37  ;;  %v11370_v19 = vld [vmem:[#allocation125_spill] sm:$0xff]  ;;  %v11371_v37 = vld [vmem:[#allocation126_spill] sm:$0xff] }
 0xb46   :  { %6971 = vmatprep.subr.bf16.mxu0 %v11362_v0  ;;  %7003 = vmatprep.subr.bf16.mxu1 %v11363_v4  ;;  %v11372_v0 = vld [vmem:[#allocation127_spill] sm:$0xff]  ;;  %v11373_v4 = vld [vmem:[#allocation128_spill] sm:$0xff] }
 0xb47   :  { %3720 = vmatprep.mubr.f32.mxu0 %v11364_v40  ;;  %3791 = vmatprep.mubr.f32.mxu1 %v11364_v40  ;;  %v11375_v40 = vld [vmem:[#allocation130_spill] sm:$0xff] }
 0xb49   :  { %6973 = vmatpush1.bf16.msra.mxu0 %v11365_v46  ;;  %7005 = vmatpush1.bf16.msra.mxu1 %v11366_v58  ;;  %v11376_v46 = vld [vmem:[#allocation131_spill] sm:$0xff]  ;;  %v11377_v58 = vld [vmem:[#allocation132_spill] sm:$0xff] }
 0xb4a   :  { %6975 = vmatprep.subr.bf16.mxu0 %v11367_v50  ;;  %7007 = vmatprep.subr.bf16.mxu1 %v11368_v44  ;;  %v11378_v50 = vld [vmem:[#allocation133_spill] sm:$0xff]  ;;  %v11379_v44 = vld [vmem:[#allocation134_spill] sm:$0xff] }
 0xb4d   :  { %6977 = vmatpush1.bf16.msra.mxu0 %v11369_v35  ;;  %7009 = vmatpush1.bf16.msra.mxu1 %v11370_v19  ;;  %v11380_v35 = vld [vmem:[#allocation135_spill] sm:$0xff]  ;;  %v11381_v19 = vld [vmem:[#allocation136_spill] sm:$0xff] }
 0xb4e   :  { %6979 = vmatprep.subr.bf16.mxu0 %v11371_v37  ;;  %7011 = vmatprep.subr.bf16.mxu1 %v11372_v0  ;;  %v11382_v37 = vld [vmem:[#allocation137_spill] sm:$0xff]  ;;  %v11383_v0 = vld [vmem:[#allocation138_spill] sm:$0xff] }
 0xb51   :  { %6981 = vmatpush1.bf16.msra.mxu0 %v11373_v4  ;;  %7013 = vmatpush1.bf16.msra.mxu1 %v11374_v48  ;;  %v11384_v4 = vld [vmem:[#allocation139_spill] sm:$0xff]  ;;  %v11385_v48 = vld [vmem:[#allocation140_spill] sm:$0xff] }
 0xb52   :  { %6983 = vmatprep.subr.bf16.mxu0 %v11375_v40  ;;  %7015 = vmatprep.subr.bf16.mxu1 %v11376_v46  ;;  %v11386_v40 = vld [vmem:[#allocation141_spill] sm:$0xff]  ;;  %v11387_v46 = vld [vmem:[#allocation142_spill] sm:$0xff] }
 0xb55   :  { %6985 = vmatpush1.bf16.msra.mxu0 %v11377_v58  ;;  %7017 = vmatpush1.bf16.msra.mxu1 %v11378_v50  ;;  %v11388_v58 = vld [vmem:[#allocation143_spill] sm:$0xff]  ;;  %v11389_v50 = vld [vmem:[#allocation144_spill] sm:$0xff] }
 0xb56   :  { %6987 = vmatprep.subr.bf16.mxu0 %v11379_v44  ;;  %7019 = vmatprep.subr.bf16.mxu1 %v11380_v35  ;;  %v11390_v44 = vld [vmem:[#allocation145_spill] sm:$0xff]  ;;  %v11391_v35 = vld [vmem:[#allocation23_spill] sm:$0xff] }
 0xb59   :  { %6989 = vmatpush1.bf16.msra.mxu0 %v11381_v19  ;;  %7021 = vmatpush1.bf16.msra.mxu1 %v11382_v37  ;;  %v11392_v19 = vld [vmem:[#allocation24_spill] sm:$0xff] }
 0xb5a   :  { %6991 = vmatprep.subr.bf16.mxu0 %v11383_v0  ;;  %7023 = vmatprep.subr.bf16.mxu1 %v11384_v4 }
 0xb5d   :  { %6993 = vmatpush1.bf16.msra.mxu0 %v11385_v48  ;;  %7025 = vmatpush1.bf16.msra.mxu1 %v11386_v40 }
 0xb5e   :  { %6995 = vmatprep.subr.bf16.mxu0 %v11387_v46  ;;  %7027 = vmatprep.subr.bf16.mxu1 %v11388_v58 }
 0xb61   :  { %6997 = vmatpush1.bf16.msra.mxu0 %v11389_v50  ;;  %7029 = vmatpush1.bf16.msra.mxu1 %v11390_v44  ;;  %v11393_v50 = vcombine.high %v11266_v20, %v11267_v1 }
 0xb62   :  { %7031 = vmatprep.subr.bf16.mxu0 %v11391_v35  ;;  %7095 = vmatprep.subr.bf16.mxu1 %v11392_v19 }
 0xbd7   :  { %v3395_v37 = vpop.f32.mrb[20].mxu0  ;;  %v3466_v0 = vpop.f32.mrb[28].mxu1 }
 0xbd8   :  { %v3397_v7 = vpop.f32.mrb[21].mxu0  ;;  %v3468_v4 = vpop.f32.mrb[29].mxu1 }
 0xbd9   :  { %v3617_v12 = vcombine.low %v3395_v37, %v3397_v7  ;;  %v3618_v48 = vcombine.low %v3466_v0, %v3468_v4  ;;  %v11405_v4 = vld [vmem:[#allocation41_spill] sm:$0xff] }
 0xbdb   :  { %v3625_v40 = vrot.slane %v3617_v12, %v8327_v18  ;;  %v3632_v46 = vrot.slane %v3618_v48, %v8327_v18  ;;  %v11403_v48 = vld [vmem:[#allocation40_spill] sm:$0xff] }
 0xbdd   :  { %v3633_v60 = vcombine.low %v3625_v40, %v3632_v46  ;;  %v11400_v46 = vld [vmem:[#allocation31_spill] sm:$0xff] }
 0xbdf   :  { %v3635_v58 = vadd.f32 %v3633_v60, %v11393_v50  ;;  %v11398_v60 = vld [vmem:[#allocation30_spill] sm:$0xff] }
 0xbe0   :  { %v11402_v50 = vld [vmem:[#allocation34_spill] sm:$0xff] }
 0xbe1   :  { %v5026_v44 = vmul.f32 -1.442695, %v3635_v58  ;;  %v3643_v19 = vrot.slane %v3635_v58, 6  ;;  %v11401_v58 = vld [vmem:[#allocation37_spill] sm:$0xff] }
 0xbe3   :  { %7872 = vpow2.f32 %v5026_v44  ;;  %v11399_v44 = vld [vmem:[#allocation36_spill] sm:$0xff] }
 0xbed   :  { %v7873_v35 = vpop.eup %7872 }
 0xbee   :  { %v3639_v22 = vadd.f32 1.0, %v7873_v35  ;;  %v11406_v35 = vld [vmem:[#allocation38_spill] sm:$0xff] }
 0xbf0   :  { %7874 = vrcp.f32 %v3639_v22  ;;  %v11397_v22 = vld [vmem:[#allocation33_spill] sm:$0xff] }
 0xbf1   :  { %7876 = vtanh.f32 %v3643_v19  ;;  %v11404_v19 = vld [vmem:[#allocation35_spill] sm:$0xff] }
 0xbfa   :  { %v7875_v13 = vpop.eup %7874 }
 0xbfb   :  { %v3647_v25 = vrot.slane %v7875_v13, 2  ;;  %v7877_v7 = vpop.eup %7876  ;;  %v3653_v40 = vrot.slane %v7875_v13, 4 }
 0xbfc   :  { %v3650_v12 = vmul.f32 %v7877_v7, %v7875_v13  ;;  %v11396_v13 = vld [vmem:[#allocation27_spill] sm:$0xff]  ;;  %v11407_v7 = vld [vmem:[#allocation44_spill] sm:$0xff] }
 0xbfd   :  { %v3649_v37 = vmul.f32 %v3647_v25, %v9685_v3  ;;  %v11394_v3 = vld [vmem:[#allocation26_spill] sm:$0xff]  ;;  %v11395_v25 = vld [vmem:[#allocation32_spill] sm:$0xff] }
 0xbff   :  { %v9878_v0 = vadd.f32 %v3650_v12, %v3649_v37  ;;  %v11408_v37 = vld [vmem:[#allocation39_spill] sm:$0xff]  ;;  %v11409_v12 = vld [vmem:[#allocation45_spill] sm:$0xff] }
 0xc01   :  { %7878 = vtanh.f32 %v9878_v0 }
 0xc0b   :  { %v7879_v1 = vpop.eup %7878 }
 0xc0c   :  { %v9881_v20 = vmul.f32 %v7879_v1, %v3653_v40  ;;  %v11410_v40 = vld [vmem:[#allocation42_spill] sm:$0xff]  ;;  %v11411_v1 = vld [vmem:[#allocation47_spill] sm:$0xff] }
 0xc0e   :  { %3721 = vmatmul.mubr.f32.vlgmr.msra.gmra.mrb[22].mxu0 %v9881_v20  ;;  %3792 = vmatmul.mubr.f32.vlgmr.msra.gmra.mrb[30].mxu1 %v9881_v20 }
 0xc0f   :  { %7033 = vmatpush1.bf16.msra.mxu0 %v8335_v52  ;;  %7097 = vmatpush1.bf16.msra.mxu1 %v8352_v11 }
 0xc10   :  { %7035 = vmatprep.subr.bf16.mxu0 %v8340_v63  ;;  %7099 = vmatprep.subr.bf16.mxu1 %v8356_v14 }
 0xc13   :  { %7037 = vmatpush1.bf16.msra.mxu0 %v8345_v2  ;;  %7101 = vmatpush1.bf16.msra.mxu1 %v8366_v26 }
 0xc14   :  { %7039 = vmatprep.subr.bf16.mxu0 %v8348_v8  ;;  %7103 = vmatprep.subr.bf16.mxu1 %v8370_v27 }
 0xc17   :  { %7041 = vmatpush1.bf16.msra.mxu0 %v8358_v17  ;;  %7105 = vmatpush1.bf16.msra.mxu1 %v8379_v38 }
 0xc18   :  { %7043 = vmatprep.subr.bf16.mxu0 %v8361_v21  ;;  %7107 = vmatprep.subr.bf16.mxu1 %v8383_v39 }
 0xc1b   :  { %7045 = vmatpush1.bf16.msra.mxu0 %v8372_v30  ;;  %7109 = vmatpush1.bf16.msra.mxu1 %v8391_v51 }
 0xc1c   :  { %7047 = vmatprep.subr.bf16.mxu0 %v8375_v33  ;;  %7111 = vmatprep.subr.bf16.mxu1 %v8395_v53 }
 0xc1f   :  { %7049 = vmatpush1.bf16.msra.mxu0 %v8385_v42  ;;  %7113 = vmatpush1.bf16.msra.mxu1 %v8403_v5 }
 0xc20   :  { %7051 = vmatprep.subr.bf16.mxu0 %v8388_v45  ;;  %7115 = vmatprep.subr.bf16.mxu1 %v8407_v6 }
 0xc23   :  { %7053 = vmatpush1.bf16.msra.mxu0 %v8397_v56  ;;  %7117 = vmatpush1.bf16.msra.mxu1 %v8415_v23 }
 0xc24   :  { %7055 = vmatprep.subr.bf16.mxu0 %v8400_v59  ;;  %7119 = vmatprep.subr.bf16.mxu1 %v8419_v24 }
 0xc27   :  { %7057 = vmatpush1.bf16.msra.mxu0 %v8409_v10  ;;  %7121 = vmatpush1.bf16.msra.mxu1 %v8427_v41 }
 0xc28   :  { %7059 = vmatprep.subr.bf16.mxu0 %v8412_v15  ;;  %7123 = vmatprep.subr.bf16.mxu1 %v8431_v43 }
 0xc2b   :  { %7061 = vmatpush1.bf16.msra.mxu0 %v8421_v29  ;;  %7125 = vmatpush1.bf16.msra.mxu1 %v8439_v61 }
 0xc2c   :  { %7063 = vmatprep.subr.bf16.mxu0 %v8424_v34  ;;  %7127 = vmatprep.subr.bf16.mxu1 %v8443_v62 }
 0xc2f   :  { %7065 = vmatpush1.bf16.msra.mxu0 %v8433_v47  ;;  %7129 = vmatpush1.bf16.msra.mxu1 %v8451_v28 }
 0xc30   :  { %7067 = vmatprep.subr.bf16.mxu0 %v8436_v54  ;;  %7131 = vmatprep.subr.bf16.mxu1 %v8455_v32 }
 0xc33   :  { %7069 = vmatpush1.bf16.msra.mxu0 %v8445_v9  ;;  %7133 = vmatpush1.bf16.msra.mxu1 %v10753_v16 }
 0xc34   :  { %7071 = vmatprep.subr.bf16.mxu0 %v10754_v55  ;;  %7135 = vmatprep.subr.bf16.mxu1 %v10885_v57 }
 0xc37   :  { %7073 = vmatpush1.bf16.msra.mxu0 %v11394_v3  ;;  %7137 = vmatpush1.bf16.msra.mxu1 %v11395_v25 }
 0xc38   :  { %7075 = vmatprep.subr.bf16.mxu0 %v11396_v13  ;;  %7139 = vmatprep.subr.bf16.mxu1 %v11397_v22 }
 0xc3b   :  { %7077 = vmatpush1.bf16.msra.mxu0 %v11398_v60  ;;  %7141 = vmatpush1.bf16.msra.mxu1 %v11399_v44  ;;  %v11419_v60 = vld [vmem:[#allocation25_spill] sm:$0xff] }
 0xc3c   :  { %7079 = vmatprep.subr.bf16.mxu0 %v11400_v46  ;;  %7143 = vmatprep.subr.bf16.mxu1 %v11401_v58  ;;  %v11412_v58 = vld [vmem:[#allocation43_spill] sm:$0xff]  ;;  %v11418_v46 = vld [vmem:[#allocation28_spill] sm:$0xff] }
 0xc3f   :  { %7081 = vmatpush1.bf16.msra.mxu0 %v11402_v50  ;;  %7145 = vmatpush1.bf16.msra.mxu1 %v11403_v48  ;;  %v11413_v50 = vld [vmem:[#allocation48_spill] sm:$0xff]  ;;  %v11414_v48 = vld [vmem:[#allocation46_spill] sm:$0xff] }
 0xc40   :  { %7083 = vmatprep.subr.bf16.mxu0 %v11404_v19  ;;  %7147 = vmatprep.subr.bf16.mxu1 %v11405_v4  ;;  %v11415_v19 = vld [vmem:[#allocation49_spill] sm:$0xff]  ;;  %v11416_v4 = vld [vmem:[#allocation50_spill] sm:$0xff] }
 0xc43   :  { %7085 = vmatpush1.bf16.msra.mxu0 %v11406_v35  ;;  %7149 = vmatpush1.bf16.msra.mxu1 %v11407_v7  ;;  %v11417_v35 = vld [vmem:[#allocation51_spill] sm:$0xff] }
 0xc44   :  { %7087 = vmatprep.subr.bf16.mxu0 %v11408_v37  ;;  %7151 = vmatprep.subr.bf16.mxu1 %v11409_v12 }
 0xc47   :  { %7089 = vmatpush1.bf16.msra.mxu0 %v11410_v40  ;;  %7153 = vmatpush1.bf16.msra.mxu1 %v11411_v1 }
 0xc48   :  { %7091 = vmatprep.subr.bf16.mxu0 %v11412_v58  ;;  %7155 = vmatprep.subr.bf16.mxu1 %v11413_v50 }
 0xc4b   :  { %7093 = vmatpush1.bf16.msra.mxu0 %v11414_v48  ;;  %7157 = vmatpush1.bf16.msra.mxu1 %v11415_v19 }
 0xc4c   :  { %7159 = vmatprep.subr.bf16.mxu0 %v11416_v4  ;;  %7223 = vmatprep.subr.bf16.mxu1 %v11417_v35 }
 0xce1   :  { %v3722_v7 = vpop.f32.mrb[22].mxu0  ;;  %v3793_v37 = vpop.f32.mrb[30].mxu1 }
 0xce2   :  { %v3798_v12 = vadd.f32 %v3722_v7, %v11418_v46  ;;  %v3724_v44 = vpop.f32.mrb[23].mxu0  ;;  %v3795_v40 = vpop.f32.mrb[31].mxu1  ;;  %v3800_v48 = vadd.f32 %v3793_v37, %v8981_v31 }
 0xce3   :  { %v3799_v1 = vadd.f32 %v3724_v44, %v11419_v60  ;;  %v3801_v19 = vadd.f32 %v3795_v40, %v11293_v49  ;;  %v11428_v40 = vld [vmem:[#allocation58_spill] sm:$0xff] }
 0xce4   :  { %v5027_v22 = vmul.f32 -1.442695, %v3798_v12  ;;  %v5029_v50 = vmul.f32 -1.442695, %v3800_v48 }
 0xce5   :  { %v5028_v58 = vmul.f32 -1.442695, %v3799_v1 }
 0xce6   :  { %7880 = vpow2.f32 %v5027_v22 }
 0xce7   :  { %7882 = vpow2.f32 %v5028_v58 }
 0xce8   :  { %7884 = vtanh.f32 %v3801_v19 }
 0xce9   :  { %7886 = vpow2.f32 %v5029_v50  ;;  %v11426_v50 = vld [vmem:[#allocation56_spill] sm:$0xff] }
 0xcf0   :  { %v7881_v4 = vpop.eup %7880 }
 0xcf1   :  { %v3811_v13 = vadd.f32 1.0, %v7881_v4  ;;  %v7883_v35 = vpop.eup %7882 }
 0xcf2   :  { %v3812_v7 = vadd.f32 1.0, %v7883_v35  ;;  %v7885_v46 = vpop.eup %7884  ;;  %v11427_v35 = vld [vmem:[#allocation57_spill] sm:$0xff] }
 0xcf3   :  { %7888 = vrcp.f32 %v3811_v13  ;;  %v7887_v25 = vpop.eup %7886  ;;  %v11424_v13 = vld [vmem:[#allocation54_spill] sm:$0xff] }
 0xcf4   :  { %7890 = vrcp.f32 %v3812_v7  ;;  %v3813_v22 = vadd.f32 1.0, %v7887_v25  ;;  %v11422_v25 = vld [vmem:[#allocation52_spill] sm:$0xff]  ;;  %v11429_v7 = vld [vmem:[#allocation59_spill] sm:$0xff] }
 0xcf6   :  { %7892 = vrcp.f32 %v3813_v22  ;;  %v11433_v22 = vld [vmem:[#allocation63_spill] sm:$0xff] }
 0xcfd   :  { %v7889_v44 = vpop.eup %7888 }
 0xcfe   :  { %v3822_v12 = vmul.f32 %v7889_v44, %v7885_v46  ;;  %v7891_v1 = vpop.eup %7890  ;;  %v11425_v46 = vld [vmem:[#allocation55_spill] sm:$0xff]  ;;  %v11430_v44 = vld [vmem:[#allocation60_spill] sm:$0xff] }
 0xcff   :  { %v3821_v58 = vmul.f32 %v7891_v1, %v9761_v36  ;;  %v11423_v36 = vld [vmem:[#allocation53_spill] sm:$0xff]  ;;  %v11432_v1 = vld [vmem:[#allocation62_spill] sm:$0xff] }
 0xd00   :  { %v7893_v48 = vpop.eup %7892 }
 0xd01   :  { %v9954_v37 = vadd.f32 %v3822_v12, %v3821_v58  ;;  %v11431_v12 = vld [vmem:[#allocation61_spill] sm:$0xff]  ;;  %v11434_v58 = vld [vmem:[#allocation64_spill] sm:$0xff] }
 0xd03   :  { %11420 = vst [vmem:[#allocation153_spill] sm:$0xff] %v9954_v37  ;;  %7894 = vtanh.f32 %v9954_v37 }
 0xd0d   :  { %v7895_v19 = vpop.eup %7894 }
 0xd0e   :  { %v9957_v4 = vmul.f32 %v7895_v19, %v7893_v48  ;;  %v11435_v48 = vld [vmem:[#allocation65_spill] sm:$0xff]  ;;  %v11436_v19 = vld [vmem:[#allocation66_spill] sm:$0xff] }
 0xd10   :  { %11421 = vst [vmem:[#allocation146_spill] sm:$0xff] %v9957_v4  ;;  %3890 = vmatprep.mubr.f32.mxu0 %v9957_v4  ;;  %3961 = vmatprep.mubr.f32.mxu1 %v9957_v4 }
 0xd11   :  { %3891 = vmatmul.mubr.f32.vlgmr.msra.gmra.mrb[24].mxu0 %v9881_v20  ;;  %3962 = vmatmul.mubr.f32.vlgmr.msra.gmra.mrb[32].mxu1 %v9881_v20 }
 0xd12   :  { %7161 = vmatpush1.bf16.msra.mxu0 %v11422_v25  ;;  %7225 = vmatpush1.bf16.msra.mxu1 %v11423_v36  ;;  %v11520_v36 = vld [vmem:[#allocation151_spill] sm:$0xff] }
 0xd13   :  { %4032 = vmatprep.mubr.f32.mxu0 %v9957_v4  ;;  %4103 = vmatprep.mubr.f32.mxu1 %v9957_v4 }
 0xd14   :  { %7163 = vmatprep.subr.bf16.mxu0 %v11424_v13  ;;  %7227 = vmatprep.subr.bf16.mxu1 %v11425_v46 }
 0xd16   :  { %7165 = vmatpush1.bf16.msra.mxu0 %v11426_v50  ;;  %7229 = vmatpush1.bf16.msra.mxu1 %v11427_v35  ;;  %v11437_v50 = vld [vmem:[#allocation67_spill] sm:$0xff]  ;;  %v11438_v35 = vld [vmem:[#allocation68_spill] sm:$0xff] }
 0xd17   :  { %7167 = vmatprep.subr.bf16.mxu0 %v11428_v40  ;;  %7231 = vmatprep.subr.bf16.mxu1 %v11429_v7  ;;  %v11439_v40 = vld [vmem:[#allocation69_spill] sm:$0xff]  ;;  %v11440_v7 = vld [vmem:[#allocation70_spill] sm:$0xff] }
 0xd1a   :  { %7169 = vmatpush1.bf16.msra.mxu0 %v11430_v44  ;;  %7233 = vmatpush1.bf16.msra.mxu1 %v11431_v12  ;;  %v11441_v44 = vld [vmem:[#allocation71_spill] sm:$0xff]  ;;  %v11442_v12 = vld [vmem:[#allocation72_spill] sm:$0xff] }
 0xd1b   :  { %7171 = vmatprep.subr.bf16.mxu0 %v11432_v1  ;;  %7235 = vmatprep.subr.bf16.mxu1 %v11433_v22  ;;  %v11443_v1 = vld [vmem:[#allocation73_spill] sm:$0xff]  ;;  %v11444_v22 = vld [vmem:[#allocation74_spill] sm:$0xff] }
 0xd1e   :  { %7173 = vmatpush1.bf16.msra.mxu0 %v11434_v58  ;;  %7237 = vmatpush1.bf16.msra.mxu1 %v11435_v48  ;;  %v11445_v58 = vld [vmem:[#allocation75_spill] sm:$0xff]  ;;  %v11446_v48 = vld [vmem:[#allocation76_spill] sm:$0xff] }
 0xd1f   :  { %7175 = vmatprep.subr.bf16.mxu0 %v11436_v19  ;;  %7239 = vmatprep.subr.bf16.mxu1 %v11437_v50  ;;  %v11447_v19 = vld [vmem:[#allocation77_spill] sm:$0xff]  ;;  %v11448_v50 = vld [vmem:[#allocation78_spill] sm:$0xff] }
 0xd22   :  { %7177 = vmatpush1.bf16.msra.mxu0 %v11438_v35  ;;  %7241 = vmatpush1.bf16.msra.mxu1 %v11439_v40  ;;  %v11449_v35 = vld [vmem:[#allocation79_spill] sm:$0xff]  ;;  %v11450_v40 = vld [vmem:[#allocation80_spill] sm:$0xff] }
 0xd23   :  { %7179 = vmatprep.subr.bf16.mxu0 %v11440_v7  ;;  %7243 = vmatprep.subr.bf16.mxu1 %v11441_v44  ;;  %v11451_v7 = vld [vmem:[#allocation81_spill] sm:$0xff]  ;;  %v11452_v44 = vld [vmem:[#allocation82_spill] sm:$0xff] }
 0xd26   :  { %7181 = vmatpush1.bf16.msra.mxu0 %v11442_v12  ;;  %7245 = vmatpush1.bf16.msra.mxu1 %v11443_v1  ;;  %v11453_v12 = vld [vmem:[#allocation83_spill] sm:$0xff]  ;;  %v11454_v1 = vld [vmem:[#allocation84_spill] sm:$0xff] }
 0xd27   :  { %7183 = vmatprep.subr.bf16.mxu0 %v11444_v22  ;;  %7247 = vmatprep.subr.bf16.mxu1 %v11445_v58  ;;  %v11455_v22 = vld [vmem:[#allocation85_spill] sm:$0xff]  ;;  %v11456_v58 = vld [vmem:[#allocation86_spill] sm:$0xff] }
 0xd2a   :  { %7185 = vmatpush1.bf16.msra.mxu0 %v11446_v48  ;;  %7249 = vmatpush1.bf16.msra.mxu1 %v11447_v19  ;;  %v11457_v48 = vld [vmem:[#allocation87_spill] sm:$0xff]  ;;  %v11458_v19 = vld [vmem:[#allocation88_spill] sm:$0xff] }
 0xd2b   :  { %7187 = vmatprep.subr.bf16.mxu0 %v11448_v50  ;;  %7251 = vmatprep.subr.bf16.mxu1 %v11449_v35  ;;  %v11459_v50 = vld [vmem:[#allocation89_spill] sm:$0xff]  ;;  %v11460_v35 = vld [vmem:[#allocation90_spill] sm:$0xff] }
 0xd2e   :  { %7189 = vmatpush1.bf16.msra.mxu0 %v11450_v40  ;;  %7253 = vmatpush1.bf16.msra.mxu1 %v11451_v7  ;;  %v11461_v40 = vld [vmem:[#allocation91_spill] sm:$0xff]  ;;  %v11462_v7 = vld [vmem:[#allocation92_spill] sm:$0xff] }
 0xd2f   :  { %7191 = vmatprep.subr.bf16.mxu0 %v11452_v44  ;;  %7255 = vmatprep.subr.bf16.mxu1 %v11453_v12  ;;  %v11463_v44 = vld [vmem:[#allocation93_spill] sm:$0xff]  ;;  %v11464_v12 = vld [vmem:[#allocation94_spill] sm:$0xff] }
 0xd32   :  { %7193 = vmatpush1.bf16.msra.mxu0 %v11454_v1  ;;  %7257 = vmatpush1.bf16.msra.mxu1 %v11455_v22  ;;  %v11465_v1 = vld [vmem:[#allocation95_spill] sm:$0xff]  ;;  %v11466_v22 = vld [vmem:[#allocation96_spill] sm:$0xff] }
 0xd33   :  { %7195 = vmatprep.subr.bf16.mxu0 %v11456_v58  ;;  %7259 = vmatprep.subr.bf16.mxu1 %v11457_v48  ;;  %v11467_v58 = vld [vmem:[#allocation97_spill] sm:$0xff]  ;;  %v11468_v48 = vld [vmem:[#allocation98_spill] sm:$0xff] }
 0xd36   :  { %7197 = vmatpush1.bf16.msra.mxu0 %v11458_v19  ;;  %7261 = vmatpush1.bf16.msra.mxu1 %v11459_v50  ;;  %v11469_v19 = vld [vmem:[#allocation99_spill] sm:$0xff]  ;;  %v11470_v50 = vld [vmem:[#allocation100_spill] sm:$0xff] }
 0xd37   :  { %7199 = vmatprep.subr.bf16.mxu0 %v11460_v35  ;;  %7263 = vmatprep.subr.bf16.mxu1 %v11461_v40  ;;  %v11471_v35 = vld [vmem:[#allocation101_spill] sm:$0xff]  ;;  %v11472_v40 = vld [vmem:[#allocation102_spill] sm:$0xff] }
 0xd3a   :  { %7201 = vmatpush1.bf16.msra.mxu0 %v11462_v7  ;;  %7265 = vmatpush1.bf16.msra.mxu1 %v11463_v44  ;;  %v11473_v7 = vld [vmem:[#allocation103_spill] sm:$0xff]  ;;  %v11474_v44 = vld [vmem:[#allocation104_spill] sm:$0xff] }
 0xd3b   :  { %7203 = vmatprep.subr.bf16.mxu0 %v11464_v12  ;;  %7267 = vmatprep.subr.bf16.mxu1 %v11465_v1  ;;  %v11475_v12 = vld [vmem:[#allocation105_spill] sm:$0xff]  ;;  %v11476_v1 = vld [vmem:[#allocation106_spill] sm:$0xff] }
 0xd3e   :  { %7205 = vmatpush1.bf16.msra.mxu0 %v11466_v22  ;;  %7269 = vmatpush1.bf16.msra.mxu1 %v11467_v58  ;;  %v11477_v22 = vld [vmem:[#allocation107_spill] sm:$0xff]  ;;  %v11478_v58 = vld [vmem:[#allocation108_spill] sm:$0xff] }
 0xd3f   :  { %7207 = vmatprep.subr.bf16.mxu0 %v11468_v48  ;;  %7271 = vmatprep.subr.bf16.mxu1 %v11469_v19  ;;  %v11479_v48 = vld [vmem:[#allocation109_spill] sm:$0xff]  ;;  %v11480_v19 = vld [vmem:[#allocation110_spill] sm:$0xff] }
 0xd42   :  { %7209 = vmatpush1.bf16.msra.mxu0 %v11470_v50  ;;  %7273 = vmatpush1.bf16.msra.mxu1 %v11471_v35  ;;  %v11481_v50 = vld [vmem:[#allocation111_spill] sm:$0xff]  ;;  %v11482_v35 = vld [vmem:[#allocation112_spill] sm:$0xff] }
 0xd43   :  { %7211 = vmatprep.subr.bf16.mxu0 %v11472_v40  ;;  %7275 = vmatprep.subr.bf16.mxu1 %v11473_v7  ;;  %v11483_v40 = vld [vmem:[#allocation113_spill] sm:$0xff]  ;;  %v11484_v7 = vld [vmem:[#allocation114_spill] sm:$0xff] }
 0xd46   :  { %7213 = vmatpush1.bf16.msra.mxu0 %v11474_v44  ;;  %7277 = vmatpush1.bf16.msra.mxu1 %v11475_v12  ;;  %v11485_v44 = vld [vmem:[#allocation115_spill] sm:$0xff] }
 0xd47   :  { %7215 = vmatprep.subr.bf16.mxu0 %v11476_v1  ;;  %7279 = vmatprep.subr.bf16.mxu1 %v11477_v22  ;;  %v11486_v22 = vld [vmem:[#allocation116_spill] sm:$0xff]  ;;  %v11500_v1 = vld [vmem:[#allocation129_spill] sm:$0xff] }
 0xd4a   :  { %7217 = vmatpush1.bf16.msra.mxu0 %v11478_v58  ;;  %7281 = vmatpush1.bf16.msra.mxu1 %v11479_v48  ;;  %v11487_v58 = vld [vmem:[#allocation117_spill] sm:$0xff]  ;;  %v11488_v48 = vld [vmem:[#allocation118_spill] sm:$0xff] }
 0xd4b   :  { %7219 = vmatprep.subr.bf16.mxu0 %v11480_v19  ;;  %7283 = vmatprep.subr.bf16.mxu1 %v11481_v50  ;;  %v11489_v19 = vld [vmem:[#allocation119_spill] sm:$0xff]  ;;  %v11490_v50 = vmov 0.0  }
 0xd4e   :  { %7221 = vmatpush1.bf16.msra.mxu0 %v11482_v35  ;;  %7285 = vmatpush1.bf16.msra.mxu1 %v11483_v40  ;;  %v11491_v40 = vld [vmem:[#allocation120_spill] sm:$0xff]  ;;  %v11494_v35 = vld [vmem:[#allocation123_spill] sm:$0xff] }
 0xd4f   :  { %7287 = vmatprep.subr.bf16.mxu0 %v11484_v7  ;;  %7319 = vmatprep.subr.bf16.mxu1 %v11485_v44  ;;  %v11492_v7 = vld [vmem:[#allocation121_spill] sm:$0xff]  ;;  %v11493_v44 = vld [vmem:[#allocation122_spill] sm:$0xff] }
 0xd51   :  { %4033 = vmatmul.mubr.f32.vlgmr.msra.gmra.mrb[26].mxu0 %v9881_v20  ;;  %4104 = vmatmul.mubr.f32.vlgmr.msra.gmra.mrb[34].mxu1 %v9881_v20  ;;  %v11495_v20 = vld [vmem:[#allocation124_spill] sm:$0xff] }
 0xd52   :  { %7289 = vmatpush1.bf16.msra.mxu0 %v11486_v22  ;;  %7321 = vmatpush1.bf16.msra.mxu1 %v11487_v58  ;;  %v11496_v22 = vld [vmem:[#allocation125_spill] sm:$0xff]  ;;  %v11497_v58 = vld [vmem:[#allocation126_spill] sm:$0xff] }
 0xd53   :  { %7291 = vmatprep.subr.bf16.mxu0 %v11488_v48  ;;  %7323 = vmatprep.subr.bf16.mxu1 %v11489_v19  ;;  %v11498_v48 = vld [vmem:[#allocation127_spill] sm:$0xff]  ;;  %v11499_v19 = vld [vmem:[#allocation128_spill] sm:$0xff] }
 0xd54   :  { %4217 = vmatprep.mubr.f32.mxu0 %v11490_v50  ;;  %4288 = vmatprep.mubr.f32.mxu1 %v11490_v50  ;;  %v11501_v50 = vld [vmem:[#allocation130_spill] sm:$0xff] }
 0xd56   :  { %7293 = vmatpush1.bf16.msra.mxu0 %v11491_v40  ;;  %7325 = vmatpush1.bf16.msra.mxu1 %v11492_v7  ;;  %v11502_v40 = vld [vmem:[#allocation131_spill] sm:$0xff]  ;;  %v11503_v7 = vld [vmem:[#allocation132_spill] sm:$0xff] }
 0xd57   :  { %7295 = vmatprep.subr.bf16.mxu0 %v11493_v44  ;;  %7327 = vmatprep.subr.bf16.mxu1 %v11494_v35  ;;  %v11504_v44 = vld [vmem:[#allocation133_spill] sm:$0xff]  ;;  %v11505_v35 = vld [vmem:[#allocation134_spill] sm:$0xff] }
 0xd5a   :  { %7297 = vmatpush1.bf16.msra.mxu0 %v11495_v20  ;;  %7329 = vmatpush1.bf16.msra.mxu1 %v11496_v22  ;;  %v11506_v20 = vld [vmem:[#allocation135_spill] sm:$0xff]  ;;  %v11507_v22 = vld [vmem:[#allocation136_spill] sm:$0xff] }
 0xd5b   :  { %7299 = vmatprep.subr.bf16.mxu0 %v11497_v58  ;;  %7331 = vmatprep.subr.bf16.mxu1 %v11498_v48  ;;  %v11508_v58 = vld [vmem:[#allocation137_spill] sm:$0xff]  ;;  %v11509_v48 = vld [vmem:[#allocation138_spill] sm:$0xff] }
 0xd5e   :  { %7301 = vmatpush1.bf16.msra.mxu0 %v11499_v19  ;;  %7333 = vmatpush1.bf16.msra.mxu1 %v11500_v1  ;;  %v11510_v19 = vld [vmem:[#allocation139_spill] sm:$0xff]  ;;  %v11511_v1 = vld [vmem:[#allocation140_spill] sm:$0xff] }
 0xd5f   :  { %7303 = vmatprep.subr.bf16.mxu0 %v11501_v50  ;;  %7335 = vmatprep.subr.bf16.mxu1 %v11502_v40  ;;  %v11512_v50 = vld [vmem:[#allocation141_spill] sm:$0xff]  ;;  %v11513_v40 = vld [vmem:[#allocation142_spill] sm:$0xff] }
 0xd62   :  { %7305 = vmatpush1.bf16.msra.mxu0 %v11503_v7  ;;  %7337 = vmatpush1.bf16.msra.mxu1 %v11504_v44  ;;  %v11514_v7 = vld [vmem:[#allocation143_spill] sm:$0xff]  ;;  %v11515_v44 = vld [vmem:[#allocation144_spill] sm:$0xff] }
 0xd63   :  { %7307 = vmatprep.subr.bf16.mxu0 %v11505_v35  ;;  %7339 = vmatprep.subr.bf16.mxu1 %v11506_v20  ;;  %v11516_v35 = vld [vmem:[#allocation145_spill] sm:$0xff]  ;;  %v11517_v20 = vld [vmem:[#allocation23_spill] sm:$0xff] }
 0xd66   :  { %7309 = vmatpush1.bf16.msra.mxu0 %v11507_v22  ;;  %7341 = vmatpush1.bf16.msra.mxu1 %v11508_v58  ;;  %v11518_v22 = vld [vmem:[#allocation24_spill] sm:$0xff] }
 0xd67   :  { %7311 = vmatprep.subr.bf16.mxu0 %v11509_v48  ;;  %7343 = vmatprep.subr.bf16.mxu1 %v11510_v19 }
 0xd6a   :  { %7313 = vmatpush1.bf16.msra.mxu0 %v11511_v1  ;;  %7345 = vmatpush1.bf16.msra.mxu1 %v11512_v50 }
 0xd6b   :  { %7315 = vmatprep.subr.bf16.mxu0 %v11513_v40  ;;  %7347 = vmatprep.subr.bf16.mxu1 %v11514_v7  ;;  %v11519_v7 = vld [vmem:[#allocation149_spill] sm:$0xff] }
 0xd6e   :  { %7317 = vmatpush1.bf16.msra.mxu0 %v11515_v44  ;;  %7349 = vmatpush1.bf16.msra.mxu1 %v11516_v35  ;;  %v11521_v44 = vcombine.low %v11519_v7, %v11520_v36 }
 0xd6f   :  { %7351 = vmatprep.subr.bf16.mxu0 %v11517_v20  ;;  %7415 = vmatprep.subr.bf16.mxu1 %v11518_v22 }
 0xde4   :  { %v3892_v58 = vpop.f32.mrb[24].mxu0  ;;  %v3963_v48 = vpop.f32.mrb[32].mxu1 }
 0xde5   :  { %v3894_v12 = vpop.f32.mrb[25].mxu0  ;;  %v3965_v19 = vpop.f32.mrb[33].mxu1 }
 0xde6   :  { %v4114_v46 = vcombine.low %v3892_v58, %v3894_v12  ;;  %v4115_v1 = vcombine.low %v3963_v48, %v3965_v19 }
 0xde8   :  { %v4122_v50 = vrot.slane %v4114_v46, %v8327_v18  ;;  %v4129_v40 = vrot.slane %v4115_v1, %v8327_v18 }
 0xdea   :  { %v4130_v13 = vcombine.low %v4122_v50, %v4129_v40 }
 0xdec   :  { %v4132_v25 = vadd.f32 %v4130_v13, %v11521_v44 }
 0xdee   :  { %v5030_v35 = vmul.f32 -1.442695, %v4132_v25  ;;  %v4140_v22 = vrot.slane %v4132_v25, 6 }
 0xdf0   :  { %7896 = vpow2.f32 %v5030_v35  ;;  %v11547_v35 = vld [vmem:[#allocation153_spill] sm:$0xff] }
 0xdfa   :  { %v7897_v20 = vpop.eup %7896 }
 0xdfb   :  { %v4136_v4 = vadd.f32 1.0, %v7897_v20 }
 0xdfd   :  { %7898 = vrcp.f32 %v4136_v4 }
 0xdfe   :  { %7900 = vtanh.f32 %v4140_v22  ;;  %v11548_v22 = vld [vmem:[#allocation146_spill] sm:$0xff] }
 0xe07   :  { %v7899_v37 = vpop.eup %7898 }
 0xe08   :  { %v4144_v49 = vrot.slane %v7899_v37, 2  ;;  %v7901_v12 = vpop.eup %7900  ;;  %v4150_v50 = vrot.slane %v7899_v37, 4 }
 0xe09   :  { %v4147_v46 = vmul.f32 %v7901_v12, %v7899_v37  ;;  %v4830_v12 = vrot.slane %v11548_v22, 6  ;;  %v11597_v22 = vld [vmem:[#allocation99_spill] sm:$0xff] }
 0xe0a   :  { %v4146_v58 = vmul.f32 %v4144_v49, %v9878_v0 }
 0xe0c   :  { %v10071_v48 = vadd.f32 %v4147_v46, %v4146_v58 }
 0xe0e   :  { %7902 = vtanh.f32 %v10071_v48 }
 0xe18   :  { %v7903_v40 = vpop.eup %7902 }
 0xe19   :  { %v10074_v13 = vmul.f32 %v7903_v40, %v4150_v50  ;;  %v11549_v50 = vld [vmem:[#allocation154_spill] sm:$0xff] }
 0xe1a   :  { %v4844_v40 = vsel %vm4838_vm1, %v11549_v50, %v4830_v12  ;;  %v11598_v12 = vld [vmem:[#allocation100_spill] sm:$0xff]  ;;  %v11601_v50 = vld [vmem:[#allocation103_spill] sm:$0xff] }
 0xe1b   :  { %4218 = vmatmul.mubr.f32.vlgmr.msra.gmra.mrb[26].mxu0 %v10074_v13  ;;  %4289 = vmatmul.mubr.f32.vlgmr.msra.gmra.mrb[34].mxu1 %v10074_v13 }
 0xe1c   :  { %7353 = vmatpush1.bf16.msra.mxu0 %v8335_v52  ;;  %7417 = vmatpush1.bf16.msra.mxu1 %v8352_v11  ;;  %v11522_v52 = vld [vmem:[#allocation32_spill] sm:$0xff] }
 0xe1d   :  { %7355 = vmatprep.subr.bf16.mxu0 %v8340_v63  ;;  %7419 = vmatprep.subr.bf16.mxu1 %v8356_v14  ;;  %v11523_v63 = vld [vmem:[#allocation27_spill] sm:$0xff]  ;;  %v11526_v11 = vld [vmem:[#allocation36_spill] sm:$0xff] }
 0xe1e   :  { %v11527_v14 = vld [vmem:[#allocation31_spill] sm:$0xff] }
 0xe20   :  { %7357 = vmatpush1.bf16.msra.mxu0 %v8345_v2  ;;  %7421 = vmatpush1.bf16.msra.mxu1 %v8366_v26  ;;  %v11524_v2 = vld [vmem:[#allocation33_spill] sm:$0xff]  ;;  %v11530_v26 = vld [vmem:[#allocation40_spill] sm:$0xff] }
 0xe21   :  { %7359 = vmatprep.subr.bf16.mxu0 %v8348_v8  ;;  %7423 = vmatprep.subr.bf16.mxu1 %v8370_v27  ;;  %v11525_v8 = vld [vmem:[#allocation30_spill] sm:$0xff]  ;;  %v11531_v27 = vld [vmem:[#allocation35_spill] sm:$0xff] }
 0xe24   :  { %7361 = vmatpush1.bf16.msra.mxu0 %v8358_v17  ;;  %7425 = vmatpush1.bf16.msra.mxu1 %v8379_v38  ;;  %v11528_v17 = vld [vmem:[#allocation37_spill] sm:$0xff]  ;;  %v11534_v38 = vld [vmem:[#allocation44_spill] sm:$0xff] }
 0xe25   :  { %7363 = vmatprep.subr.bf16.mxu0 %v8361_v21  ;;  %7427 = vmatprep.subr.bf16.mxu1 %v8383_v39  ;;  %v11529_v21 = vld [vmem:[#allocation34_spill] sm:$0xff]  ;;  %v11535_v39 = vld [vmem:[#allocation39_spill] sm:$0xff] }
 0xe28   :  { %7365 = vmatpush1.bf16.msra.mxu0 %v8372_v30  ;;  %7429 = vmatpush1.bf16.msra.mxu1 %v8391_v51  ;;  %v11532_v30 = vld [vmem:[#allocation41_spill] sm:$0xff]  ;;  %v11538_v51 = vld [vmem:[#allocation47_spill] sm:$0xff] }
 0xe29   :  { %7367 = vmatprep.subr.bf16.mxu0 %v8375_v33  ;;  %7431 = vmatprep.subr.bf16.mxu1 %v8395_v53  ;;  %v11533_v33 = vld [vmem:[#allocation38_spill] sm:$0xff]  ;;  %v11539_v53 = vld [vmem:[#allocation43_spill] sm:$0xff] }
 0xe2c   :  { %7369 = vmatpush1.bf16.msra.mxu0 %v8385_v42  ;;  %7433 = vmatpush1.bf16.msra.mxu1 %v8403_v5  ;;  %v11536_v42 = vld [vmem:[#allocation45_spill] sm:$0xff] }
 0xe2d   :  { %7371 = vmatprep.subr.bf16.mxu0 %v8388_v45  ;;  %7435 = vmatprep.subr.bf16.mxu1 %v8407_v6  ;;  %v11537_v45 = vld [vmem:[#allocation42_spill] sm:$0xff]  ;;  %v11542_v5 = vld [vmem:[#allocation49_spill] sm:$0xff] }
 0xe2e   :  { %v11543_v6 = vld [vmem:[#allocation50_spill] sm:$0xff] }
 0xe30   :  { %7373 = vmatpush1.bf16.msra.mxu0 %v8397_v56  ;;  %7437 = vmatpush1.bf16.msra.mxu1 %v8415_v23  ;;  %v11540_v56 = vld [vmem:[#allocation48_spill] sm:$0xff] }
 0xe31   :  { %7375 = vmatprep.subr.bf16.mxu0 %v8400_v59  ;;  %7439 = vmatprep.subr.bf16.mxu1 %v8419_v24  ;;  %v11541_v59 = vld [vmem:[#allocation46_spill] sm:$0xff]  ;;  %v11545_v24 = vld [vmem:[#allocation28_spill] sm:$0xff] }
 0xe34   :  { %7377 = vmatpush1.bf16.msra.mxu0 %v8409_v10  ;;  %7441 = vmatpush1.bf16.msra.mxu1 %v8427_v41  ;;  %v11544_v10 = vld [vmem:[#allocation51_spill] sm:$0xff] }
 0xe35   :  { %7379 = vmatprep.subr.bf16.mxu0 %v8412_v15  ;;  %7443 = vmatprep.subr.bf16.mxu1 %v8431_v43 }
 0xe38   :  { %7381 = vmatpush1.bf16.msra.mxu0 %v8421_v29  ;;  %7445 = vmatpush1.bf16.msra.mxu1 %v8439_v61 }
 0xe39   :  { %7383 = vmatprep.subr.bf16.mxu0 %v8424_v34  ;;  %7447 = vmatprep.subr.bf16.mxu1 %v8443_v62  ;;  %v11546_v62 = vld [vmem:[#allocation152_spill] sm:$0xff] }
 0xe3c   :  { %7385 = vmatpush1.bf16.msra.mxu0 %v8433_v47  ;;  %7449 = vmatpush1.bf16.msra.mxu1 %v8451_v28 }
 0xe3d   :  { %7387 = vmatprep.subr.bf16.mxu0 %v8436_v54  ;;  %7451 = vmatprep.subr.bf16.mxu1 %v8455_v32 }
 0xe40   :  { %7389 = vmatpush1.bf16.msra.mxu0 %v8445_v9  ;;  %7453 = vmatpush1.bf16.msra.mxu1 %v10753_v16 }
 0xe41   :  { %7391 = vmatprep.subr.bf16.mxu0 %v10754_v55  ;;  %7455 = vmatprep.subr.bf16.mxu1 %v10885_v57 }
 0xe44   :  { %7393 = vmatpush1.bf16.msra.mxu0 %v11394_v3  ;;  %7457 = vmatpush1.bf16.msra.mxu1 %v11522_v52  ;;  %v11550_v52 = vld [vmem:[#allocation52_spill] sm:$0xff] }
 0xe45   :  { %7395 = vmatprep.subr.bf16.mxu0 %v11523_v63  ;;  %7459 = vmatprep.subr.bf16.mxu1 %v11524_v2  ;;  %v11551_v63 = vld [vmem:[#allocation53_spill] sm:$0xff] }
 0xe48   :  { %7397 = vmatpush1.bf16.msra.mxu0 %v11525_v8  ;;  %7461 = vmatpush1.bf16.msra.mxu1 %v11526_v11  ;;  %v11552_v8 = vld [vmem:[#allocation54_spill] sm:$0xff]  ;;  %v11553_v11 = vld [vmem:[#allocation55_spill] sm:$0xff] }
 0xe49   :  { %7399 = vmatprep.subr.bf16.mxu0 %v11527_v14  ;;  %7463 = vmatprep.subr.bf16.mxu1 %v11528_v17  ;;  %v11554_v14 = vld [vmem:[#allocation56_spill] sm:$0xff]  ;;  %v11555_v17 = vld [vmem:[#allocation57_spill] sm:$0xff] }
 0xe4c   :  { %7401 = vmatpush1.bf16.msra.mxu0 %v11529_v21  ;;  %7465 = vmatpush1.bf16.msra.mxu1 %v11530_v26  ;;  %v11556_v21 = vld [vmem:[#allocation58_spill] sm:$0xff]  ;;  %v11557_v26 = vld [vmem:[#allocation59_spill] sm:$0xff] }
 0xe4d   :  { %7403 = vmatprep.subr.bf16.mxu0 %v11531_v27  ;;  %7467 = vmatprep.subr.bf16.mxu1 %v11532_v30  ;;  %v11558_v27 = vld [vmem:[#allocation60_spill] sm:$0xff]  ;;  %v11559_v30 = vld [vmem:[#allocation61_spill] sm:$0xff] }
 0xe50   :  { %7405 = vmatpush1.bf16.msra.mxu0 %v11533_v33  ;;  %7469 = vmatpush1.bf16.msra.mxu1 %v11534_v38  ;;  %v11560_v33 = vld [vmem:[#allocation62_spill] sm:$0xff]  ;;  %v11561_v38 = vld [vmem:[#allocation63_spill] sm:$0xff] }
 0xe51   :  { %7407 = vmatprep.subr.bf16.mxu0 %v11535_v39  ;;  %7471 = vmatprep.subr.bf16.mxu1 %v11536_v42  ;;  %v11562_v39 = vld [vmem:[#allocation64_spill] sm:$0xff]  ;;  %v11563_v42 = vld [vmem:[#allocation65_spill] sm:$0xff] }
 0xe54   :  { %7409 = vmatpush1.bf16.msra.mxu0 %v11537_v45  ;;  %7473 = vmatpush1.bf16.msra.mxu1 %v11538_v51  ;;  %v11564_v45 = vld [vmem:[#allocation66_spill] sm:$0xff]  ;;  %v11565_v51 = vld [vmem:[#allocation67_spill] sm:$0xff] }
 0xe55   :  { %7411 = vmatprep.subr.bf16.mxu0 %v11539_v53  ;;  %7475 = vmatprep.subr.bf16.mxu1 %v11540_v56  ;;  %v11566_v53 = vld [vmem:[#allocation68_spill] sm:$0xff]  ;;  %v11567_v56 = vld [vmem:[#allocation69_spill] sm:$0xff] }
 0xe58   :  { %7413 = vmatpush1.bf16.msra.mxu0 %v11541_v59  ;;  %7477 = vmatpush1.bf16.msra.mxu1 %v11542_v5  ;;  %v11568_v59 = vld [vmem:[#allocation70_spill] sm:$0xff]  ;;  %v11569_v5 = vld [vmem:[#allocation71_spill] sm:$0xff] }
 0xe59   :  { %7479 = vmatprep.subr.bf16.mxu0 %v11543_v6  ;;  %7543 = vmatprep.subr.bf16.mxu1 %v11544_v10  ;;  %v11570_v6 = vld [vmem:[#allocation72_spill] sm:$0xff]  ;;  %v11571_v10 = vld [vmem:[#allocation73_spill] sm:$0xff] }
 0xeee   :  { %v4219_v15 = vpop.f32.mrb[26].mxu0  ;;  %v4290_v23 = vpop.f32.mrb[34].mxu1 }
 0xeef   :  { %v4295_v29 = vadd.f32 %v4219_v15, %v11545_v24  ;;  %v4221_v34 = vpop.f32.mrb[27].mxu0  ;;  %v4292_v41 = vpop.f32.mrb[35].mxu1  ;;  %v4297_v61 = vadd.f32 %v4290_v23, %v8981_v31  ;;  %v11572_v15 = vld [vmem:[#allocation74_spill] sm:$0xff]  ;;  %v11573_v23 = vld [vmem:[#allocation75_spill] sm:$0xff] }
 0xef0   :  { %v4296_v43 = vadd.f32 %v4221_v34, %v11419_v60  ;;  %v4298_v9 = vadd.f32 %v4292_v41, %v11546_v62  ;;  %v11575_v34 = vld [vmem:[#allocation77_spill] sm:$0xff]  ;;  %v11576_v41 = vld [vmem:[#allocation78_spill] sm:$0xff] }
 0xef1   :  { %v5031_v47 = vmul.f32 -1.442695, %v4295_v29  ;;  %v5033_v28 = vmul.f32 -1.442695, %v4297_v61  ;;  %v11574_v29 = vld [vmem:[#allocation76_spill] sm:$0xff]  ;;  %v11580_v61 = vld [vmem:[#allocation82_spill] sm:$0xff] }
 0xef2   :  { %v5032_v54 = vmul.f32 -1.442695, %v4296_v43  ;;  %v11577_v43 = vld [vmem:[#allocation79_spill] sm:$0xff] }
 0xef3   :  { %7904 = vpow2.f32 %v5031_v47  ;;  %v11578_v47 = vld [vmem:[#allocation80_spill] sm:$0xff] }
 0xef4   :  { %7906 = vpow2.f32 %v5032_v54  ;;  %v11579_v54 = vld [vmem:[#allocation81_spill] sm:$0xff] }
 0xef5   :  { %7908 = vtanh.f32 %v4298_v9  ;;  %v11581_v9 = vld [vmem:[#allocation83_spill] sm:$0xff] }
 0xef6   :  { %7910 = vpow2.f32 %v5033_v28  ;;  %v11582_v28 = vld [vmem:[#allocation84_spill] sm:$0xff] }
 0xefd   :  { %v7905_v32 = vpop.eup %7904 }
 0xefe   :  { %v4308_v16 = vadd.f32 1.0, %v7905_v32  ;;  %v7907_v55 = vpop.eup %7906  ;;  %v11583_v32 = vld [vmem:[#allocation85_spill] sm:$0xff] }
 0xeff   :  { %v4309_v57 = vadd.f32 1.0, %v7907_v55  ;;  %v7909_v49 = vpop.eup %7908  ;;  %v11585_v55 = vld [vmem:[#allocation87_spill] sm:$0xff] }
 0xf00   :  { %7912 = vrcp.f32 %v4308_v16  ;;  %v7911_v0 = vpop.eup %7910  ;;  %v11584_v16 = vld [vmem:[#allocation86_spill] sm:$0xff] }
 0xf01   :  { %7914 = vrcp.f32 %v4309_v57  ;;  %v4310_v25 = vadd.f32 1.0, %v7911_v0  ;;  %v11586_v57 = vld [vmem:[#allocation88_spill] sm:$0xff]  ;;  %v11588_v0 = vld [vmem:[#allocation90_spill] sm:$0xff] }
 0xf03   :  { %7916 = vrcp.f32 %v4310_v25  ;;  %v11592_v25 = vld [vmem:[#allocation94_spill] sm:$0xff] }
 0xf0a   :  { %v7913_v3 = vpop.eup %7912 }
 0xf0b   :  { %v4319_v37 = vmul.f32 %v7913_v3, %v7909_v49  ;;  %v7915_v4 = vpop.eup %7914  ;;  %v11587_v49 = vld [vmem:[#allocation89_spill] sm:$0xff]  ;;  %v11589_v3 = vld [vmem:[#allocation91_spill] sm:$0xff] }
 0xf0c   :  { %v4318_v44 = vmul.f32 %v7915_v4, %v11547_v35  ;;  %v11591_v4 = vld [vmem:[#allocation93_spill] sm:$0xff]  ;;  %v11593_v35 = vld [vmem:[#allocation95_spill] sm:$0xff] }
 0xf0d   :  { %v7917_v19 = vpop.eup %7916 }
 0xf0e   :  { %v10147_v1 = vadd.f32 %v4319_v37, %v4318_v44  ;;  %v11590_v37 = vld [vmem:[#allocation92_spill] sm:$0xff] }
 0xf0f   :  { %v11594_v44 = vld [vmem:[#allocation96_spill] sm:$0xff] }
 0xf10   :  { %7918 = vtanh.f32 %v10147_v1 }
 0xf1a   :  { %v7919_v20 = vpop.eup %7918 }
 0xf1b   :  { %v4322_v58 = vmul.f32 %v7919_v20, %v7917_v19  ;;  %v11595_v19 = vld [vmem:[#allocation97_spill] sm:$0xff]  ;;  %v11596_v20 = vld [vmem:[#allocation98_spill] sm:$0xff] }
 0xf1d   :  { %4387 = vmatprep.mubr.f32.mxu0 %v4322_v58  ;;  %4458 = vmatprep.mubr.f32.mxu1 %v4322_v58  ;;  %v4833_v46 = vrot.slane %v4322_v58, 4 }
 0xf1e   :  { %4388 = vmatmul.mubr.f32.vlgmr.msra.gmra.mrb[28].mxu0 %v10074_v13  ;;  %4459 = vmatmul.mubr.f32.vlgmr.msra.gmra.mrb[36].mxu1 %v10074_v13 }
 0xf1f   :  { %7481 = vmatpush1.bf16.msra.mxu0 %v11550_v52  ;;  %7545 = vmatpush1.bf16.msra.mxu1 %v11551_v63  ;;  %v10158_v2 = vsel %vm4840_vm2, %v4844_v40, %v4833_v46  ;;  %v11600_v46 = vld [vmem:[#allocation102_spill] sm:$0xff]  ;;  %v11602_v40 = vld [vmem:[#allocation104_spill] sm:$0xff]  ;;  %v11603_v52 = vld [vmem:[#allocation105_spill] sm:$0xff] }
 0xf20   :  { %4529 = vmatprep.mubr.f32.mxu0 %v4322_v58  ;;  %4600 = vmatprep.mubr.f32.mxu1 %v4322_v58  ;;  %v11599_v58 = vld [vmem:[#allocation101_spill] sm:$0xff]  ;;  %v11604_v63 = vld [vmem:[#allocation106_spill] sm:$0xff] }
 0xf21   :  { %7483 = vmatprep.subr.bf16.mxu0 %v11552_v8  ;;  %7547 = vmatprep.subr.bf16.mxu1 %v11553_v11  ;;  %v11605_v8 = vld [vmem:[#allocation107_spill] sm:$0xff]  ;;  %v11606_v11 = vld [vmem:[#allocation108_spill] sm:$0xff] }
 0xf23   :  { %7485 = vmatpush1.bf16.msra.mxu0 %v11554_v14  ;;  %7549 = vmatpush1.bf16.msra.mxu1 %v11555_v17  ;;  %v11607_v14 = vld [vmem:[#allocation109_spill] sm:$0xff]  ;;  %v11608_v17 = vld [vmem:[#allocation110_spill] sm:$0xff] }
 0xf24   :  { %7487 = vmatprep.subr.bf16.mxu0 %v11556_v21  ;;  %7551 = vmatprep.subr.bf16.mxu1 %v11557_v26  ;;  %v11609_v21 = vld [vmem:[#allocation111_spill] sm:$0xff]  ;;  %v11610_v26 = vld [vmem:[#allocation112_spill] sm:$0xff] }
 0xf27   :  { %7489 = vmatpush1.bf16.msra.mxu0 %v11558_v27  ;;  %7553 = vmatpush1.bf16.msra.mxu1 %v11559_v30  ;;  %v11611_v27 = vld [vmem:[#allocation113_spill] sm:$0xff]  ;;  %v11612_v30 = vld [vmem:[#allocation114_spill] sm:$0xff] }
 0xf28   :  { %7491 = vmatprep.subr.bf16.mxu0 %v11560_v33  ;;  %7555 = vmatprep.subr.bf16.mxu1 %v11561_v38  ;;  %v11613_v33 = vld [vmem:[#allocation115_spill] sm:$0xff]  ;;  %v11614_v38 = vld [vmem:[#allocation116_spill] sm:$0xff] }
 0xf2b   :  { %7493 = vmatpush1.bf16.msra.mxu0 %v11562_v39  ;;  %7557 = vmatpush1.bf16.msra.mxu1 %v11563_v42  ;;  %v11615_v39 = vld [vmem:[#allocation117_spill] sm:$0xff]  ;;  %v11616_v42 = vld [vmem:[#allocation118_spill] sm:$0xff] }
 0xf2c   :  { %7495 = vmatprep.subr.bf16.mxu0 %v11564_v45  ;;  %7559 = vmatprep.subr.bf16.mxu1 %v11565_v51  ;;  %v11617_v45 = vld [vmem:[#allocation119_spill] sm:$0xff]  ;;  %v11618_v51 = vmov 0.0  }
 0xf2f   :  { %7497 = vmatpush1.bf16.msra.mxu0 %v11566_v53  ;;  %7561 = vmatpush1.bf16.msra.mxu1 %v11567_v56  ;;  %v11619_v53 = vld [vmem:[#allocation120_spill] sm:$0xff]  ;;  %v11620_v56 = vld [vmem:[#allocation121_spill] sm:$0xff] }
 0xf30   :  { %7499 = vmatprep.subr.bf16.mxu0 %v11568_v59  ;;  %7563 = vmatprep.subr.bf16.mxu1 %v11569_v5  ;;  %v11621_v59 = vld [vmem:[#allocation122_spill] sm:$0xff]  ;;  %v11622_v5 = vld [vmem:[#allocation123_spill] sm:$0xff] }
 0xf33   :  { %7501 = vmatpush1.bf16.msra.mxu0 %v11570_v6  ;;  %7565 = vmatpush1.bf16.msra.mxu1 %v11571_v10  ;;  %v11624_v6 = vld [vmem:[#allocation125_spill] sm:$0xff]  ;;  %v11625_v10 = vld [vmem:[#allocation126_spill] sm:$0xff] }
 0xf34   :  { %7503 = vmatprep.subr.bf16.mxu0 %v11572_v15  ;;  %7567 = vmatprep.subr.bf16.mxu1 %v11573_v23  ;;  %v11626_v15 = vld [vmem:[#allocation127_spill] sm:$0xff]  ;;  %v11627_v23 = vld [vmem:[#allocation128_spill] sm:$0xff] }
 0xf37   :  { %7505 = vmatpush1.bf16.msra.mxu0 %v11574_v29  ;;  %7569 = vmatpush1.bf16.msra.mxu1 %v11575_v34  ;;  %v11628_v29 = vld [vmem:[#allocation129_spill] sm:$0xff]  ;;  %v11629_v34 = vld [vmem:[#allocation130_spill] sm:$0xff] }
 0xf38   :  { %7507 = vmatprep.subr.bf16.mxu0 %v11576_v41  ;;  %7571 = vmatprep.subr.bf16.mxu1 %v11577_v43  ;;  %v11630_v41 = vld [vmem:[#allocation131_spill] sm:$0xff]  ;;  %v11631_v43 = vld [vmem:[#allocation132_spill] sm:$0xff] }
 0xf3b   :  { %7509 = vmatpush1.bf16.msra.mxu0 %v11578_v47  ;;  %7573 = vmatpush1.bf16.msra.mxu1 %v11579_v54  ;;  %v11632_v47 = vld [vmem:[#allocation133_spill] sm:$0xff]  ;;  %v11633_v54 = vld [vmem:[#allocation134_spill] sm:$0xff] }
 0xf3c   :  { %7511 = vmatprep.subr.bf16.mxu0 %v11580_v61  ;;  %7575 = vmatprep.subr.bf16.mxu1 %v11581_v9  ;;  %v11634_v61 = vld [vmem:[#allocation135_spill] sm:$0xff]  ;;  %v11635_v9 = vld [vmem:[#allocation136_spill] sm:$0xff] }
 0xf3f   :  { %7513 = vmatpush1.bf16.msra.mxu0 %v11582_v28  ;;  %7577 = vmatpush1.bf16.msra.mxu1 %v11583_v32  ;;  %v11636_v28 = vld [vmem:[#allocation137_spill] sm:$0xff]  ;;  %v11637_v32 = vld [vmem:[#allocation138_spill] sm:$0xff] }
 0xf40   :  { %7515 = vmatprep.subr.bf16.mxu0 %v11584_v16  ;;  %7579 = vmatprep.subr.bf16.mxu1 %v11585_v55  ;;  %v11638_v16 = vld [vmem:[#allocation139_spill] sm:$0xff]  ;;  %v11639_v55 = vld [vmem:[#allocation140_spill] sm:$0xff] }
 0xf43   :  { %7517 = vmatpush1.bf16.msra.mxu0 %v11586_v57  ;;  %7581 = vmatpush1.bf16.msra.mxu1 %v11587_v49  ;;  %v11640_v57 = vld [vmem:[#allocation141_spill] sm:$0xff]  ;;  %v11641_v49 = vld [vmem:[#allocation142_spill] sm:$0xff] }
 0xf44   :  { %7519 = vmatprep.subr.bf16.mxu0 %v11588_v0  ;;  %7583 = vmatprep.subr.bf16.mxu1 %v11589_v3  ;;  %v11642_v0 = vld [vmem:[#allocation143_spill] sm:$0xff]  ;;  %v11643_v3 = vld [vmem:[#allocation144_spill] sm:$0xff] }
 0xf47   :  { %7521 = vmatpush1.bf16.msra.mxu0 %v11590_v37  ;;  %7585 = vmatpush1.bf16.msra.mxu1 %v11591_v4  ;;  %v11644_v37 = vld [vmem:[#allocation145_spill] sm:$0xff] }
 0xf48   :  { %7523 = vmatprep.subr.bf16.mxu0 %v11592_v25  ;;  %7587 = vmatprep.subr.bf16.mxu1 %v11593_v35 }
 0xf4b   :  { %7525 = vmatpush1.bf16.msra.mxu0 %v11594_v44  ;;  %7589 = vmatpush1.bf16.msra.mxu1 %v11595_v19 }
 0xf4c   :  { %7527 = vmatprep.subr.bf16.mxu0 %v11596_v20  ;;  %7591 = vmatprep.subr.bf16.mxu1 %v11597_v22 }
 0xf4f   :  { %7529 = vmatpush1.bf16.msra.mxu0 %v11598_v12  ;;  %7593 = vmatpush1.bf16.msra.mxu1 %v11599_v58 }
 0xf50   :  { %7531 = vmatprep.subr.bf16.mxu0 %v11600_v46  ;;  %7595 = vmatprep.subr.bf16.mxu1 %v11601_v50  ;;  %v11645_v46 = vcombine.high %v11519_v7, %v11520_v36 }
 0xf53   :  { %7533 = vmatpush1.bf16.msra.mxu0 %v11602_v40  ;;  %7597 = vmatpush1.bf16.msra.mxu1 %v11603_v52 }
 0xf54   :  { %7535 = vmatprep.subr.bf16.mxu0 %v11604_v63  ;;  %7599 = vmatprep.subr.bf16.mxu1 %v11605_v8 }
 0xf57   :  { %7537 = vmatpush1.bf16.msra.mxu0 %v11606_v11  ;;  %7601 = vmatpush1.bf16.msra.mxu1 %v11607_v14 }
 0xf58   :  { %7539 = vmatprep.subr.bf16.mxu0 %v11608_v17  ;;  %7603 = vmatprep.subr.bf16.mxu1 %v11609_v21 }
 0xf5b   :  { %7541 = vmatpush1.bf16.msra.mxu0 %v11610_v26  ;;  %7605 = vmatpush1.bf16.msra.mxu1 %v11611_v27 }
 0xf5c   :  { %7607 = vmatprep.subr.bf16.mxu0 %v11612_v30  ;;  %7639 = vmatprep.subr.bf16.mxu1 %v11613_v33  ;;  %v11646_v30 = vld [vmem:[#allocation29_spill] sm:$0xff]  ;;  %v448_v33 = vld [vmem:[#allocation11] sm:$0xff] }
 0xf5e   :  { %4530 = vmatmul.mubr.f32.vlgmr.msra.gmra.mrb[30].mxu0 %v10074_v13  ;;  %4601 = vmatmul.mubr.f32.vlgmr.msra.gmra.mrb[38].mxu1 %v10074_v13  ;;  %v11623_v13 = vld [vmem:[#allocation124_spill] sm:$0xff] }
 0xf5f   :  { %7609 = vmatpush1.bf16.msra.mxu0 %v11614_v38  ;;  %7641 = vmatpush1.bf16.msra.mxu1 %v11615_v39  ;;  %v449_v38 = vld [vmem:[#allocation11 + $0x8] sm:$0xff] }
 0xf60   :  { %7611 = vmatprep.subr.bf16.mxu0 %v11616_v42  ;;  %7643 = vmatprep.subr.bf16.mxu1 %v11617_v45  ;;  %v7670_v39 = vpack.c.bf16 %v449_v38, %v448_v33  ;;  %v451_v42 = vld [vmem:[#allocation11 + $0x18] sm:$0xff] }
 0xf61   :  { %4714 = vmatprep.mubr.f32.mxu0 %v11618_v51  ;;  %4785 = vmatprep.mubr.f32.mxu1 %v11618_v51  ;;  %v452_v51 = vld [vmem:[#allocation11 + $0x20] sm:$0xff] }
 0xf63   :  { %7613 = vmatpush1.bf16.msra.mxu0 %v11619_v53  ;;  %7645 = vmatpush1.bf16.msra.mxu1 %v11620_v56  ;;  %v453_v53 = vld [vmem:[#allocation11 + $0x28] sm:$0xff] }
 0xf64   :  { %7615 = vmatprep.subr.bf16.mxu0 %v11621_v59  ;;  %7647 = vmatprep.subr.bf16.mxu1 %v11622_v5  ;;  %v7678_v56 = vpack.c.bf16 %v453_v53, %v452_v51  ;;  %v454_v59 = vld [vmem:[#allocation11 + $0x30] sm:$0xff]  ;;  %v455_v5 = vld [vmem:[#allocation11 + $0x38] sm:$0xff] }
 0xf67   :  { %7617 = vmatpush1.bf16.msra.mxu0 %v11623_v13  ;;  %7649 = vmatpush1.bf16.msra.mxu1 %v11624_v6  ;;  %v7682_v13 = vpack.c.bf16 %v455_v5, %v454_v59  ;;  %v456_v6 = vld [vmem:[#allocation11 + $0x40] sm:$0xff] }
 0xf68   :  { %7619 = vmatprep.subr.bf16.mxu0 %v11625_v10  ;;  %7651 = vmatprep.subr.bf16.mxu1 %v11626_v15  ;;  %v457_v10 = vld [vmem:[#allocation11 + $0x48] sm:$0xff] }
 0xf69   :  { %v7686_v15 = vpack.c.bf16 %v457_v10, %v456_v6 }
 0xf6b   :  { %7621 = vmatpush1.bf16.msra.mxu0 %v11627_v23  ;;  %7653 = vmatpush1.bf16.msra.mxu1 %v11628_v29  ;;  %v458_v23 = vld [vmem:[#allocation11 + $0x50] sm:$0xff]  ;;  %v459_v29 = vld [vmem:[#allocation11 + $0x58] sm:$0xff] }
 0xf6c   :  { %7623 = vmatprep.subr.bf16.mxu0 %v11629_v34  ;;  %7655 = vmatprep.subr.bf16.mxu1 %v11630_v41  ;;  %v460_v34 = vld [vmem:[#allocation11 + $0x60] sm:$0xff]  ;;  %v7690_v41 = vpack.c.bf16 %v459_v29, %v458_v23 }
 0xf6f   :  { %7625 = vmatpush1.bf16.msra.mxu0 %v11631_v43  ;;  %7657 = vmatpush1.bf16.msra.mxu1 %v11632_v47  ;;  %v461_v43 = vld [vmem:[#allocation11 + $0x68] sm:$0xff] }
 0xf70   :  { %7627 = vmatprep.subr.bf16.mxu0 %v11633_v54  ;;  %7659 = vmatprep.subr.bf16.mxu1 %v11634_v61  ;;  %v7694_v47 = vpack.c.bf16 %v461_v43, %v460_v34  ;;  %v462_v54 = vld [vmem:[#allocation11 + $0x70] sm:$0xff]  ;;  %v463_v61 = vld [vmem:[#allocation11 + $0x78] sm:$0xff] }
 0xf73   :  { %7629 = vmatpush1.bf16.msra.mxu0 %v11635_v9  ;;  %7661 = vmatpush1.bf16.msra.mxu1 %v11636_v28  ;;  %v7698_v9 = vpack.c.bf16 %v463_v61, %v462_v54 }
 0xf74   :  { %7631 = vmatprep.subr.bf16.mxu0 %v11637_v32  ;;  %7663 = vmatprep.subr.bf16.mxu1 %v11638_v16 }
 0xf77   :  { %7633 = vmatpush1.bf16.msra.mxu0 %v11639_v55  ;;  %7665 = vmatpush1.bf16.msra.mxu1 %v11640_v57 }
 0xf78   :  { %7635 = vmatprep.subr.bf16.mxu0 %v11641_v49  ;;  %7667 = vmatprep.subr.bf16.mxu1 %v11642_v0 }
 0xf7b   :  { %7637 = vmatpush1.bf16.msra.mxu0 %v11643_v3  ;;  %7669 = vmatpush1.bf16.msra.mxu1 %v11644_v37 }
 0xf7c   :  { %7671 = vmatprep.subr.bf16.mxu0 %v7670_v39 }
 0xff1   :  { %v4389_v4 = vpop.f32.mrb[28].mxu0  ;;  %v4460_v25 = vpop.f32.mrb[36].mxu1 }
 0xff2   :  { %v4391_v35 = vpop.f32.mrb[29].mxu0  ;;  %v4462_v44 = vpop.f32.mrb[37].mxu1 }
 0xff3   :  { %v4611_v19 = vcombine.low %v4389_v4, %v4391_v35  ;;  %v4612_v20 = vcombine.low %v4460_v25, %v4462_v44 }
 0xff5   :  { %v4619_v22 = vrot.slane %v4611_v19, %v8327_v18  ;;  %v4626_v12 = vrot.slane %v4612_v20, %v8327_v18 }
 0xff7   :  { %v4627_v58 = vcombine.low %v4619_v22, %v4626_v12 }
 0xff9   :  { %v4629_v50 = vadd.f32 %v4627_v58, %v11645_v46 }
 0xffb   :  { %v5034_v40 = vmul.f32 -1.442695, %v4629_v50  ;;  %v4637_v8 = vrot.slane %v4629_v50, 6 }
 0xffd   :  { %7920 = vpow2.f32 %v5034_v40 }
0x1007   :  { %v7921_v52 = vpop.eup %7920 }
0x1008   :  { %v4633_v63 = vadd.f32 1.0, %v7921_v52 }
0x100a   :  { %7922 = vrcp.f32 %v4633_v63 }
0x100b   :  { %7924 = vtanh.f32 %v4637_v8 }
0x1014   :  { %v7923_v11 = vpop.eup %7922 }
0x1015   :  { %v4641_v14 = vrot.slane %v7923_v11, 2  ;;  %v7925_v17 = vpop.eup %7924  ;;  %v4647_v18 = vrot.slane %v7923_v11, 4 }
0x1016   :  { %v4644_v21 = vmul.f32 %v7925_v17, %v7923_v11 }
0x1017   :  { %v4643_v26 = vmul.f32 %v4641_v14, %v10071_v48  ;;  %v450_v48 = vld [vmem:[#allocation11 + $0x10] sm:$0xff] }
0x1018   :  { %v7674_v45 = vpack.c.bf16 %v451_v42, %v450_v48 }
0x1019   :  { %v10262_v27 = vadd.f32 %v4644_v21, %v4643_v26 }
0x101b   :  { %7926 = vtanh.f32 %v10262_v27 }
0x1025   :  { %v7927_v36 = vpop.eup %7926 }
0x1026   :  { %v10265_v7 = vmul.f32 %v7927_v36, %v4647_v18 }
0x1028   :  { %4715 = vmatmul.mubr.f32.vlgmr.msra.gmra.mrb[30].mxu0 %v10265_v7  ;;  %4786 = vmatmul.mubr.f32.vlgmr.msra.gmra.mrb[38].mxu1 %v10265_v7 }
0x1029   :  { %5091 = vmatprep.mubr.f32.mxu0 %v11646_v30  ;;  %7673 = vmatpush3.bf16.msra.mxu0 %v7670_v39 }
0x102a   :  { %7675 = vmatprep.subr.bf16.mxu0 %v7674_v45 }
0x102d   :  { %7677 = vmatpush3.bf16.msra.mxu0 %v7674_v45 }
0x102e   :  { %7679 = vmatprep.subr.bf16.mxu0 %v7678_v56 }
0x1031   :  { %7681 = vmatpush3.bf16.msra.mxu0 %v7678_v56 }
0x1032   :  { %7683 = vmatprep.subr.bf16.mxu0 %v7682_v13 }
0x1035   :  { %7685 = vmatpush3.bf16.msra.mxu0 %v7682_v13 }
0x1036   :  { %7687 = vmatprep.subr.bf16.mxu0 %v7686_v15 }
0x1039   :  { %7689 = vmatpush3.bf16.msra.mxu0 %v7686_v15 }
0x103a   :  { %7691 = vmatprep.subr.bf16.mxu0 %v7690_v41 }
0x103d   :  { %7693 = vmatpush3.bf16.msra.mxu0 %v7690_v41 }
0x103e   :  { %7695 = vmatprep.subr.bf16.mxu0 %v7694_v47 }
0x1041   :  { %7697 = vmatpush3.bf16.msra.mxu0 %v7694_v47 }
0x1042   :  { %7699 = vmatprep.subr.bf16.mxu0 %v7698_v9 }
0x1045   :  { %7701 = vmatpush3.bf16.msra.mxu0 %v7698_v9 }
0x10fb   :  { %v4716_v28 = vpop.f32.mrb[30].mxu0  ;;  %v4787_v32 = vpop.f32.mrb[38].mxu1 }
0x10fc   :  { %v4792_v16 = vadd.f32 %v4716_v28, %v11545_v24  ;;  %v4718_v55 = vpop.f32.mrb[31].mxu0  ;;  %v4789_v57 = vpop.f32.mrb[39].mxu1  ;;  %v4794_v37 = vadd.f32 %v4787_v32, %v8981_v31 }
0x10fd   :  { %v4793_v49 = vadd.f32 %v4718_v55, %v11419_v60  ;;  %v4795_v4 = vadd.f32 %v4789_v57, %v11546_v62 }
0x10fe   :  { %v5035_v0 = vmul.f32 -1.442695, %v4792_v16  ;;  %v5037_v25 = vmul.f32 -1.442695, %v4794_v37 }
0x10ff   :  { %v5036_v3 = vmul.f32 -1.442695, %v4793_v49 }
0x1100   :  { %7928 = vpow2.f32 %v5035_v0 }
0x1101   :  { %7930 = vpow2.f32 %v5036_v3 }
0x1102   :  { %7932 = vtanh.f32 %v4795_v4 }
0x1103   :  { %7934 = vpow2.f32 %v5037_v25 }
0x110a   :  { %v7929_v35 = vpop.eup %7928 }
0x110b   :  { %v4805_v44 = vadd.f32 1.0, %v7929_v35  ;;  %v7931_v19 = vpop.eup %7930 }
0x110c   :  { %v4806_v24 = vadd.f32 1.0, %v7931_v19  ;;  %v7933_v20 = vpop.eup %7932 }
0x110d   :  { %7936 = vrcp.f32 %v4805_v44  ;;  %v7935_v22 = vpop.eup %7934 }
0x110e   :  { %7938 = vrcp.f32 %v4806_v24  ;;  %v4807_v46 = vadd.f32 1.0, %v7935_v22 }
0x1110   :  { %7940 = vrcp.f32 %v4807_v46 }
0x1117   :  { %v7937_v60 = vpop.eup %7936 }
0x1118   :  { %v4816_v12 = vmul.f32 %v7937_v60, %v7933_v20  ;;  %v7939_v58 = vpop.eup %7938 }
0x1119   :  { %v4815_v50 = vmul.f32 %v7939_v58, %v10147_v1 }
0x111a   :  { %v7941_v40 = vpop.eup %7940 }
0x111b   :  { %v4817_v31 = vadd.f32 %v4816_v12, %v4815_v50 }
0x111d   :  { %7942 = vtanh.f32 %v4817_v31  ;;  %v4944_v62 = vcombine.low %v10262_v27, %v4817_v31 }
0x111f   :  { %5040 = vst.sshfl [vmem:[#allocation16] sm:$0x33 pattern:$0x76325410] %v4944_v62 }
0x1127   :  { %v7943_v52 = vpop.eup %7942 }
0x1128   :  { %v4819_v63 = vmul.f32 %v7943_v52, %v7941_v40 }
0x112a   :  { %v4836_v8 = vrot.slane %v4819_v63, 2  ;;  %v4932_v11 = vcombine.low %v10265_v7, %v4819_v63 }
0x112c   :  { %v4846_v14 = vsel %vm4842_vm3, %v10158_v2, %v4836_v8  ;;  %5039 = vst.sshfl [vmem:[#allocation14] sm:$0x33 pattern:$0x76325410] %v4932_v11 }
0x112d   :  { %5092 = vmatmul.mubr.f32.vlgmr.msra.gmra.mrb[32].mxu0 %v4846_v14 }
0x112e   :  { %8087 = shalt.err (!%p8084_p10)
}
0x112f   :  { %s8088_s27 = scalar_lea.hbm %s10332_s11, 64 }
0x1130   :  { %p8089_p11 = scmp.ne.s32.totalorder %s10332_s11, %s8088_s27  ;;  %p8092_p12 = scmp.lt.u32.totalorder %s8088_s27, %s10332_s11 }
0x1132   :  { %p8094_p13 = pnand %p8092_p12, %p8089_p11 }
0x1134   :  { %8097 = shalt.err (!%p8094_p13)
}
0x1135   :  { %4975 = dma.vmem_to_hbm [thread:$0]  %s4973_s23, 64, %s10332_s11, [#allocation15]  }
0x1136   :  { %s8170_s15 = smov [#allocation16]  }
0x1137   :  { %s4982_s30 = sshll.u32 %s8170_s15, 4  ;;  %s4983_s30 = int_to_ptr.vmem [resolvable:$true] %s4982_s30 }
0x1138   :  { %s8098_s16 = scalar_lea.vmem %s4983_s30, 64  ;;  %p8103_p1 = scmp.lt.s32.totalorder %s4983_s30, %s4983_s30 }
0x1139   :  { %p8099_p0 = scmp.ne.s32.totalorder %s4983_s30, %s8098_s16  ;;  %p8104_p2 = scmp.lt.s32.totalorder %s8098_s16, %s8098_s16 }
0x113b   :  { %p8105_p3 = por %p8104_p2, %p8103_p1 }
0x113d   :  { %p8106_p4 = pnand %p8105_p3, %p8099_p0 }
0x113f   :  { %8109 = shalt.err (!%p8106_p4)
}
0x1140   :  { %s8110_s0 = scalar_lea.hbm %s10333_s12, 64 }
0x1141   :  { %p8111_p5 = scmp.ne.s32.totalorder %s10333_s12, %s8110_s0  ;;  %p8114_p6 = scmp.lt.u32.totalorder %s8110_s0, %s10333_s12 }
0x1143   :  { %p8116_p7 = pnand %p8114_p6, %p8111_p5 }
0x1145   :  { %8119 = shalt.err (!%p8116_p7)
}
0x1146   :  { %4985 = dma.vmem_to_hbm [thread:$0]  %s4983_s30, 64, %s10333_s12, [#allocation15]   ;;  %v5038_v1 = vld [vmem:[%s10330_s9] ss:$0 sm:$0xff] }
0x1147   :  { %s8171_s7 = smov [#allocation13]  }
0x1148   :  { %s4959_s23 = sshll.u32 %s8171_s7, 4  ;;  %s4960_s23 = int_to_ptr.vmem [resolvable:$true] %s4959_s23 }
0x1149   :  { %s8120_s25 = scalar_lea.vmem %s4960_s23, 256  ;;  %p8125_p9 = scmp.lt.s32.totalorder %s4960_s23, %s4960_s23 }
0x114a   :  { %p8121_p8 = scmp.ne.s32.totalorder %s4960_s23, %s8120_s25  ;;  %p8126_p10 = scmp.lt.s32.totalorder %s8120_s25, %s8120_s25 }
0x114c   :  { %p8127_p11 = por %p8126_p10, %p8125_p9 }
0x114e   :  { %p8128_p12 = pnand %p8127_p11, %p8121_p8 }
0x1200   :  { %v5093_v2 = vpop.f32.mrb[32].mxu0 }
0x1201   :  { %v4926_v17 = vadd.f32 %v5093_v2, %v5038_v1  ;;  %v4920_v21 = vpop.f32.mrb[33].mxu0 }
0x1202   :  { %v4921_v26 = vadd.f32 %v5038_v1, %v4920_v21 }
0x1203   :  { %4930 = vst [vmem:[#allocation13 + $0x8] sm:$0xff] %v4926_v17 }
0x1204   :  { %4929 = vst [vmem:[#allocation13] sm:$0xff] %v4921_v26 }
0x1205   :  { %8131 = shalt.err (!%p8128_p12)
}
0x1206   :  { %s8132_s9 = scalar_lea.hbm %s10331_s10, 256 }
0x1207   :  { %p8133_p13 = scmp.ne.s32.totalorder %s10331_s10, %s8132_s9  ;;  %p8136_p0 = scmp.lt.u32.totalorder %s8132_s9, %s10331_s10 }
0x1209   :  { %p8138_p1 = pnand %p8136_p0, %p8133_p13 }
0x120b   :  { %8141 = shalt.err (!%p8138_p1)
}
0x120c   :  { %4965 = dma.vmem_to_hbm [thread:$0]  %s4960_s23, 256, %s10331_s10, [#allocation4], %s8165_s6, %s8165_s6, %s8166_s4  }
0x120d   :  { %8150 = dma.done.wait [#allocation4], 256  }
0x120e   :  { %8151 = vsyncadd [#allocation4], 4294967040 }
0x120f   :  { %8152 = dma.done.wait [#allocation15], 128  }
0x1210   :  { %8153 = vsyncadd [#allocation15], 4294967168 }
0x1211   :  { %4995 = vsyncpa [#allocation3], 1 }
0x1212   :  { %4996 = vsyncpa [#allocation6], 1 }
0x1213   :  { %4997 = vsyncpa [#allocation9], 1 }
0x1214   :  { %4998 = vsyncpa [#allocation12], 1 }
0x1215   :  { %4999 = vsyncpa [#allocation4], 1 }
0x1216   :  { %5000 = vsyncpa [#allocation15], 1 }

</bundles_post_ra>
